<compile_context>
chip_gen: v5e
topology: v5e:2x2
jax: 0.10.0
libtpu: 0.0.40
codegen_flags: <defaults>
</compile_context>

<pallas_src>
import math

import jax
import jax.numpy as jnp
from jax import lax
from jax.experimental import pallas as pl
from jax.experimental.pallas import tpu as pltpu


def _round_up(x, m):
    return ((x + m - 1) // m) * m


# ----------------------------- Pallas kernel ------------------------------- #
def _conv_mm_bias_relu_kernel(p_ref, w_ref, b_ref, o_ref):
    # p_ref: (tm, Kp) bf16 im2col patch tile (whole K in one block)
    # w_ref: (Kp, Np) bf16 flattened conv weight (same block for every M tile)
    # b_ref: (1,  Np) f32 bias
    # o_ref: (tm, Np) output tile (bf16 for intermediate layers, f32 for last)
    acc = jnp.dot(p_ref[...], w_ref[...], preferred_element_type=jnp.float32)
    o_ref[...] = jnp.maximum(acc + b_ref[...], 0.0).astype(o_ref.dtype)


def matmul_bias_relu(patches, w_pad, b_pad, *, out_dtype, tm=128):
    """relu(patches @ w_pad + b_pad) on the MXU; grid over M tiles only.

    patches: (M, Kp) bf16, Kp a multiple of 128 (zero-padded columns).
    w_pad:   (Kp, Np) bf16 (zero rows beyond real K, zero cols beyond cout).
    b_pad:   (1, Np)  f32.
    Returns (M, Np) out_dtype.
    """
    M, Kp = patches.shape
    Kp_w, Np = w_pad.shape
    assert Kp == Kp_w and Kp % 128 == 0 and Np % 128 == 0
    tm = min(tm, _round_up(M, 16))          # bf16 native sublane tile is 16

    return pl.pallas_call(
        _conv_mm_bias_relu_kernel,
        out_shape=jax.ShapeDtypeStruct((M, Np), out_dtype),
        grid=(pl.cdiv(M, tm),),
        in_specs=[
            pl.BlockSpec((tm, Kp), lambda i: (i, 0)),
            pl.BlockSpec((Kp, Np), lambda i: (0, 0)),   # resident across M tiles
            pl.BlockSpec((1, Np), lambda i: (0, 0)),
        ],
        out_specs=pl.BlockSpec((tm, Np), lambda i: (i, 0)),
        compiler_params=pltpu.CompilerParams(
            dimension_semantics=("parallel",),
            vmem_limit_bytes=32 * 1024 * 1024,
        ),
    )(patches, w_pad, b_pad)


# ------------------------------ im2col glue -------------------------------- #
def conv3d_relu_layer(x_ndhwc, w_pad, b_pad, *, k, stride, cin, Kp, out_dtype):
    """One Conv3d(k, stride, VALID) + ReLU in channels-last layout.

    x_ndhwc is bf16; only its first `cin` channels are real (the un-padding
    slice of the previous layer is folded into this im2col)."""
    N, D, H, W, _ = x_ndhwc.shape
    Do = (D - k) // stride + 1
    Ho = (H - k) // stride + 1
    Wo = (W - k) // stride + 1

    parts = []
    for kd in range(k):
        for kh in range(k):
            for kw in range(k):
                parts.append(x_ndhwc[:,
                                     kd:kd + stride * Do:stride,
                                     kh:kh + stride * Ho:stride,
                                     kw:kw + stride * Wo:stride, :cin])
    K = cin * k * k * k
    if Kp > K:  # fold K padding into the same concat (single pass)
        parts.append(jnp.zeros((N, Do, Ho, Wo, Kp - K), jnp.bfloat16))
    # columns ordered (kd, kh, kw, cin) -- matches the prepared weight layout
    patches = jnp.concatenate(parts, axis=-1).reshape(N * Do * Ho * Wo, Kp)

    out = matmul_bias_relu(patches, w_pad, b_pad, out_dtype=out_dtype)
    Np = w_pad.shape[1]
    # keep the (possibly zero-padded) Np channel dim; next layer slices :cin
    return out.reshape(N, Do, Ho, Wo, Np)


# --------------------------- model construction ---------------------------- #
def build_backbone_params(key, start_kernel_size=7, n_layers=3,
                          decrease_kernel=True, final_channels=128,
                          intermediary_channels=64, in_channels=3):
    """Replicates BackboneConvModel.__init__ layer-shape logic with
    deterministic (PRNGKey-seeded) weights in PyTorch (OIDHW) layout."""
    kernel_size = start_kernel_size
    ks_list = []
    decrease = max(1, start_kernel_size // n_layers) if decrease_kernel else 0
    for _ in range(n_layers):
        ks_list.append(kernel_size)
        kernel_size = kernel_size - decrease
        if kernel_size < 1:
            kernel_size = 1

    params, strides = [], []
    cin = in_channels
    for idx, k in enumerate(ks_list):
        cout = intermediary_channels if idx != n_layers - 1 else final_channels
        stride = 2 if idx < n_layers // 2 else 1
        key, kw_key, kb_key = jax.random.split(key, 3)
        fan_in = cin * k * k * k
        scale = 1.0 / math.sqrt(fan_in)
        w = jax.random.normal(kw_key, (cout, cin, k, k, k), jnp.float32) * scale
        b = jax.random.normal(kb_key, (cout,), jnp.float32) * scale
        params.append((w, b))
        strides.append(stride)
        cin = cout
    return params, ks_list, strides


def prepare_pallas_params(params):
    """Reorder/flatten/pad/cast conv weights & bias ONCE for the kernel.
    K is padded to a multiple of 128, cout to a multiple of 128 (lane-dense)."""
    prepped = []
    for w, b in params:
        cout, cin, k, _, _ = w.shape
        K = cin * k * k * k
        Kp = _round_up(K, 128)
        Np = _round_up(cout, 128)
        # (Cout, Cin, kd, kh, kw) -> columns ordered (kd, kh, kw, cin)
        w_mat = jnp.transpose(w, (2, 3, 4, 1, 0)).reshape(K, cout)
        w_pad = jnp.zeros((Kp, Np), jnp.bfloat16).at[:K, :cout].set(
            w_mat.astype(jnp.bfloat16))
        b_pad = jnp.zeros((1, Np), jnp.float32).at[:, :cout].set(
            b.reshape(1, cout))
        prepped.append(dict(w_pad=w_pad, b_pad=b_pad, k=k, cin=cin,
                            cout=cout, Kp=Kp))
    return prepped


def backbone_forward_pallas(x_ncdhw, prepped, strides):
    """Forward pass matching BackboneConvModel.forward (Conv3d+ReLU stack)."""
    x = jnp.transpose(x_ncdhw, (0, 2, 3, 4, 1)).astype(jnp.bfloat16)  # NDHWC
    n_layers = len(prepped)
    for idx, (p, s) in enumerate(zip(prepped, strides)):
        last = idx == n_layers - 1
        x = conv3d_relu_layer(
            x, p["w_pad"], p["b_pad"], k=p["k"], stride=s,
            cin=p["cin"], Kp=p["Kp"],
            out_dtype=jnp.float32 if last else jnp.bfloat16)
    x = x[..., :prepped[-1]["cout"]]            # drop channel padding (no-op here)
    return jnp.transpose(x, (0, 4, 1, 2, 3))    # back to NCDHW


def backbone_forward_reference(x, params, strides):
    """Pure-JAX f32 reference (lax conv) for correctness checking."""
    for (w, b), s in zip(params, strides):
        y = lax.conv_general_dilated(
            x, w, window_strides=(s, s, s), padding="VALID",
            dimension_numbers=("NCDHW", "OIDHW", "NCDHW"),
            precision=lax.Precision.HIGHEST)
        y = y + b.reshape(1, -1, 1, 1, 1)
        x = jnp.maximum(y, 0.0)
    return x


# ---------------------------------- main ----------------------------------- #
if __name__ == "__main__":
    key = jax.random.PRNGKey(0)
    key, x_key = jax.random.split(key)

    # Smallest spatial size that survives k=[7,5,3], strides=[2,1,1] is 19.
    N, C, D = 2, 3, 19
    x = jax.random.normal(x_key, (N, C, D, D, D), jnp.float32)

    params, ks_list, strides = build_backbone_params(key)
    prepped = prepare_pallas_params(params)

    fwd = jax.jit(lambda inp: backbone_forward_pallas(inp, prepped, strides))
    out = jax.block_until_ready(fwd(x))

    ref = jax.block_until_ready(backbone_forward_reference(x, params, strides))

    assert out.shape == (N, 128, 1, 1, 1), out.shape
    max_err = float(jnp.max(jnp.abs(out - ref)))
    # bf16 MXU inputs with f32 accumulation vs. full-f32 reference.
    assert jnp.allclose(out, ref, rtol=2e-2, atol=2e-2), max_err

    print("KERNEL_OK")
</pallas_src>

<mosaic_0001>
module attributes {stable_mosaic.version = 11 : i64} {
  func.func @_conv_mm_bias_relu_kernel(%arg0: i32, %arg1: memref<128x1152xbf16, #tpu.memory_space<vmem>>, %arg2: memref<1152x128xbf16, #tpu.memory_space<vmem>>, %arg3: memref<1x128xf32, #tpu.memory_space<vmem>>, %arg4: memref<128x128xbf16, #tpu.memory_space<vmem>>) attributes {dimension_semantics = [#tpu.dimension_semantics<parallel>], iteration_bounds = array<i64: 6>, scalar_prefetch = 0 : i64, scratch_operands = 0 : i64, tpu.core_type = #tpu.core_type<tc>, window_params = [{transform_indices = @transform_0, window_bounds = array<i64: 128, 1152>}, {pipeline_mode = #tpu.pipeline_mode<synchronous>, transform_indices = @transform_1, window_bounds = array<i64: 1152, 128>}, {pipeline_mode = #tpu.pipeline_mode<synchronous>, transform_indices = @transform_2, window_bounds = array<i64: 1, 128>}, {transform_indices = @transform_3, window_bounds = array<i64: 128, 128>}]} {
    %c0 = arith.constant 0 : index
    %c0_0 = arith.constant 0 : index
    %0 = vector.load %arg1[%c0, %c0_0] : memref<128x1152xbf16, #tpu.memory_space<vmem>>, vector<128x1152xbf16>
    %c0_1 = arith.constant 0 : index
    %c0_2 = arith.constant 0 : index
    %1 = vector.load %arg2[%c0_1, %c0_2] : memref<1152x128xbf16, #tpu.memory_space<vmem>>, vector<1152x128xbf16>
    %cst = arith.constant dense<0.000000e+00> : vector<128x128xf32>
    %2 = tpu.matmul %0, %1, %cst {dimension_numbers = #tpu.dot_dimension_numbers<[1], [0], [0], [1], [0, 0, 1, 1], [], []>} : vector<128x1152xbf16>, vector<1152x128xbf16>, vector<128x128xf32> -> vector<128x128xf32>
    %c0_3 = arith.constant 0 : index
    %c0_4 = arith.constant 0 : index
    %3 = vector.load %arg3[%c0_3, %c0_4] : memref<1x128xf32, #tpu.memory_space<vmem>>, vector<1x128xf32>
    %4 = vector.broadcast %3 : vector<1x128xf32> to vector<128x128xf32>
    %5 = arith.addf %2, %4 : vector<128x128xf32>
    %cst_5 = arith.constant 0.000000e+00 : f32
    %6 = vector.broadcast %cst_5 : f32 to vector<128x128xf32>
    %7 = arith.maximumf %5, %6 : vector<128x128xf32>
    %8 = arith.truncf %7 : vector<128x128xf32> to vector<128x128xbf16>
    %c0_6 = arith.constant 0 : index
    %c0_7 = arith.constant 0 : index
    %9 = vector.load %arg4[%c0_6, %c0_7] : memref<128x128xbf16, #tpu.memory_space<vmem>>, vector<128x128xbf16>
    tpu.vector_store %arg4[%c0_6, %c0_7], %8 {strides = array<i32>} : memref<128x128xbf16, #tpu.memory_space<vmem>>, vector<128x128xbf16>,
    return
  }
  func.func @transform_0(%arg0: i32) -> (i32, i32) {
    %c0_i32 = arith.constant 0 : i32
    %c0_i32_0 = arith.constant 0 : i32
    return %arg0, %c0_i32 : i32, i32
  }
  func.func @transform_1(%arg0: i32) -> (i32, i32) {
    %c0_i32 = arith.constant 0 : i32
    %c0_i32_0 = arith.constant 0 : i32
    %c0_i32_1 = arith.constant 0 : i32
    return %c0_i32, %c0_i32_0 : i32, i32
  }
  func.func @transform_2(%arg0: i32) -> (i32, i32) {
    %c0_i32 = arith.constant 0 : i32
    %c0_i32_0 = arith.constant 0 : i32
    %c0_i32_1 = arith.constant 0 : i32
    return %c0_i32, %c0_i32_0 : i32, i32
  }
  func.func @transform_3(%arg0: i32) -> (i32, i32) {
    %c0_i32 = arith.constant 0 : i32
    %c0_i32_0 = arith.constant 0 : i32
    return %arg0, %c0_i32 : i32, i32
  }
}

module attributes {stable_mosaic.version = 11 : i64} {
  func.func @_conv_mm_bias_relu_kernel(%arg0: i32, %arg1: memref<64x8064xbf16, #tpu.memory_space<vmem>>, %arg2: memref<8064x128xbf16, #tpu.memory_space<vmem>>, %arg3: memref<1x128xf32, #tpu.memory_space<vmem>>, %arg4: memref<64x128xbf16, #tpu.memory_space<vmem>>) attributes {dimension_semantics = [#tpu.dimension_semantics<parallel>], iteration_bounds = array<i64: 1>, scalar_prefetch = 0 : i64, scratch_operands = 0 : i64, tpu.core_type = #tpu.core_type<tc>, window_params = [{transform_indices = @transform_0, window_bounds = array<i64: 64, 8064>}, {pipeline_mode = #tpu.pipeline_mode<synchronous>, transform_indices = @transform_1, window_bounds = array<i64: 8064, 128>}, {pipeline_mode = #tpu.pipeline_mode<synchronous>, transform_indices = @transform_2, window_bounds = array<i64: 1, 128>}, {transform_indices = @transform_3, window_bounds = array<i64: 64, 128>}]} {
    %c0 = arith.constant 0 : index
    %c0_0 = arith.constant 0 : index
    %0 = vector.load %arg1[%c0, %c0_0] : memref<64x8064xbf16, #tpu.memory_space<vmem>>, vector<64x8064xbf16>
    %c0_1 = arith.constant 0 : index
    %c0_2 = arith.constant 0 : index
    %1 = vector.load %arg2[%c0_1, %c0_2] : memref<8064x128xbf16, #tpu.memory_space<vmem>>, vector<8064x128xbf16>
    %cst = arith.constant dense<0.000000e+00> : vector<64x128xf32>
    %2 = tpu.matmul %0, %1, %cst {dimension_numbers = #tpu.dot_dimension_numbers<[1], [0], [0], [1], [0, 0, 1, 1], [], []>} : vector<64x8064xbf16>, vector<8064x128xbf16>, vector<64x128xf32> -> vector<64x128xf32>
    %c0_3 = arith.constant 0 : index
    %c0_4 = arith.constant 0 : index
    %3 = vector.load %arg3[%c0_3, %c0_4] : memref<1x128xf32, #tpu.memory_space<vmem>>, vector<1x128xf32>
    %4 = vector.broadcast %3 : vector<1x128xf32> to vector<64x128xf32>
    %5 = arith.addf %2, %4 : vector<64x128xf32>
    %cst_5 = arith.constant 0.000000e+00 : f32
    %6 = vector.broadcast %cst_5 : f32 to vector<64x128xf32>
    %7 = arith.maximumf %5, %6 : vector<64x128xf32>
    %8 = arith.truncf %7 : vector<64x128xf32> to vector<64x128xbf16>
    %c0_6 = arith.constant 0 : index
    %c0_7 = arith.constant 0 : index
    %9 = vector.load %arg4[%c0_6, %c0_7] : memref<64x128xbf16, #tpu.memory_space<vmem>>, vector<64x128xbf16>
    tpu.vector_store %arg4[%c0_6, %c0_7], %8 {strides = array<i32>} : memref<64x128xbf16, #tpu.memory_space<vmem>>, vector<64x128xbf16>,
    return
  }
  func.func @transform_0(%arg0: i32) -> (i32, i32) {
    %c0_i32 = arith.constant 0 : i32
    %c0_i32_0 = arith.constant 0 : i32
    return %arg0, %c0_i32 : i32, i32
  }
  func.func @transform_1(%arg0: i32) -> (i32, i32) {
    %c0_i32 = arith.constant 0 : i32
    %c0_i32_0 = arith.constant 0 : i32
    %c0_i32_1 = arith.constant 0 : i32
    return %c0_i32, %c0_i32_0 : i32, i32
  }
  func.func @transform_2(%arg0: i32) -> (i32, i32) {
    %c0_i32 = arith.constant 0 : i32
    %c0_i32_0 = arith.constant 0 : i32
    %c0_i32_1 = arith.constant 0 : i32
    return %c0_i32, %c0_i32_0 : i32, i32
  }
  func.func @transform_3(%arg0: i32) -> (i32, i32) {
    %c0_i32 = arith.constant 0 : i32
    %c0_i32_0 = arith.constant 0 : i32
    return %arg0, %c0_i32 : i32, i32
  }
}

module attributes {stable_mosaic.version = 11 : i64} {
  func.func @_conv_mm_bias_relu_kernel(%arg0: i32, %arg1: memref<16x1792xbf16, #tpu.memory_space<vmem>>, %arg2: memref<1792x128xbf16, #tpu.memory_space<vmem>>, %arg3: memref<1x128xf32, #tpu.memory_space<vmem>>, %arg4: memref<16x128xf32, #tpu.memory_space<vmem>>) attributes {dimension_semantics = [#tpu.dimension_semantics<parallel>], iteration_bounds = array<i64: 1>, scalar_prefetch = 0 : i64, scratch_operands = 0 : i64, tpu.core_type = #tpu.core_type<tc>, window_params = [{transform_indices = @transform_0, window_bounds = array<i64: 16, 1792>}, {pipeline_mode = #tpu.pipeline_mode<synchronous>, transform_indices = @transform_1, window_bounds = array<i64: 1792, 128>}, {pipeline_mode = #tpu.pipeline_mode<synchronous>, transform_indices = @transform_2, window_bounds = array<i64: 1, 128>}, {transform_indices = @transform_3, window_bounds = array<i64: 16, 128>}]} {
    %c0 = arith.constant 0 : index
    %c0_0 = arith.constant 0 : index
    %0 = vector.load %arg1[%c0, %c0_0] : memref<16x1792xbf16, #tpu.memory_space<vmem>>, vector<16x1792xbf16>
    %c0_1 = arith.constant 0 : index
    %c0_2 = arith.constant 0 : index
    %1 = vector.load %arg2[%c0_1, %c0_2] : memref<1792x128xbf16, #tpu.memory_space<vmem>>, vector<1792x128xbf16>
    %cst = arith.constant dense<0.000000e+00> : vector<16x128xf32>
    %2 = tpu.matmul %0, %1, %cst {dimension_numbers = #tpu.dot_dimension_numbers<[1], [0], [0], [1], [0, 0, 1, 1], [], []>} : vector<16x1792xbf16>, vector<1792x128xbf16>, vector<16x128xf32> -> vector<16x128xf32>
    %c0_3 = arith.constant 0 : index
    %c0_4 = arith.constant 0 : index
    %3 = vector.load %arg3[%c0_3, %c0_4] : memref<1x128xf32, #tpu.memory_space<vmem>>, vector<1x128xf32>
    %4 = vector.broadcast %3 : vector<1x128xf32> to vector<16x128xf32>
    %5 = arith.addf %2, %4 : vector<16x128xf32>
    %cst_5 = arith.constant 0.000000e+00 : f32
    %6 = vector.broadcast %cst_5 : f32 to vector<16x128xf32>
    %7 = arith.maximumf %5, %6 : vector<16x128xf32>
    %c0_6 = arith.constant 0 : index
    %c0_7 = arith.constant 0 : index
    %8 = vector.load %arg4[%c0_6, %c0_7] : memref<16x128xf32, #tpu.memory_space<vmem>>, vector<16x128xf32>
    tpu.vector_store %arg4[%c0_6, %c0_7], %7 {strides = array<i32>} : memref<16x128xf32, #tpu.memory_space<vmem>>, vector<16x128xf32>,
    return
  }
  func.func @transform_0(%arg0: i32) -> (i32, i32) {
    %c0_i32 = arith.constant 0 : i32
    %c0_i32_0 = arith.constant 0 : i32
    return %arg0, %c0_i32 : i32, i32
  }
  func.func @transform_1(%arg0: i32) -> (i32, i32) {
    %c0_i32 = arith.constant 0 : i32
    %c0_i32_0 = arith.constant 0 : i32
    %c0_i32_1 = arith.constant 0 : i32
    return %c0_i32, %c0_i32_0 : i32, i32
  }
  func.func @transform_2(%arg0: i32) -> (i32, i32) {
    %c0_i32 = arith.constant 0 : i32
    %c0_i32_0 = arith.constant 0 : i32
    %c0_i32_1 = arith.constant 0 : i32
    return %c0_i32, %c0_i32_0 : i32, i32
  }
  func.func @transform_3(%arg0: i32) -> (i32, i32) {
    %c0_i32 = arith.constant 0 : i32
    %c0_i32_0 = arith.constant 0 : i32
    return %arg0, %c0_i32 : i32, i32
  }
}

</mosaic_0001>

<bundles_post_ra>
// kernel: _lambda_.3
= control target key start
LH: loop header
LB: loop body
LE: loop exit
PB: predicated region body
PF: predicated region fallthrough
CT: control target
= control target key end

     0   :  { %s3009_s12 = smov 0   ;;  %s3011_s13 = smov 0   ;;  %s3624_s0 = inlined_call_operand.vmem [shape: bf16[686,1152], index: 0, kind: input, shape index: {}]   ;;  %s3625_s1 = inlined_call_operand.vmem [shape: bf16[1152,128], index: 1, kind: input, shape index: {}]   ;;  %s3626_s2 = inlined_call_operand.vmem [shape: f32[1,128], index: 2, kind: input, shape index: {}]   ;;  %s3627_s3 = inlined_call_operand.vmem [shape: bf16[686,128], index: 3, kind: output, shape index: {}]  }
   0x1   :  { %s3013_s14 = smov 0  }
   0x2 LB: > { %s3022_s15 = sadd.s32 4294967295, %s2955_s14   ;;  %s3024_s16 = sadd.s32 1, %s2955_s14   ;;  %s2955_s14 = sphi %s3013_s14, %s3636_s14   ;;  %s2951_s13 = sphi %s3011_s13, %s3635_s13   ;;  %s2947_s12 = sphi %s3009_s12, %s3634_s12  }
   0x3   : > { %s85_s17 = ssub.s32 %s2955_s14, %s3024_s16  ;;  %s88_s18 = sadd.s32 1, %s2951_s13 }
   0x4   : > { %p86_p0 = scmp.eq.s32.totalorder %s85_s17, 0  ;;  %p98_p1 = scmp.ne.s32.totalorder %s2951_s13, %s2947_s12 }
   0x5   : > { %p99_p2 = scmp.eq.s32.totalorder %s3022_s15, 5  ;;  %p1996_p3 = scmp.ge.s32.totalorder %s2955_s14, 1 }
   0x6   : > { %s3032_s19 = scalar_select %p86_p0, %s2951_s13, %s88_s18  }
   0x7   : > { %p3034_p4 = por %p99_p2, %p98_p1  ;;  %p149_p5 = scmp.lt.s32.totalorder %s2955_s14, 7 }
   0x9   : > { %p150_p6 = pnand %p1996_p3, %p149_p5 }
   0xa   : > { %s3048_s27 = sshll.u32 (!%p150_p6), %s3022_s15, 4 }
   0xb   : > { %153 = sbr.rel (%p150_p6) target bundleno = 519 (0x207), region = 32  ;;  %p184_p7 = scmp.lt.s32.totalorder (!%p150_p6), %s3048_s27, 85 }
  0x10   : > { %v2672_v0 = vld [vmem:[%s3625_s1 + $0x38] sm:$0xff]  ;;  %v2671_v1 = vld [vmem:[%s3625_s1 + $0x30] sm:$0xff]  ;;  %v2670_v2 = vld [vmem:[%s3625_s1 + $0x28] sm:$0xff]  ;;  %s185_s5 = scalar_select %p184_p7, %s3048_s27, 85 }
  0x11   : > { %2787 = vmatpush.bf16.msra.mxu1 %v2672_v0  ;;  %2788 = vmatpush.bf16.msra.mxu2 %v2672_v0  ;;  %v2669_v3 = vld [vmem:[%s3625_s1 + $0x20] sm:$0xff]  ;;  %v2668_v4 = vld [vmem:[%s3625_s1 + $0x18] sm:$0xff]  ;;  %v2667_v5 = vld [vmem:[%s3625_s1 + $0x10] sm:$0xff]  ;;  %s2737_s21 = sshll.u32 (%p3034_p4), %s3022_s15, 6 }
  0x12   : > { %2789 = vmatpush.bf16.msra.mxu3 %v2672_v0  ;;  %1228 = vmatpush.bf16.msra.mxu0 %v2672_v0  ;;  %s2811_s8 = smul.u32 36, %s185_s5  ;;  %v2666_v6 = vld [vmem:[%s3625_s1 + $0x8] sm:$0xff]  ;;  %v2665_v7 = vld [vmem:[%s3625_s1] sm:$0xff]  ;;  %v2688_v16 = vld [vmem:[%s3625_s1 + $0xb8] sm:$0xff]  ;;  %s3531_s24 = scalar_lea.vmem (%p3034_p4), %s3627_s3, %s2737_s21  }
  0x13   : > { %v2680_v17 = vld [vmem:[%s3625_s1 + $0x78] sm:$0xff]  ;;  %v2687_v24 = vld [vmem:[%s3625_s1 + $0xb0] sm:$0xff]  ;;  %v2686_v28 = vld [vmem:[%s3625_s1 + $0xa8] sm:$0xff] }
  0x14   : > { %s3067_s17 = scalar_lea.vmem %s3624_s0, %s2811_s8  ;;  %v2696_v22 = vld [vmem:[%s3625_s1 + $0xf8] sm:$0xff]  ;;  %v2679_v25 = vld [vmem:[%s3625_s1 + $0x70] sm:$0xff]  ;;  %v2678_v29 = vld [vmem:[%s3625_s1 + $0x68] sm:$0xff] }
  0x15   : > { %2790 = vmatpush.bf16.msra.mxu1 %v2671_v1  ;;  %2791 = vmatpush.bf16.msra.mxu2 %v2671_v1  ;;  %v2074_v8 = vld [vmem:[%s3067_s17 + $0x90] sm:$0xf]  ;;  %v2615_v9 = vld [vmem:[%s3067_s17 + $0xb0] sm:$0xf0]  ;;  %v2146_v10 = vld [vmem:[%s3067_s17 + $0x120] sm:$0xf] }
  0x16   : > { %2792 = vmatpush.bf16.msra.mxu3 %v2671_v1  ;;  %1229 = vmatpush.bf16.msra.mxu0 %v2671_v1  ;;  %v2633_v11 = vld [vmem:[%s3067_s17 + $0x140] sm:$0xf0]  ;;  %v2218_v12 = vld [vmem:[%s3067_s17 + $0x1b0] sm:$0xf]  ;;  %v2651_v13 = vld [vmem:[%s3067_s17 + $0x1d0] sm:$0xf0]  ;;  %v2075_v18 = vor.u32 %v2615_v9, %v2074_v8 }
  0x17   : > { %v2002_v14 = vld [vmem:[%s3067_s17] sm:$0xf]  ;;  %v2597_v15 = vld [vmem:[%s3067_s17 + $0x20] sm:$0xf0]  ;;  %v2147_v19 = vor.u32 %v2633_v11, %v2146_v10  ;;  %v2219_v20 = vor.u32 %v2651_v13, %v2218_v12  ;;  %v2704_v23 = vld [vmem:[%s3625_s1 + $0x138] sm:$0xff] }
  0x18   : > { %v2003_v21 = vor.u32 %v2597_v15, %v2002_v14  ;;  %v2695_v26 = vld [vmem:[%s3625_s1 + $0xf0] sm:$0xff]  ;;  %v2694_v30 = vld [vmem:[%s3625_s1 + $0xe8] sm:$0xff]  ;;  %v2685_v32 = vld [vmem:[%s3625_s1 + $0xa0] sm:$0xff] }
  0x19   : > { %2793 = vmatpush.bf16.msra.mxu1 %v2670_v2  ;;  %2794 = vmatpush.bf16.msra.mxu2 %v2670_v2  ;;  %v2703_v27 = vld [vmem:[%s3625_s1 + $0x130] sm:$0xff]  ;;  %v2702_v31 = vld [vmem:[%s3625_s1 + $0x128] sm:$0xff]  ;;  %v2677_v33 = vld [vmem:[%s3625_s1 + $0x60] sm:$0xff] }
  0x1a   : > { %2795 = vmatpush.bf16.msra.mxu3 %v2670_v2  ;;  %1230 = vmatpush.bf16.msra.mxu0 %v2670_v2  ;;  %v2693_v34 = vld [vmem:[%s3625_s1 + $0xe0] sm:$0xff]  ;;  %v2110_v36 = vld [vmem:[%s3067_s17 + $0xd8] sm:$0xf]  ;;  %v2624_v37 = vld [vmem:[%s3067_s17 + $0xf8] sm:$0xf0] }
  0x1b   : > { %v2701_v35 = vld [vmem:[%s3625_s1 + $0x120] sm:$0xff]  ;;  %v2182_v38 = vld [vmem:[%s3067_s17 + $0x168] sm:$0xf]  ;;  %v2642_v39 = vld [vmem:[%s3067_s17 + $0x188] sm:$0xf0]  ;;  %v2111_v46 = vor.u32 %v2624_v37, %v2110_v36 }
  0x1c   : > { %v2254_v40 = vld [vmem:[%s3067_s17 + $0x1f8] sm:$0xf]  ;;  %v2660_v41 = vld [vmem:[%s3067_s17 + $0x218] sm:$0xf0]  ;;  %v2038_v42 = vld [vmem:[%s3067_s17 + $0x48] sm:$0xf]  ;;  %v2183_v47 = vor.u32 %v2642_v39, %v2182_v38 }
  0x1d   : > { %2796 = vmatpush.bf16.msra.mxu1 %v2669_v3  ;;  %2797 = vmatpush.bf16.msra.mxu2 %v2669_v3  ;;  %v2606_v43 = vld [vmem:[%s3067_s17 + $0x68] sm:$0xf0]  ;;  %v2684_v44 = vld [vmem:[%s3625_s1 + $0x98] sm:$0xff]  ;;  %v2255_v48 = vor.u32 %v2660_v41, %v2254_v40  ;;  %v2683_v52 = vld [vmem:[%s3625_s1 + $0x90] sm:$0xff] }
  0x1e   : > { %2798 = vmatpush.bf16.msra.mxu3 %v2669_v3  ;;  %1231 = vmatpush.bf16.msra.mxu0 %v2669_v3  ;;  %v2676_v45 = vld [vmem:[%s3625_s1 + $0x58] sm:$0xff]  ;;  %v2039_v49 = vor.u32 %v2606_v43, %v2038_v42  ;;  %v2675_v53 = vld [vmem:[%s3625_s1 + $0x50] sm:$0xff]  ;;  %v2682_v56 = vld [vmem:[%s3625_s1 + $0x88] sm:$0xff] }
  0x1f   : > { %v2692_v50 = vld [vmem:[%s3625_s1 + $0xd8] sm:$0xff]  ;;  %v2691_v54 = vld [vmem:[%s3625_s1 + $0xd0] sm:$0xff]  ;;  %v2674_v57 = vld [vmem:[%s3625_s1 + $0x48] sm:$0xff] }
  0x20   : > { %v2700_v51 = vld [vmem:[%s3625_s1 + $0x118] sm:$0xff]  ;;  %v2699_v55 = vld [vmem:[%s3625_s1 + $0x110] sm:$0xff]  ;;  %v2690_v58 = vld [vmem:[%s3625_s1 + $0xc8] sm:$0xff] }
  0x21   : > { %2799 = vmatpush.bf16.msra.mxu1 %v2668_v4  ;;  %2800 = vmatpush.bf16.msra.mxu2 %v2668_v4  ;;  %v2698_v59 = vld [vmem:[%s3625_s1 + $0x108] sm:$0xff]  ;;  %v2681_v60 = vld [vmem:[%s3625_s1 + $0x80] sm:$0xff]  ;;  %v2720_v2 = vld [vmem:[%s3625_s1 + $0x1b8] sm:$0xff] }
  0x22   : > { %2801 = vmatpush.bf16.msra.mxu3 %v2668_v4  ;;  %1232 = vmatpush.bf16.msra.mxu0 %v2668_v4  ;;  %v2673_v61 = vld [vmem:[%s3625_s1 + $0x40] sm:$0xff]  ;;  %v2004_v1 = vld [vmem:[%s3067_s17 + $0x24] sm:$0xf0]  ;;  %v2712_v3 = vld [vmem:[%s3625_s1 + $0x178] sm:$0xff] }
  0x23   : > { %v2593_v62 = vld [vmem:[%s3067_s17 + $0x4] sm:$0xf]  ;;  %v2010_v4 = vld [vmem:[%s3067_s17 + $0x8] sm:$0xf]  ;;  %v2018_v8 = vld [vmem:[%s3067_s17 + $0x10] sm:$0xf] }
  0x24   : > { %v2689_v63 = vld [vmem:[%s3625_s1 + $0xc0] sm:$0xff]  ;;  %v2599_v9 = vld [vmem:[%s3067_s17 + $0x30] sm:$0xf0]  ;;  %v2728_v10 = vld [vmem:[%s3625_s1 + $0x1f8] sm:$0xff]  ;;  %v2007_v12 = vor.u32 %v2593_v62, %v2004_v1 }
  0x25   : > { %2802 = vmatpush.bf16.msra.mxu1 %v2667_v5  ;;  %2803 = vmatpush.bf16.msra.mxu2 %v2667_v5  ;;  %v2697_v0 = vld [vmem:[%s3625_s1 + $0x100] sm:$0xff]  ;;  %v2736_v11 = vld [vmem:[%s3625_s1 + $0x238] sm:$0xff]  ;;  %v2019_v15 = vor.u32 %v2599_v9, %v2018_v8  ;;  %v2611_v40 = vld [vmem:[%s3067_s17 + $0x94] sm:$0xf] }
  0x26   : > { %2804 = vmatpush.bf16.msra.mxu3 %v2667_v5  ;;  %1233 = vmatpush.bf16.msra.mxu0 %v2667_v5  ;;  %v2598_v5 = vld [vmem:[%s3067_s17 + $0x28] sm:$0xf0]  ;;  %v2717_v36 = vld [vmem:[%s3625_s1 + $0x1a0] sm:$0xff]  ;;  %v2076_v41 = vld [vmem:[%s3067_s17 + $0xb4] sm:$0xf0] }
  0x27   : > { %v2011_v13 = vor.u32 %v2598_v5, %v2010_v4  ;;  %v2725_v37 = vld [vmem:[%s3625_s1 + $0x1e0] sm:$0xff]  ;;  %v2082_v42 = vld [vmem:[%s3067_s17 + $0x98] sm:$0xf]  ;;  %v2616_v43 = vld [vmem:[%s3067_s17 + $0xb8] sm:$0xf0] }
  0x28   : > { %v2709_v38 = vld [vmem:[%s3625_s1 + $0x160] sm:$0xff]  ;;  %v2126_v62 = vld [vmem:[%s3067_s17 + $0xe8] sm:$0xf]  ;;  %v2715_v4 = vld [vmem:[%s3625_s1 + $0x190] sm:$0xff] }
  0x29   : > { %2805 = vmatpush.bf16.msra.mxu1 %v2666_v6  ;;  %2806 = vmatpush.bf16.msra.mxu2 %v2666_v6  ;;  %v2733_v39 = vld [vmem:[%s3625_s1 + $0x220] sm:$0xff]  ;;  %v2723_v5 = vld [vmem:[%s3625_s1 + $0x1d0] sm:$0xff]  ;;  %v2148_v9 = vld [vmem:[%s3067_s17 + $0x144] sm:$0xf0] }
  0x2a   : > { %2807 = vmatpush.bf16.msra.mxu3 %v2666_v6  ;;  %1234 = vmatpush.bf16.msra.mxu0 %v2666_v6  ;;  %v2594_v6 = vld [vmem:[%s3067_s17 + $0xc] sm:$0xf]  ;;  %v2629_v8 = vld [vmem:[%s3067_s17 + $0x124] sm:$0xf] }
  0x2d   : > { %2808 = vmatpush.bf16.msra.mxu1 %v2665_v7  ;;  %2809 = vmatpush.bf16.msra.mxu2 %v2665_v7 }
  0x2e   : > { %2810 = vmatpush.bf16.msra.mxu3 %v2665_v7  ;;  %1235 = vmatpush.bf16.msra.mxu0 %v2665_v7  ;;  %v2012_v7 = vld [vmem:[%s3067_s17 + $0x2c] sm:$0xf0] }
  0x2f   : > { %v2015_v14 = vor.u32 %v2594_v6, %v2012_v7  ;;  %v2707_v6 = vld [vmem:[%s3625_s1 + $0x150] sm:$0xff] }
  0x30   : > { %1246 = vmatmul.bf16.vlgmr.msra.gmra.mxu1 %v2075_v18  ;;  %1256 = vmatmul.bf16.vlgmr.msra.gmra.mxu2 %v2147_v19  ;;  %v2727_v18 = vld [vmem:[%s3625_s1 + $0x1f0] sm:$0xff] }
  0x31   : > { %1326 = vmatpush.bf16.msrb.mxu2 %v2688_v16  ;;  %1277 = vmatpush.bf16.msrb.mxu1 %v2680_v17  ;;  %v2719_v16 = vld [vmem:[%s3625_s1 + $0x1b0] sm:$0xff] }
  0x32   : > { %1266 = vmatmul.bf16.vlgmr.msra.gmra.mxu3 %v2219_v20  ;;  %1236 = vmatmul.bf16.vlgmr.msra.gmra.mxu0 %v2003_v21  ;;  %v2711_v17 = vld [vmem:[%s3625_s1 + $0x170] sm:$0xff]  ;;  %v2718_v20 = vld [vmem:[%s3625_s1 + $0x1a8] sm:$0xff] }
  0x33   : > { %1375 = vmatpush.bf16.msrb.mxu3 %v2696_v22  ;;  %1424 = vmatpush.bf16.msrb.mxu0 %v2704_v23  ;;  %v2735_v19 = vld [vmem:[%s3625_s1 + $0x230] sm:$0xff]  ;;  %v2710_v21 = vld [vmem:[%s3625_s1 + $0x168] sm:$0xff] }
  0x34   : > { %v2726_v22 = vld [vmem:[%s3625_s1 + $0x1e8] sm:$0xff]  ;;  %v2731_v7 = vld [vmem:[%s3625_s1 + $0x210] sm:$0xff] }
  0x35   : > { %1327 = vmatpush.bf16.msrb.mxu2 %v2687_v24  ;;  %1278 = vmatpush.bf16.msrb.mxu1 %v2679_v25  ;;  %v2734_v23 = vld [vmem:[%s3625_s1 + $0x228] sm:$0xff]  ;;  %v2040_v25 = vld [vmem:[%s3067_s17 + $0x6c] sm:$0xf0] }
  0x36   : > { %v2602_v24 = vld [vmem:[%s3067_s17 + $0x4c] sm:$0xf] }
  0x37   : > { %1376 = vmatpush.bf16.msrb.mxu3 %v2695_v26  ;;  %1425 = vmatpush.bf16.msrb.mxu0 %v2703_v27  ;;  %v2046_v26 = vld [vmem:[%s3067_s17 + $0x50] sm:$0xf]  ;;  %v2607_v27 = vld [vmem:[%s3067_s17 + $0x70] sm:$0xf0] }
  0x39   : > { %1328 = vmatpush.bf16.msrb.mxu2 %v2686_v28  ;;  %1279 = vmatpush.bf16.msrb.mxu1 %v2678_v29  ;;  %v2603_v28 = vld [vmem:[%s3067_s17 + $0x54] sm:$0xf]  ;;  %v2048_v29 = vld [vmem:[%s3067_s17 + $0x74] sm:$0xf0] }
  0x3b   : > { %1377 = vmatpush.bf16.msrb.mxu3 %v2694_v30  ;;  %1426 = vmatpush.bf16.msrb.mxu0 %v2702_v31  ;;  %v2054_v30 = vld [vmem:[%s3067_s17 + $0x58] sm:$0xf]  ;;  %v2608_v31 = vld [vmem:[%s3067_s17 + $0x78] sm:$0xf0] }
  0x3d   : > { %1329 = vmatpush.bf16.msrb.mxu2 %v2685_v32  ;;  %1280 = vmatpush.bf16.msrb.mxu1 %v2677_v33  ;;  %v2043_v32 = vor.u32 %v2602_v24, %v2040_v25  ;;  %v2047_v33 = vor.u32 %v2607_v27, %v2046_v26  ;;  %v2638_v24 = vld [vmem:[%s3067_s17 + $0x16c] sm:$0xf]  ;;  %v2184_v25 = vld [vmem:[%s3067_s17 + $0x18c] sm:$0xf0]  ;;  %v2643_v27 = vld [vmem:[%s3067_s17 + $0x190] sm:$0xf0] }
  0x3e   : > { %v2190_v26 = vld [vmem:[%s3067_s17 + $0x170] sm:$0xf] }
  0x3f   : > { %1378 = vmatpush.bf16.msrb.mxu3 %v2693_v34  ;;  %1427 = vmatpush.bf16.msrb.mxu0 %v2701_v35  ;;  %v2051_v34 = vor.u32 %v2603_v28, %v2048_v29  ;;  %v2055_v35 = vor.u32 %v2608_v31, %v2054_v30  ;;  %v2639_v28 = vld [vmem:[%s3067_s17 + $0x174] sm:$0xf]  ;;  %v2192_v29 = vld [vmem:[%s3067_s17 + $0x194] sm:$0xf0]  ;;  %v2644_v31 = vld [vmem:[%s3067_s17 + $0x198] sm:$0xf0] }
  0x40   : > { %1251 = vmatmul.bf16.gmra.mxu1 %v2111_v46  ;;  %1261 = vmatmul.bf16.gmra.mxu2 %v2183_v47  ;;  %v2090_v46 = vld [vmem:[%s3067_s17 + $0xa0] sm:$0xf]  ;;  %v2617_v47 = vld [vmem:[%s3067_s17 + $0xc0] sm:$0xf0]  ;;  %v2198_v30 = vld [vmem:[%s3067_s17 + $0x178] sm:$0xf] }
  0x41   : > { %1330 = vmatpush.bf16.msrb.mxu2 %v2684_v44  ;;  %1281 = vmatpush.bf16.msrb.mxu1 %v2676_v45  ;;  %v2612_v44 = vld [vmem:[%s3067_s17 + $0x9c] sm:$0xf]  ;;  %v2084_v45 = vld [vmem:[%s3067_s17 + $0xbc] sm:$0xf0] }
  0x42   : > { %1271 = vmatmul.bf16.gmra.mxu3 %v2255_v48  ;;  %1241 = vmatmul.bf16.gmra.mxu0 %v2039_v49  ;;  %v2079_v48 = vor.u32 %v2611_v40, %v2076_v41  ;;  %v2083_v49 = vor.u32 %v2616_v43, %v2082_v42  ;;  %v2647_v40 = vld [vmem:[%s3067_s17 + $0x1b4] sm:$0xf]  ;;  %v2220_v41 = vld [vmem:[%s3067_s17 + $0x1d4] sm:$0xf0]  ;;  %v2652_v43 = vld [vmem:[%s3067_s17 + $0x1d8] sm:$0xf0] }
  0x43   : > { %1379 = vmatpush.bf16.msrb.mxu3 %v2692_v50  ;;  %1428 = vmatpush.bf16.msrb.mxu0 %v2700_v51  ;;  %v2087_v50 = vor.u32 %v2612_v44, %v2084_v45  ;;  %v2091_v51 = vor.u32 %v2617_v47, %v2090_v46  ;;  %v2226_v42 = vld [vmem:[%s3067_s17 + $0x1b8] sm:$0xf]  ;;  %v2648_v44 = vld [vmem:[%s3067_s17 + $0x1bc] sm:$0xf]  ;;  %v2228_v45 = vld [vmem:[%s3067_s17 + $0x1dc] sm:$0xf0] }
  0x44   : > { %v2234_v46 = vld [vmem:[%s3067_s17 + $0x1c0] sm:$0xf]  ;;  %v2653_v47 = vld [vmem:[%s3067_s17 + $0x1e0] sm:$0xf0] }
  0x45   : > { %1331 = vmatpush.bf16.msrb.mxu2 %v2683_v52  ;;  %1282 = vmatpush.bf16.msrb.mxu1 %v2675_v53  ;;  %v2716_v52 = vld [vmem:[%s3625_s1 + $0x198] sm:$0xff] }
  0x46   : > { %v2724_v53 = vld [vmem:[%s3625_s1 + $0x1d8] sm:$0xff] }
  0x47   : > { %1380 = vmatpush.bf16.msrb.mxu3 %v2691_v54  ;;  %1429 = vmatpush.bf16.msrb.mxu0 %v2699_v55  ;;  %v2708_v54 = vld [vmem:[%s3625_s1 + $0x158] sm:$0xff] }
  0x48   : > { %v2732_v55 = vld [vmem:[%s3625_s1 + $0x218] sm:$0xff] }
  0x49   : > { %1332 = vmatpush.bf16.msrb.mxu2 %v2682_v56  ;;  %1283 = vmatpush.bf16.msrb.mxu1 %v2674_v57  ;;  %v2620_v56 = vld [vmem:[%s3067_s17 + $0xdc] sm:$0xf]  ;;  %v2112_v57 = vld [vmem:[%s3067_s17 + $0xfc] sm:$0xf0] }
  0x4b   : > { %1381 = vmatpush.bf16.msrb.mxu3 %v2690_v58  ;;  %1430 = vmatpush.bf16.msrb.mxu0 %v2698_v59  ;;  %v2118_v58 = vld [vmem:[%s3067_s17 + $0xe0] sm:$0xf]  ;;  %v2625_v59 = vld [vmem:[%s3067_s17 + $0x100] sm:$0xf0] }
  0x4c   : > { %v2119_v1 = vor.u32 %v2625_v59, %v2118_v58 }
  0x4d   : > { %1333 = vmatpush.bf16.msrb.mxu2 %v2681_v60  ;;  %1284 = vmatpush.bf16.msrb.mxu1 %v2673_v61  ;;  %v2621_v60 = vld [vmem:[%s3067_s17 + $0xe4] sm:$0xf]  ;;  %v2120_v61 = vld [vmem:[%s3067_s17 + $0x104] sm:$0xf0] }
  0x4f   : > { %1382 = vmatpush.bf16.msrb.mxu3 %v2689_v63  ;;  %1431 = vmatpush.bf16.msrb.mxu0 %v2697_v0  ;;  %v2626_v63 = vld [vmem:[%s3067_s17 + $0x108] sm:$0xf0]  ;;  %v2115_v0 = vor.u32 %v2620_v56, %v2112_v57 }
  0x50   : > { %1285 = vmatmul.bf16.vlgmr.msrb.gmra.mxu1 %v2007_v12  ;;  %1334 = vmatmul.bf16.vlgmr.msrb.gmra.mxu2 %v2011_v13  ;;  %v2630_v12 = vld [vmem:[%s3067_s17 + $0x12c] sm:$0xf]  ;;  %v2156_v13 = vld [vmem:[%s3067_s17 + $0x14c] sm:$0xf0] }
  0x51   : > { %1522 = vmatpush.bf16.msra.mxu2 %v2720_v2  ;;  %1473 = vmatpush.bf16.msra.mxu1 %v2712_v3  ;;  %v2123_v2 = vor.u32 %v2621_v60, %v2120_v61  ;;  %v2127_v3 = vor.u32 %v2626_v63, %v2126_v62  ;;  %v2656_v61 = vld [vmem:[%s3067_s17 + $0x1fc] sm:$0xf]  ;;  %v2256_v62 = vld [vmem:[%s3067_s17 + $0x21c] sm:$0xf0] }
  0x52   : > { %1383 = vmatmul.bf16.vlgmr.msrb.gmra.mxu3 %v2015_v14  ;;  %1432 = vmatmul.bf16.vlgmr.msrb.gmra.mxu0 %v2019_v15  ;;  %v2162_v14 = vld [vmem:[%s3067_s17 + $0x130] sm:$0xf]  ;;  %v2635_v15 = vld [vmem:[%s3067_s17 + $0x150] sm:$0xf0]  ;;  %v2262_v63 = vld [vmem:[%s3067_s17 + $0x200] sm:$0xf] }
  0x53   : > { %1571 = vmatpush.bf16.msra.mxu3 %v2728_v10  ;;  %1620 = vmatpush.bf16.msra.mxu0 %v2736_v11  ;;  %v2154_v10 = vld [vmem:[%s3067_s17 + $0x128] sm:$0xf]  ;;  %v2634_v11 = vld [vmem:[%s3067_s17 + $0x148] sm:$0xf0] }
  0x55   : > { %1523 = vmatpush.bf16.msra.mxu2 %v2719_v16  ;;  %1474 = vmatpush.bf16.msra.mxu1 %v2711_v17  ;;  %v2151_v16 = vor.u32 %v2629_v8, %v2148_v9  ;;  %v2155_v17 = vor.u32 %v2634_v11, %v2154_v10  ;;  %v2259_v8 = vor.u32 %v2656_v61, %v2256_v62  ;;  %v2064_v61 = vld [vmem:[%s3067_s17 + $0x84] sm:$0xf0] }
  0x56   : > { %v2070_v62 = vld [vmem:[%s3067_s17 + $0x68] sm:$0xf] }
  0x57   : > { %1572 = vmatpush.bf16.msra.mxu3 %v2727_v18  ;;  %1621 = vmatpush.bf16.msra.mxu0 %v2735_v19  ;;  %v2159_v18 = vor.u32 %v2630_v12, %v2156_v13  ;;  %v2163_v19 = vor.u32 %v2635_v15, %v2162_v14 }
  0x59   : > { %1524 = vmatpush.bf16.msra.mxu2 %v2718_v20  ;;  %1475 = vmatpush.bf16.msra.mxu1 %v2710_v21  ;;  %v2714_v20 = vld [vmem:[%s3625_s1 + $0x188] sm:$0xff] }
  0x5a   : > { %v2722_v21 = vld [vmem:[%s3625_s1 + $0x1c8] sm:$0xff] }
  0x5b   : > { %1573 = vmatpush.bf16.msra.mxu3 %v2726_v22  ;;  %1622 = vmatpush.bf16.msra.mxu0 %v2734_v23  ;;  %v2706_v22 = vld [vmem:[%s3625_s1 + $0x148] sm:$0xff] }
  0x5c   : > { %v2730_v23 = vld [vmem:[%s3625_s1 + $0x208] sm:$0xff] }
  0x5d   : > { %1525 = vmatpush.bf16.msra.mxu2 %v2717_v36  ;;  %1476 = vmatpush.bf16.msra.mxu1 %v2709_v38  ;;  %v2713_v36 = vld [vmem:[%s3625_s1 + $0x180] sm:$0xff] }
  0x5e   : > { %v2705_v38 = vld [vmem:[%s3625_s1 + $0x140] sm:$0xff] }
  0x5f   : > { %1574 = vmatpush.bf16.msra.mxu3 %v2725_v37  ;;  %1623 = vmatpush.bf16.msra.mxu0 %v2733_v39  ;;  %v2721_v37 = vld [vmem:[%s3625_s1 + $0x1c0] sm:$0xff] }
  0x60   : > { %1290 = vmatmul.bf16.gmra.mxu1 %v2043_v32  ;;  %1339 = vmatmul.bf16.gmra.mxu2 %v2047_v33  ;;  %v2187_v32 = vor.u32 %v2638_v24, %v2184_v25  ;;  %v2191_v33 = vor.u32 %v2643_v27, %v2190_v26  ;;  %v2729_v39 = vld [vmem:[%s3625_s1 + $0x200] sm:$0xff]  ;;  %v2600_v24 = vld [vmem:[%s3067_s17 + $0x38] sm:$0xf0] }
  0x61   : > { %1526 = vmatpush.bf16.msra.mxu2 %v2716_v52  ;;  %1477 = vmatpush.bf16.msra.mxu1 %v2708_v54  ;;  %v2235_v52 = vor.u32 %v2653_v47, %v2234_v46  ;;  %v3341_v54 = vld [vmem:[%s3626_s2] ss:$0 sm:$0xff]  ;;  %v2596_v25 = vld [vmem:[%s3067_s17 + $0x1c] sm:$0xf] }
  0x62   : > { %1388 = vmatmul.bf16.gmra.mxu3 %v2051_v34  ;;  %1437 = vmatmul.bf16.gmra.mxu0 %v2055_v35  ;;  %v2195_v34 = vor.u32 %v2639_v28, %v2192_v29  ;;  %v2199_v35 = vor.u32 %v2644_v31, %v2198_v30  ;;  %v2028_v26 = vld [vmem:[%s3067_s17 + $0x3c] sm:$0xf0]  ;;  %v2601_v28 = vld [vmem:[%s3067_s17 + $0x40] sm:$0xf0] }
  0x63   : > { %1575 = vmatpush.bf16.msra.mxu3 %v2724_v53  ;;  %1624 = vmatpush.bf16.msra.mxu0 %v2732_v55  ;;  %v2034_v27 = vld [vmem:[%s3067_s17 + $0x20] sm:$0xf] }
  0x65   : > { %1527 = vmatpush.bf16.msra.mxu2 %v2715_v4  ;;  %1478 = vmatpush.bf16.msra.mxu1 %v2707_v6  ;;  %v2662_v4 = vld [vmem:[%s3067_s17 + $0x228] sm:$0xf0] }
  0x67   : > { %1576 = vmatpush.bf16.msra.mxu3 %v2723_v5  ;;  %1625 = vmatpush.bf16.msra.mxu0 %v2731_v7 }
  0x69   : > { %1528 = vmatpush.bf16.msra.mxu2 %v2714_v20  ;;  %1479 = vmatpush.bf16.msra.mxu1 %v2706_v22  ;;  %v2020_v22 = vld [vmem:[%s3067_s17 + $0x34] sm:$0xf0] }
  0x6b   : > { %1577 = vmatpush.bf16.msra.mxu3 %v2722_v21  ;;  %1626 = vmatpush.bf16.msra.mxu0 %v2730_v23  ;;  %v2595_v21 = vld [vmem:[%s3067_s17 + $0x14] sm:$0xf]  ;;  %v2026_v23 = vld [vmem:[%s3067_s17 + $0x18] sm:$0xf] }
  0x6d   : > { %1529 = vmatpush.bf16.msra.mxu2 %v2713_v36  ;;  %1480 = vmatpush.bf16.msra.mxu1 %v2705_v38  ;;  %v2035_v38 = vor.u32 %v2601_v28, %v2034_v27  ;;  %v2613_v27 = vld [vmem:[%s3067_s17 + $0xa4] sm:$0xf]  ;;  %v2092_v28 = vld [vmem:[%s3067_s17 + $0xc4] sm:$0xf0] }
  0x6f   : > { %1578 = vmatpush.bf16.msra.mxu3 %v2721_v37  ;;  %1627 = vmatpush.bf16.msra.mxu0 %v2729_v39  ;;  %v2031_v37 = vor.u32 %v2596_v25, %v2028_v26 }
  0x70   : > { %1295 = vmatmul.bf16.gmra.mxu1 %v2079_v48  ;;  %1344 = vmatmul.bf16.gmra.mxu2 %v2083_v49  ;;  %v2223_v48 = vor.u32 %v2647_v40, %v2220_v41  ;;  %v2227_v49 = vor.u32 %v2652_v43, %v2226_v42 }
  0x72   : > { %1393 = vmatmul.bf16.gmra.mxu3 %v2087_v50  ;;  %1442 = vmatmul.bf16.gmra.mxu0 %v2091_v51  ;;  %v2231_v51 = vor.u32 %v2648_v44, %v2228_v45 }
  0x80   : > { %1300 = vmatmul.bf16.gmra.mxu1 %v2115_v0  ;;  %1349 = vmatmul.bf16.gmra.mxu2 %v2119_v1  ;;  %v2661_v0 = vld [vmem:[%s3067_s17 + $0x220] sm:$0xf0] }
  0x81   : > { %v2657_v1 = vld [vmem:[%s3067_s17 + $0x204] sm:$0xf]  ;;  %v2263_v9 = vor.u32 %v2661_v0, %v2262_v63  ;;  %v2610_v63 = vld [vmem:[%s3067_s17 + $0x88] sm:$0xf0] }
  0x82   : > { %1398 = vmatmul.bf16.gmra.mxu3 %v2123_v2  ;;  %1447 = vmatmul.bf16.gmra.mxu0 %v2127_v3  ;;  %v2264_v2 = vld [vmem:[%s3067_s17 + $0x224] sm:$0xf0] }
  0x83   : > { %v2270_v3 = vld [vmem:[%s3067_s17 + $0x208] sm:$0xf]  ;;  %v2267_v12 = vor.u32 %v2657_v1, %v2264_v2 }
  0x84   : > { %v2271_v13 = vor.u32 %v2662_v4, %v2270_v3 }
  0x90   : > { %1305 = vmatmul.bf16.gmra.mxu1 %v2151_v16  ;;  %1354 = vmatmul.bf16.gmra.mxu2 %v2155_v17 }
  0x92   : > { %1403 = vmatmul.bf16.gmra.mxu3 %v2159_v18  ;;  %1452 = vmatmul.bf16.gmra.mxu0 %v2163_v19 }
  0xa0   : > { %1310 = vmatmul.bf16.gmra.mxu1 %v2187_v32  ;;  %1359 = vmatmul.bf16.gmra.mxu2 %v2191_v33  ;;  %v2023_v33 = vor.u32 %v2595_v21, %v2020_v22 }
  0xa2   : > { %1408 = vmatmul.bf16.gmra.mxu3 %v2195_v34  ;;  %1457 = vmatmul.bf16.gmra.mxu0 %v2199_v35  ;;  %v2027_v34 = vor.u32 %v2600_v24, %v2026_v23 }
  0xad   : > { %v3336_v50 = vpop.f32.mrf.mxu1 }
  0xaf   : > { %v1237_v53 = vpop.f32.mrf.mxu0 }
  0xb0   : > { %1315 = vmatmul.bf16.gmra.mxu1 %v2223_v48  ;;  %1364 = vmatmul.bf16.gmra.mxu2 %v2227_v49  ;;  %v1238_v30 = vadd.f32 %v3341_v54, %v1237_v53  ;;  %v2604_v49 = vld [vmem:[%s3067_s17 + $0x5c] sm:$0xf]  ;;  %v2062_v53 = vld [vmem:[%s3067_s17 + $0x60] sm:$0xf] }
  0xb2   : > { %1413 = vmatmul.bf16.gmra.mxu3 %v2231_v51  ;;  %1462 = vmatmul.bf16.gmra.mxu0 %v2235_v52  ;;  %v2056_v51 = vld [vmem:[%s3067_s17 + $0x7c] sm:$0xf0] }
  0xb3   : > { %v1257_v55 = vpop.f32.mrf.mxu2  ;;  %v2059_v3 = vor.u32 %v2604_v49, %v2056_v51 }
  0xb4   : > { %v3344_v56 = vadd.f32 %v3341_v54, %v1257_v55  ;;  %v2609_v55 = vld [vmem:[%s3067_s17 + $0x80] sm:$0xf0] }
  0xb5   : > { %v1267_v57 = vpop.f32.mrf.mxu3  ;;  %v3349_v59 = vpop.f32.mrf.mxu1  ;;  %v2063_v4 = vor.u32 %v2609_v55, %v2062_v53 }
  0xb6   : > { %v3347_v58 = vadd.f32 %v3341_v54, %v1267_v57  ;;  %v2605_v57 = vld [vmem:[%s3067_s17 + $0x64] sm:$0xf]  ;;  %v1250_v51 = vadd.f32 %v3341_v54, %v3349_v59 }
  0xb7   : > { %v1239_v60 = vpop.f32.mrf.mxu0 }
  0xb8   : > { %v1240_v42 = vadd.f32 %v3341_v54, %v1239_v60 }
  0xbb   : > { %v1259_v5 = vpop.f32.mrf.mxu2 }
  0xbc   : > { %v3360_v6 = vadd.f32 %v3341_v54, %v1259_v5 }
  0xbd   : > { %v1269_v7 = vpop.f32.mrf.mxu3  ;;  %v3365_v11 = vpop.f32.mrf.mxu1 }
  0xbe   : > { %v3363_v10 = vadd.f32 %v3341_v54, %v1269_v7  ;;  %v2067_v7 = vor.u32 %v2605_v57, %v2064_v61  ;;  %v1253_v59 = vadd.f32 %v3341_v54, %v3365_v11 }
  0xbf   : > { %v1242_v14 = vpop.f32.mrf.mxu0 }
  0xc0   : > { %1320 = vmatmul.bf16.gmra.mxu1 %v2259_v8  ;;  %1369 = vmatmul.bf16.gmra.mxu2 %v2263_v9  ;;  %v1243_v1 = vadd.f32 %v3341_v54, %v1242_v14  ;;  %v2071_v8 = vor.u32 %v2610_v63, %v2070_v62 }
  0xc2   : > { %1418 = vmatmul.bf16.gmra.mxu3 %v2267_v12  ;;  %1467 = vmatmul.bf16.gmra.mxu0 %v2271_v13 }
  0xc3   : > { %v1262_v15 = vpop.f32.mrf.mxu2 }
  0xc4   : > { %v3368_v16 = vadd.f32 %v3341_v54, %v1262_v15 }
  0xc5   : > { %v1272_v17 = vpop.f32.mrf.mxu3  ;;  %v3373_v19 = vpop.f32.mrf.mxu1 }
  0xc6   : > { %v3371_v18 = vadd.f32 %v3341_v54, %v1272_v17 }
  0xc7   : > { %v1244_v20 = vpop.f32.mrf.mxu0 }
  0xc8   : > { %v1245_v17 = vadd.f32 %v3341_v54, %v1244_v20  ;;  %v1248_v20 = vadd.f32 %v3341_v54, %v3336_v50 }
  0xcb   : > { %v1264_v29 = vpop.f32.mrf.mxu2 }
  0xcc   : > { %v3385_v31 = vadd.f32 %v3341_v54, %v1264_v29 }
  0xcd   : > { %v1274_v32 = vpop.f32.mrf.mxu3  ;;  %v1286_v36 = vpop.f32.mrf.mxu1 }
  0xce   : > { %v3388_v35 = vadd.f32 %v3341_v54, %v1274_v32  ;;  %v1287_v39 = vadd.f32 %v1286_v36, %v1238_v30  ;;  %v2098_v30 = vld [vmem:[%s3067_s17 + $0xa8] sm:$0xf]  ;;  %v2618_v32 = vld [vmem:[%s3067_s17 + $0xc8] sm:$0xf0]  ;;  %v2106_v36 = vld [vmem:[%s3067_s17 + $0xb0] sm:$0xf] }
  0xcf   : > { %v1433_v40 = vpop.f32.mrf.mxu0 }
  0xd0   : > { %1481 = vmatmul.bf16.vlgmr.msra.gmra.mxu1 %v2023_v33  ;;  %1530 = vmatmul.bf16.vlgmr.msra.gmra.mxu2 %v2027_v34  ;;  %v2614_v33 = vld [vmem:[%s3067_s17 + $0xac] sm:$0xf]  ;;  %v2100_v34 = vld [vmem:[%s3067_s17 + $0xcc] sm:$0xf0] }
  0xd2   : > { %1579 = vmatmul.bf16.vlgmr.msra.gmra.mxu3 %v2031_v37  ;;  %1628 = vmatmul.bf16.vlgmr.msra.gmra.mxu0 %v2035_v38  ;;  %v2619_v37 = vld [vmem:[%s3067_s17 + $0xd0] sm:$0xf0] }
  0xd3   : > { %v1335_v41 = vpop.f32.mrf.mxu2 }
  0xd4   : > { %v1336_v43 = vadd.f32 %v1335_v41, %v1287_v39  ;;  %v2095_v41 = vor.u32 %v2613_v27, %v2092_v28  ;;  %v1255_v28 = vadd.f32 %v3341_v54, %v3373_v19 }
  0xd5   : > { %v1384_v44 = vpop.f32.mrf.mxu3  ;;  %v1288_v45 = vpop.f32.mrf.mxu1 }
  0xd6   : > { %v1385_v46 = vadd.f32 %v1384_v44, %v1336_v43  ;;  %v1289_v47 = vadd.f32 %v1288_v45, %v1240_v42  ;;  %v2099_v42 = vor.u32 %v2618_v32, %v2098_v30  ;;  %v2103_v44 = vor.u32 %v2614_v33, %v2100_v34 }
  0xd7   : > { %v1435_v48 = vpop.f32.mrf.mxu0  ;;  %v2107_v45 = vor.u32 %v2619_v37, %v2106_v36 }
  0xd8   : > { %v3393_v52 = vadd.f32 %v1433_v40, %v1385_v46 }
  0xdb   : > { %v1337_v0 = vpop.f32.mrf.mxu2 }
  0xdc   : > { %v1338_v60 = vadd.f32 %v1337_v0, %v1289_v47  ;;  %v2622_v0 = vld [vmem:[%s3067_s17 + $0xec] sm:$0xf] }
  0xdd   : > { %v1386_v2 = vpop.f32.mrf.mxu3  ;;  %v1291_v5 = vpop.f32.mrf.mxu1 }
  0xde   : > { %v1387_v9 = vadd.f32 %v1386_v2, %v1338_v60  ;;  %v1292_v12 = vadd.f32 %v1291_v5, %v1243_v1  ;;  %v2128_v1 = vld [vmem:[%s3067_s17 + $0x10c] sm:$0xf0]  ;;  %v2136_v5 = vld [vmem:[%s3067_s17 + $0x114] sm:$0xf0] }
  0xdf   : > { %v1438_v13 = vpop.f32.mrf.mxu0  ;;  %v2134_v2 = vld [vmem:[%s3067_s17 + $0xf0] sm:$0xf] }
  0xe0   : > { %1486 = vmatmul.bf16.gmra.mxu1 %v2059_v3  ;;  %1535 = vmatmul.bf16.gmra.mxu2 %v2063_v4  ;;  %v3402_v15 = vadd.f32 %v1435_v48, %v1387_v9  ;;  %v2627_v3 = vld [vmem:[%s3067_s17 + $0x110] sm:$0xf0] }
  0xe1   : > { %v2623_v4 = vld [vmem:[%s3067_s17 + $0xf4] sm:$0xf] }
  0xe2   : > { %1584 = vmatmul.bf16.gmra.mxu3 %v2067_v7  ;;  %1633 = vmatmul.bf16.gmra.mxu0 %v2071_v8  ;;  %v2142_v7 = vld [vmem:[%s3067_s17 + $0xf8] sm:$0xf]  ;;  %v2628_v8 = vld [vmem:[%s3067_s17 + $0x118] sm:$0xf0] }
  0xe3   : > { %v1340_v14 = vpop.f32.mrf.mxu2 }
  0xe4   : > { %v1341_v21 = vadd.f32 %v1340_v14, %v1292_v12  ;;  %v2131_v14 = vor.u32 %v2622_v0, %v2128_v1 }
  0xe5   : > { %v1389_v22 = vpop.f32.mrf.mxu3  ;;  %v1293_v23 = vpop.f32.mrf.mxu1 }
  0xe6   : > { %v1390_v24 = vadd.f32 %v1389_v22, %v1341_v21  ;;  %v1294_v25 = vadd.f32 %v1293_v23, %v1245_v17  ;;  %v2135_v17 = vor.u32 %v2627_v3, %v2134_v2  ;;  %v2139_v22 = vor.u32 %v2623_v4, %v2136_v5  ;;  %v2640_v5 = vld [vmem:[%s3067_s17 + $0x17c] sm:$0xf] }
  0xe7   : > { %v1440_v26 = vpop.f32.mrf.mxu0  ;;  %v2143_v23 = vor.u32 %v2628_v8, %v2142_v7  ;;  %v2200_v7 = vld [vmem:[%s3067_s17 + $0x19c] sm:$0xf0] }
  0xe8   : > { %v3407_v29 = vadd.f32 %v1438_v13, %v1390_v24 }
  0xeb   : > { %v1342_v38 = vpop.f32.mrf.mxu2 }
  0xec   : > { %v1343_v39 = vadd.f32 %v1342_v38, %v1294_v25  ;;  %v2631_v38 = vld [vmem:[%s3067_s17 + $0x134] sm:$0xf] }
  0xed   : > { %v1391_v40 = vpop.f32.mrf.mxu3  ;;  %v1296_v43 = vpop.f32.mrf.mxu1 }
  0xee   : > { %v1392_v46 = vadd.f32 %v1391_v40, %v1343_v39  ;;  %v1297_v47 = vadd.f32 %v1296_v43, %v1248_v20  ;;  %v2164_v20 = vld [vmem:[%s3067_s17 + $0x154] sm:$0xf0]  ;;  %v2172_v43 = vld [vmem:[%s3067_s17 + $0x15c] sm:$0xf0] }
  0xef   : > { %v1443_v48 = vpop.f32.mrf.mxu0  ;;  %v2170_v40 = vld [vmem:[%s3067_s17 + $0x138] sm:$0xf]  ;;  %v2167_v54 = vor.u32 %v2631_v38, %v2164_v20 }
  0xf0   : > { %1491 = vmatmul.bf16.gmra.mxu1 %v2095_v41  ;;  %1540 = vmatmul.bf16.gmra.mxu2 %v2099_v42  ;;  %v3417_v49 = vadd.f32 %v1440_v26, %v1392_v46  ;;  %v2636_v41 = vld [vmem:[%s3067_s17 + $0x158] sm:$0xf0] }
  0xf1   : > { %v2632_v42 = vld [vmem:[%s3067_s17 + $0x13c] sm:$0xf]  ;;  %v2171_v19 = vor.u32 %v2636_v41, %v2170_v40  ;;  %v2649_v41 = vld [vmem:[%s3067_s17 + $0x1c4] sm:$0xf] }
  0xf2   : > { %1589 = vmatmul.bf16.gmra.mxu3 %v2103_v44  ;;  %1638 = vmatmul.bf16.gmra.mxu0 %v2107_v45  ;;  %v2178_v44 = vld [vmem:[%s3067_s17 + $0x140] sm:$0xf]  ;;  %v2637_v45 = vld [vmem:[%s3067_s17 + $0x160] sm:$0xf0] }
  0xf3   : > { %v1345_v50 = vpop.f32.mrf.mxu2 }
  0xf4   : > { %v1346_v53 = vadd.f32 %v1345_v50, %v1297_v47 }
  0xf5   : > { %v1394_v55 = vpop.f32.mrf.mxu3  ;;  %v1298_v57 = vpop.f32.mrf.mxu1 }
  0xf6   : > { %v1395_v61 = vadd.f32 %v1394_v55, %v1346_v53  ;;  %v1299_v62 = vadd.f32 %v1298_v57, %v1250_v51  ;;  %v2175_v51 = vor.u32 %v2632_v42, %v2172_v43  ;;  %v2179_v53 = vor.u32 %v2637_v45, %v2178_v44  ;;  %v2236_v42 = vld [vmem:[%s3067_s17 + $0x1e4] sm:$0xf0]  ;;  %v2654_v45 = vld [vmem:[%s3067_s17 + $0x1e8] sm:$0xf0] }
  0xf7   : > { %v1445_v63 = vpop.f32.mrf.mxu0  ;;  %v2242_v44 = vld [vmem:[%s3067_s17 + $0x1c8] sm:$0xf] }
  0xf8   : > { %v3423_v60 = vadd.f32 %v1443_v48, %v1395_v61 }
  0xfb   : > { %v1347_v9 = vpop.f32.mrf.mxu2 }
  0xfc   : > { %v1348_v12 = vadd.f32 %v1347_v9, %v1299_v62  ;;  %v2206_v9 = vld [vmem:[%s3067_s17 + $0x180] sm:$0xf] }
  0xfd   : > { %v1396_v13 = vpop.f32.mrf.mxu3  ;;  %v1301_v21 = vpop.f32.mrf.mxu1 }
  0xfe   : > { %v1397_v24 = vadd.f32 %v1396_v13, %v1348_v12  ;;  %v1302_v25 = vadd.f32 %v1301_v21, %v1253_v59  ;;  %v2645_v59 = vld [vmem:[%s3067_s17 + $0x1a0] sm:$0xf0]  ;;  %v2208_v13 = vld [vmem:[%s3067_s17 + $0x1a4] sm:$0xf0] }
  0xff   : > { %v1448_v26 = vpop.f32.mrf.mxu0  ;;  %v2641_v12 = vld [vmem:[%s3067_s17 + $0x184] sm:$0xf] }
 0x100   : > { %1496 = vmatmul.bf16.gmra.mxu1 %v2131_v14  ;;  %1545 = vmatmul.bf16.gmra.mxu2 %v2135_v17  ;;  %v3433_v27 = vadd.f32 %v1445_v63, %v1397_v24  ;;  %v2214_v14 = vld [vmem:[%s3067_s17 + $0x188] sm:$0xf]  ;;  %v2646_v17 = vld [vmem:[%s3067_s17 + $0x1a8] sm:$0xf0]  ;;  %v2203_v24 = vor.u32 %v2640_v5, %v2200_v7 }
 0x102   : > { %1594 = vmatmul.bf16.gmra.mxu3 %v2139_v22  ;;  %1643 = vmatmul.bf16.gmra.mxu0 %v2143_v23 }
 0x103   : > { %v1350_v11 = vpop.f32.mrf.mxu2 }
 0x104   : > { %v1351_v30 = vadd.f32 %v1350_v11, %v1302_v25  ;;  %v2207_v25 = vor.u32 %v2645_v59, %v2206_v9  ;;  %v2211_v11 = vor.u32 %v2641_v12, %v2208_v13  ;;  %v2658_v59 = vld [vmem:[%s3067_s17 + $0x20c] sm:$0xf]  ;;  %v2272_v12 = vld [vmem:[%s3067_s17 + $0x22c] sm:$0xf0] }
 0x105   : > { %v1399_v32 = vpop.f32.mrf.mxu3  ;;  %v1303_v33 = vpop.f32.mrf.mxu1 }
 0x106   : > { %v1400_v34 = vadd.f32 %v1399_v32, %v1351_v30  ;;  %v1304_v36 = vadd.f32 %v1303_v33, %v1255_v28  ;;  %v2215_v28 = vor.u32 %v2646_v17, %v2214_v14  ;;  %v2278_v14 = vld [vmem:[%s3067_s17 + $0x210] sm:$0xf]  ;;  %v2663_v17 = vld [vmem:[%s3067_s17 + $0x230] sm:$0xf0] }
 0x107   : > { %v1450_v37 = vpop.f32.mrf.mxu0 }
 0x108   : > { %v3439_v39 = vadd.f32 %v1448_v26, %v1400_v34 }
 0x10b   : > { %v1352_v46 = vpop.f32.mrf.mxu2 }
 0x10c   : > { %v1353_v47 = vadd.f32 %v1352_v46, %v1304_v36  ;;  %v2650_v46 = vld [vmem:[%s3067_s17 + $0x1cc] sm:$0xf] }
 0x10d   : > { %v1401_v48 = vpop.f32.mrf.mxu3  ;;  %v1306_v50 = vpop.f32.mrf.mxu1 }
 0x10e   : > { %v1402_v55 = vadd.f32 %v1401_v48, %v1353_v47  ;;  %v1307_v57 = vadd.f32 %v1306_v50, %v3344_v56  ;;  %v2244_v47 = vld [vmem:[%s3067_s17 + $0x1ec] sm:$0xf0] }
 0x10f   : > { %v1453_v61 = vpop.f32.mrf.mxu0  ;;  %v2250_v48 = vld [vmem:[%s3067_s17 + $0x1d0] sm:$0xf] }
 0x110   : > { %1501 = vmatmul.bf16.gmra.mxu1 %v2167_v54  ;;  %1550 = vmatmul.bf16.gmra.mxu2 %v2171_v19  ;;  %v3448_v62 = vadd.f32 %v1450_v37, %v1402_v55  ;;  %v2655_v54 = vld [vmem:[%s3067_s17 + $0x1f0] sm:$0xf0]  ;;  %v2243_v55 = vor.u32 %v2654_v45, %v2242_v44 }
 0x112   : > { %1599 = vmatmul.bf16.gmra.mxu3 %v2175_v51  ;;  %1648 = vmatmul.bf16.gmra.mxu0 %v2179_v53  ;;  %v2239_v53 = vor.u32 %v2649_v41, %v2236_v42 }
 0x113   : > { %v1355_v63 = vpop.f32.mrf.mxu2 }
 0x114   : > { %v1356_v0 = vadd.f32 %v1355_v63, %v1307_v57  ;;  %v2251_v63 = vor.u32 %v2655_v54, %v2250_v48 }
 0x115   : > { %v1404_v1 = vpop.f32.mrf.mxu3  ;;  %v1308_v2 = vpop.f32.mrf.mxu1 }
 0x116   : > { %v1405_v3 = vadd.f32 %v1404_v1, %v1356_v0  ;;  %v1309_v56 = vadd.f32 %v1308_v2, %v3360_v6 }
 0x117   : > { %v1455_v4 = vpop.f32.mrf.mxu0 }
 0x118   : > { %v3453_v8 = vadd.f32 %v1453_v61, %v1405_v3  ;;  %v2247_v61 = vor.u32 %v2650_v46, %v2244_v47 }
 0x11b   : > { %v1357_v21 = vpop.f32.mrf.mxu2 }
 0x11c   : > { %v1358_v22 = vadd.f32 %v1357_v21, %v1309_v56  ;;  %v2659_v21 = vld [vmem:[%s3067_s17 + $0x214] sm:$0xf] }
 0x11d   : > { %v1406_v23 = vpop.f32.mrf.mxu3  ;;  %v1311_v26 = vpop.f32.mrf.mxu1 }
 0x11e   : > { %v1407_v6 = vadd.f32 %v1406_v23, %v1358_v22  ;;  %v1312_v30 = vadd.f32 %v1311_v26, %v3368_v16  ;;  %v2280_v22 = vld [vmem:[%s3067_s17 + $0x234] sm:$0xf0] }
 0x11f   : > { %v1458_v32 = vpop.f32.mrf.mxu0  ;;  %v2286_v23 = vld [vmem:[%s3067_s17 + $0x218] sm:$0xf] }
 0x120   : > { %1506 = vmatmul.bf16.gmra.mxu1 %v2203_v24  ;;  %1555 = vmatmul.bf16.gmra.mxu2 %v2207_v25  ;;  %v3462_v33 = vadd.f32 %v1455_v4, %v1407_v6  ;;  %v2664_v24 = vld [vmem:[%s3067_s17 + $0x238] sm:$0xf0]  ;;  %v2279_v6 = vor.u32 %v2663_v17, %v2278_v14  ;;  %s175_s17 = sand.u32 1, %s2947_s12   ;;  %s1725_s12 = ssub.s32 (%p3034_p4), 86, %s3048_s27 }
 0x121   : > { %s1997_s14 = sshll.u32 %s175_s17, 6  ;;  %p1726_p8 = scmp.lt.s32.totalorder (%p3034_p4), %s1725_s12, 16 }
 0x122   : > { %1604 = vmatmul.bf16.gmra.mxu3 %v2211_v11  ;;  %1653 = vmatmul.bf16.gmra.mxu0 %v2215_v28  ;;  %v2275_v28 = vor.u32 %v2658_v59, %v2272_v12  ;;  %s3501_s18 = scalar_lea.vmem [#allocation2], %s1997_s14  }
 0x123   : > { %v1360_v34 = vpop.f32.mrf.mxu2 }
 0x124   : > { %v1361_v36 = vadd.f32 %v1360_v34, %v1312_v30  ;;  %v2287_v34 = vor.u32 %v2664_v24, %v2286_v23 }
 0x125   : > { %v1409_v37 = vpop.f32.mrf.mxu3  ;;  %v1313_v38 = vpop.f32.mrf.mxu1 }
 0x126   : > { %v1410_v20 = vadd.f32 %v1409_v37, %v1361_v36  ;;  %v1314_v16 = vadd.f32 %v1313_v38, %v3385_v31 }
 0x127   : > { %v1460_v40 = vpop.f32.mrf.mxu0 }
 0x128   : > { %v3467_v43 = vadd.f32 %v1458_v32, %v1410_v20  ;;  %v2283_v32 = vor.u32 %v2659_v21, %v2280_v22 }
 0x12b   : > { %v1362_v19 = vpop.f32.mrf.mxu2 }
 0x12c   : > { %v1363_v50 = vadd.f32 %v1362_v19, %v1314_v16 }
 0x12d   : > { %v1411_v51 = vpop.f32.mrf.mxu3  ;;  %v1316_v57 = vpop.f32.mrf.mxu1 }
 0x12e   : > { %v1412_v31 = vadd.f32 %v1411_v51, %v1363_v50  ;;  %v1317_v0 = vadd.f32 %v1316_v57, %v3347_v58 }
 0x12f   : > { %v1463_v1 = vpop.f32.mrf.mxu0 }
 0x130   : > { %1511 = vmatmul.bf16.gmra.mxu1 %v2239_v53  ;;  %1560 = vmatmul.bf16.gmra.mxu2 %v2243_v55  ;;  %v3476_v2 = vadd.f32 %v1460_v40, %v1412_v31 }
 0x132   : > { %1609 = vmatmul.bf16.gmra.mxu3 %v2247_v61  ;;  %1658 = vmatmul.bf16.gmra.mxu0 %v2251_v63 }
 0x133   : > { %v1365_v3 = vpop.f32.mrf.mxu2 }
 0x134   : > { %v1366_v56 = vadd.f32 %v1365_v3, %v1317_v0 }
 0x135   : > { %v1414_v4 = vpop.f32.mrf.mxu3  ;;  %v1318_v5 = vpop.f32.mrf.mxu1 }
 0x136   : > { %v1415_v7 = vadd.f32 %v1414_v4, %v1366_v56  ;;  %v1319_v58 = vadd.f32 %v1318_v5, %v3363_v10 }
 0x137   : > { %v1465_v9 = vpop.f32.mrf.mxu0 }
 0x138   : > { %v3481_v13 = vadd.f32 %v1463_v1, %v1415_v7 }
 0x13b   : > { %v1367_v25 = vpop.f32.mrf.mxu2 }
 0x13c   : > { %v1368_v26 = vadd.f32 %v1367_v25, %v1319_v58 }
 0x13d   : > { %v1416_v11 = vpop.f32.mrf.mxu3  ;;  %v1321_v30 = vpop.f32.mrf.mxu1 }
 0x13e   : > { %v1417_v10 = vadd.f32 %v1416_v11, %v1368_v26  ;;  %v1322_v36 = vadd.f32 %v1321_v30, %v3371_v18 }
 0x13f   : > { %v1468_v37 = vpop.f32.mrf.mxu0 }
 0x140   : > { %1516 = vmatmul.bf16.gmra.mxu1 %v2275_v28  ;;  %1565 = vmatmul.bf16.gmra.mxu2 %v2279_v6  ;;  %v3490_v38 = vadd.f32 %v1465_v9, %v1417_v10 }
 0x142   : > { %1614 = vmatmul.bf16.gmra.mxu3 %v2283_v32  ;;  %1663 = vmatmul.bf16.gmra.mxu0 %v2287_v34 }
 0x143   : > { %v1370_v20 = vpop.f32.mrf.mxu2 }
 0x144   : > { %v1371_v16 = vadd.f32 %v1370_v20, %v1322_v36 }
 0x145   : > { %v1419_v40 = vpop.f32.mrf.mxu3  ;;  %v1323_v41 = vpop.f32.mrf.mxu1 }
 0x146   : > { %v1420_v42 = vadd.f32 %v1419_v40, %v1371_v16  ;;  %v1324_v44 = vadd.f32 %v1323_v41, %v3388_v35 }
 0x147   : > { %v1470_v45 = vpop.f32.mrf.mxu0 }
 0x148   : > { %v3493_v46 = vadd.f32 %v1468_v37, %v1420_v42 }
 0x14b   : > { %v1372_v47 = vpop.f32.mrf.mxu2 }
 0x14c   : > { %v1373_v48 = vadd.f32 %v1372_v47, %v1324_v44 }
 0x14d   : > { %v1421_v18 = vpop.f32.mrf.mxu3  ;;  %v1482_v54 = vpop.f32.mrf.mxu1 }
 0x14e   : > { %v1422_v19 = vadd.f32 %v1421_v18, %v1373_v48  ;;  %v1483_v55 = vadd.f32 %v1482_v54, %v3393_v52 }
 0x14f   : > { %v1629_v50 = vpop.f32.mrf.mxu0 }
 0x150   : > { %v3495_v51 = vadd.f32 %v1470_v45, %v1422_v19 }
 0x153   : > { %v1531_v53 = vpop.f32.mrf.mxu2 }
 0x154   : > { %v1532_v63 = vadd.f32 %v1531_v53, %v1483_v55 }
 0x155   : > { %v1580_v57 = vpop.f32.mrf.mxu3  ;;  %v1484_v61 = vpop.f32.mrf.mxu1 }
 0x156   : > { %v1581_v35 = vadd.f32 %v1580_v57, %v1532_v63  ;;  %v1485_v0 = vadd.f32 %v1484_v61, %v3402_v15 }
 0x157   : > { %v1631_v31 = vpop.f32.mrf.mxu0 }
 0x158   : > { %v1630_v5 = vadd.f32 %v1629_v50, %v1581_v35 }
 0x15a   : > { %v1669_v59 = vmax.f32 %v1630_v5, 0.0 }
 0x15b   : > { %v1533_v1 = vpop.f32.mrf.mxu2 }
 0x15c   : > { %v1534_v3 = vadd.f32 %v1533_v1, %v1485_v0 }
 0x15d   : > { %v1582_v56 = vpop.f32.mrf.mxu3  ;;  %v1487_v4 = vpop.f32.mrf.mxu1 }
 0x15e   : > { %v1583_v7 = vadd.f32 %v1582_v56, %v1534_v3  ;;  %v1488_v17 = vadd.f32 %v1487_v4, %v3407_v29 }
 0x15f   : > { %v1634_v58 = vpop.f32.mrf.mxu0 }
 0x160   : > { %v1632_v9 = vadd.f32 %v1631_v31, %v1583_v7 }
 0x162   : > { %v1670_v12 = vmax.f32 %v1632_v9, 0.0 }
 0x163   : > { %v1536_v52 = vpop.f32.mrf.mxu2 }
 0x164   : > { %v2743_v14 = vpack.c.bf16 %v1670_v12, %v1669_v59  ;;  %v1537_v15 = vadd.f32 %v1536_v52, %v1488_v17 }
 0x165   : > { %v1585_v21 = vpop.f32.mrf.mxu3  ;;  %v1489_v22 = vpop.f32.mrf.mxu1 }
 0x166   : > { %2744 = vst [vmem:[%s3501_s18] sm:$0xff] %v2743_v14   ;;  %v1586_v24 = vadd.f32 %v1585_v21, %v1537_v15  ;;  %v1490_v25 = vadd.f32 %v1489_v22, %v3417_v49 }
 0x167   : > { %v1636_v23 = vpop.f32.mrf.mxu0 }
 0x168   : > { %v1635_v30 = vadd.f32 %v1634_v58, %v1586_v24 }
 0x16a   : > { %v1671_v10 = vmax.f32 %v1635_v30, 0.0 }
 0x16b   : > { %v1538_v26 = vpop.f32.mrf.mxu2 }
 0x16c   : > { %v1539_v11 = vadd.f32 %v1538_v26, %v1490_v25 }
 0x16d   : > { %v1587_v28 = vpop.f32.mrf.mxu3  ;;  %v1492_v6 = vpop.f32.mrf.mxu1 }
 0x16e   : > { %v1588_v32 = vadd.f32 %v1587_v28, %v1539_v11  ;;  %v1493_v16 = vadd.f32 %v1492_v6, %v3423_v60 }
 0x16f   : > { %v1639_v34 = vpop.f32.mrf.mxu0 }
 0x170   : > { %v1637_v29 = vadd.f32 %v1636_v23, %v1588_v32 }
 0x172   : > { %v1672_v36 = vmax.f32 %v1637_v29, 0.0 }
 0x173   : > { %v1541_v37 = vpop.f32.mrf.mxu2 }
 0x174   : > { %v2748_v20 = vpack.c.bf16 %v1672_v36, %v1671_v10  ;;  %v1542_v42 = vadd.f32 %v1541_v37, %v1493_v16 }
 0x175   : > { %v1590_v40 = vpop.f32.mrf.mxu3  ;;  %v1494_v41 = vpop.f32.mrf.mxu1 }
 0x176   : > { %2780 = vst [vmem:[%s3501_s18 + $0x8] sm:$0xff] %v2748_v20   ;;  %v1591_v44 = vadd.f32 %v1590_v40, %v1542_v42  ;;  %v1495_v45 = vadd.f32 %v1494_v41, %v3433_v27 }
 0x177   : > { %v1641_v49 = vpop.f32.mrf.mxu0 }
 0x178   : > { %v1640_v19 = vadd.f32 %v1639_v34, %v1591_v44 }
 0x17a   : > { %v1673_v57 = vmax.f32 %v1640_v19, 0.0 }
 0x17b   : > { %v1543_v47 = vpop.f32.mrf.mxu2 }
 0x17c   : > { %v1544_v48 = vadd.f32 %v1543_v47, %v1495_v45 }
 0x17d   : > { %v1592_v18 = vpop.f32.mrf.mxu3  ;;  %v1497_v54 = vpop.f32.mrf.mxu1 }
 0x17e   : > { %v1593_v50 = vadd.f32 %v1592_v18, %v1544_v48  ;;  %v1498_v31 = vadd.f32 %v1497_v54, %v3439_v39 }
 0x17f   : > { %v1644_v53 = vpop.f32.mrf.mxu0 }
 0x180   : > { %v1642_v55 = vadd.f32 %v1641_v49, %v1593_v50 }
 0x182   : > { %v1674_v61 = vmax.f32 %v1642_v55, 0.0 }
 0x183   : > { %v1546_v60 = vpop.f32.mrf.mxu2 }
 0x184   : > { %v2753_v63 = vpack.c.bf16 %v1674_v61, %v1673_v57  ;;  %v1547_v1 = vadd.f32 %v1546_v60, %v1498_v31 }
 0x185   : > { %v1595_v35 = vpop.f32.mrf.mxu3  ;;  %v1499_v0 = vpop.f32.mrf.mxu1 }
 0x186   : > { %2781 = vst [vmem:[%s3501_s18 + $0x10] sm:$0xff] %v2753_v63   ;;  %v1596_v3 = vadd.f32 %v1595_v35, %v1547_v1  ;;  %v1500_v56 = vadd.f32 %v1499_v0, %v3448_v62 }
 0x187   : > { %v1646_v27 = vpop.f32.mrf.mxu0 }
 0x188   : > { %v1645_v9 = vadd.f32 %v1644_v53, %v1596_v3 }
 0x18a   : > { %v1675_v14 = vmax.f32 %v1645_v9, 0.0 }
 0x18b   : > { %v1548_v4 = vpop.f32.mrf.mxu2 }
 0x18c   : > { %v1549_v5 = vadd.f32 %v1548_v4, %v1500_v56 }
 0x18d   : > { %v1597_v7 = vpop.f32.mrf.mxu3  ;;  %v1502_v58 = vpop.f32.mrf.mxu1 }
 0x18e   : > { %v1598_v59 = vadd.f32 %v1597_v7, %v1549_v5  ;;  %v1503_v22 = vadd.f32 %v1502_v58, %v3453_v8 }
 0x18f   : > { %v1649_v12 = vpop.f32.mrf.mxu0 }
 0x190   : > { %v1647_v52 = vadd.f32 %v1646_v27, %v1598_v59 }
 0x192   : > { %v1676_v17 = vmax.f32 %v1647_v52, 0.0 }
 0x193   : > { %v1551_v39 = vpop.f32.mrf.mxu2 }
 0x194   : > { %v2758_v21 = vpack.c.bf16 %v1676_v17, %v1675_v14  ;;  %v1552_v24 = vadd.f32 %v1551_v39, %v1503_v22 }
 0x195   : > { %v1600_v15 = vpop.f32.mrf.mxu3  ;;  %v1504_v23 = vpop.f32.mrf.mxu1 }
 0x196   : > { %2782 = vst [vmem:[%s3501_s18 + $0x18] sm:$0xff] %v2758_v21   ;;  %v1601_v25 = vadd.f32 %v1600_v15, %v1552_v24  ;;  %v1505_v26 = vadd.f32 %v1504_v23, %v3462_v33 }
 0x197   : > { %v1651_v62 = vpop.f32.mrf.mxu0 }
 0x198   : > { %v1650_v32 = vadd.f32 %v1649_v12, %v1601_v25 }
 0x19a   : > { %v1677_v36 = vmax.f32 %v1650_v32, 0.0 }
 0x19b   : > { %v1553_v11 = vpop.f32.mrf.mxu2 }
 0x19c   : > { %v1554_v28 = vadd.f32 %v1553_v11, %v1505_v26 }
 0x19d   : > { %v1602_v6 = vpop.f32.mrf.mxu3  ;;  %v1507_v30 = vpop.f32.mrf.mxu1 }
 0x19e   : > { %v1603_v34 = vadd.f32 %v1602_v6, %v1554_v28  ;;  %v1508_v16 = vadd.f32 %v1507_v30, %v3467_v43 }
 0x19f   : > { %v1654_v29 = vpop.f32.mrf.mxu0 }
 0x1a0   : > { %v1652_v10 = vadd.f32 %v1651_v62, %v1603_v34 }
 0x1a2   : > { %v1678_v37 = vmax.f32 %v1652_v10, 0.0 }
 0x1a3   : > { %v1556_v8 = vpop.f32.mrf.mxu2 }
 0x1a4   : > { %v2763_v20 = vpack.c.bf16 %v1678_v37, %v1677_v36  ;;  %v1557_v42 = vadd.f32 %v1556_v8, %v1508_v16 }
 0x1a5   : > { %v1605_v40 = vpop.f32.mrf.mxu3  ;;  %v1509_v41 = vpop.f32.mrf.mxu1 }
 0x1a6   : > { %2783 = vst [vmem:[%s3501_s18 + $0x20] sm:$0xff] %v2763_v20   ;;  %v1606_v49 = vadd.f32 %v1605_v40, %v1557_v42  ;;  %v1510_v44 = vadd.f32 %v1509_v41, %v3476_v2 }
 0x1a7   : > { %v1656_v33 = vpop.f32.mrf.mxu0 }
 0x1a8   : > { %v1655_v54 = vadd.f32 %v1654_v29, %v1606_v49 }
 0x1aa   : > { %v1679_v55 = vmax.f32 %v1655_v54, 0.0 }
 0x1ab   : > { %v1558_v45 = vpop.f32.mrf.mxu2 }
 0x1ac   : > { %v1559_v47 = vadd.f32 %v1558_v45, %v1510_v44 }
 0x1ad   : > { %v1607_v48 = vpop.f32.mrf.mxu3  ;;  %v1512_v18 = vpop.f32.mrf.mxu1 }
 0x1ae   : > { %v1608_v19 = vadd.f32 %v1607_v48, %v1559_v47  ;;  %v1513_v60 = vadd.f32 %v1512_v18, %v3481_v13 }
 0x1af   : > { %v1659_v53 = vpop.f32.mrf.mxu0 }
 0x1b0   : > { %v1657_v50 = vadd.f32 %v1656_v33, %v1608_v19 }
 0x1b2   : > { %v1680_v57 = vmax.f32 %v1657_v50, 0.0 }
 0x1b3   : > { %v1561_v43 = vpop.f32.mrf.mxu2 }
 0x1b4   : > { %v2768_v61 = vpack.c.bf16 %v1680_v57, %v1679_v55  ;;  %v1562_v35 = vadd.f32 %v1561_v43, %v1513_v60 }
 0x1b5   : > { %v1610_v63 = vpop.f32.mrf.mxu3  ;;  %v1514_v31 = vpop.f32.mrf.mxu1 }
 0x1b6   : > { %2784 = vst [vmem:[%s3501_s18 + $0x28] sm:$0xff] %v2768_v61   ;;  %v1611_v2 = vadd.f32 %v1610_v63, %v1562_v35  ;;  %v1515_v0 = vadd.f32 %v1514_v31, %v3490_v38 }
 0x1b7   : > { %v1661_v1 = vpop.f32.mrf.mxu0 }
 0x1b8   : > { %v1660_v5 = vadd.f32 %v1659_v53, %v1611_v2 }
 0x1ba   : > { %v1681_v9 = vmax.f32 %v1660_v5, 0.0 }
 0x1bb   : > { %v1563_v27 = vpop.f32.mrf.mxu2 }
 0x1bc   : > { %v1564_v3 = vadd.f32 %v1563_v27, %v1515_v0 }
 0x1bd   : > { %v1612_v56 = vpop.f32.mrf.mxu3  ;;  %v1517_v4 = vpop.f32.mrf.mxu1 }
 0x1be   : > { %v1613_v7 = vadd.f32 %v1612_v56, %v1564_v3  ;;  %v1518_v52 = vadd.f32 %v1517_v4, %v3493_v46 }
 0x1bf   : > { %v1664_v17 = vpop.f32.mrf.mxu0 }
 0x1c0   : > { %v1662_v58 = vadd.f32 %v1661_v1, %v1613_v7 }
 0x1c2   : > { %v1682_v59 = vmax.f32 %v1662_v58, 0.0 }
 0x1c3   : > { %v1566_v12 = vpop.f32.mrf.mxu2 }
 0x1c4   : > { %v2773_v13 = vpack.c.bf16 %v1682_v59, %v1681_v9  ;;  %v1567_v38 = vadd.f32 %v1566_v12, %v1518_v52 }
 0x1c5   : > { %v1615_v14 = vpop.f32.mrf.mxu3  ;;  %v1519_v39 = vpop.f32.mrf.mxu1 }
 0x1c6   : > { %2785 = vst [vmem:[%s3501_s18 + $0x30] sm:$0xff] %v2773_v13   ;;  %v1616_v21 = vadd.f32 %v1615_v14, %v1567_v38  ;;  %v1520_v22 = vadd.f32 %v1519_v39, %v3495_v51 }
 0x1c7   : > { %v1666_v26 = vpop.f32.mrf.mxu0 }
 0x1c8   : > { %v1665_v62 = vadd.f32 %v1664_v17, %v1616_v21 }
 0x1ca   : > { %v1683_v28 = vmax.f32 %v1665_v62, 0.0 }
 0x1cb   : > { %v1568_v15 = vpop.f32.mrf.mxu2 }
 0x1cc   : > { %v1569_v23 = vadd.f32 %v1568_v15, %v1520_v22 }
 0x1cd   : > { %v1617_v24 = vpop.f32.mrf.mxu3 }
 0x1ce   : > { %v1618_v25 = vadd.f32 %v1617_v24, %v1569_v23 }
 0x1d0   : > { %v1667_v11 = vadd.f32 %v1666_v26, %v1618_v25 }
 0x1d2   : > { %v1684_v6 = vmax.f32 %v1667_v11, 0.0  ;;  %1723 = sbr.rel (!%p3034_p4) target bundleno = 519 (0x207), region = 36 }
 0x1d4   : > { %v2778_v30 = vpack.c.bf16 %v1684_v6, %v1683_v28 }
 0x1d6   : > { %2786 = vst [vmem:[%s3501_s18 + $0x38] sm:$0xff] %v2778_v30  }
 0x1d7   : > { %s3638_s12 = smov (!%p1726_p8, %s1725_s12), 16 }
 0x1d8   : > { %s2578_s25 = sshll.u32 %s3638_s12, 2 }
 0x1d9   : > { %p2581_p9 = scmp.eq.s32.totalorder %s2578_s25, 0 }
 0x1da   : > { %s3537_s26 = sshrl.u32 (!%p2581_p9), %s3638_s12, 4 }
 0x1db   : > { %1734 = sbr.rel (%p2581_p9) target bundleno = 519 (0x207), region = 40  ;;  %p2582_p10 = scmp.le.s32.totalorder (!%p2581_p9), %s3537_s26, 0 }
 0x1e0   : > { %1949 = sbr.rel (%p2582_p10) target bundleno = 502 (0x1f6), region = 112  ;;  %s3629_s15 = smov (!%p2582_p10), %s3531_s24 }
 0x1e1   : > { %s3630_s20 = smov (!%p2582_p10), %s3501_s18  ;;  %s3546_s27 = smov (!%p2582_p10), 0  }
 0x1e2   : > { %s3548_s28 = smov (!%p2582_p10), 0  }
 0x1e5 LB: >> { %v1751_v46 = vld [vmem:[%s2963_s20] sm:$0xf]  ;;  %v1753_v51 = vld [vmem:[%s2963_s20 + $0x4] sm:$0xf]  ;;  %v1755_v32 = vld [vmem:[%s2963_s20 + $0x8] sm:$0xf]  ;;  %s2971_s28 = sphi %s3548_s28, %s1745_s28   ;;  %s2967_s27 = sphi %s3546_s27, %s3633_s27   ;;  %s2963_s20 = sphi %s3630_s20, %s3632_s20   ;;  %s2959_s15 = sphi %s3629_s15, %s3631_s15  }
 0x1e6   : >> { %1752 = vst [vmem:[%s2959_s15] sm:$0xf] %v1751_v46  ;;  %v1757_v34 = vld [vmem:[%s2963_s20 + $0xc] sm:$0xf]  ;;  %s1783_s29 = sadd.s32 1, %s2967_s27  ;;  %v1759_v29 = vld [vmem:[%s2963_s20 + $0x10] sm:$0xf] }
 0x1e7   : >> { %1754 = vst [vmem:[%s2959_s15 + $0x4] sm:$0xf] %v1753_v51  ;;  %v1761_v10 = vld [vmem:[%s2963_s20 + $0x14] sm:$0xf]  ;;  %p1784_p11 = scmp.ge.s32.totalorder %s1783_s29, %s3537_s26  ;;  %v1763_v36 = vld [vmem:[%s2963_s20 + $0x18] sm:$0xf] }
 0x1e8   : >> { %1756 = vst [vmem:[%s2959_s15 + $0x8] sm:$0xf] %v1755_v32  ;;  %v1765_v37 = vld [vmem:[%s2963_s20 + $0x1c] sm:$0xf]  ;;  %v1767_v8 = vld [vmem:[%s2963_s20 + $0x20] sm:$0xf] }
 0x1e9   : >> { %1758 = vst [vmem:[%s2959_s15 + $0xc] sm:$0xf] %v1757_v34  ;;  %v1769_v20 = vld [vmem:[%s2963_s20 + $0x24] sm:$0xf]  ;;  %s3640_s29 = smov (%p1784_p11, %s1783_s29), 0  ;;  %s1745_s28 = sadd.s32 1, %s2971_s28  }
 0x1ea   : >> { %1760 = vst [vmem:[%s2959_s15 + $0x10] sm:$0xf] %v1759_v29  ;;  %v1771_v16 = vld [vmem:[%s2963_s20 + $0x28] sm:$0xf]  ;;  %v1773_v40 = vld [vmem:[%s2963_s20 + $0x2c] sm:$0xf]  ;;  %p1744_p12 = scmp.ge.s32.totalorder %s1745_s28, %s3537_s26  ;;  %s3633_s27 = smov %s3640_s29 }
 0x1eb   : >> { %1762 = vst [vmem:[%s2959_s15 + $0x14] sm:$0xf] %v1761_v10  ;;  %s2583_s30 = sshll.u32 %s3640_s29, 6  ;;  %v1775_v41 = vld [vmem:[%s2963_s20 + $0x30] sm:$0xf] }
 0x1ec   : >> { %1764 = vst [vmem:[%s2959_s15 + $0x18] sm:$0xf] %v1763_v36  ;;  %s1788_s4 = scalar_lea.vmem %s3501_s18, %s2583_s30 [#allocation2]   ;;  %s1789_s5 = scalar_lea.vmem %s3531_s24, %s2583_s30   ;;  %v1777_v42 = vld [vmem:[%s2963_s20 + $0x34] sm:$0xf]  ;;  %v1779_v33 = vld [vmem:[%s2963_s20 + $0x38] sm:$0xf] }
 0x1ed   : >> { %1766 = vst [vmem:[%s2959_s15 + $0x1c] sm:$0xf] %v1765_v37  ;;  %v1781_v49 = vld [vmem:[%s2963_s20 + $0x3c] sm:$0xf]  ;;  %s3632_s20 = smov %s1788_s4 }
 0x1ee   : >> { %1768 = vst [vmem:[%s2959_s15 + $0x20] sm:$0xf] %v1767_v8 }
 0x1ef   : >> { %1770 = vst [vmem:[%s2959_s15 + $0x24] sm:$0xf] %v1769_v20 }
 0x1f0   : >> { %1772 = vst [vmem:[%s2959_s15 + $0x28] sm:$0xf] %v1771_v16 }
 0x1f1   : >> { %1774 = vst [vmem:[%s2959_s15 + $0x2c] sm:$0xf] %v1773_v40  ;;  %1747 = sbr.rel (!%p1744_p12) target bundleno = 485 (0x1e5), region = 118 }
 0x1f2   : >> { %1776 = vst [vmem:[%s2959_s15 + $0x30] sm:$0xf] %v1775_v41 }
 0x1f3   : >> { %1778 = vst [vmem:[%s2959_s15 + $0x34] sm:$0xf] %v1777_v42 }
 0x1f4   : >> { %1780 = vst [vmem:[%s2959_s15 + $0x38] sm:$0xf] %v1779_v33 }
 0x1f5   : >> { %1782 = vst [vmem:[%s2959_s15 + $0x3c] sm:$0xf] %v1781_v49  ;;  %s3631_s15 = smov %s1789_s5 }
 0x1f6 PF: > { %s3606_s6 = sand.u32 15, %s3638_s12   ;;  %s2738_s7 = sshll.u32 %s3537_s26, 6 }
 0x1f7   : > { %s1794_s8 = scalar_lea.vmem %s3501_s18, %s2738_s7 [#allocation2]   ;;  %s1796_s9 = scalar_lea.vmem %s3531_s24, %s2738_s7  }
 0x1f8   : > { %p2588_p13 = scmp.le.s32.totalorder %s3606_s6, 0 }
 0x1f9   : > { %s2973_s10 = smov (!%p2588_p13), %s1796_s9   ;;  %s2977_s11 = smov (!%p2588_p13), %s1794_s8  }
 0x1fa   : > { %1963 = sbr.rel (%p2588_p13) target bundleno = 519 (0x207), region = 123  ;;  %s2981_s17 = smov (!%p2588_p13), 0  }
 0x1fb   : > { %s2985_s14 = smov (!%p2588_p13), 0  }
 0x1ff LB: >> { %v1806_v44 = vld [vmem:[%s2979_s11] sm:$0xf]  ;;  %s1808_s12 = sadd.s32 1, %s2983_s17  ;;  %s1800_s14 = sadd.s32 1, %s2987_s14   ;;  %s2987_s14 = sphi %s2985_s14, %s1800_s14   ;;  %s2983_s17 = sphi %s2981_s17, %s2982_s17   ;;  %s2979_s11 = sphi %s2977_s11, %s1813_s11   ;;  %s2975_s10 = sphi %s2973_s10, %s1814_s10  }
 0x200   : >> { %1807 = vst [vmem:[%s2975_s10] sm:$0xf] %v1806_v44  ;;  %p1809_p0 = scmp.ge.s32.totalorder %s1808_s12, %s3606_s6  ;;  %p1799_p1 = scmp.ge.s32.totalorder %s1800_s14, %s3606_s6 }
 0x202   : >> { %s3642_s12 = smov (%p1809_p0, %s1808_s12), 0  ;;  %1802 = sbr.rel (!%p1799_p1) target bundleno = 511 (0x1ff), region = 129 }
 0x203   : >> { %s2589_s18 = sshll.u32 %s3642_s12, 2  ;;  %s2982_s17 = smov %s3642_s12  }
 0x204   : >> { %s1813_s11 = scalar_lea.vmem %s1794_s8, %s2589_s18 [#allocation2]   ;;  %s1814_s10 = scalar_lea.vmem %s1796_s9, %s2589_s18  }
 0x207 PF: > { %p10_p2 = scmp.ge.s32.totalorder %s3024_s16, 8   ;;  %s3634_s12 = smov %s2951_s13 }
 0x208   : > { %s3635_s13 = smov %s3032_s19  ;;  %s3636_s14 = smov %s3024_s16 }
 0x209   :  { %12 = sbr.rel (!%p10_p2) target bundleno = 2 (0x2), region = 140 }

// kernel: _lambda_.5
= control target key start
LH: loop header
LB: loop body
LE: loop exit
PB: predicated region body
PF: predicated region fallthrough
CT: control target
= control target key end

     0   :  { %8 = vsyncpa [#allocation3], 0  ;;  %s2219_s0 = inlined_call_operand.vmem [shape: bf16[2,1792], index: 0, kind: input, shape index: {}]   ;;  %s2220_s1 = inlined_call_operand.vmem [shape: bf16[1792,128], index: 1, kind: input, shape index: {}]   ;;  %s2221_s2 = inlined_call_operand.vmem [shape: f32[1,128], index: 2, kind: input, shape index: {}]   ;;  %s2222_s3 = inlined_call_operand.hbm [shape: f32[2,128], index: 3, kind: output, shape index: {}]  }
   0x1   :  { %v1671_v0 = vld [vmem:[%s2220_s1 + $0x38] sm:$0xff]  ;;  %v1670_v4 = vld [vmem:[%s2220_s1 + $0x30] sm:$0xff]  ;;  %v1669_v8 = vld [vmem:[%s2220_s1 + $0x28] sm:$0xff] }
   0x2   :  { %v1679_v1 = vld [vmem:[%s2220_s1 + $0x78] sm:$0xff]  ;;  %998 = vmatpush.bf16.msra.mxu0 %v1671_v0  ;;  %v1678_v5 = vld [vmem:[%s2220_s1 + $0x70] sm:$0xff]  ;;  %v1677_v9 = vld [vmem:[%s2220_s1 + $0x68] sm:$0xff] }
   0x3   :  { %v1687_v2 = vld [vmem:[%s2220_s1 + $0xb8] sm:$0xff]  ;;  %1012 = vmatpush.bf16.msra.mxu1 %v1679_v1  ;;  %v1686_v6 = vld [vmem:[%s2220_s1 + $0xb0] sm:$0xff]  ;;  %v1685_v10 = vld [vmem:[%s2220_s1 + $0xa8] sm:$0xff] }
   0x4   :  { %v1695_v3 = vld [vmem:[%s2220_s1 + $0xf8] sm:$0xff]  ;;  %1026 = vmatpush.bf16.msra.mxu2 %v1687_v2  ;;  %v1694_v7 = vld [vmem:[%s2220_s1 + $0xf0] sm:$0xff]  ;;  %v1693_v11 = vld [vmem:[%s2220_s1 + $0xe8] sm:$0xff] }
   0x5   :  { %1040 = vmatpush.bf16.msra.mxu3 %v1695_v3  ;;  %v1668_v12 = vld [vmem:[%s2220_s1 + $0x20] sm:$0xff]  ;;  %v1667_v16 = vld [vmem:[%s2220_s1 + $0x18] sm:$0xff]  ;;  %v17_v21 = vld [vmem:[%s2219_s0 + $0xe] sm:$0xff] }
   0x6   :  { %999 = vmatpush.bf16.msra.mxu0 %v1670_v4  ;;  %v1676_v13 = vld [vmem:[%s2220_s1 + $0x60] sm:$0xff]  ;;  %v1675_v17 = vld [vmem:[%s2220_s1 + $0x58] sm:$0xff]  ;;  %v21_v23 = vld [vmem:[%s2219_s0 + $0x2a] sm:$0xff]  ;;  %263 = vst [vmem:[#allocation1 + $0x1] ss:$9 sm:$0xff] %v17_v21 }
   0x7   :  { %1013 = vmatpush.bf16.msra.mxu1 %v1678_v5  ;;  %v1684_v14 = vld [vmem:[%s2220_s1 + $0xa0] sm:$0xff]  ;;  %v1683_v18 = vld [vmem:[%s2220_s1 + $0x98] sm:$0xff]  ;;  %v1666_v24 = vld [vmem:[%s2220_s1 + $0x10] sm:$0xff]  ;;  %269 = vst [vmem:[#allocation1 + $0x3] ss:$9 sm:$0xff] %v21_v23 }
   0x8   :  { %1027 = vmatpush.bf16.msra.mxu2 %v1686_v6  ;;  %v1692_v15 = vld [vmem:[%s2220_s1 + $0xe0] sm:$0xff]  ;;  %v1691_v19 = vld [vmem:[%s2220_s1 + $0xd8] sm:$0xff]  ;;  %v1674_v25 = vld [vmem:[%s2220_s1 + $0x50] sm:$0xff] }
   0x9   :  { %1041 = vmatpush.bf16.msra.mxu3 %v1694_v7  ;;  %v15_v20 = vld [vmem:[%s2219_s0] sm:$0xff]  ;;  %v23_v26 = vld [vmem:[%s2219_s0 + $0x38] sm:$0xff]  ;;  %v1682_v27 = vld [vmem:[%s2220_s1 + $0x90] sm:$0xff] }
   0xa   :  { %1000 = vmatpush.bf16.msra.mxu0 %v1669_v8  ;;  %v19_v22 = vld [vmem:[%s2219_s0 + $0x1c] sm:$0xff]  ;;  %260 = vst [vmem:[#allocation1] ss:$9 sm:$0xff] %v15_v20  ;;  %v1690_v28 = vld [vmem:[%s2220_s1 + $0xd0] sm:$0xff]  ;;  %v25_v29 = vld [vmem:[%s2219_s0 + $0x46] sm:$0xff] }
   0xb   :  { %1014 = vmatpush.bf16.msra.mxu1 %v1677_v9  ;;  %266 = vst [vmem:[#allocation1 + $0x2] ss:$9 sm:$0xff] %v19_v22  ;;  %v27_v30 = vld [vmem:[%s2219_s0 + $0x54] sm:$0xff]  ;;  %v29_v31 = vld [vmem:[%s2219_s0 + $0x62] sm:$0xff] }
   0xc   :  { %1028 = vmatpush.bf16.msra.mxu2 %v1685_v10  ;;  %272 = vst [vmem:[#allocation1 + $0x4] ss:$9 sm:$0xff] %v23_v26  ;;  %v1665_v32 = vld [vmem:[%s2220_s1 + $0x8] sm:$0xff]  ;;  %v1664_v36 = vld [vmem:[%s2220_s1] sm:$0xff]  ;;  %v1703_v39 = vld [vmem:[%s2220_s1 + $0x138] sm:$0xff] }
   0xd   :  { %1042 = vmatpush.bf16.msra.mxu3 %v1693_v11  ;;  %v1673_v33 = vld [vmem:[%s2220_s1 + $0x48] sm:$0xff]  ;;  %275 = vst [vmem:[#allocation1 + $0x5] ss:$9 sm:$0xff] %v25_v29  ;;  %v1672_v37 = vld [vmem:[%s2220_s1 + $0x40] sm:$0xff]  ;;  %v1711_v40 = vld [vmem:[%s2220_s1 + $0x178] sm:$0xff] }
   0xe   :  { %1001 = vmatpush.bf16.msra.mxu0 %v1668_v12  ;;  %v1681_v34 = vld [vmem:[%s2220_s1 + $0x88] sm:$0xff]  ;;  %278 = vst [vmem:[#allocation1 + $0x6] ss:$9 sm:$0xff] %v27_v30  ;;  %v1680_v38 = vld [vmem:[%s2220_s1 + $0x80] sm:$0xff]  ;;  %v1719_v41 = vld [vmem:[%s2220_s1 + $0x1b8] sm:$0xff] }
   0xf   :  { %1015 = vmatpush.bf16.msra.mxu1 %v1676_v13  ;;  %v1689_v35 = vld [vmem:[%s2220_s1 + $0xc8] sm:$0xff]  ;;  %281 = vst [vmem:[#allocation1 + $0x7] ss:$9 sm:$0xff] %v29_v31  ;;  %v1688_v42 = vld [vmem:[%s2220_s1 + $0xc0] sm:$0xff]  ;;  %v1727_v43 = vld [vmem:[%s2220_s1 + $0x1f8] sm:$0xff] }
  0x10   :  { %1029 = vmatpush.bf16.msra.mxu2 %v1684_v14  ;;  %v1702_v44 = vld [vmem:[%s2220_s1 + $0x130] sm:$0xff]  ;;  %v1701_v52 = vld [vmem:[%s2220_s1 + $0x128] sm:$0xff]  ;;  %v1700_v56 = vld [vmem:[%s2220_s1 + $0x120] sm:$0xff] }
  0x11   :  { %1043 = vmatpush.bf16.msra.mxu3 %v1692_v15  ;;  %v1710_v47 = vld [vmem:[%s2220_s1 + $0x170] sm:$0xff]  ;;  %v1709_v53 = vld [vmem:[%s2220_s1 + $0x168] sm:$0xff]  ;;  %v1708_v57 = vld [vmem:[%s2220_s1 + $0x160] sm:$0xff] }
  0x12   :  { %1002 = vmatpush.bf16.msra.mxu0 %v1667_v16  ;;  %v1718_v48 = vld [vmem:[%s2220_s1 + $0x1b0] sm:$0xff]  ;;  %v1717_v54 = vld [vmem:[%s2220_s1 + $0x1a8] sm:$0xff]  ;;  %v1716_v58 = vld [vmem:[%s2220_s1 + $0x1a0] sm:$0xff] }
  0x13   :  { %1016 = vmatpush.bf16.msra.mxu1 %v1675_v17  ;;  %v1726_v50 = vld [vmem:[%s2220_s1 + $0x1f0] sm:$0xff]  ;;  %v1725_v55 = vld [vmem:[%s2220_s1 + $0x1e8] sm:$0xff]  ;;  %v1724_v59 = vld [vmem:[%s2220_s1 + $0x1e0] sm:$0xff] }
  0x14   :  { %1030 = vmatpush.bf16.msra.mxu2 %v1683_v18  ;;  %v1699_v60 = vld [vmem:[%s2220_s1 + $0x118] sm:$0xff]  ;;  %v1698_v0 = vld [vmem:[%s2220_s1 + $0x110] sm:$0xff]  ;;  %v1697_v4 = vld [vmem:[%s2220_s1 + $0x108] sm:$0xff] }
  0x15   :  { %1044 = vmatpush.bf16.msra.mxu3 %v1691_v19  ;;  %v1707_v61 = vld [vmem:[%s2220_s1 + $0x158] sm:$0xff]  ;;  %v1706_v1 = vld [vmem:[%s2220_s1 + $0x150] sm:$0xff]  ;;  %v1705_v5 = vld [vmem:[%s2220_s1 + $0x148] sm:$0xff] }
  0x16   :  { %1003 = vmatpush.bf16.msra.mxu0 %v1666_v24  ;;  %v282_v45 = vld [vmem:[#allocation1] sm:$0xff]  ;;  %v284_v46 = vld [vmem:[#allocation1 + $0x12] sm:$0xff]  ;;  %v283_v49 = vld [vmem:[#allocation1 + $0x9] sm:$0xff] }
  0x17   :  { %1017 = vmatpush.bf16.msra.mxu1 %v1674_v25  ;;  %v285_v51 = vld [vmem:[#allocation1 + $0x1b] sm:$0xff]  ;;  %v1714_v2 = vld [vmem:[%s2220_s1 + $0x190] sm:$0xff]  ;;  %v1713_v6 = vld [vmem:[%s2220_s1 + $0x188] sm:$0xff] }
  0x18   :  { %1031 = vmatpush.bf16.msra.mxu2 %v1682_v27  ;;  %v1715_v62 = vld [vmem:[%s2220_s1 + $0x198] sm:$0xff]  ;;  %v1722_v3 = vld [vmem:[%s2220_s1 + $0x1d0] sm:$0xff]  ;;  %v1721_v7 = vld [vmem:[%s2220_s1 + $0x1c8] sm:$0xff] }
  0x19   :  { %1045 = vmatpush.bf16.msra.mxu3 %v1690_v28  ;;  %v1723_v63 = vld [vmem:[%s2220_s1 + $0x1d8] sm:$0xff]  ;;  %v1696_v8 = vld [vmem:[%s2220_s1 + $0x100] sm:$0xff]  ;;  %v16_v9 = vld [vmem:[%s2219_s0 + $0x8] sm:$0x3f] }
  0x1a   :  { %1004 = vmatpush.bf16.msra.mxu0 %v1665_v32  ;;  %v286_v10 = vld [vmem:[#allocation1 + $0x24] sm:$0xff]  ;;  %v288_v11 = vld [vmem:[#allocation1 + $0x36] sm:$0xff]  ;;  %v287_v13 = vld [vmem:[#allocation1 + $0x2d] sm:$0xff] }
  0x1b   :  { %1018 = vmatpush.bf16.msra.mxu1 %v1673_v33  ;;  %v18_v12 = vld [vmem:[%s2219_s0 + $0x16] sm:$0x3f]  ;;  %v289_v14 = vld [vmem:[#allocation1 + $0x3f] sm:$0xff]  ;;  %v26_v24 = vld [vmem:[%s2219_s0 + $0x4e] sm:$0x3f] }
  0x1c   :  { %1032 = vmatpush.bf16.msra.mxu2 %v1681_v34  ;;  %v20_v15 = vld [vmem:[%s2219_s0 + $0x24] sm:$0x3f]  ;;  %v22_v18 = vld [vmem:[%s2219_s0 + $0x32] sm:$0x3f]  ;;  %291 = vst [vmem:[#allocation1] ss:$9 sm:$0xff] %v16_v9 }
  0x1d   :  { %1046 = vmatpush.bf16.msra.mxu3 %v1689_v35  ;;  %v1704_v16 = vld [vmem:[%s2220_s1 + $0x140] sm:$0xff]  ;;  %v1735_v19 = vld [vmem:[%s2220_s1 + $0x238] sm:$0xff]  ;;  %293 = vst [vmem:[#allocation1 + $0x1] ss:$9 sm:$0xff] %v18_v12  ;;  %v30_v27 = vld [vmem:[%s2219_s0 + $0x6a] sm:$0x3f] }
  0x1e   :  { %1005 = vmatpush.bf16.msra.mxu0 %v1664_v36  ;;  %v1712_v17 = vld [vmem:[%s2220_s1 + $0x180] sm:$0xff]  ;;  %v1743_v20 = vld [vmem:[%s2220_s1 + $0x278] sm:$0xff]  ;;  %295 = vst [vmem:[#allocation1 + $0x2] ss:$9 sm:$0xff] %v20_v15  ;;  %v1734_v28 = vld [vmem:[%s2220_s1 + $0x230] sm:$0xff] }
  0x1f   :  { %1019 = vmatpush.bf16.msra.mxu1 %v1672_v37  ;;  %v24_v21 = vld [vmem:[%s2219_s0 + $0x40] sm:$0x3f]  ;;  %v1751_v22 = vld [vmem:[%s2220_s1 + $0x2b8] sm:$0xff]  ;;  %297 = vst [vmem:[#allocation1 + $0x3] ss:$9 sm:$0xff] %v22_v18  ;;  %v1742_v29 = vld [vmem:[%s2220_s1 + $0x270] sm:$0xff] }
  0x20   :  { %1033 = vmatpush.bf16.msra.mxu2 %v1680_v38  ;;  %v1720_v23 = vld [vmem:[%s2220_s1 + $0x1c0] sm:$0xff]  ;;  %v1759_v26 = vld [vmem:[%s2220_s1 + $0x2f8] sm:$0xff]  ;;  %299 = vst [vmem:[#allocation1 + $0x4] ss:$9 sm:$0xff] %v24_v21  ;;  %v1750_v30 = vld [vmem:[%s2220_s1 + $0x2b0] sm:$0xff] }
  0x21   :  { %1047 = vmatpush.bf16.msra.mxu3 %v1688_v42  ;;  %1006 = vmatmul.bf16.vlgmr.msra.gmra.mxu0 %v282_v45  ;;  %v28_v25 = vld [vmem:[%s2219_s0 + $0x5c] sm:$0x3f]  ;;  %301 = vst [vmem:[#allocation1 + $0x5] ss:$9 sm:$0xff] %v26_v24  ;;  %v1758_v31 = vld [vmem:[%s2220_s1 + $0x2f0] sm:$0xff]  ;;  %v1733_v32 = vld [vmem:[%s2220_s1 + $0x228] sm:$0xff] }
  0x22   :  { %1054 = vmatpush.bf16.msrb.mxu0 %v1703_v39  ;;  %1020 = vmatmul.bf16.vlgmr.msra.gmra.mxu1 %v283_v49  ;;  %303 = vst [vmem:[#allocation1 + $0x6] ss:$9 sm:$0xff] %v28_v25  ;;  %v1741_v33 = vld [vmem:[%s2220_s1 + $0x268] sm:$0xff]  ;;  %v1732_v36 = vld [vmem:[%s2220_s1 + $0x220] sm:$0xff]  ;;  %v1747_v42 = vld [vmem:[%s2220_s1 + $0x298] sm:$0xff] }
  0x23   :  { %1068 = vmatpush.bf16.msrb.mxu1 %v1711_v40  ;;  %1034 = vmatmul.bf16.vlgmr.msra.gmra.mxu2 %v284_v46  ;;  %305 = vst [vmem:[#allocation1 + $0x7] ss:$9 sm:$0xff] %v30_v27  ;;  %v1749_v34 = vld [vmem:[%s2220_s1 + $0x2a8] sm:$0xff]  ;;  %v1740_v37 = vld [vmem:[%s2220_s1 + $0x260] sm:$0xff]  ;;  %v1731_v40 = vld [vmem:[%s2220_s1 + $0x218] sm:$0xff] }
  0x24   :  { %1082 = vmatpush.bf16.msrb.mxu2 %v1719_v41  ;;  %1048 = vmatmul.bf16.vlgmr.msra.gmra.mxu3 %v285_v51  ;;  %v1757_v35 = vld [vmem:[%s2220_s1 + $0x2e8] sm:$0xff]  ;;  %v1748_v38 = vld [vmem:[%s2220_s1 + $0x2a0] sm:$0xff]  ;;  %v1739_v41 = vld [vmem:[%s2220_s1 + $0x258] sm:$0xff] }
  0x25   :  { %1096 = vmatpush.bf16.msrb.mxu3 %v1727_v43  ;;  %v1756_v39 = vld [vmem:[%s2220_s1 + $0x2e0] sm:$0xff]  ;;  %v1755_v43 = vld [vmem:[%s2220_s1 + $0x2d8] sm:$0xff]  ;;  %v1738_v45 = vld [vmem:[%s2220_s1 + $0x250] sm:$0xff] }
  0x26   :  { %1055 = vmatpush.bf16.msrb.mxu0 %v1702_v44  ;;  %v1730_v44 = vld [vmem:[%s2220_s1 + $0x210] sm:$0xff]  ;;  %v1737_v49 = vld [vmem:[%s2220_s1 + $0x248] sm:$0xff]  ;;  %v1779_v18 = vld [vmem:[%s2221_s2] ss:$0 sm:$0xff] }
  0x27   :  { %1069 = vmatpush.bf16.msrb.mxu1 %v1710_v47  ;;  %v1746_v46 = vld [vmem:[%s2220_s1 + $0x290] sm:$0xff]  ;;  %v1753_v51 = vld [vmem:[%s2220_s1 + $0x2c8] sm:$0xff] }
  0x28   :  { %1083 = vmatpush.bf16.msrb.mxu2 %v1718_v48  ;;  %v1754_v47 = vld [vmem:[%s2220_s1 + $0x2d0] sm:$0xff]  ;;  %v1729_v48 = vld [vmem:[%s2220_s1 + $0x208] sm:$0xff] }
  0x29   :  { %1097 = vmatpush.bf16.msrb.mxu3 %v1726_v50  ;;  %v1745_v50 = vld [vmem:[%s2220_s1 + $0x288] sm:$0xff] }
  0x2a   :  { %1056 = vmatpush.bf16.msrb.mxu0 %v1701_v52  ;;  %v1728_v52 = vld [vmem:[%s2220_s1 + $0x200] sm:$0xff]  ;;  %v1769_v9 = vld [vmem:[%s2220_s1 + $0x348] sm:$0xff] }
  0x2b   :  { %1070 = vmatpush.bf16.msrb.mxu1 %v1709_v53  ;;  %v1736_v53 = vld [vmem:[%s2220_s1 + $0x240] sm:$0xff] }
  0x2c   :  { %1084 = vmatpush.bf16.msrb.mxu2 %v1717_v54  ;;  %v1744_v54 = vld [vmem:[%s2220_s1 + $0x280] sm:$0xff] }
  0x2d   :  { %1098 = vmatpush.bf16.msrb.mxu3 %v1725_v55  ;;  %v1767_v55 = vld [vmem:[%s2220_s1 + $0x338] sm:$0xff]  ;;  %v310_v12 = vld [vmem:[#allocation1 + $0x24] sm:$0xff] }
  0x2e   :  { %1057 = vmatpush.bf16.msrb.mxu0 %v1700_v56  ;;  %v1775_v56 = vld [vmem:[%s2220_s1 + $0x378] sm:$0xff] }
  0x2f   :  { %1071 = vmatpush.bf16.msrb.mxu1 %v1708_v57  ;;  %v1752_v57 = vld [vmem:[%s2220_s1 + $0x2c0] sm:$0xff] }
  0x30   :  { %1085 = vmatpush.bf16.msrb.mxu2 %v1716_v58  ;;  %v306_v58 = vld [vmem:[#allocation1] sm:$0xff] }
  0x31   :  { %1099 = vmatpush.bf16.msrb.mxu3 %v1724_v59  ;;  %v308_v59 = vld [vmem:[#allocation1 + $0x12] sm:$0xff] }
  0x32   :  { %1058 = vmatpush.bf16.msrb.mxu0 %v1699_v60  ;;  %v307_v60 = vld [vmem:[#allocation1 + $0x9] sm:$0xff] }
  0x33   :  { %1072 = vmatpush.bf16.msrb.mxu1 %v1707_v61  ;;  %v1766_v61 = vld [vmem:[%s2220_s1 + $0x330] sm:$0xff] }
  0x34   :  { %1086 = vmatpush.bf16.msrb.mxu2 %v1715_v62  ;;  %v309_v62 = vld [vmem:[#allocation1 + $0x1b] sm:$0xff] }
  0x35   :  { %1100 = vmatpush.bf16.msrb.mxu3 %v1723_v63  ;;  %v1774_v63 = vld [vmem:[%s2220_s1 + $0x370] sm:$0xff] }
  0x36   :  { %1059 = vmatpush.bf16.msrb.mxu0 %v1698_v0  ;;  %v1765_v0 = vld [vmem:[%s2220_s1 + $0x328] sm:$0xff] }
  0x37   :  { %1073 = vmatpush.bf16.msrb.mxu1 %v1706_v1  ;;  %v1773_v1 = vld [vmem:[%s2220_s1 + $0x368] sm:$0xff] }
  0x38   :  { %1087 = vmatpush.bf16.msrb.mxu2 %v1714_v2  ;;  %v1764_v2 = vld [vmem:[%s2220_s1 + $0x320] sm:$0xff] }
  0x39   :  { %1101 = vmatpush.bf16.msrb.mxu3 %v1722_v3  ;;  %v1772_v3 = vld [vmem:[%s2220_s1 + $0x360] sm:$0xff] }
  0x3a   :  { %1060 = vmatpush.bf16.msrb.mxu0 %v1697_v4  ;;  %v1763_v4 = vld [vmem:[%s2220_s1 + $0x318] sm:$0xff] }
  0x3b   :  { %1074 = vmatpush.bf16.msrb.mxu1 %v1705_v5  ;;  %v1771_v5 = vld [vmem:[%s2220_s1 + $0x358] sm:$0xff] }
  0x3c   :  { %1088 = vmatpush.bf16.msrb.mxu2 %v1713_v6  ;;  %v1762_v6 = vld [vmem:[%s2220_s1 + $0x310] sm:$0xff] }
  0x3d   :  { %1102 = vmatpush.bf16.msrb.mxu3 %v1721_v7  ;;  %v1770_v7 = vld [vmem:[%s2220_s1 + $0x350] sm:$0xff] }
  0x3e   :  { %1061 = vmatpush.bf16.msrb.mxu0 %v1696_v8  ;;  %v1761_v8 = vld [vmem:[%s2220_s1 + $0x308] sm:$0xff] }
  0x3f   :  { %1075 = vmatpush.bf16.msrb.mxu1 %v1704_v16 }
  0x40   :  { %1089 = vmatpush.bf16.msrb.mxu2 %v1712_v17 }
  0x41   :  { %1103 = vmatpush.bf16.msrb.mxu3 %v1720_v23  ;;  %1062 = vmatmul.bf16.vlgmr.msrb.gmra.mxu0 %v286_v10  ;;  %v1760_v10 = vld [vmem:[%s2220_s1 + $0x300] sm:$0xff] }
  0x42   :  { %1110 = vmatpush.bf16.msra.mxu0 %v1735_v19  ;;  %1076 = vmatmul.bf16.vlgmr.msrb.gmra.mxu1 %v287_v13  ;;  %v311_v13 = vld [vmem:[#allocation1 + $0x2d] sm:$0xff] }
  0x43   :  { %1124 = vmatpush.bf16.msra.mxu1 %v1743_v20  ;;  %1090 = vmatmul.bf16.vlgmr.msrb.gmra.mxu2 %v288_v11  ;;  %v1768_v11 = vld [vmem:[%s2220_s1 + $0x340] sm:$0xff] }
  0x44   :  { %1138 = vmatpush.bf16.msra.mxu2 %v1751_v22  ;;  %1104 = vmatmul.bf16.vlgmr.msrb.gmra.mxu3 %v289_v14 }
  0x45   :  { %1152 = vmatpush.bf16.msra.mxu3 %v1759_v26 }
  0x46   :  { %1111 = vmatpush.bf16.msra.mxu0 %v1734_v28 }
  0x47   :  { %1125 = vmatpush.bf16.msra.mxu1 %v1742_v29 }
  0x48   :  { %1139 = vmatpush.bf16.msra.mxu2 %v1750_v30 }
  0x49   :  { %1153 = vmatpush.bf16.msra.mxu3 %v1758_v31 }
  0x4a   :  { %1112 = vmatpush.bf16.msra.mxu0 %v1733_v32 }
  0x4b   :  { %1126 = vmatpush.bf16.msra.mxu1 %v1741_v33 }
  0x4c   :  { %1140 = vmatpush.bf16.msra.mxu2 %v1749_v34 }
  0x4d   :  { %1154 = vmatpush.bf16.msra.mxu3 %v1757_v35 }
  0x4e   :  { %1113 = vmatpush.bf16.msra.mxu0 %v1732_v36 }
  0x4f   :  { %1127 = vmatpush.bf16.msra.mxu1 %v1740_v37 }
  0x50   :  { %1141 = vmatpush.bf16.msra.mxu2 %v1748_v38 }
  0x51   :  { %1155 = vmatpush.bf16.msra.mxu3 %v1756_v39 }
  0x52   :  { %1114 = vmatpush.bf16.msra.mxu0 %v1731_v40 }
  0x53   :  { %1128 = vmatpush.bf16.msra.mxu1 %v1739_v41 }
  0x54   :  { %1142 = vmatpush.bf16.msra.mxu2 %v1747_v42 }
  0x55   :  { %1156 = vmatpush.bf16.msra.mxu3 %v1755_v43 }
  0x56   :  { %1115 = vmatpush.bf16.msra.mxu0 %v1730_v44 }
  0x57   :  { %1129 = vmatpush.bf16.msra.mxu1 %v1738_v45 }
  0x58   :  { %1143 = vmatpush.bf16.msra.mxu2 %v1746_v46 }
  0x59   :  { %1157 = vmatpush.bf16.msra.mxu3 %v1754_v47 }
  0x5a   :  { %1116 = vmatpush.bf16.msra.mxu0 %v1729_v48 }
  0x5b   :  { %1130 = vmatpush.bf16.msra.mxu1 %v1737_v49 }
  0x5c   :  { %1144 = vmatpush.bf16.msra.mxu2 %v1745_v50 }
  0x5d   :  { %1158 = vmatpush.bf16.msra.mxu3 %v1753_v51 }
  0x5e   :  { %1117 = vmatpush.bf16.msra.mxu0 %v1728_v52 }
  0x5f   :  { %1131 = vmatpush.bf16.msra.mxu1 %v1736_v53 }
  0x60   :  { %1145 = vmatpush.bf16.msra.mxu2 %v1744_v54 }
  0x61   :  { %1159 = vmatpush.bf16.msra.mxu3 %v1752_v57  ;;  %1118 = vmatmul.bf16.vlgmr.msra.gmra.mxu0 %v306_v58 }
  0x62   :  { %1166 = vmatpush.bf16.msrb.mxu0 %v1767_v55  ;;  %1132 = vmatmul.bf16.vlgmr.msra.gmra.mxu1 %v307_v60 }
  0x63   :  { %1180 = vmatpush.bf16.msrb.mxu1 %v1775_v56  ;;  %1146 = vmatmul.bf16.vlgmr.msra.gmra.mxu2 %v308_v59 }
  0x64   :  { %1160 = vmatmul.bf16.vlgmr.msra.gmra.mxu3 %v309_v62 }
  0x66   :  { %1167 = vmatpush.bf16.msrb.mxu0 %v1766_v61 }
  0x67   :  { %1181 = vmatpush.bf16.msrb.mxu1 %v1774_v63 }
  0x6a   :  { %1168 = vmatpush.bf16.msrb.mxu0 %v1765_v0 }
  0x6b   :  { %1182 = vmatpush.bf16.msrb.mxu1 %v1773_v1 }
  0x6e   :  { %1169 = vmatpush.bf16.msrb.mxu0 %v1764_v2 }
  0x6f   :  { %1183 = vmatpush.bf16.msrb.mxu1 %v1772_v3 }
  0x72   :  { %1170 = vmatpush.bf16.msrb.mxu0 %v1763_v4 }
  0x73   :  { %1184 = vmatpush.bf16.msrb.mxu1 %v1771_v5 }
  0x76   :  { %1171 = vmatpush.bf16.msrb.mxu0 %v1762_v6 }
  0x77   :  { %1185 = vmatpush.bf16.msrb.mxu1 %v1770_v7 }
  0x7a   :  { %1172 = vmatpush.bf16.msrb.mxu0 %v1761_v8 }
  0x7b   :  { %1186 = vmatpush.bf16.msrb.mxu1 %v1769_v9 }
  0x7e   :  { %1173 = vmatpush.bf16.msrb.mxu0 %v1760_v10 }
  0x7f   :  { %1187 = vmatpush.bf16.msrb.mxu1 %v1768_v11 }
  0x81   :  { %1174 = vmatmul.bf16.vlgmr.msrb.gmra.mxu0 %v310_v12 }
  0x82   :  { %1188 = vmatmul.bf16.vlgmr.msrb.gmra.mxu1 %v311_v13 }
  0x9e   :  { %v1007_v14 = vpop.f32.mrf.mxu0 }
  0x9f   :  { %v1021_v15 = vpop.f32.mrf.mxu1  ;;  %v1008_v21 = vadd.f32 %v1779_v18, %v1007_v14 }
  0xa1   :  { %v1022_v23 = vadd.f32 %v1021_v15, %v1008_v21 }
  0xa6   :  { %v1035_v16 = vpop.f32.mrf.mxu2  ;;  %v1009_v17 = vpop.f32.mrf.mxu0 }
  0xa7   :  { %v1023_v19 = vpop.f32.mrf.mxu1  ;;  %v1049_v20 = vpop.f32.mrf.mxu3  ;;  %v1036_v27 = vadd.f32 %v1035_v16, %v1022_v23  ;;  %v1010_v28 = vadd.f32 %v1779_v18, %v1009_v17 }
  0xa9   :  { %v1050_v29 = vadd.f32 %v1049_v20, %v1036_v27  ;;  %v1024_v32 = vadd.f32 %v1023_v19, %v1010_v28 }
  0xae   :  { %v1037_v22 = vpop.f32.mrf.mxu2 }
  0xaf   :  { %v1051_v26 = vpop.f32.mrf.mxu3  ;;  %v1038_v36 = vadd.f32 %v1037_v22, %v1024_v32 }
  0xb1   :  { %v1052_v40 = vadd.f32 %v1051_v26, %v1038_v36 }
  0xbe   :  { %v1063_v24 = vpop.f32.mrf.mxu0 }
  0xbf   :  { %v1077_v25 = vpop.f32.mrf.mxu1  ;;  %v1064_v33 = vadd.f32 %v1063_v24, %v1050_v29 }
  0xc1   :  { %v1078_v37 = vadd.f32 %v1077_v25, %v1064_v33 }
  0xc6   :  { %v1091_v30 = vpop.f32.mrf.mxu2  ;;  %v1065_v31 = vpop.f32.mrf.mxu0 }
  0xc7   :  { %v1079_v34 = vpop.f32.mrf.mxu1  ;;  %v1105_v35 = vpop.f32.mrf.mxu3  ;;  %v1092_v41 = vadd.f32 %v1091_v30, %v1078_v37  ;;  %v1066_v43 = vadd.f32 %v1065_v31, %v1052_v40 }
  0xc9   :  { %v1106_v45 = vadd.f32 %v1105_v35, %v1092_v41  ;;  %v1080_v46 = vadd.f32 %v1079_v34, %v1066_v43 }
  0xce   :  { %v1093_v38 = vpop.f32.mrf.mxu2 }
  0xcf   :  { %v1107_v44 = vpop.f32.mrf.mxu3  ;;  %v1094_v49 = vadd.f32 %v1093_v38, %v1080_v46 }
  0xd1   :  { %v1108_v54 = vadd.f32 %v1107_v44, %v1094_v49 }
  0xde   :  { %v1119_v39 = vpop.f32.mrf.mxu0 }
  0xdf   :  { %v1133_v42 = vpop.f32.mrf.mxu1  ;;  %v1120_v47 = vadd.f32 %v1119_v39, %v1106_v45 }
  0xe1   :  { %v1134_v51 = vadd.f32 %v1133_v42, %v1120_v47 }
  0xe6   :  { %v1147_v48 = vpop.f32.mrf.mxu2  ;;  %v1121_v50 = vpop.f32.mrf.mxu0 }
  0xe7   :  { %v1135_v52 = vpop.f32.mrf.mxu1  ;;  %v1161_v53 = vpop.f32.mrf.mxu3  ;;  %v1148_v55 = vadd.f32 %v1147_v48, %v1134_v51  ;;  %v1122_v56 = vadd.f32 %v1121_v50, %v1108_v54 }
  0xe9   :  { %v1162_v57 = vadd.f32 %v1161_v53, %v1148_v55  ;;  %v1136_v60 = vadd.f32 %v1135_v52, %v1122_v56 }
  0xee   :  { %v1149_v58 = vpop.f32.mrf.mxu2 }
  0xef   :  { %v1150_v63 = vadd.f32 %v1149_v58, %v1136_v60  ;;  %v1163_v1 = vpop.f32.mrf.mxu3 }
  0xf1   :  { %v1164_v3 = vadd.f32 %v1163_v1, %v1150_v63 }
  0xfe   :  { %v1175_v59 = vpop.f32.mrf.mxu0 }
  0xff   :  { %v1176_v61 = vadd.f32 %v1175_v59, %v1162_v57  ;;  %v1189_v62 = vpop.f32.mrf.mxu1 }
 0x101   :  { %v1190_v0 = vadd.f32 %v1189_v62, %v1176_v61 }
 0x103   :  { %v1194_v2 = vmax.f32 %v1190_v0, 0.0 }
 0x105   :  { %1196 = vst [vmem:[#allocation2] sm:$0xff] %v1194_v2 }
 0x106   :  { %v1177_v4 = vpop.f32.mrf.mxu0 }
 0x107   :  { %v1178_v5 = vadd.f32 %v1177_v4, %v1164_v3  ;;  %v1191_v6 = vpop.f32.mrf.mxu1 }
 0x109   :  { %v1192_v7 = vadd.f32 %v1191_v6, %v1178_v5 }
 0x10b   :  { %v1195_v8 = vmax.f32 %v1192_v7, 0.0 }
 0x10d   :  { %1197 = vst [vmem:[#allocation2 + $0x8] sm:$0xff] %v1195_v8 }
 0x10e   :  { %1201 = vsyncadd [#allocation3], 224  ;;  %s1204_s0 = sshll.u32 %s2222_s3, 4  ;;  %s1806_s24 = smov [#allocation2]   ;;  %s1205_s0 = int_to_ptr.hbm [resolvable:$true] %s1204_s0 }
 0x10f   :  { %s1202_s25 = sshll.u32 %s1806_s24, 4  ;;  %s1807_s26 = smov 32   ;;  %s1203_s25 = int_to_ptr.vmem [resolvable:$true] %s1202_s25 }
 0x110   :  { %s1808_s27 = smov 2  }
 0x111   :  { %1210 = dma.vmem_to_hbm [thread:$0]  %s1203_s25, 32, %s1205_s0, [#allocation3], %s1807_s26, %s1807_s26, %s1808_s27  }
 0x112   :  { %1804 = dma.done.wait [#allocation3], 256  }
 0x113   :  { %1805 = vsyncadd [#allocation3], 4294967040 }
 0x114   :  { %1215 = vsyncpa [#allocation3], 1 }

// kernel: _lambda_.4
= control target key start
LH: loop header
LB: loop body
LE: loop exit
PB: predicated region body
PF: predicated region fallthrough
CT: control target
= control target key end

     0   :  { %s15007_s0 = inlined_call_operand.vmem [shape: bf16[54,8064], index: 0, kind: input, shape index: {}]   ;;  %s15008_s1 = inlined_call_operand.vmem [shape: bf16[8064,128], index: 1, kind: input, shape index: {}]   ;;  %s15009_s2 = inlined_call_operand.vmem [shape: f32[1,128], index: 2, kind: input, shape index: {}]   ;;  %s15010_s3 = inlined_call_operand.vmem [shape: bf16[54,128], index: 3, kind: output, shape index: {}]  }
   0x1   :  { %v10777_v0 = vld [vmem:[%s15008_s1 + $0x38] sm:$0xff]  ;;  %v10776_v3 = vld [vmem:[%s15008_s1 + $0x30] sm:$0xff]  ;;  %v10775_v6 = vld [vmem:[%s15008_s1 + $0x28] sm:$0xff] }
   0x2   :  { %v10785_v1 = vld [vmem:[%s15008_s1 + $0x78] sm:$0xff]  ;;  %5570 = vmatpush.bf16.msra.mxu0 %v10777_v0  ;;  %11297 = vmatpush.bf16.msra.mxu3 %v10777_v0  ;;  %v10784_v4 = vld [vmem:[%s15008_s1 + $0x70] sm:$0xff]  ;;  %v10783_v7 = vld [vmem:[%s15008_s1 + $0x68] sm:$0xff] }
   0x3   :  { %v10793_v2 = vld [vmem:[%s15008_s1 + $0xb8] sm:$0xff]  ;;  %5599 = vmatpush.bf16.msra.mxu1 %v10785_v1  ;;  %v10792_v5 = vld [vmem:[%s15008_s1 + $0xb0] sm:$0xff]  ;;  %v10791_v8 = vld [vmem:[%s15008_s1 + $0xa8] sm:$0xff] }
   0x4   :  { %5628 = vmatpush.bf16.msra.mxu2 %v10793_v2  ;;  %v10774_v9 = vld [vmem:[%s15008_s1 + $0x20] sm:$0xff]  ;;  %v10773_v12 = vld [vmem:[%s15008_s1 + $0x18] sm:$0xff]  ;;  %v10772_v15 = vld [vmem:[%s15008_s1 + $0x10] sm:$0xff] }
   0x5   :  { %v10782_v10 = vld [vmem:[%s15008_s1 + $0x60] sm:$0xff]  ;;  %v10781_v13 = vld [vmem:[%s15008_s1 + $0x58] sm:$0xff]  ;;  %v10780_v16 = vld [vmem:[%s15008_s1 + $0x50] sm:$0xff] }
   0x6   :  { %5571 = vmatpush.bf16.msra.mxu0 %v10776_v3  ;;  %11298 = vmatpush.bf16.msra.mxu3 %v10776_v3  ;;  %v10790_v11 = vld [vmem:[%s15008_s1 + $0xa0] sm:$0xff]  ;;  %v10789_v14 = vld [vmem:[%s15008_s1 + $0x98] sm:$0xff]  ;;  %v10788_v17 = vld [vmem:[%s15008_s1 + $0x90] sm:$0xff] }
   0x7   :  { %5600 = vmatpush.bf16.msra.mxu1 %v10784_v4  ;;  %v10771_v18 = vld [vmem:[%s15008_s1 + $0x8] sm:$0xff]  ;;  %v10770_v21 = vld [vmem:[%s15008_s1] sm:$0xff]  ;;  %v10549_v25 = vld [vmem:[%s15007_s0 + $0xf8] sm:$0xf0] }
   0x8   :  { %5629 = vmatpush.bf16.msra.mxu2 %v10792_v5  ;;  %v10779_v19 = vld [vmem:[%s15008_s1 + $0x48] sm:$0xff]  ;;  %v10778_v22 = vld [vmem:[%s15008_s1 + $0x40] sm:$0xff]  ;;  %v8000_v26 = vld [vmem:[%s15007_s0 + $0x3f0] sm:$0xf] }
   0x9   :  { %v10787_v20 = vld [vmem:[%s15008_s1 + $0x88] sm:$0xff]  ;;  %v10786_v23 = vld [vmem:[%s15008_s1 + $0x80] sm:$0xff]  ;;  %v10801_v32 = vld [vmem:[%s15008_s1 + $0xf8] sm:$0xff] }
   0xa   :  { %5572 = vmatpush.bf16.msra.mxu0 %v10775_v6  ;;  %11299 = vmatpush.bf16.msra.mxu3 %v10775_v6  ;;  %v7496_v24 = vld [vmem:[%s15007_s0] sm:$0xf]  ;;  %v10675_v27 = vld [vmem:[%s15007_s0 + $0x4e8] sm:$0xf0]  ;;  %v10518_v28 = vld [vmem:[%s15007_s0 + $0x4] sm:$0xf] }
   0xb   :  { %5601 = vmatpush.bf16.msra.mxu1 %v10783_v7  ;;  %v7498_v29 = vld [vmem:[%s15007_s0 + $0xfc] sm:$0xf0]  ;;  %v7504_v30 = vld [vmem:[%s15007_s0 + $0x8] sm:$0xf]  ;;  %v10550_v31 = vld [vmem:[%s15007_s0 + $0x100] sm:$0xf0]  ;;  %v7497_v34 = vor.u32 %v10549_v25, %v7496_v24  ;;  %v8001_v35 = vor.u32 %v10675_v27, %v8000_v26 }
   0xc   :  { %5630 = vmatpush.bf16.msra.mxu2 %v10791_v8  ;;  %v10825_v33 = vld [vmem:[%s15008_s1 + $0x1b8] sm:$0xff]  ;;  %v7501_v36 = vor.u32 %v10518_v28, %v7498_v29  ;;  %v7505_v37 = vor.u32 %v10550_v31, %v7504_v30  ;;  %v10800_v40 = vld [vmem:[%s15008_s1 + $0xf0] sm:$0xff]  ;;  %v10799_v44 = vld [vmem:[%s15008_s1 + $0xe8] sm:$0xff] }
   0xd   :  { %v10809_v38 = vld [vmem:[%s15008_s1 + $0x138] sm:$0xff]  ;;  %v10824_v41 = vld [vmem:[%s15008_s1 + $0x1b0] sm:$0xff]  ;;  %v10823_v45 = vld [vmem:[%s15008_s1 + $0x1a8] sm:$0xff] }
   0xe   :  { %5573 = vmatpush.bf16.msra.mxu0 %v10774_v9  ;;  %11300 = vmatpush.bf16.msra.mxu3 %v10774_v9  ;;  %v10817_v39 = vld [vmem:[%s15008_s1 + $0x178] sm:$0xff]  ;;  %v10808_v42 = vld [vmem:[%s15008_s1 + $0x130] sm:$0xff]  ;;  %v10807_v46 = vld [vmem:[%s15008_s1 + $0x128] sm:$0xff] }
   0xf   :  { %5602 = vmatpush.bf16.msra.mxu1 %v10782_v10  ;;  %v10816_v43 = vld [vmem:[%s15008_s1 + $0x170] sm:$0xff]  ;;  %v10815_v47 = vld [vmem:[%s15008_s1 + $0x168] sm:$0xff]  ;;  %v10798_v48 = vld [vmem:[%s15008_s1 + $0xe0] sm:$0xff] }
  0x10   :  { %5631 = vmatpush.bf16.msra.mxu2 %v10790_v11  ;;  %v10822_v49 = vld [vmem:[%s15008_s1 + $0x1a0] sm:$0xff]  ;;  %v7748_v51 = vld [vmem:[%s15007_s0 + $0x1f8] sm:$0xf]  ;;  %v10612_v52 = vld [vmem:[%s15007_s0 + $0x2f0] sm:$0xf0] }
  0x11   :  { %v10806_v50 = vld [vmem:[%s15008_s1 + $0x120] sm:$0xff]  ;;  %v8252_v53 = vld [vmem:[%s15007_s0 + $0x5e8] sm:$0xf]  ;;  %v10581_v55 = vld [vmem:[%s15007_s0 + $0x1fc] sm:$0xf]  ;;  %v7749_v62 = vor.u32 %v10612_v52, %v7748_v51 }
  0x12   :  { %5574 = vmatpush.bf16.msra.mxu0 %v10773_v12  ;;  %11301 = vmatpush.bf16.msra.mxu3 %v10773_v12  ;;  %v10738_v54 = vld [vmem:[%s15007_s0 + $0x6e0] sm:$0xf0]  ;;  %v7750_v56 = vld [vmem:[%s15007_s0 + $0x2f4] sm:$0xf0]  ;;  %v7756_v57 = vld [vmem:[%s15007_s0 + $0x200] sm:$0xf] }
  0x13   :  { %5603 = vmatpush.bf16.msra.mxu1 %v10781_v13  ;;  %v10613_v58 = vld [vmem:[%s15007_s0 + $0x2f8] sm:$0xf0]  ;;  %v10814_v59 = vld [vmem:[%s15008_s1 + $0x160] sm:$0xff]  ;;  %v8253_v63 = vor.u32 %v10738_v54, %v8252_v53  ;;  %v7753_v0 = vor.u32 %v10581_v55, %v7750_v56  ;;  %v10796_v4 = vld [vmem:[%s15008_s1 + $0xd0] sm:$0xff] }
  0x14   :  { %5632 = vmatpush.bf16.msra.mxu2 %v10789_v14  ;;  %v10797_v60 = vld [vmem:[%s15008_s1 + $0xd8] sm:$0xff]  ;;  %v7757_v1 = vor.u32 %v10613_v58, %v7756_v57  ;;  %v10820_v5 = vld [vmem:[%s15008_s1 + $0x190] sm:$0xff]  ;;  %v10795_v8 = vld [vmem:[%s15008_s1 + $0xc8] sm:$0xff] }
  0x15   :  { %v10821_v61 = vld [vmem:[%s15008_s1 + $0x198] sm:$0xff]  ;;  %v10804_v6 = vld [vmem:[%s15008_s1 + $0x110] sm:$0xff]  ;;  %v10819_v9 = vld [vmem:[%s15008_s1 + $0x188] sm:$0xff] }
  0x16   :  { %5575 = vmatpush.bf16.msra.mxu0 %v10772_v15  ;;  %11302 = vmatpush.bf16.msra.mxu3 %v10772_v15  ;;  %v10805_v2 = vld [vmem:[%s15008_s1 + $0x118] sm:$0xff]  ;;  %v10812_v7 = vld [vmem:[%s15008_s1 + $0x150] sm:$0xff]  ;;  %v10803_v10 = vld [vmem:[%s15008_s1 + $0x108] sm:$0xff] }
  0x17   :  { %5604 = vmatpush.bf16.msra.mxu1 %v10780_v16  ;;  %v10813_v3 = vld [vmem:[%s15008_s1 + $0x158] sm:$0xff]  ;;  %v10811_v11 = vld [vmem:[%s15008_s1 + $0x148] sm:$0xff]  ;;  %v10794_v12 = vld [vmem:[%s15008_s1 + $0xc0] sm:$0xff] }
  0x18   :  { %5633 = vmatpush.bf16.msra.mxu2 %v10788_v17  ;;  %v10818_v13 = vld [vmem:[%s15008_s1 + $0x180] sm:$0xff]  ;;  %v10644_v15 = vld [vmem:[%s15007_s0 + $0x3f4] sm:$0xf]  ;;  %v10833_v16 = vld [vmem:[%s15008_s1 + $0x1f8] sm:$0xff] }
  0x19   :  { %v10802_v14 = vld [vmem:[%s15008_s1 + $0x100] sm:$0xff]  ;;  %v8002_v17 = vld [vmem:[%s15007_s0 + $0x4ec] sm:$0xf0]  ;;  %v10551_v24 = vld [vmem:[%s15007_s0 + $0x108] sm:$0xf0] }
  0x1a   :  { %5576 = vmatpush.bf16.msra.mxu0 %v10771_v18  ;;  %11303 = vmatpush.bf16.msra.mxu3 %v10771_v18  ;;  %v10519_v18 = vld [vmem:[%s15007_s0 + $0xc] sm:$0xf]  ;;  %v10841_v25 = vld [vmem:[%s15008_s1 + $0x238] sm:$0xff]  ;;  %v8005_v27 = vor.u32 %v10644_v15, %v8002_v17  ;;  %v10832_v30 = vld [vmem:[%s15008_s1 + $0x1f0] sm:$0xff] }
  0x1b   :  { %5605 = vmatpush.bf16.msra.mxu1 %v10779_v19  ;;  %v7506_v19 = vld [vmem:[%s15007_s0 + $0x104] sm:$0xf0]  ;;  %v10840_v31 = vld [vmem:[%s15008_s1 + $0x230] sm:$0xff]  ;;  %v10873_v15 = vld [vmem:[%s15008_s1 + $0x338] sm:$0xff] }
  0x1c   :  { %5634 = vmatpush.bf16.msra.mxu2 %v10787_v20  ;;  %v8008_v20 = vld [vmem:[%s15007_s0 + $0x3f8] sm:$0xf]  ;;  %v7509_v26 = vor.u32 %v10519_v18, %v7506_v19  ;;  %v10828_v54 = vld [vmem:[%s15008_s1 + $0x1d0] sm:$0xff]  ;;  %v10827_v56 = vld [vmem:[%s15008_s1 + $0x1c8] sm:$0xff] }
  0x1d   :  { %v10836_v55 = vld [vmem:[%s15008_s1 + $0x210] sm:$0xff]  ;;  %v10855_v57 = vld [vmem:[%s15008_s1 + $0x2a8] sm:$0xff] }
  0x1e   :  { %5577 = vmatpush.bf16.msra.mxu0 %v10770_v21  ;;  %11304 = vmatpush.bf16.msra.mxu3 %v10770_v21  ;;  %v10676_v21 = vld [vmem:[%s15007_s0 + $0x4f0] sm:$0xf0]  ;;  %v10835_v58 = vld [vmem:[%s15008_s1 + $0x208] sm:$0xff] }
  0x1f   :  { %5606 = vmatpush.bf16.msra.mxu1 %v10778_v22  ;;  %v10810_v22 = vld [vmem:[%s15008_s1 + $0x140] sm:$0xff]  ;;  %v8009_v28 = vor.u32 %v10676_v21, %v8008_v20  ;;  %v10864_v17 = vld [vmem:[%s15008_s1 + $0x2f0] sm:$0xff] }
  0x20   :  { %5635 = vmatpush.bf16.msra.mxu2 %v10786_v23  ;;  %v7512_v23 = vld [vmem:[%s15007_s0 + $0x10] sm:$0xf]  ;;  %v10708_v20 = vld [vmem:[%s15007_s0 + $0x5f4] sm:$0xf] }
  0x21   :  { %5578 = vmatmul.bf16.vlgmr.msra.gmra.mxu0 %v7497_v34  ;;  %5588 = vmatmul.bf16.vlgmr.msra.gmra.mxu3 %v8001_v35  ;;  %v7513_v29 = vor.u32 %v10551_v24, %v7512_v23  ;;  %v10839_v34 = vld [vmem:[%s15008_s1 + $0x228] sm:$0xff]  ;;  %v10849_v35 = vld [vmem:[%s15008_s1 + $0x278] sm:$0xff]  ;;  %v10844_v18 = vld [vmem:[%s15008_s1 + $0x250] sm:$0xff] }
  0x22   :  { %5657 = vmatpush.bf16.msrb.mxu3 %v10801_v32  ;;  %5607 = vmatmul.bf16.vlgmr.msra.gmra.mxu1 %v7501_v36  ;;  %v10831_v32 = vld [vmem:[%s15008_s1 + $0x1e8] sm:$0xff]  ;;  %v10856_v36 = vld [vmem:[%s15008_s1 + $0x2b0] sm:$0xff] }
  0x23   :  { %5636 = vmatmul.bf16.vlgmr.msra.gmra.mxu2 %v7505_v37  ;;  %5686 = vmatpush.bf16.msrb.mxu0 %v10809_v38  ;;  %v10848_v37 = vld [vmem:[%s15008_s1 + $0x270] sm:$0xff]  ;;  %v10830_v38 = vld [vmem:[%s15008_s1 + $0x1e0] sm:$0xff]  ;;  %v7766_v23 = vld [vmem:[%s15007_s0 + $0x304] sm:$0xf0] }
  0x24   :  { %5744 = vmatpush.bf16.msrb.mxu2 %v10825_v33  ;;  %5715 = vmatpush.bf16.msrb.mxu1 %v10817_v39  ;;  %v10857_v33 = vld [vmem:[%s15008_s1 + $0x2b8] sm:$0xff]  ;;  %v10838_v39 = vld [vmem:[%s15008_s1 + $0x220] sm:$0xff]  ;;  %v10872_v19 = vld [vmem:[%s15008_s1 + $0x330] sm:$0xff] }
  0x25   :  { %v8262_v21 = vld [vmem:[%s15007_s0 + $0x6ec] sm:$0xf0] }
  0x26   :  { %5658 = vmatpush.bf16.msrb.mxu3 %v10800_v40  ;;  %v10707_v40 = vld [vmem:[%s15007_s0 + $0x5ec] sm:$0xf]  ;;  %v7772_v24 = vld [vmem:[%s15007_s0 + $0x210] sm:$0xf] }
  0x27   :  { %5687 = vmatpush.bf16.msrb.mxu0 %v10808_v42  ;;  %v10582_v42 = vld [vmem:[%s15007_s0 + $0x204] sm:$0xf] }
  0x28   :  { %5745 = vmatpush.bf16.msrb.mxu2 %v10824_v41  ;;  %5716 = vmatpush.bf16.msrb.mxu1 %v10816_v43  ;;  %v8254_v41 = vld [vmem:[%s15007_s0 + $0x6e4] sm:$0xf0]  ;;  %v7758_v43 = vld [vmem:[%s15007_s0 + $0x2fc] sm:$0xf0] }
  0x29   :  { %v8257_v51 = vor.u32 %v10707_v40, %v8254_v41  ;;  %v10646_v40 = vld [vmem:[%s15007_s0 + $0x404] sm:$0xf]  ;;  %v10521_v41 = vld [vmem:[%s15007_s0 + $0x1c] sm:$0xf] }
  0x2a   :  { %5659 = vmatpush.bf16.msrb.mxu3 %v10799_v44  ;;  %v8260_v44 = vld [vmem:[%s15007_s0 + $0x5f0] sm:$0xf] }
  0x2b   :  { %5688 = vmatpush.bf16.msrb.mxu0 %v10807_v46  ;;  %v10829_v46 = vld [vmem:[%s15008_s1 + $0x1d8] sm:$0xff] }
  0x2c   :  { %5746 = vmatpush.bf16.msrb.mxu2 %v10823_v45  ;;  %5717 = vmatpush.bf16.msrb.mxu1 %v10815_v47  ;;  %v10739_v45 = vld [vmem:[%s15007_s0 + $0x6e8] sm:$0xf0]  ;;  %v7764_v47 = vld [vmem:[%s15007_s0 + $0x208] sm:$0xf] }
  0x2d   :  { %v8261_v52 = vor.u32 %v10739_v45, %v8260_v44  ;;  %v8024_v44 = vld [vmem:[%s15007_s0 + $0x408] sm:$0xf]  ;;  %v10678_v45 = vld [vmem:[%s15007_s0 + $0x500] sm:$0xf0] }
  0x2e   :  { %5660 = vmatpush.bf16.msrb.mxu3 %v10798_v48  ;;  %v10614_v48 = vld [vmem:[%s15007_s0 + $0x300] sm:$0xf0] }
  0x2f   :  { %5689 = vmatpush.bf16.msrb.mxu0 %v10806_v50  ;;  %v7761_v50 = vor.u32 %v10582_v42, %v7758_v43  ;;  %v7765_v53 = vor.u32 %v10614_v48, %v7764_v47  ;;  %v7522_v42 = vld [vmem:[%s15007_s0 + $0x114] sm:$0xf0]  ;;  %v8018_v43 = vld [vmem:[%s15007_s0 + $0x4fc] sm:$0xf0]  ;;  %v10553_v47 = vld [vmem:[%s15007_s0 + $0x118] sm:$0xf0] }
  0x30   :  { %5747 = vmatpush.bf16.msrb.mxu2 %v10822_v49  ;;  %5718 = vmatpush.bf16.msrb.mxu1 %v10814_v59  ;;  %v10837_v49 = vld [vmem:[%s15008_s1 + $0x218] sm:$0xff]  ;;  %v10847_v59 = vld [vmem:[%s15008_s1 + $0x268] sm:$0xff]  ;;  %v7525_v48 = vor.u32 %v10521_v41, %v7522_v42 }
  0x31   :  { %5583 = vmatmul.bf16.gmra.mxu0 %v7749_v62  ;;  %5593 = vmatmul.bf16.gmra.mxu3 %v8253_v63  ;;  %v10826_v62 = vld [vmem:[%s15008_s1 + $0x1c0] sm:$0xff]  ;;  %v10877_v41 = vld [vmem:[%s15008_s1 + $0x358] sm:$0xff] }
  0x32   :  { %5661 = vmatpush.bf16.msrb.mxu3 %v10797_v60  ;;  %5612 = vmatmul.bf16.gmra.mxu1 %v7753_v0  ;;  %v10854_v60 = vld [vmem:[%s15008_s1 + $0x2a0] sm:$0xff]  ;;  %v10645_v0 = vld [vmem:[%s15007_s0 + $0x3fc] sm:$0xf] }
  0x33   :  { %5641 = vmatmul.bf16.gmra.mxu2 %v7757_v1  ;;  %5690 = vmatpush.bf16.msrb.mxu0 %v10805_v2  ;;  %v10834_v63 = vld [vmem:[%s15008_s1 + $0x200] sm:$0xff]  ;;  %v8010_v1 = vld [vmem:[%s15007_s0 + $0x4f4] sm:$0xf0]  ;;  %v10520_v2 = vld [vmem:[%s15007_s0 + $0x14] sm:$0xf] }
  0x34   :  { %5748 = vmatpush.bf16.msrb.mxu2 %v10821_v61  ;;  %5719 = vmatpush.bf16.msrb.mxu1 %v10813_v3  ;;  %v10846_v61 = vld [vmem:[%s15008_s1 + $0x260] sm:$0xff]  ;;  %v7514_v3 = vld [vmem:[%s15007_s0 + $0x10c] sm:$0xf0]  ;;  %v10905_v42 = vld [vmem:[%s15008_s1 + $0x438] sm:$0xff] }
  0x36   :  { %5662 = vmatpush.bf16.msrb.mxu3 %v10796_v4  ;;  %v7520_v4 = vld [vmem:[%s15007_s0 + $0x18] sm:$0xf] }
  0x37   :  { %5691 = vmatpush.bf16.msrb.mxu0 %v10804_v6  ;;  %v8016_v6 = vld [vmem:[%s15007_s0 + $0x400] sm:$0xf] }
  0x38   :  { %5749 = vmatpush.bf16.msrb.mxu2 %v10820_v5  ;;  %5720 = vmatpush.bf16.msrb.mxu1 %v10812_v7  ;;  %v10552_v5 = vld [vmem:[%s15007_s0 + $0x110] sm:$0xf0]  ;;  %v10677_v7 = vld [vmem:[%s15007_s0 + $0x4f8] sm:$0xf0] }
  0x3a   :  { %5663 = vmatpush.bf16.msrb.mxu3 %v10795_v8  ;;  %v8013_v8 = vor.u32 %v10645_v0, %v8010_v1  ;;  %v7780_v0 = vld [vmem:[%s15007_s0 + $0x218] sm:$0xf]  ;;  %v10616_v1 = vld [vmem:[%s15007_s0 + $0x310] sm:$0xf0] }
  0x3b   :  { %5692 = vmatpush.bf16.msrb.mxu0 %v10803_v10  ;;  %v7521_v10 = vor.u32 %v10552_v5, %v7520_v4  ;;  %v10868_v5 = vld [vmem:[%s15008_s1 + $0x310] sm:$0xff] }
  0x3c   :  { %5750 = vmatpush.bf16.msrb.mxu2 %v10819_v9  ;;  %5721 = vmatpush.bf16.msrb.mxu1 %v10811_v11  ;;  %v7517_v9 = vor.u32 %v10520_v2, %v7514_v3  ;;  %v8017_v11 = vor.u32 %v10677_v7, %v8016_v6  ;;  %v10880_v6 = vld [vmem:[%s15008_s1 + $0x370] sm:$0xff]  ;;  %v7781_v7 = vor.u32 %v10616_v1, %v7780_v0 }
  0x3d   :  { %v10876_v0 = vld [vmem:[%s15008_s1 + $0x350] sm:$0xff] }
  0x3e   :  { %5664 = vmatpush.bf16.msrb.mxu3 %v10794_v12  ;;  %v10853_v12 = vld [vmem:[%s15008_s1 + $0x298] sm:$0xff]  ;;  %v10904_v1 = vld [vmem:[%s15008_s1 + $0x430] sm:$0xff] }
  0x3f   :  { %5693 = vmatpush.bf16.msrb.mxu0 %v10802_v14  ;;  %v10845_v14 = vld [vmem:[%s15008_s1 + $0x258] sm:$0xff] }
  0x40   :  { %5751 = vmatpush.bf16.msrb.mxu2 %v10818_v13  ;;  %5722 = vmatpush.bf16.msrb.mxu1 %v10810_v22  ;;  %v10865_v13 = vld [vmem:[%s15008_s1 + $0x2f8] sm:$0xff]  ;;  %v10583_v22 = vld [vmem:[%s15007_s0 + $0x20c] sm:$0xf] }
  0x41   :  { %5665 = vmatmul.bf16.vlgmr.msrb.gmra.mxu3 %v7509_v26  ;;  %v8268_v26 = vld [vmem:[%s15007_s0 + $0x5f8] sm:$0xf] }
  0x42   :  { %5773 = vmatpush.bf16.msra.mxu3 %v10833_v16  ;;  %5617 = vmatmul.bf16.gmra.mxu1 %v8005_v27  ;;  %v10852_v16 = vld [vmem:[%s15008_s1 + $0x290] sm:$0xff] }
  0x43   :  { %5802 = vmatpush.bf16.msra.mxu0 %v10841_v25  ;;  %5646 = vmatmul.bf16.gmra.mxu2 %v8009_v28  ;;  %v10615_v25 = vld [vmem:[%s15007_s0 + $0x308] sm:$0xf0]  ;;  %v10740_v27 = vld [vmem:[%s15007_s0 + $0x6f0] sm:$0xf0]  ;;  %v8265_v28 = vor.u32 %v10708_v20, %v8262_v21  ;;  %v10554_v20 = vld [vmem:[%s15007_s0 + $0x120] sm:$0xf0] }
  0x44   :  { %5694 = vmatmul.bf16.vlgmr.msrb.gmra.mxu0 %v7513_v29  ;;  %5860 = vmatpush.bf16.msra.mxu2 %v10857_v33  ;;  %v7769_v29 = vor.u32 %v10583_v22, %v7766_v23  ;;  %v10863_v33 = vld [vmem:[%s15008_s1 + $0x2e8] sm:$0xff]  ;;  %v8032_v21 = vld [vmem:[%s15007_s0 + $0x410] sm:$0xf] }
  0x45   :  { %5831 = vmatpush.bf16.msra.mxu1 %v10849_v35  ;;  %v10871_v35 = vld [vmem:[%s15008_s1 + $0x328] sm:$0xff] }
  0x46   :  { %5774 = vmatpush.bf16.msra.mxu3 %v10832_v30  ;;  %v7773_v30 = vor.u32 %v10615_v25, %v7772_v24  ;;  %v10679_v22 = vld [vmem:[%s15007_s0 + $0x508] sm:$0xf0] }
  0x47   :  { %5803 = vmatpush.bf16.msra.mxu0 %v10840_v31  ;;  %v8269_v31 = vor.u32 %v10740_v27, %v8268_v26  ;;  %v10866_v27 = vld [vmem:[%s15008_s1 + $0x300] sm:$0xff] }
  0x48   :  { %5861 = vmatpush.bf16.msra.mxu2 %v10856_v36  ;;  %v10850_v36 = vld [vmem:[%s15008_s1 + $0x280] sm:$0xff] }
  0x49   :  { %5832 = vmatpush.bf16.msra.mxu1 %v10848_v37  ;;  %v10862_v37 = vld [vmem:[%s15008_s1 + $0x2e0] sm:$0xff] }
  0x4a   :  { %5775 = vmatpush.bf16.msra.mxu3 %v10831_v32  ;;  %v10851_v32 = vld [vmem:[%s15008_s1 + $0x288] sm:$0xff] }
  0x4b   :  { %5804 = vmatpush.bf16.msra.mxu0 %v10839_v34  ;;  %v10843_v34 = vld [vmem:[%s15008_s1 + $0x248] sm:$0xff] }
  0x4c   :  { %5862 = vmatpush.bf16.msra.mxu2 %v10855_v57  ;;  %v10888_v57 = vld [vmem:[%s15008_s1 + $0x3b0] sm:$0xff] }
  0x4d   :  { %5833 = vmatpush.bf16.msra.mxu1 %v10847_v59  ;;  %v10584_v59 = vld [vmem:[%s15007_s0 + $0x214] sm:$0xf] }
  0x4e   :  { %5776 = vmatpush.bf16.msra.mxu3 %v10830_v38  ;;  %v10842_v38 = vld [vmem:[%s15008_s1 + $0x240] sm:$0xff] }
  0x4f   :  { %5805 = vmatpush.bf16.msra.mxu0 %v10838_v39  ;;  %v10870_v39 = vld [vmem:[%s15008_s1 + $0x320] sm:$0xff] }
  0x50   :  { %5863 = vmatpush.bf16.msra.mxu2 %v10854_v60  ;;  %v7774_v60 = vld [vmem:[%s15007_s0 + $0x30c] sm:$0xf0] }
  0x51   :  { %5670 = vmatmul.bf16.gmra.mxu3 %v7761_v50  ;;  %5834 = vmatpush.bf16.msra.mxu1 %v10846_v61  ;;  %v8025_v50 = vor.u32 %v10678_v45, %v8024_v44  ;;  %v8270_v61 = vld [vmem:[%s15007_s0 + $0x6f4] sm:$0xf0]  ;;  %v7777_v2 = vor.u32 %v10584_v59, %v7774_v60  ;;  %v10896_v44 = vld [vmem:[%s15008_s1 + $0x3f0] sm:$0xff] }
  0x52   :  { %5777 = vmatpush.bf16.msra.mxu3 %v10829_v46  ;;  %5622 = vmatmul.bf16.gmra.mxu1 %v8257_v51  ;;  %v7528_v46 = vld [vmem:[%s15007_s0 + $0x20] sm:$0xf] }
  0x53   :  { %5806 = vmatpush.bf16.msra.mxu0 %v10837_v49  ;;  %5651 = vmatmul.bf16.gmra.mxu2 %v8261_v52  ;;  %v8021_v49 = vor.u32 %v10646_v40, %v8018_v43  ;;  %v7529_v51 = vor.u32 %v10553_v47, %v7528_v46  ;;  %v10861_v52 = vld [vmem:[%s15008_s1 + $0x2d8] sm:$0xff]  ;;  %v10884_v43 = vld [vmem:[%s15008_s1 + $0x390] sm:$0xff]  ;;  %v10710_v46 = vld [vmem:[%s15007_s0 + $0x604] sm:$0xf] }
  0x54   :  { %5699 = vmatmul.bf16.gmra.mxu0 %v7765_v53  ;;  %5864 = vmatpush.bf16.msra.mxu2 %v10853_v12  ;;  %v10889_v53 = vld [vmem:[%s15008_s1 + $0x3b8] sm:$0xff]  ;;  %v11861_v12 = vld [vmem:[%s15009_s2] ss:$0 sm:$0xff] }
  0x55   :  { %5835 = vmatpush.bf16.msra.mxu1 %v10845_v14  ;;  %v10886_v14 = vld [vmem:[%s15008_s1 + $0x3a0] sm:$0xff] }
  0x56   :  { %5778 = vmatpush.bf16.msra.mxu3 %v10828_v54  ;;  %v10869_v54 = vld [vmem:[%s15008_s1 + $0x318] sm:$0xff]  ;;  %v8278_v47 = vld [vmem:[%s15007_s0 + $0x6fc] sm:$0xf0] }
  0x57   :  { %5807 = vmatpush.bf16.msra.mxu0 %v10836_v55  ;;  %v10881_v55 = vld [vmem:[%s15008_s1 + $0x378] sm:$0xff] }
  0x58   :  { %5865 = vmatpush.bf16.msra.mxu2 %v10852_v16  ;;  %v8026_v16 = vld [vmem:[%s15007_s0 + $0x504] sm:$0xf0] }
  0x59   :  { %5836 = vmatpush.bf16.msra.mxu1 %v10844_v18  ;;  %v7530_v18 = vld [vmem:[%s15007_s0 + $0x11c] sm:$0xf0] }
  0x5a   :  { %5779 = vmatpush.bf16.msra.mxu3 %v10827_v56  ;;  %v10860_v56 = vld [vmem:[%s15008_s1 + $0x2d0] sm:$0xff] }
  0x5b   :  { %5808 = vmatpush.bf16.msra.mxu0 %v10835_v58  ;;  %v10709_v58 = vld [vmem:[%s15007_s0 + $0x5fc] sm:$0xf] }
  0x5c   :  { %5866 = vmatpush.bf16.msra.mxu2 %v10851_v32  ;;  %v8273_v3 = vor.u32 %v10709_v58, %v8270_v61 }
  0x5d   :  { %5837 = vmatpush.bf16.msra.mxu1 %v10843_v34  ;;  %v10897_v34 = vld [vmem:[%s15008_s1 + $0x3f8] sm:$0xff] }
  0x5e   :  { %5780 = vmatpush.bf16.msra.mxu3 %v10826_v62  ;;  %v8276_v62 = vld [vmem:[%s15007_s0 + $0x600] sm:$0xf] }
  0x5f   :  { %5809 = vmatpush.bf16.msra.mxu0 %v10834_v63  ;;  %v10741_v63 = vld [vmem:[%s15007_s0 + $0x6f8] sm:$0xf0] }
  0x60   :  { %5867 = vmatpush.bf16.msra.mxu2 %v10850_v36  ;;  %v8277_v4 = vor.u32 %v10741_v63, %v8276_v62 }
  0x61   :  { %5675 = vmatmul.bf16.gmra.mxu3 %v8013_v8  ;;  %5838 = vmatpush.bf16.msra.mxu1 %v10842_v38  ;;  %v10859_v8 = vld [vmem:[%s15008_s1 + $0x2c8] sm:$0xff] }
  0x62   :  { %5723 = vmatmul.bf16.vlgmr.msrb.gmra.mxu1 %v7517_v9  ;;  %5889 = vmatpush.bf16.msrb.mxu3 %v10865_v13  ;;  %v10887_v9 = vld [vmem:[%s15008_s1 + $0x3a8] sm:$0xff]  ;;  %v10858_v13 = vld [vmem:[%s15008_s1 + $0x2c0] sm:$0xff] }
  0x63   :  { %5752 = vmatmul.bf16.vlgmr.msrb.gmra.mxu2 %v7521_v10  ;;  %5918 = vmatpush.bf16.msrb.mxu0 %v10873_v15  ;;  %v10867_v10 = vld [vmem:[%s15008_s1 + $0x308] sm:$0xff] }
  0x64   :  { %5704 = vmatmul.bf16.gmra.mxu0 %v8017_v11  ;;  %5976 = vmatpush.bf16.msrb.mxu2 %v10889_v53  ;;  %v10879_v11 = vld [vmem:[%s15008_s1 + $0x368] sm:$0xff] }
  0x65   :  { %5947 = vmatpush.bf16.msrb.mxu1 %v10881_v55  ;;  %v10647_v15 = vld [vmem:[%s15007_s0 + $0x40c] sm:$0xf]  ;;  %v8284_v53 = vld [vmem:[%s15007_s0 + $0x608] sm:$0xf] }
  0x66   :  { %5890 = vmatpush.bf16.msrb.mxu3 %v10864_v17  ;;  %v10522_v17 = vld [vmem:[%s15007_s0 + $0x24] sm:$0xf]  ;;  %v8029_v23 = vor.u32 %v10647_v15, %v8026_v16 }
  0x67   :  { %5919 = vmatpush.bf16.msrb.mxu0 %v10872_v19  ;;  %v7536_v19 = vld [vmem:[%s15007_s0 + $0x28] sm:$0xf]  ;;  %v7533_v25 = vor.u32 %v10522_v17, %v7530_v18  ;;  %v10894_v15 = vld [vmem:[%s15008_s1 + $0x3e0] sm:$0xff]  ;;  %v10648_v17 = vld [vmem:[%s15007_s0 + $0x414] sm:$0xf] }
  0x68   :  { %5977 = vmatpush.bf16.msrb.mxu2 %v10888_v57  ;;  %v7537_v26 = vor.u32 %v10554_v20, %v7536_v19  ;;  %v10523_v18 = vld [vmem:[%s15007_s0 + $0x2c] sm:$0xf]  ;;  %v7538_v19 = vld [vmem:[%s15007_s0 + $0x124] sm:$0xf0]  ;;  %v8034_v20 = vld [vmem:[%s15007_s0 + $0x50c] sm:$0xf0] }
  0x69   :  { %5948 = vmatpush.bf16.msrb.mxu1 %v10880_v6 }
  0x6a   :  { %5891 = vmatpush.bf16.msrb.mxu3 %v10863_v33  ;;  %v10885_v33 = vld [vmem:[%s15008_s1 + $0x398] sm:$0xff] }
  0x6b   :  { %5920 = vmatpush.bf16.msrb.mxu0 %v10871_v35 }
  0x6c   :  { %5978 = vmatpush.bf16.msrb.mxu2 %v10887_v9 }
  0x6d   :  { %5949 = vmatpush.bf16.msrb.mxu1 %v10879_v11  ;;  %v10875_v11 = vld [vmem:[%s15008_s1 + $0x348] sm:$0xff] }
  0x6e   :  { %5892 = vmatpush.bf16.msrb.mxu3 %v10862_v37 }
  0x6f   :  { %5921 = vmatpush.bf16.msrb.mxu0 %v10870_v39 }
  0x70   :  { %5979 = vmatpush.bf16.msrb.mxu2 %v10886_v14  ;;  %v10882_v14 = vld [vmem:[%s15008_s1 + $0x380] sm:$0xff] }
  0x71   :  { %5680 = vmatmul.bf16.gmra.mxu3 %v8265_v28  ;;  %v10878_v28 = vld [vmem:[%s15008_s1 + $0x360] sm:$0xff] }
  0x72   :  { %5728 = vmatmul.bf16.gmra.mxu1 %v7769_v29  ;;  %5893 = vmatpush.bf16.msrb.mxu3 %v10861_v52 }
  0x73   :  { %5757 = vmatmul.bf16.gmra.mxu2 %v7773_v30  ;;  %5922 = vmatpush.bf16.msrb.mxu0 %v10869_v54  ;;  %v10742_v54 = vld [vmem:[%s15007_s0 + $0x700] sm:$0xf0] }
  0x74   :  { %5709 = vmatmul.bf16.gmra.mxu0 %v8269_v31  ;;  %v8033_v31 = vor.u32 %v10679_v22, %v8032_v21  ;;  %5950 = vmatpush.bf16.msrb.mxu1 %v10878_v28  ;;  %v8285_v63 = vor.u32 %v10742_v54, %v8284_v53  ;;  %v8040_v21 = vld [vmem:[%s15007_s0 + $0x418] sm:$0xf]  ;;  %v10680_v22 = vld [vmem:[%s15007_s0 + $0x510] sm:$0xf0]  ;;  %v10711_v53 = vld [vmem:[%s15007_s0 + $0x60c] sm:$0xf] }
  0x75   :  { %5980 = vmatpush.bf16.msrb.mxu2 %v10885_v33  ;;  %v10586_v54 = vld [vmem:[%s15007_s0 + $0x224] sm:$0xf] }
  0x76   :  { %5894 = vmatpush.bf16.msrb.mxu3 %v10860_v56  ;;  %v8281_v56 = vor.u32 %v10710_v46, %v8278_v47 }
  0x77   :  { %5923 = vmatpush.bf16.msrb.mxu0 %v10868_v5 }
  0x78   :  { %5951 = vmatpush.bf16.msrb.mxu1 %v10877_v41 }
  0x79   :  { %5981 = vmatpush.bf16.msrb.mxu2 %v10884_v43 }
  0x7a   :  { %5895 = vmatpush.bf16.msrb.mxu3 %v10859_v8 }
  0x7b   :  { %5924 = vmatpush.bf16.msrb.mxu0 %v10867_v10 }
  0x7c   :  { %5952 = vmatpush.bf16.msrb.mxu1 %v10876_v0 }
  0x7e   :  { %5896 = vmatpush.bf16.msrb.mxu3 %v10858_v13  ;;  %v10903_v13 = vld [vmem:[%s15008_s1 + $0x428] sm:$0xff] }
  0x7f   :  { %5925 = vmatpush.bf16.msrb.mxu0 %v10866_v27  ;;  %v7541_v27 = vor.u32 %v10523_v18, %v7538_v19 }
  0x80   :  { %5953 = vmatpush.bf16.msrb.mxu1 %v10875_v11  ;;  %v10900_v11 = vld [vmem:[%s15008_s1 + $0x410] sm:$0xff] }
  0x81   :  { %5781 = vmatmul.bf16.vlgmr.msra.gmra.mxu3 %v7525_v48  ;;  %v10585_v48 = vld [vmem:[%s15007_s0 + $0x21c] sm:$0xf] }
  0x82   :  { %5733 = vmatmul.bf16.gmra.mxu1 %v8021_v49  ;;  %6005 = vmatpush.bf16.msra.mxu3 %v10897_v34  ;;  %v7782_v49 = vld [vmem:[%s15007_s0 + $0x314] sm:$0xf0] }
  0x83   :  { %5762 = vmatmul.bf16.gmra.mxu2 %v8025_v50  ;;  %v7788_v50 = vld [vmem:[%s15007_s0 + $0x220] sm:$0xf]  ;;  %v7785_v59 = vor.u32 %v10585_v48, %v7782_v49  ;;  %v10901_v48 = vld [vmem:[%s15008_s1 + $0x418] sm:$0xff] }
  0x84   :  { %5810 = vmatmul.bf16.vlgmr.msra.gmra.mxu0 %v7529_v51  ;;  %v10617_v51 = vld [vmem:[%s15007_s0 + $0x318] sm:$0xf0] }
  0x85   :  { %6034 = vmatpush.bf16.msra.mxu0 %v10905_v42  ;;  %v7789_v60 = vor.u32 %v10617_v51, %v7788_v50  ;;  %v10913_v49 = vld [vmem:[%s15008_s1 + $0x478] sm:$0xff]  ;;  %v10892_v51 = vld [vmem:[%s15008_s1 + $0x3d0] sm:$0xff] }
  0x86   :  { %6006 = vmatpush.bf16.msra.mxu3 %v10896_v44 }
  0x89   :  { %6035 = vmatpush.bf16.msra.mxu0 %v10904_v1 }
  0x8d   :  { %6036 = vmatpush.bf16.msra.mxu0 %v10903_v13 }
  0x91   :  { %5786 = vmatmul.bf16.gmra.mxu3 %v7777_v2 }
  0x92   :  { %5738 = vmatmul.bf16.gmra.mxu1 %v8273_v3  ;;  %v10883_v3 = vld [vmem:[%s15008_s1 + $0x388] sm:$0xff] }
  0x93   :  { %5767 = vmatmul.bf16.gmra.mxu2 %v8277_v4  ;;  %v10895_v4 = vld [vmem:[%s15008_s1 + $0x3e8] sm:$0xff] }
  0x94   :  { %5815 = vmatmul.bf16.gmra.mxu0 %v7781_v7  ;;  %5982 = vmatpush.bf16.msrb.mxu2 %v10883_v3 }
  0x95   :  { %6007 = vmatpush.bf16.msra.mxu3 %v10895_v4 }
  0x98   :  { %5983 = vmatpush.bf16.msrb.mxu2 %v10882_v14 }
  0x99   :  { %6008 = vmatpush.bf16.msra.mxu3 %v10894_v15  ;;  %v10919_v15 = vld [vmem:[%s15008_s1 + $0x4a8] sm:$0xff] }
  0x9e   :  { %v5579_v24 = vpop.f32.mrf.mxu0 }
  0x9f   :  { %v5580_v29 = vadd.f32 %v11861_v12, %v5579_v24  ;;  %v5608_v30 = vpop.f32.mrf.mxu1  ;;  %v7544_v24 = vld [vmem:[%s15007_s0 + $0x30] sm:$0xf] }
  0xa1   :  { %v5609_v32 = vadd.f32 %v5608_v30, %v5580_v29  ;;  %5791 = vmatmul.bf16.gmra.mxu3 %v8029_v23  ;;  %v8037_v30 = vor.u32 %v10648_v17, %v8034_v20 }
  0xa2   :  { %5839 = vmatmul.bf16.vlgmr.msra.gmra.mxu1 %v7533_v25  ;;  %v10555_v25 = vld [vmem:[%s15007_s0 + $0x128] sm:$0xf0] }
  0xa3   :  { %5868 = vmatmul.bf16.vlgmr.msra.gmra.mxu2 %v7537_v26  ;;  %v7545_v34 = vor.u32 %v10555_v25, %v7544_v24  ;;  %v10899_v24 = vld [vmem:[%s15008_s1 + $0x408] sm:$0xff] }
  0xa4   :  { %5820 = vmatmul.bf16.gmra.mxu0 %v8033_v31  ;;  %v11906_v35 = vpop.f32.mrf.mxu3  ;;  %v8041_v31 = vor.u32 %v10680_v22, %v8040_v21  ;;  %v10911_v25 = vld [vmem:[%s15008_s1 + $0x468] sm:$0xff] }
  0xa5   :  { %v5590_v28 = vadd.f32 %v11861_v12, %v11906_v35  ;;  %v10893_v35 = vld [vmem:[%s15008_s1 + $0x3d8] sm:$0xff] }
  0xa6   :  { %v5637_v36 = vpop.f32.mrf.mxu2  ;;  %v5581_v38 = vpop.f32.mrf.mxu0  ;;  %6009 = vmatpush.bf16.msra.mxu3 %v10893_v35 }
  0xa7   :  { %v11908_v37 = vadd.f32 %v5637_v36, %v5609_v32  ;;  %v5582_v39 = vadd.f32 %v11861_v12, %v5581_v38  ;;  %v5610_v40 = vpop.f32.mrf.mxu1  ;;  %v10874_v32 = vld [vmem:[%s15008_s1 + $0x340] sm:$0xff] }
  0xa8   :  { %v10902_v36 = vld [vmem:[%s15008_s1 + $0x420] sm:$0xff]  ;;  %5954 = vmatpush.bf16.msrb.mxu1 %v10874_v32  ;;  %v7552_v32 = vld [vmem:[%s15007_s0 + $0x38] sm:$0xf] }
  0xa9   :  { %v5611_v45 = vadd.f32 %v5610_v40, %v5582_v39  ;;  %6037 = vmatpush.bf16.msra.mxu0 %v10902_v36  ;;  %v10921_v40 = vld [vmem:[%s15008_s1 + $0x4b8] sm:$0xff]  ;;  %v8048_v36 = vld [vmem:[%s15007_s0 + $0x420] sm:$0xf] }
  0xaa   :  { %6092 = vmatpush.bf16.msra.mxu2 %v10921_v40  ;;  %6010 = vmatpush.bf16.msra.mxu3 %v10892_v51  ;;  %v10917_v51 = vld [vmem:[%s15008_s1 + $0x498] sm:$0xff] }
  0xac   :  { %v11941_v52 = vpop.f32.mrf.mxu3  ;;  %6063 = vmatpush.bf16.msra.mxu1 %v10913_v49 }
  0xad   :  { %v5592_v44 = vadd.f32 %v11861_v12, %v11941_v52  ;;  %v10920_v52 = vld [vmem:[%s15008_s1 + $0x4b0] sm:$0xff]  ;;  %6038 = vmatpush.bf16.msra.mxu0 %v10901_v48 }
  0xae   :  { %v5639_v55 = vpop.f32.mrf.mxu2  ;;  %v5584_v58 = vpop.f32.mrf.mxu0  ;;  %6093 = vmatpush.bf16.msra.mxu2 %v10920_v52  ;;  %v10929_v52 = vld [vmem:[%s15008_s1 + $0x4f8] sm:$0xff] }
  0xaf   :  { %v11949_v57 = vadd.f32 %v5639_v55, %v5611_v45  ;;  %v5585_v61 = vadd.f32 %v11861_v12, %v5584_v58  ;;  %v5613_v62 = vpop.f32.mrf.mxu1  ;;  %v7790_v55 = vld [vmem:[%s15007_s0 + $0x31c] sm:$0xf0]  ;;  %v8292_v58 = vld [vmem:[%s15007_s0 + $0x610] sm:$0xf] }
  0xb0   :  { %v7793_v1 = vor.u32 %v10586_v54, %v7790_v55 }
  0xb1   :  { %v5614_v2 = vadd.f32 %v5613_v62, %v5585_v61  ;;  %5796 = vmatmul.bf16.gmra.mxu3 %v8281_v56  ;;  %v8286_v56 = vld [vmem:[%s15007_s0 + $0x704] sm:$0xf0]  ;;  %v10618_v62 = vld [vmem:[%s15007_s0 + $0x320] sm:$0xf0]  ;;  %6039 = vmatpush.bf16.msra.mxu0 %v10900_v11  ;;  %v10744_v11 = vld [vmem:[%s15007_s0 + $0x710] sm:$0xf0] }
  0xb2   :  { %5844 = vmatmul.bf16.gmra.mxu1 %v7785_v59  ;;  %v10743_v59 = vld [vmem:[%s15007_s0 + $0x708] sm:$0xf0]  ;;  %v7796_v61 = vld [vmem:[%s15007_s0 + $0x228] sm:$0xf]  ;;  %v8289_v4 = vor.u32 %v10711_v53, %v8286_v56  ;;  %6094 = vmatpush.bf16.msra.mxu2 %v10919_v15 }
  0xb3   :  { %5873 = vmatmul.bf16.gmra.mxu2 %v7789_v60 }
  0xb4   :  { %5825 = vmatmul.bf16.gmra.mxu0 %v8285_v63  ;;  %v11964_v5 = vpop.f32.mrf.mxu3 }
  0xb5   :  { %6040 = vmatpush.bf16.msra.mxu0 %v10899_v24 }
  0xb6   :  { %v5642_v6 = vpop.f32.mrf.mxu2  ;;  %v5586_v8 = vpop.f32.mrf.mxu0 }
  0xb7   :  { %v11966_v7 = vadd.f32 %v5642_v6, %v5614_v2  ;;  %v5587_v9 = vadd.f32 %v11861_v12, %v5586_v8  ;;  %v5615_v10 = vpop.f32.mrf.mxu1  ;;  %v5595_v2 = vadd.f32 %v11861_v12, %v11964_v5  ;;  %v8293_v6 = vor.u32 %v10743_v59, %v8292_v58  ;;  %v10891_v5 = vld [vmem:[%s15008_s1 + $0x3c8] sm:$0xff]  ;;  %v10909_v59 = vld [vmem:[%s15008_s1 + $0x458] sm:$0xff] }
  0xb8   :  { %6011 = vmatpush.bf16.msra.mxu3 %v10891_v5 }
  0xb9   :  { %v5616_v16 = vadd.f32 %v5615_v10, %v5587_v9  ;;  %v7797_v10 = vor.u32 %v10618_v62, %v7796_v61 }
  0xbc   :  { %v11999_v23 = vpop.f32.mrf.mxu3 }
  0xbd   :  { %v5597_v19 = vadd.f32 %v11861_v12, %v11999_v23  ;;  %v10918_v12 = vld [vmem:[%s15008_s1 + $0x4a0] sm:$0xff]  ;;  %v10649_v23 = vld [vmem:[%s15007_s0 + $0x41c] sm:$0xf] }
  0xbe   :  { %v5644_v26 = vpop.f32.mrf.mxu2  ;;  %6095 = vmatpush.bf16.msra.mxu2 %v10918_v12 }
  0xbf   :  { %v12009_v29 = vadd.f32 %v5644_v26, %v5616_v16  ;;  %v5618_v33 = vpop.f32.mrf.mxu1 }
  0xc0   :  { %v5619_v38 = vadd.f32 %v5618_v33, %v5590_v28  ;;  %v8042_v28 = vld [vmem:[%s15007_s0 + $0x514] sm:$0xf0]  ;;  %v10556_v33 = vld [vmem:[%s15007_s0 + $0x130] sm:$0xf0] }
  0xc1   :  { %v5695_v39 = vpop.f32.mrf.mxu0  ;;  %5897 = vmatmul.bf16.vlgmr.msrb.gmra.mxu3 %v7541_v27  ;;  %v10890_v27 = vld [vmem:[%s15008_s1 + $0x3c0] sm:$0xff]  ;;  %v8045_v40 = vor.u32 %v10649_v23, %v8042_v28 }
  0xc2   :  { %5849 = vmatmul.bf16.gmra.mxu1 %v8037_v30  ;;  %v10524_v30 = vld [vmem:[%s15007_s0 + $0x34] sm:$0xf]  ;;  %6012 = vmatpush.bf16.msra.mxu3 %v10890_v27 }
  0xc3   :  { %5878 = vmatmul.bf16.gmra.mxu2 %v8041_v31  ;;  %v7546_v31 = vld [vmem:[%s15007_s0 + $0x12c] sm:$0xf0] }
  0xc4   :  { %5926 = vmatmul.bf16.vlgmr.msrb.gmra.mxu0 %v7545_v34  ;;  %v5666_v41 = vpop.f32.mrf.mxu3  ;;  %6096 = vmatpush.bf16.msra.mxu2 %v10917_v51 }
  0xc5   :  { %v5667_v43 = vadd.f32 %v5666_v41, %v11908_v37 }
  0xc6   :  { %v5647_v42 = vpop.f32.mrf.mxu2  ;;  %6121 = vmatpush.bf16.msrb.mxu3 %v10929_v52 }
  0xc7   :  { %v12026_v45 = vadd.f32 %v5647_v42, %v5619_v38  ;;  %v12028_v46 = vadd.f32 %v5695_v39, %v5667_v43  ;;  %v5620_v47 = vpop.f32.mrf.mxu1  ;;  %v10681_v38 = vld [vmem:[%s15007_s0 + $0x518] sm:$0xf0]  ;;  %v7549_v42 = vor.u32 %v10524_v30, %v7546_v31  ;;  %v7553_v43 = vor.u32 %v10556_v33, %v7552_v32  ;;  %v10907_v31 = vld [vmem:[%s15008_s1 + $0x448] sm:$0xff] }
  0xc8   :  { %v5621_v50 = vadd.f32 %v5620_v47, %v5592_v44  ;;  %v10898_v44 = vld [vmem:[%s15008_s1 + $0x400] sm:$0xff]  ;;  %v8049_v49 = vor.u32 %v10681_v38, %v8048_v36  ;;  %v10935_v32 = vld [vmem:[%s15008_s1 + $0x528] sm:$0xff] }
  0xc9   :  { %v5697_v37 = vpop.f32.mrf.mxu0  ;;  %6041 = vmatpush.bf16.msra.mxu0 %v10898_v44  ;;  %v10926_v36 = vld [vmem:[%s15008_s1 + $0x4e0] sm:$0xff] }
  0xca   :  { %v10650_v38 = vld [vmem:[%s15007_s0 + $0x424] sm:$0xf] }
  0xcc   :  { %v5668_v60 = vpop.f32.mrf.mxu3 }
  0xcd   :  { %v5669_v0 = vadd.f32 %v5668_v60, %v11949_v57  ;;  %v10912_v57 = vld [vmem:[%s15008_s1 + $0x470] sm:$0xff]  ;;  %v10937_v60 = vld [vmem:[%s15008_s1 + $0x538] sm:$0xff] }
  0xce   :  { %v5649_v63 = vpop.f32.mrf.mxu2  ;;  %6064 = vmatpush.bf16.msra.mxu1 %v10912_v57  ;;  %6150 = vmatpush.bf16.msrb.mxu0 %v10937_v60 }
  0xcf   :  { %v12069_v3 = vadd.f32 %v5649_v63, %v5621_v50  ;;  %v12071_v8 = vadd.f32 %v5697_v37, %v5669_v0  ;;  %v5623_v9 = vpop.f32.mrf.mxu1  ;;  %v10910_v50 = vld [vmem:[%s15008_s1 + $0x460] sm:$0xff]  ;;  %v10928_v63 = vld [vmem:[%s15008_s1 + $0x4f0] sm:$0xff] }
  0xd0   :  { %v5624_v13 = vadd.f32 %v5623_v9, %v5595_v2  ;;  %v10712_v0 = vld [vmem:[%s15007_s0 + $0x614] sm:$0xf]  ;;  %v10587_v2 = vld [vmem:[%s15007_s0 + $0x22c] sm:$0xf]  ;;  %6122 = vmatpush.bf16.msrb.mxu3 %v10928_v63 }
  0xd1   :  { %v5700_v14 = vpop.f32.mrf.mxu0  ;;  %5902 = vmatmul.bf16.gmra.mxu3 %v7793_v1  ;;  %v8294_v1 = vld [vmem:[%s15007_s0 + $0x70c] sm:$0xf0] }
  0xd2   :  { %5854 = vmatmul.bf16.gmra.mxu1 %v8289_v4  ;;  %v7798_v4 = vld [vmem:[%s15007_s0 + $0x324] sm:$0xf0] }
  0xd3   :  { %5883 = vmatmul.bf16.gmra.mxu2 %v8293_v6  ;;  %6065 = vmatpush.bf16.msra.mxu1 %v10911_v25  ;;  %v7804_v6 = vld [vmem:[%s15007_s0 + $0x230] sm:$0xf]  ;;  %v7801_v15 = vor.u32 %v10587_v2, %v7798_v4  ;;  %v10933_v4 = vld [vmem:[%s15008_s1 + $0x518] sm:$0xff] }
  0xd4   :  { %5931 = vmatmul.bf16.gmra.mxu0 %v7797_v10  ;;  %v5671_v16 = vpop.f32.mrf.mxu3  ;;  %v8300_v10 = vld [vmem:[%s15007_s0 + $0x618] sm:$0xf] }
  0xd5   :  { %v5672_v18 = vadd.f32 %v5671_v16, %v11966_v7 }
  0xd6   :  { %v5652_v17 = vpop.f32.mrf.mxu2 }
  0xd7   :  { %v12088_v20 = vadd.f32 %v5652_v17, %v5624_v13  ;;  %v12090_v21 = vadd.f32 %v5700_v14, %v5672_v18  ;;  %v5625_v22 = vpop.f32.mrf.mxu1  ;;  %6066 = vmatpush.bf16.msra.mxu1 %v10910_v50  ;;  %v8297_v14 = vor.u32 %v10712_v0, %v8294_v1 }
  0xd8   :  { %v5626_v26 = vadd.f32 %v5625_v22, %v5597_v19  ;;  %v8301_v19 = vor.u32 %v10744_v11, %v8300_v10  ;;  %v10908_v22 = vld [vmem:[%s15008_s1 + $0x450] sm:$0xff]  ;;  %v10713_v11 = vld [vmem:[%s15007_s0 + $0x61c] sm:$0xf] }
  0xd9   :  { %v5702_v7 = vpop.f32.mrf.mxu0  ;;  %v10952_v10 = vld [vmem:[%s15008_s1 + $0x5b0] sm:$0xff] }
  0xdb   :  { %6067 = vmatpush.bf16.msra.mxu1 %v10909_v59  ;;  %v10934_v59 = vld [vmem:[%s15008_s1 + $0x520] sm:$0xff] }
  0xdc   :  { %v5673_v34 = vpop.f32.mrf.mxu3 }
  0xdd   :  { %v5674_v35 = vadd.f32 %v5673_v34, %v12009_v29 }
  0xde   :  { %v5654_v39 = vpop.f32.mrf.mxu2 }
  0xdf   :  { %v12129_v41 = vadd.f32 %v5654_v39, %v5626_v26  ;;  %v12134_v47 = vadd.f32 %v5702_v7, %v5674_v35  ;;  %v5724_v48 = vpop.f32.mrf.mxu1  ;;  %6068 = vmatpush.bf16.msra.mxu1 %v10908_v22  ;;  %v10915_v26 = vld [vmem:[%s15008_s1 + $0x488] sm:$0xff]  ;;  %v10525_v39 = vld [vmem:[%s15007_s0 + $0x3c] sm:$0xf]  ;;  %v7554_v35 = vld [vmem:[%s15007_s0 + $0x134] sm:$0xf0] }
  0xe0   :  { %v5725_v29 = vadd.f32 %v5724_v48, %v12028_v46  ;;  %v10927_v7 = vld [vmem:[%s15008_s1 + $0x4e8] sm:$0xff]  ;;  %v10557_v48 = vld [vmem:[%s15007_s0 + $0x138] sm:$0xf0] }
  0xe1   :  { %v5705_v37 = vpop.f32.mrf.mxu0  ;;  %5907 = vmatmul.bf16.gmra.mxu3 %v8045_v40  ;;  %v8050_v40 = vld [vmem:[%s15007_s0 + $0x51c] sm:$0xf0] }
  0xe2   :  { %5955 = vmatmul.bf16.vlgmr.msrb.gmra.mxu1 %v7549_v42  ;;  %6123 = vmatpush.bf16.msrb.mxu3 %v10927_v7  ;;  %v8056_v42 = vld [vmem:[%s15007_s0 + $0x428] sm:$0xf]  ;;  %v8053_v51 = vor.u32 %v10650_v38, %v8050_v40 }
  0xe3   :  { %5984 = vmatmul.bf16.vlgmr.msrb.gmra.mxu2 %v7553_v43  ;;  %6069 = vmatpush.bf16.msra.mxu1 %v10907_v31  ;;  %v10682_v43 = vld [vmem:[%s15007_s0 + $0x520] sm:$0xf0]  ;;  %v10944_v31 = vld [vmem:[%s15008_s1 + $0x570] sm:$0xff]  ;;  %v10931_v40 = vld [vmem:[%s15008_s1 + $0x508] sm:$0xff] }
  0xe4   :  { %5936 = vmatmul.bf16.gmra.mxu0 %v8049_v49  ;;  %v5676_v53 = vpop.f32.mrf.mxu3  ;;  %v8057_v52 = vor.u32 %v10682_v43, %v8056_v42  ;;  %v10943_v42 = vld [vmem:[%s15008_s1 + $0x568] sm:$0xff] }
  0xe5   :  { %v5677_v54 = vadd.f32 %v5676_v53, %v12026_v45  ;;  %v10916_v45 = vld [vmem:[%s15008_s1 + $0x490] sm:$0xff]  ;;  %v10906_v53 = vld [vmem:[%s15008_s1 + $0x440] sm:$0xff] }
  0xe6   :  { %v5753_v55 = vpop.f32.mrf.mxu2  ;;  %6097 = vmatpush.bf16.msra.mxu2 %v10916_v45  ;;  %6124 = vmatpush.bf16.msrb.mxu3 %v10926_v36 }
  0xe7   :  { %v12147_v46 = vadd.f32 %v5753_v55, %v5725_v29  ;;  %v12149_v56 = vadd.f32 %v5705_v37, %v5677_v54  ;;  %v5726_v58 = vpop.f32.mrf.mxu1  ;;  %v7557_v37 = vor.u32 %v10525_v39, %v7554_v35  ;;  %6070 = vmatpush.bf16.msra.mxu1 %v10906_v53 }
  0xe8   :  { %v5727_v62 = vadd.f32 %v5726_v58, %v12071_v8  ;;  %v10619_v8 = vld [vmem:[%s15007_s0 + $0x328] sm:$0xf0] }
  0xe9   :  { %v5707_v61 = vpop.f32.mrf.mxu0  ;;  %v7805_v16 = vor.u32 %v10619_v8, %v7804_v6  ;;  %v10945_v6 = vld [vmem:[%s15008_s1 + $0x578] sm:$0xff] }
  0xea   :  { %6098 = vmatpush.bf16.msra.mxu2 %v10915_v26 }
  0xeb   :  { %6179 = vmatpush.bf16.msrb.mxu1 %v10945_v6 }
  0xec   :  { %v5678_v9 = vpop.f32.mrf.mxu3 }
  0xed   :  { %v5679_v57 = vadd.f32 %v5678_v9, %v12069_v3  ;;  %v10936_v3 = vld [vmem:[%s15008_s1 + $0x530] sm:$0xff] }
  0xee   :  { %v5755_v13 = vpop.f32.mrf.mxu2  ;;  %6151 = vmatpush.bf16.msrb.mxu0 %v10936_v3 }
  0xef   :  { %v12189_v5 = vadd.f32 %v5755_v13, %v5727_v62  ;;  %v12191_v17 = vadd.f32 %v5707_v61, %v5679_v57  ;;  %v5729_v18 = vpop.f32.mrf.mxu1  ;;  %v10925_v61 = vld [vmem:[%s15008_s1 + $0x4d8] sm:$0xff]  ;;  %v10588_v57 = vld [vmem:[%s15007_s0 + $0x234] sm:$0xf]  ;;  %v7806_v13 = vld [vmem:[%s15007_s0 + $0x32c] sm:$0xf0]  ;;  %6180 = vmatpush.bf16.msrb.mxu1 %v10944_v31 }
  0xf0   :  { %v5730_v25 = vadd.f32 %v5729_v18, %v12090_v21  ;;  %v10953_v62 = vld [vmem:[%s15008_s1 + $0x5b8] sm:$0xff]  ;;  %6125 = vmatpush.bf16.msrb.mxu3 %v10925_v61 }
  0xf1   :  { %v5710_v24 = vpop.f32.mrf.mxu0  ;;  %5912 = vmatmul.bf16.gmra.mxu3 %v8297_v14  ;;  %v8302_v14 = vld [vmem:[%s15007_s0 + $0x714] sm:$0xf0] }
  0xf2   :  { %5960 = vmatmul.bf16.gmra.mxu1 %v7801_v15  ;;  %6152 = vmatpush.bf16.msrb.mxu0 %v10935_v32  ;;  %v8308_v15 = vld [vmem:[%s15007_s0 + $0x620] sm:$0xf]  ;;  %v7812_v18 = vld [vmem:[%s15007_s0 + $0x238] sm:$0xf]  ;;  %v8305_v26 = vor.u32 %v10713_v11, %v8302_v14 }
  0xf3   :  { %5989 = vmatmul.bf16.gmra.mxu2 %v7805_v16  ;;  %v10745_v16 = vld [vmem:[%s15007_s0 + $0x718] sm:$0xf0]  ;;  %6181 = vmatpush.bf16.msrb.mxu1 %v10943_v42 }
  0xf4   :  { %5941 = vmatmul.bf16.gmra.mxu0 %v8301_v19  ;;  %v5681_v27 = vpop.f32.mrf.mxu3  ;;  %v10620_v19 = vld [vmem:[%s15007_s0 + $0x330] sm:$0xf0]  ;;  %v8309_v7 = vor.u32 %v10745_v16, %v8308_v15  ;;  %v10941_v14 = vld [vmem:[%s15008_s1 + $0x558] sm:$0xff] }
  0xf5   :  { %v5682_v21 = vadd.f32 %v5681_v27, %v12088_v20  ;;  %v10914_v20 = vld [vmem:[%s15008_s1 + $0x480] sm:$0xff]  ;;  %v10969_v15 = vld [vmem:[%s15008_s1 + $0x638] sm:$0xff] }
  0xf6   :  { %v5758_v12 = vpop.f32.mrf.mxu2  ;;  %6099 = vmatpush.bf16.msra.mxu2 %v10914_v20  ;;  %6153 = vmatpush.bf16.msrb.mxu0 %v10934_v59 }
  0xf7   :  { %v12207_v23 = vadd.f32 %v5758_v12, %v5730_v25  ;;  %v12209_v28 = vadd.f32 %v5710_v24, %v5682_v21  ;;  %v5731_v30 = vpop.f32.mrf.mxu1  ;;  %v7809_v25 = vor.u32 %v10588_v57, %v7806_v13  ;;  %v7813_v12 = vor.u32 %v10620_v19, %v7812_v18  ;;  %v10960_v18 = vld [vmem:[%s15008_s1 + $0x5f0] sm:$0xff]  ;;  %v10714_v19 = vld [vmem:[%s15007_s0 + $0x624] sm:$0xf] }
  0xf8   :  { %v5732_v34 = vadd.f32 %v5731_v30, %v12134_v47  ;;  %v7560_v47 = vld [vmem:[%s15007_s0 + $0x40] sm:$0xf]  ;;  %v10932_v30 = vld [vmem:[%s15008_s1 + $0x510] sm:$0xff] }
  0xf9   :  { %v5712_v33 = vpop.f32.mrf.mxu0  ;;  %v7561_v58 = vor.u32 %v10557_v48, %v7560_v47  ;;  %v10950_v47 = vld [vmem:[%s15008_s1 + $0x5a0] sm:$0xff]  ;;  %v10651_v48 = vld [vmem:[%s15007_s0 + $0x42c] sm:$0xf] }
  0xfa   :  { %6208 = vmatpush.bf16.msrb.mxu2 %v10953_v62  ;;  %6154 = vmatpush.bf16.msrb.mxu0 %v10933_v4  ;;  %v10942_v4 = vld [vmem:[%s15008_s1 + $0x560] sm:$0xff] }
  0xfb   :  { %6182 = vmatpush.bf16.msrb.mxu1 %v10942_v4 }
  0xfc   :  { %v5683_v44 = vpop.f32.mrf.mxu3 }
  0xfd   :  { %v5684_v49 = vadd.f32 %v5683_v44, %v12129_v41 }
  0xfe   :  { %v5760_v50 = vpop.f32.mrf.mxu2  ;;  %6209 = vmatpush.bf16.msrb.mxu2 %v10952_v10  ;;  %6155 = vmatpush.bf16.msrb.mxu0 %v10932_v30 }
  0xff   :  { %v12249_v29 = vadd.f32 %v5760_v50, %v5732_v34  ;;  %v12254_v54 = vadd.f32 %v5712_v33, %v5684_v49  ;;  %v5734_v55 = vpop.f32.mrf.mxu1  ;;  %v10923_v33 = vld [vmem:[%s15008_s1 + $0x4c8] sm:$0xff]  ;;  %v10526_v50 = vld [vmem:[%s15007_s0 + $0x44] sm:$0xf]  ;;  %6183 = vmatpush.bf16.msrb.mxu1 %v10941_v14 }
 0x100   :  { %v5735_v41 = vadd.f32 %v5734_v55, %v12149_v56  ;;  %v10951_v34 = vld [vmem:[%s15008_s1 + $0x5a8] sm:$0xff]  ;;  %v10966_v14 = vld [vmem:[%s15008_s1 + $0x620] sm:$0xff] }
 0x101   :  { %v5811_v60 = vpop.f32.mrf.mxu0  ;;  %6013 = vmatmul.bf16.vlgmr.msra.gmra.mxu3 %v7557_v37  ;;  %v8058_v49 = vld [vmem:[%s15007_s0 + $0x524] sm:$0xf0]  ;;  %v7562_v37 = vld [vmem:[%s15007_s0 + $0x13c] sm:$0xf0]  ;;  %v10683_v55 = vld [vmem:[%s15007_s0 + $0x528] sm:$0xf0] }
 0x102   :  { %5965 = vmatmul.bf16.gmra.mxu1 %v8053_v51  ;;  %6210 = vmatpush.bf16.msrb.mxu2 %v10951_v34  ;;  %v7568_v51 = vld [vmem:[%s15007_s0 + $0x48] sm:$0xf]  ;;  %v7565_v61 = vor.u32 %v10526_v50, %v7562_v37 }
 0x103   :  { %5994 = vmatmul.bf16.gmra.mxu2 %v8057_v52  ;;  %6156 = vmatpush.bf16.msrb.mxu0 %v10931_v40  ;;  %v10558_v52 = vld [vmem:[%s15007_s0 + $0x140] sm:$0xf0]  ;;  %v10939_v37 = vld [vmem:[%s15008_s1 + $0x548] sm:$0xff] }
 0x104   :  { %6042 = vmatmul.bf16.vlgmr.msra.gmra.mxu0 %v7561_v58  ;;  %v5782_v45 = vpop.f32.mrf.mxu3  ;;  %v7569_v62 = vor.u32 %v10558_v52, %v7568_v51  ;;  %v10967_v51 = vld [vmem:[%s15008_s1 + $0x628] sm:$0xff] }
 0x105   :  { %v5783_v0 = vadd.f32 %v5782_v45, %v12147_v46  ;;  %v10924_v46 = vld [vmem:[%s15008_s1 + $0x4d0] sm:$0xff]  ;;  %v10930_v45 = vld [vmem:[%s15008_s1 + $0x500] sm:$0xff] }
 0x106   :  { %v5763_v63 = vpop.f32.mrf.mxu2  ;;  %6126 = vmatpush.bf16.msrb.mxu3 %v10924_v46  ;;  %6211 = vmatpush.bf16.msrb.mxu2 %v10950_v47 }
 0x107   :  { %v12267_v56 = vadd.f32 %v5763_v63, %v5735_v41  ;;  %v12269_v1 = vadd.f32 %v5811_v60, %v5783_v0  ;;  %v5736_v2 = vpop.f32.mrf.mxu1  ;;  %v8061_v41 = vor.u32 %v10651_v48, %v8058_v49  ;;  %6157 = vmatpush.bf16.msrb.mxu0 %v10930_v45 }
 0x108   :  { %v5737_v8 = vadd.f32 %v5736_v2, %v12191_v17 }
 0x109   :  { %v5813_v9 = vpop.f32.mrf.mxu0 }
 0x10a   :  { %6127 = vmatpush.bf16.msrb.mxu3 %v10923_v33 }
 0x10b   :  { %6266 = vmatpush.bf16.msra.mxu0 %v10969_v15 }
 0x10c   :  { %v5784_v17 = vpop.f32.mrf.mxu3 }
 0x10d   :  { %v5785_v24 = vadd.f32 %v5784_v17, %v12189_v5 }
 0x10e   :  { %v5765_v22 = vpop.f32.mrf.mxu2 }
 0x10f   :  { %v12309_v3 = vadd.f32 %v5765_v22, %v5737_v8  ;;  %v12311_v27 = vadd.f32 %v5813_v9, %v5785_v24  ;;  %v5739_v21 = vpop.f32.mrf.mxu1  ;;  %v10949_v8 = vld [vmem:[%s15008_s1 + $0x598] sm:$0xff]  ;;  %v8310_v22 = vld [vmem:[%s15007_s0 + $0x71c] sm:$0xf0] }
 0x110   :  { %v5740_v32 = vadd.f32 %v5739_v21, %v12209_v28  ;;  %v10961_v9 = vld [vmem:[%s15008_s1 + $0x5f8] sm:$0xff]  ;;  %6212 = vmatpush.bf16.msrb.mxu2 %v10949_v8  ;;  %v8316_v21 = vld [vmem:[%s15007_s0 + $0x628] sm:$0xf] }
 0x111   :  { %v5816_v5 = vpop.f32.mrf.mxu0  ;;  %6018 = vmatmul.bf16.gmra.mxu3 %v7809_v25  ;;  %v10589_v24 = vld [vmem:[%s15007_s0 + $0x23c] sm:$0xf]  ;;  %v7814_v25 = vld [vmem:[%s15007_s0 + $0x334] sm:$0xf0] }
 0x112   :  { %5970 = vmatmul.bf16.gmra.mxu1 %v8305_v26  ;;  %v7820_v26 = vld [vmem:[%s15007_s0 + $0x240] sm:$0xf]  ;;  %v7817_v33 = vor.u32 %v10589_v24, %v7814_v25  ;;  %v10965_v25 = vld [vmem:[%s15008_s1 + $0x618] sm:$0xff] }
 0x113   :  { %5999 = vmatmul.bf16.gmra.mxu2 %v8309_v7  ;;  %v10621_v7 = vld [vmem:[%s15007_s0 + $0x338] sm:$0xf0] }
 0x114   :  { %6047 = vmatmul.bf16.gmra.mxu0 %v7813_v12  ;;  %v5787_v20 = vpop.f32.mrf.mxu3  ;;  %v10746_v12 = vld [vmem:[%s15007_s0 + $0x720] sm:$0xf0]  ;;  %v7821_v34 = vor.u32 %v10621_v7, %v7820_v26  ;;  %v10977_v26 = vld [vmem:[%s15008_s1 + $0x678] sm:$0xff] }
 0x115   :  { %v5788_v38 = vadd.f32 %v5787_v20, %v12207_v23  ;;  %v10922_v23 = vld [vmem:[%s15008_s1 + $0x4c0] sm:$0xff] }
 0x116   :  { %v5768_v36 = vpop.f32.mrf.mxu2  ;;  %6128 = vmatpush.bf16.msrb.mxu3 %v10922_v23 }
 0x117   :  { %v12327_v28 = vadd.f32 %v5768_v36, %v5740_v32  ;;  %v12329_v39 = vadd.f32 %v5816_v5, %v5788_v38  ;;  %v5741_v35 = vpop.f32.mrf.mxu1  ;;  %v8313_v32 = vor.u32 %v10714_v19, %v8310_v22  ;;  %v8317_v38 = vor.u32 %v10746_v12, %v8316_v21  ;;  %v10984_v21 = vld [vmem:[%s15008_s1 + $0x6b0] sm:$0xff]  ;;  %v10715_v12 = vld [vmem:[%s15007_s0 + $0x62c] sm:$0xf] }
 0x118   :  { %v5742_v43 = vadd.f32 %v5741_v35, %v12254_v54  ;;  %v8064_v54 = vld [vmem:[%s15007_s0 + $0x430] sm:$0xf] }
 0x119   :  { %v5818_v44 = vpop.f32.mrf.mxu0  ;;  %v8065_v2 = vor.u32 %v10683_v55, %v8064_v54  ;;  %v10940_v35 = vld [vmem:[%s15008_s1 + $0x550] sm:$0xff]  ;;  %v10958_v54 = vld [vmem:[%s15008_s1 + $0x5e0] sm:$0xff] }
 0x11a   :  { %6237 = vmatpush.bf16.msra.mxu3 %v10961_v9  ;;  %6184 = vmatpush.bf16.msrb.mxu1 %v10940_v35  ;;  %v10652_v55 = vld [vmem:[%s15007_s0 + $0x434] sm:$0xf] }
 0x11c   :  { %v5789_v53 = vpop.f32.mrf.mxu3 }
 0x11d   :  { %v5790_v59 = vadd.f32 %v5789_v53, %v12249_v29 }
 0x11e   :  { %v5770_v58 = vpop.f32.mrf.mxu2  ;;  %6238 = vmatpush.bf16.msra.mxu3 %v10960_v18  ;;  %6185 = vmatpush.bf16.msrb.mxu1 %v10939_v37  ;;  %v10976_v37 = vld [vmem:[%s15008_s1 + $0x670] sm:$0xff] }
 0x11f   :  { %v12369_v60 = vadd.f32 %v5770_v58, %v5742_v43  ;;  %v12374_v63 = vadd.f32 %v5818_v44, %v5790_v59  ;;  %v5840_v0 = vpop.f32.mrf.mxu1  ;;  %v10947_v43 = vld [vmem:[%s15008_s1 + $0x588] sm:$0xff] }
 0x120   :  { %v5841_v29 = vadd.f32 %v5840_v0, %v12269_v1  ;;  %v10959_v44 = vld [vmem:[%s15008_s1 + $0x5e8] sm:$0xff] }
 0x121   :  { %v5821_v6 = vpop.f32.mrf.mxu0  ;;  %6023 = vmatmul.bf16.gmra.mxu3 %v8061_v41  ;;  %v10527_v58 = vld [vmem:[%s15007_s0 + $0x4c] sm:$0xf]  ;;  %v7570_v59 = vld [vmem:[%s15007_s0 + $0x144] sm:$0xf0]  ;;  %v8066_v41 = vld [vmem:[%s15007_s0 + $0x52c] sm:$0xf0] }
 0x122   :  { %6071 = vmatmul.bf16.vlgmr.msra.gmra.mxu1 %v7565_v61  ;;  %6239 = vmatpush.bf16.msra.mxu3 %v10959_v44  ;;  %v8072_v61 = vld [vmem:[%s15007_s0 + $0x438] sm:$0xf]  ;;  %v10559_v0 = vld [vmem:[%s15007_s0 + $0x148] sm:$0xf0]  ;;  %v8069_v8 = vor.u32 %v10652_v55, %v8066_v41 }
 0x123   :  { %6100 = vmatmul.bf16.vlgmr.msra.gmra.mxu2 %v7569_v62  ;;  %v10684_v62 = vld [vmem:[%s15007_s0 + $0x530] sm:$0xf0]  ;;  %v10963_v41 = vld [vmem:[%s15008_s1 + $0x608] sm:$0xff] }
 0x124   :  { %6052 = vmatmul.bf16.gmra.mxu0 %v8065_v2  ;;  %v5792_v46 = vpop.f32.mrf.mxu3  ;;  %v8073_v9 = vor.u32 %v10684_v62, %v8072_v61  ;;  %v10975_v61 = vld [vmem:[%s15008_s1 + $0x668] sm:$0xff] }
 0x125   :  { %v5793_v10 = vadd.f32 %v5792_v46, %v12267_v56  ;;  %v10948_v56 = vld [vmem:[%s15008_s1 + $0x590] sm:$0xff]  ;;  %v10938_v46 = vld [vmem:[%s15008_s1 + $0x540] sm:$0xff] }
 0x126   :  { %v5869_v11 = vpop.f32.mrf.mxu2  ;;  %6213 = vmatpush.bf16.msrb.mxu2 %v10948_v56  ;;  %6240 = vmatpush.bf16.msra.mxu3 %v10958_v54 }
 0x127   :  { %v12387_v1 = vadd.f32 %v5869_v11, %v5841_v29  ;;  %v12389_v57 = vadd.f32 %v5821_v6, %v5793_v10  ;;  %v5842_v13 = vpop.f32.mrf.mxu1  ;;  %v7573_v6 = vor.u32 %v10527_v58, %v7570_v59  ;;  %6186 = vmatpush.bf16.msrb.mxu1 %v10938_v46 }
 0x128   :  { %v5843_v17 = vadd.f32 %v5842_v13, %v12311_v27 }
 0x129   :  { %v5823_v16 = vpop.f32.mrf.mxu0 }
 0x12a   :  { %6214 = vmatpush.bf16.msrb.mxu2 %v10947_v43 }
 0x12b   :  { %6295 = vmatpush.bf16.msra.mxu1 %v10977_v26 }
 0x12c   :  { %v5794_v27 = vpop.f32.mrf.mxu3 }
 0x12d   :  { %v5795_v30 = vadd.f32 %v5794_v27, %v12309_v3  ;;  %v10968_v3 = vld [vmem:[%s15008_s1 + $0x630] sm:$0xff] }
 0x12e   :  { %v5871_v31 = vpop.f32.mrf.mxu2  ;;  %6267 = vmatpush.bf16.msra.mxu0 %v10968_v3 }
 0x12f   :  { %v12429_v5 = vadd.f32 %v5871_v31, %v5843_v17  ;;  %v12431_v20 = vadd.f32 %v5823_v16, %v5795_v30  ;;  %v5845_v36 = vpop.f32.mrf.mxu1  ;;  %v10957_v16 = vld [vmem:[%s15008_s1 + $0x5d8] sm:$0xff]  ;;  %v10590_v30 = vld [vmem:[%s15007_s0 + $0x244] sm:$0xf]  ;;  %v7822_v31 = vld [vmem:[%s15007_s0 + $0x33c] sm:$0xf0]  ;;  %6296 = vmatpush.bf16.msra.mxu1 %v10976_v37 }
 0x130   :  { %v5846_v42 = vadd.f32 %v5845_v36, %v12329_v39  ;;  %v10985_v17 = vld [vmem:[%s15008_s1 + $0x6b8] sm:$0xff]  ;;  %6241 = vmatpush.bf16.msra.mxu3 %v10957_v16  ;;  %v7828_v36 = vld [vmem:[%s15007_s0 + $0x248] sm:$0xf] }
 0x131   :  { %v5826_v40 = vpop.f32.mrf.mxu0  ;;  %6028 = vmatmul.bf16.gmra.mxu3 %v8313_v32  ;;  %v8318_v32 = vld [vmem:[%s15007_s0 + $0x724] sm:$0xf0] }
 0x132   :  { %6076 = vmatmul.bf16.gmra.mxu1 %v7817_v33  ;;  %6268 = vmatpush.bf16.msra.mxu0 %v10967_v51  ;;  %v8324_v33 = vld [vmem:[%s15007_s0 + $0x630] sm:$0xf]  ;;  %v8321_v43 = vor.u32 %v10715_v12, %v8318_v32  ;;  %v10973_v32 = vld [vmem:[%s15008_s1 + $0x658] sm:$0xff] }
 0x133   :  { %6105 = vmatmul.bf16.gmra.mxu2 %v7821_v34  ;;  %v10747_v34 = vld [vmem:[%s15007_s0 + $0x728] sm:$0xf0]  ;;  %6297 = vmatpush.bf16.msra.mxu1 %v10975_v61 }
 0x134   :  { %6057 = vmatmul.bf16.gmra.mxu0 %v8317_v38  ;;  %v5797_v23 = vpop.f32.mrf.mxu3  ;;  %v10622_v38 = vld [vmem:[%s15007_s0 + $0x340] sm:$0xf0]  ;;  %v8325_v44 = vor.u32 %v10747_v34, %v8324_v33  ;;  %v11001_v33 = vld [vmem:[%s15008_s1 + $0x738] sm:$0xff] }
 0x135   :  { %v5798_v39 = vadd.f32 %v5797_v23, %v12327_v28  ;;  %v10946_v28 = vld [vmem:[%s15008_s1 + $0x580] sm:$0xff] }
 0x136   :  { %v5874_v47 = vpop.f32.mrf.mxu2  ;;  %6215 = vmatpush.bf16.msrb.mxu2 %v10946_v28  ;;  %6269 = vmatpush.bf16.msra.mxu0 %v10966_v14 }
 0x137   :  { %v12447_v48 = vadd.f32 %v5874_v47, %v5846_v42  ;;  %v12449_v49 = vadd.f32 %v5826_v40, %v5798_v39  ;;  %v5847_v50 = vpop.f32.mrf.mxu1  ;;  %v7825_v42 = vor.u32 %v10590_v30, %v7822_v31  ;;  %v7829_v47 = vor.u32 %v10622_v38, %v7828_v36  ;;  %v10992_v36 = vld [vmem:[%s15008_s1 + $0x6f0] sm:$0xff] }
 0x138   :  { %v5848_v53 = vadd.f32 %v5847_v50, %v12374_v63  ;;  %v7576_v63 = vld [vmem:[%s15007_s0 + $0x50] sm:$0xf]  ;;  %v10716_v38 = vld [vmem:[%s15007_s0 + $0x634] sm:$0xf] }
 0x139   :  { %v5828_v52 = vpop.f32.mrf.mxu0  ;;  %v7577_v13 = vor.u32 %v10559_v0, %v7576_v63  ;;  %v10964_v50 = vld [vmem:[%s15008_s1 + $0x610] sm:$0xff]  ;;  %v10982_v63 = vld [vmem:[%s15008_s1 + $0x6a0] sm:$0xff]  ;;  %v10653_v0 = vld [vmem:[%s15007_s0 + $0x43c] sm:$0xf] }
 0x13a   :  { %6324 = vmatpush.bf16.msra.mxu2 %v10985_v17  ;;  %6270 = vmatpush.bf16.msra.mxu0 %v10965_v25  ;;  %v10974_v25 = vld [vmem:[%s15008_s1 + $0x660] sm:$0xff] }
 0x13b   :  { %6298 = vmatpush.bf16.msra.mxu1 %v10974_v25 }
 0x13c   :  { %v5799_v45 = vpop.f32.mrf.mxu3 }
 0x13d   :  { %v5800_v2 = vadd.f32 %v5799_v45, %v12369_v60 }
 0x13e   :  { %v5876_v4 = vpop.f32.mrf.mxu2  ;;  %6325 = vmatpush.bf16.msra.mxu2 %v10984_v21  ;;  %6271 = vmatpush.bf16.msra.mxu0 %v10964_v50 }
 0x13f   :  { %v12489_v29 = vadd.f32 %v5876_v4, %v5848_v53  ;;  %v12494_v10 = vadd.f32 %v5828_v52, %v5800_v2  ;;  %v5850_v11 = vpop.f32.mrf.mxu1  ;;  %v10955_v52 = vld [vmem:[%s15008_s1 + $0x5c8] sm:$0xff]  ;;  %v8074_v2 = vld [vmem:[%s15007_s0 + $0x534] sm:$0xf0]  ;;  %v10528_v4 = vld [vmem:[%s15007_s0 + $0x54] sm:$0xf]  ;;  %6299 = vmatpush.bf16.msra.mxu1 %v10973_v32 }
 0x140   :  { %v5851_v60 = vadd.f32 %v5850_v11, %v12389_v57  ;;  %v10983_v53 = vld [vmem:[%s15008_s1 + $0x6a8] sm:$0xff]  ;;  %v10685_v11 = vld [vmem:[%s15007_s0 + $0x538] sm:$0xf0]  ;;  %v10998_v32 = vld [vmem:[%s15008_s1 + $0x720] sm:$0xff] }
 0x141   :  { %v5927_v15 = vpop.f32.mrf.mxu0  ;;  %6129 = vmatmul.bf16.vlgmr.msrb.gmra.mxu3 %v7573_v6  ;;  %v7578_v6 = vld [vmem:[%s15007_s0 + $0x14c] sm:$0xf0] }
 0x142   :  { %6081 = vmatmul.bf16.gmra.mxu1 %v8069_v8  ;;  %6326 = vmatpush.bf16.msra.mxu2 %v10983_v53  ;;  %v7584_v8 = vld [vmem:[%s15007_s0 + $0x58] sm:$0xf]  ;;  %v7581_v16 = vor.u32 %v10528_v4, %v7578_v6  ;;  %v10971_v6 = vld [vmem:[%s15008_s1 + $0x648] sm:$0xff] }
 0x143   :  { %6110 = vmatmul.bf16.gmra.mxu2 %v8073_v9  ;;  %6272 = vmatpush.bf16.msra.mxu0 %v10963_v41  ;;  %v10560_v9 = vld [vmem:[%s15007_s0 + $0x150] sm:$0xf0] }
 0x144   :  { %6158 = vmatmul.bf16.vlgmr.msrb.gmra.mxu0 %v7577_v13  ;;  %v5898_v56 = vpop.f32.mrf.mxu3  ;;  %v7585_v17 = vor.u32 %v10560_v9, %v7584_v8  ;;  %v10999_v8 = vld [vmem:[%s15008_s1 + $0x728] sm:$0xff] }
 0x145   :  { %v5899_v19 = vadd.f32 %v5898_v56, %v12387_v1  ;;  %v10956_v1 = vld [vmem:[%s15008_s1 + $0x5d0] sm:$0xff]  ;;  %v10962_v56 = vld [vmem:[%s15008_s1 + $0x600] sm:$0xff] }
 0x146   :  { %v5879_v18 = vpop.f32.mrf.mxu2  ;;  %6242 = vmatpush.bf16.msra.mxu3 %v10956_v1  ;;  %6327 = vmatpush.bf16.msra.mxu2 %v10982_v63 }
 0x147   :  { %v12507_v57 = vadd.f32 %v5879_v18, %v5851_v60  ;;  %v12509_v22 = vadd.f32 %v5927_v15, %v5899_v19  ;;  %v5852_v24 = vpop.f32.mrf.mxu1  ;;  %v8077_v60 = vor.u32 %v10653_v0, %v8074_v2  ;;  %6273 = vmatpush.bf16.msra.mxu0 %v10962_v56 }
 0x148   :  { %v5853_v7 = vadd.f32 %v5852_v24, %v12431_v20 }
 0x149   :  { %v5929_v27 = vpop.f32.mrf.mxu0 }
 0x14a   :  { %6243 = vmatpush.bf16.msra.mxu3 %v10955_v52 }
 0x14b   :  { %6382 = vmatpush.bf16.msrb.mxu0 %v11001_v33 }
 0x14c   :  { %v5900_v20 = vpop.f32.mrf.mxu3 }
 0x14d   :  { %v5901_v40 = vadd.f32 %v5900_v20, %v12429_v5 }
 0x14e   :  { %v5881_v35 = vpop.f32.mrf.mxu2 }
 0x14f   :  { %v12549_v3 = vadd.f32 %v5881_v35, %v5853_v7  ;;  %v12551_v23 = vadd.f32 %v5929_v27, %v5901_v40  ;;  %v5855_v39 = vpop.f32.mrf.mxu1  ;;  %v10981_v7 = vld [vmem:[%s15008_s1 + $0x698] sm:$0xff]  ;;  %v8326_v35 = vld [vmem:[%s15007_s0 + $0x72c] sm:$0xf0]  ;;  %v10591_v40 = vld [vmem:[%s15007_s0 + $0x24c] sm:$0xf] }
 0x150   :  { %v5856_v51 = vadd.f32 %v5855_v39, %v12449_v49  ;;  %v10993_v27 = vld [vmem:[%s15008_s1 + $0x6f8] sm:$0xff]  ;;  %6328 = vmatpush.bf16.msra.mxu2 %v10981_v7 }
 0x151   :  { %v5932_v5 = vpop.f32.mrf.mxu0  ;;  %6134 = vmatmul.bf16.gmra.mxu3 %v7825_v42  ;;  %v7830_v42 = vld [vmem:[%s15007_s0 + $0x344] sm:$0xf0]  ;;  %v8332_v39 = vld [vmem:[%s15007_s0 + $0x638] sm:$0xf] }
 0x152   :  { %6086 = vmatmul.bf16.gmra.mxu1 %v8321_v43  ;;  %v7836_v43 = vld [vmem:[%s15007_s0 + $0x250] sm:$0xf]  ;;  %v7833_v52 = vor.u32 %v10591_v40, %v7830_v42  ;;  %v10997_v42 = vld [vmem:[%s15008_s1 + $0x718] sm:$0xff] }
 0x153   :  { %6115 = vmatmul.bf16.gmra.mxu2 %v8325_v44  ;;  %v10623_v44 = vld [vmem:[%s15007_s0 + $0x348] sm:$0xf0] }
 0x154   :  { %6163 = vmatmul.bf16.gmra.mxu0 %v7829_v47  ;;  %v5903_v28 = vpop.f32.mrf.mxu3  ;;  %v10748_v47 = vld [vmem:[%s15007_s0 + $0x730] sm:$0xf0]  ;;  %v7837_v53 = vor.u32 %v10623_v44, %v7836_v43  ;;  %v11009_v43 = vld [vmem:[%s15008_s1 + $0x778] sm:$0xff] }
 0x155   :  { %v5904_v55 = vadd.f32 %v5903_v28, %v12447_v48  ;;  %v10954_v48 = vld [vmem:[%s15008_s1 + $0x5c0] sm:$0xff] }
 0x156   :  { %v5884_v54 = vpop.f32.mrf.mxu2  ;;  %6244 = vmatpush.bf16.msra.mxu3 %v10954_v48 }
 0x157   :  { %v12567_v49 = vadd.f32 %v5884_v54, %v5856_v51  ;;  %v12569_v58 = vadd.f32 %v5932_v5, %v5904_v55  ;;  %v5857_v59 = vpop.f32.mrf.mxu1  ;;  %v8329_v51 = vor.u32 %v10716_v38, %v8326_v35  ;;  %v8333_v55 = vor.u32 %v10748_v47, %v8332_v39  ;;  %v11016_v39 = vld [vmem:[%s15008_s1 + $0x7b0] sm:$0xff]  ;;  %v10717_v47 = vld [vmem:[%s15007_s0 + $0x63c] sm:$0xf] }
 0x158   :  { %v5858_v62 = vadd.f32 %v5857_v59, %v12494_v10  ;;  %v8080_v10 = vld [vmem:[%s15007_s0 + $0x440] sm:$0xf]  ;;  %v10972_v59 = vld [vmem:[%s15008_s1 + $0x650] sm:$0xff] }
 0x159   :  { %v5934_v45 = vpop.f32.mrf.mxu0  ;;  %v8081_v24 = vor.u32 %v10685_v11, %v8080_v10  ;;  %6300 = vmatpush.bf16.msra.mxu1 %v10972_v59  ;;  %v10990_v10 = vld [vmem:[%s15008_s1 + $0x6e0] sm:$0xff] }
 0x15a   :  { %6353 = vmatpush.bf16.msrb.mxu3 %v10993_v27  ;;  %v10654_v11 = vld [vmem:[%s15007_s0 + $0x444] sm:$0xf] }
 0x15c   :  { %v5905_v46 = vpop.f32.mrf.mxu3 }
 0x15d   :  { %v5906_v14 = vadd.f32 %v5905_v46, %v12489_v29  ;;  %6301 = vmatpush.bf16.msra.mxu1 %v10971_v6  ;;  %v11008_v6 = vld [vmem:[%s15008_s1 + $0x770] sm:$0xff] }
 0x15e   :  { %v5886_v13 = vpop.f32.mrf.mxu2  ;;  %6354 = vmatpush.bf16.msrb.mxu3 %v10992_v36 }
 0x15f   :  { %v12609_v15 = vadd.f32 %v5886_v13, %v5858_v62  ;;  %v12614_v18 = vadd.f32 %v5934_v45, %v5906_v14  ;;  %v5956_v19 = vpop.f32.mrf.mxu1  ;;  %v10979_v62 = vld [vmem:[%s15008_s1 + $0x688] sm:$0xff]  ;;  %v10529_v13 = vld [vmem:[%s15007_s0 + $0x5c] sm:$0xf]  ;;  %v7586_v14 = vld [vmem:[%s15007_s0 + $0x154] sm:$0xf0] }
 0x160   :  { %v5957_v29 = vadd.f32 %v5956_v19, %v12509_v22  ;;  %v10991_v45 = vld [vmem:[%s15008_s1 + $0x6e8] sm:$0xff]  ;;  %v10561_v19 = vld [vmem:[%s15007_s0 + $0x158] sm:$0xf0] }
 0x161   :  { %v5937_v26 = vpop.f32.mrf.mxu0  ;;  %6139 = vmatmul.bf16.gmra.mxu3 %v8077_v60  ;;  %v8082_v60 = vld [vmem:[%s15007_s0 + $0x53c] sm:$0xf0] }
 0x162   :  { %6187 = vmatmul.bf16.vlgmr.msrb.gmra.mxu1 %v7581_v16  ;;  %6355 = vmatpush.bf16.msrb.mxu3 %v10991_v45  ;;  %v8088_v16 = vld [vmem:[%s15007_s0 + $0x448] sm:$0xf]  ;;  %v8085_v7 = vor.u32 %v10654_v11, %v8082_v60 }
 0x163   :  { %6216 = vmatmul.bf16.vlgmr.msrb.gmra.mxu2 %v7585_v17  ;;  %v10686_v17 = vld [vmem:[%s15007_s0 + $0x540] sm:$0xf0]  ;;  %v10995_v60 = vld [vmem:[%s15008_s1 + $0x708] sm:$0xff] }
 0x164   :  { %6168 = vmatmul.bf16.gmra.mxu0 %v8081_v24  ;;  %v5908_v1 = vpop.f32.mrf.mxu3  ;;  %v8089_v27 = vor.u32 %v10686_v17, %v8088_v16  ;;  %v11007_v16 = vld [vmem:[%s15008_s1 + $0x768] sm:$0xff] }
 0x165   :  { %v5909_v21 = vadd.f32 %v5908_v1, %v12507_v57  ;;  %v10980_v57 = vld [vmem:[%s15008_s1 + $0x690] sm:$0xff]  ;;  %v10970_v1 = vld [vmem:[%s15008_s1 + $0x640] sm:$0xff] }
 0x166   :  { %v5985_v12 = vpop.f32.mrf.mxu2  ;;  %6329 = vmatpush.bf16.msra.mxu2 %v10980_v57  ;;  %6356 = vmatpush.bf16.msrb.mxu3 %v10990_v10 }
 0x167   :  { %v12627_v22 = vadd.f32 %v5985_v12, %v5957_v29  ;;  %v12629_v30 = vadd.f32 %v5937_v26, %v5909_v21  ;;  %v5958_v31 = vpop.f32.mrf.mxu1  ;;  %v7589_v26 = vor.u32 %v10529_v13, %v7586_v14  ;;  %6302 = vmatpush.bf16.msra.mxu1 %v10970_v1 }
 0x168   :  { %v5959_v20 = vadd.f32 %v5958_v31, %v12551_v23 }
 0x169   :  { %v5939_v34 = vpop.f32.mrf.mxu0 }
 0x16a   :  { %6330 = vmatpush.bf16.msra.mxu2 %v10979_v62 }
 0x16b   :  { %6411 = vmatpush.bf16.msrb.mxu1 %v11009_v43 }
 0x16c   :  { %v5910_v23 = vpop.f32.mrf.mxu3 }
 0x16d   :  { %v5911_v50 = vadd.f32 %v5910_v23, %v12549_v3  ;;  %v11000_v3 = vld [vmem:[%s15008_s1 + $0x730] sm:$0xff] }
 0x16e   :  { %v5987_v37 = vpop.f32.mrf.mxu2  ;;  %6383 = vmatpush.bf16.msrb.mxu0 %v11000_v3 }
 0x16f   :  { %v12669_v5 = vadd.f32 %v5987_v37, %v5959_v20  ;;  %v12671_v28 = vadd.f32 %v5939_v34, %v5911_v50  ;;  %v5961_v54 = vpop.f32.mrf.mxu1  ;;  %v10989_v34 = vld [vmem:[%s15008_s1 + $0x6d8] sm:$0xff]  ;;  %v10592_v50 = vld [vmem:[%s15007_s0 + $0x254] sm:$0xf]  ;;  %v7838_v37 = vld [vmem:[%s15007_s0 + $0x34c] sm:$0xf0]  ;;  %6412 = vmatpush.bf16.msrb.mxu1 %v11008_v6 }
 0x170   :  { %v5962_v61 = vadd.f32 %v5961_v54, %v12569_v58  ;;  %v11017_v20 = vld [vmem:[%s15008_s1 + $0x7b8] sm:$0xff]  ;;  %6357 = vmatpush.bf16.msrb.mxu3 %v10989_v34 }
 0x171   :  { %v5942_v41 = vpop.f32.mrf.mxu0  ;;  %6144 = vmatmul.bf16.gmra.mxu3 %v8329_v51  ;;  %v8334_v51 = vld [vmem:[%s15007_s0 + $0x734] sm:$0xf0] }
 0x172   :  { %6192 = vmatmul.bf16.gmra.mxu1 %v7833_v52  ;;  %6384 = vmatpush.bf16.msrb.mxu0 %v10999_v8  ;;  %v8340_v52 = vld [vmem:[%s15007_s0 + $0x640] sm:$0xf]  ;;  %v7844_v54 = vld [vmem:[%s15007_s0 + $0x258] sm:$0xf]  ;;  %v8337_v62 = vor.u32 %v10717_v47, %v8334_v51 }
 0x173   :  { %6221 = vmatmul.bf16.gmra.mxu2 %v7837_v53  ;;  %v10749_v53 = vld [vmem:[%s15007_s0 + $0x738] sm:$0xf0]  ;;  %6413 = vmatpush.bf16.msrb.mxu1 %v11007_v16 }
 0x174   :  { %6173 = vmatmul.bf16.gmra.mxu0 %v8333_v55  ;;  %v5913_v48 = vpop.f32.mrf.mxu3  ;;  %v10624_v55 = vld [vmem:[%s15007_s0 + $0x350] sm:$0xf0]  ;;  %v8341_v45 = vor.u32 %v10749_v53, %v8340_v52  ;;  %v11005_v51 = vld [vmem:[%s15008_s1 + $0x758] sm:$0xff] }
 0x175   :  { %v5914_v58 = vadd.f32 %v5913_v48, %v12567_v49  ;;  %v10978_v49 = vld [vmem:[%s15008_s1 + $0x680] sm:$0xff]  ;;  %v11033_v52 = vld [vmem:[%s15008_s1 + $0x838] sm:$0xff] }
 0x176   :  { %v5990_v63 = vpop.f32.mrf.mxu2  ;;  %6331 = vmatpush.bf16.msra.mxu2 %v10978_v49  ;;  %6385 = vmatpush.bf16.msrb.mxu0 %v10998_v32 }
 0x177   :  { %v12687_v0 = vadd.f32 %v5990_v63, %v5962_v61  ;;  %v12689_v2 = vadd.f32 %v5942_v41, %v5914_v58  ;;  %v5963_v4 = vpop.f32.mrf.mxu1  ;;  %v7841_v61 = vor.u32 %v10592_v50, %v7838_v37  ;;  %v7845_v63 = vor.u32 %v10624_v55, %v7844_v54  ;;  %v11024_v54 = vld [vmem:[%s15008_s1 + $0x7f0] sm:$0xff]  ;;  %v10718_v55 = vld [vmem:[%s15007_s0 + $0x644] sm:$0xf] }
 0x178   :  { %v5964_v46 = vadd.f32 %v5963_v4, %v12614_v18  ;;  %v7592_v18 = vld [vmem:[%s15007_s0 + $0x60] sm:$0xf]  ;;  %v10996_v4 = vld [vmem:[%s15008_s1 + $0x710] sm:$0xff] }
 0x179   :  { %v5944_v9 = vpop.f32.mrf.mxu0  ;;  %v7593_v31 = vor.u32 %v10561_v19, %v7592_v18  ;;  %v11014_v18 = vld [vmem:[%s15008_s1 + $0x7a0] sm:$0xff]  ;;  %v10655_v19 = vld [vmem:[%s15007_s0 + $0x44c] sm:$0xf] }
 0x17a   :  { %6440 = vmatpush.bf16.msrb.mxu2 %v11017_v20  ;;  %6386 = vmatpush.bf16.msrb.mxu0 %v10997_v42  ;;  %v11006_v42 = vld [vmem:[%s15008_s1 + $0x760] sm:$0xff] }
 0x17b   :  { %6414 = vmatpush.bf16.msrb.mxu1 %v11006_v42 }
 0x17c   :  { %v5915_v56 = vpop.f32.mrf.mxu3 }
 0x17d   :  { %v5916_v24 = vadd.f32 %v5915_v56, %v12609_v15 }
 0x17e   :  { %v5992_v25 = vpop.f32.mrf.mxu2  ;;  %6441 = vmatpush.bf16.msrb.mxu2 %v11016_v39  ;;  %6387 = vmatpush.bf16.msrb.mxu0 %v10996_v4 }
 0x17f   :  { %v12729_v29 = vadd.f32 %v5992_v25, %v5964_v46  ;;  %v12734_v21 = vadd.f32 %v5944_v9, %v5916_v24  ;;  %v5966_v12 = vpop.f32.mrf.mxu1  ;;  %v10987_v9 = vld [vmem:[%s15008_s1 + $0x6c8] sm:$0xff]  ;;  %v10530_v25 = vld [vmem:[%s15007_s0 + $0x64] sm:$0xf]  ;;  %6415 = vmatpush.bf16.msrb.mxu1 %v11005_v51 }
 0x180   :  { %v5967_v15 = vadd.f32 %v5966_v12, %v12629_v30  ;;  %v11015_v46 = vld [vmem:[%s15008_s1 + $0x7a8] sm:$0xff]  ;;  %v11030_v51 = vld [vmem:[%s15008_s1 + $0x820] sm:$0xff] }
 0x181   :  { %v6043_v33 = vpop.f32.mrf.mxu0  ;;  %6245 = vmatmul.bf16.vlgmr.msra.gmra.mxu3 %v7589_v26  ;;  %v8090_v24 = vld [vmem:[%s15007_s0 + $0x544] sm:$0xf0]  ;;  %v7594_v26 = vld [vmem:[%s15007_s0 + $0x15c] sm:$0xf0]  ;;  %v10687_v12 = vld [vmem:[%s15007_s0 + $0x548] sm:$0xf0] }
 0x182   :  { %6197 = vmatmul.bf16.gmra.mxu1 %v8085_v7  ;;  %6442 = vmatpush.bf16.msrb.mxu2 %v11015_v46  ;;  %v7600_v7 = vld [vmem:[%s15007_s0 + $0x68] sm:$0xf]  ;;  %v7597_v34 = vor.u32 %v10530_v25, %v7594_v26 }
 0x183   :  { %6226 = vmatmul.bf16.gmra.mxu2 %v8089_v27  ;;  %6388 = vmatpush.bf16.msrb.mxu0 %v10995_v60  ;;  %v10562_v27 = vld [vmem:[%s15007_s0 + $0x160] sm:$0xf0]  ;;  %v11003_v26 = vld [vmem:[%s15008_s1 + $0x748] sm:$0xff] }
 0x184   :  { %6274 = vmatmul.bf16.vlgmr.msra.gmra.mxu0 %v7593_v31  ;;  %v6014_v57 = vpop.f32.mrf.mxu3  ;;  %v7601_v20 = vor.u32 %v10562_v27, %v7600_v7  ;;  %v11031_v7 = vld [vmem:[%s15008_s1 + $0x828] sm:$0xff] }
 0x185   :  { %v6015_v38 = vadd.f32 %v6014_v57, %v12627_v22  ;;  %v10988_v22 = vld [vmem:[%s15008_s1 + $0x6d0] sm:$0xff]  ;;  %v10994_v57 = vld [vmem:[%s15008_s1 + $0x700] sm:$0xff] }
 0x186   :  { %v5995_v36 = vpop.f32.mrf.mxu2  ;;  %6358 = vmatpush.bf16.msrb.mxu3 %v10988_v22  ;;  %6443 = vmatpush.bf16.msrb.mxu2 %v11014_v18 }
 0x187   :  { %v12747_v30 = vadd.f32 %v5995_v36, %v5967_v15  ;;  %v12749_v35 = vadd.f32 %v6043_v33, %v6015_v38  ;;  %v5968_v40 = vpop.f32.mrf.mxu1  ;;  %v8093_v15 = vor.u32 %v10655_v19, %v8090_v24  ;;  %6389 = vmatpush.bf16.msrb.mxu0 %v10994_v57 }
 0x188   :  { %v5969_v44 = vadd.f32 %v5968_v40, %v12671_v28 }
 0x189   :  { %v6045_v23 = vpop.f32.mrf.mxu0 }
 0x18a   :  { %6359 = vmatpush.bf16.msrb.mxu3 %v10987_v9 }
 0x18b   :  { %6498 = vmatpush.bf16.msra.mxu0 %v11033_v52 }
 0x18c   :  { %v6016_v28 = vpop.f32.mrf.mxu3 }
 0x18d   :  { %v6017_v41 = vadd.f32 %v6016_v28, %v12669_v5 }
 0x18e   :  { %v5997_v59 = vpop.f32.mrf.mxu2 }
 0x18f   :  { %v12789_v3 = vadd.f32 %v5997_v59, %v5969_v44  ;;  %v12791_v48 = vadd.f32 %v6045_v23, %v6017_v41  ;;  %v5971_v58 = vpop.f32.mrf.mxu1  ;;  %v11013_v44 = vld [vmem:[%s15008_s1 + $0x798] sm:$0xff]  ;;  %v8342_v59 = vld [vmem:[%s15007_s0 + $0x73c] sm:$0xf0] }
 0x190   :  { %v5972_v8 = vadd.f32 %v5971_v58, %v12689_v2  ;;  %v11025_v23 = vld [vmem:[%s15008_s1 + $0x7f8] sm:$0xff]  ;;  %6444 = vmatpush.bf16.msrb.mxu2 %v11013_v44  ;;  %v8348_v58 = vld [vmem:[%s15007_s0 + $0x648] sm:$0xf] }
 0x191   :  { %v6048_v5 = vpop.f32.mrf.mxu0  ;;  %6250 = vmatmul.bf16.gmra.mxu3 %v7841_v61  ;;  %v10593_v41 = vld [vmem:[%s15007_s0 + $0x25c] sm:$0xf]  ;;  %v7846_v61 = vld [vmem:[%s15007_s0 + $0x354] sm:$0xf0] }
 0x192   :  { %6202 = vmatmul.bf16.gmra.mxu1 %v8337_v62  ;;  %v7852_v62 = vld [vmem:[%s15007_s0 + $0x260] sm:$0xf]  ;;  %v7849_v9 = vor.u32 %v10593_v41, %v7846_v61  ;;  %v11029_v61 = vld [vmem:[%s15008_s1 + $0x818] sm:$0xff] }
 0x193   :  { %6231 = vmatmul.bf16.gmra.mxu2 %v8341_v45  ;;  %v10625_v45 = vld [vmem:[%s15007_s0 + $0x358] sm:$0xf0] }
 0x194   :  { %6279 = vmatmul.bf16.gmra.mxu0 %v7845_v63  ;;  %v6019_v49 = vpop.f32.mrf.mxu3  ;;  %v10750_v63 = vld [vmem:[%s15007_s0 + $0x740] sm:$0xf0]  ;;  %v7853_v46 = vor.u32 %v10625_v45, %v7852_v62  ;;  %v11041_v62 = vld [vmem:[%s15008_s1 + $0x878] sm:$0xff] }
 0x195   :  { %v6020_v11 = vadd.f32 %v6019_v49, %v12687_v0  ;;  %v10986_v0 = vld [vmem:[%s15008_s1 + $0x6c0] sm:$0xff] }
 0x196   :  { %v6000_v10 = vpop.f32.mrf.mxu2  ;;  %6360 = vmatpush.bf16.msrb.mxu3 %v10986_v0 }
 0x197   :  { %v12807_v2 = vadd.f32 %v6000_v10, %v5972_v8  ;;  %v12809_v13 = vadd.f32 %v6048_v5, %v6020_v11  ;;  %v5973_v14 = vpop.f32.mrf.mxu1  ;;  %v8345_v8 = vor.u32 %v10718_v55, %v8342_v59  ;;  %v8349_v11 = vor.u32 %v10750_v63, %v8348_v58  ;;  %v11048_v58 = vld [vmem:[%s15008_s1 + $0x8b0] sm:$0xff]  ;;  %v10719_v63 = vld [vmem:[%s15007_s0 + $0x64c] sm:$0xf] }
 0x198   :  { %v5974_v17 = vadd.f32 %v5973_v14, %v12734_v21  ;;  %v8096_v21 = vld [vmem:[%s15007_s0 + $0x450] sm:$0xf] }
 0x199   :  { %v6050_v56 = vpop.f32.mrf.mxu0  ;;  %v8097_v40 = vor.u32 %v10687_v12, %v8096_v21  ;;  %v11004_v14 = vld [vmem:[%s15008_s1 + $0x750] sm:$0xff]  ;;  %v11022_v21 = vld [vmem:[%s15008_s1 + $0x7e0] sm:$0xff] }
 0x19a   :  { %6469 = vmatpush.bf16.msra.mxu3 %v11025_v23  ;;  %6416 = vmatpush.bf16.msrb.mxu1 %v11004_v14  ;;  %v10656_v12 = vld [vmem:[%s15007_s0 + $0x454] sm:$0xf] }
 0x19c   :  { %v6021_v1 = vpop.f32.mrf.mxu3 }
 0x19d   :  { %v6022_v32 = vadd.f32 %v6021_v1, %v12729_v29 }
 0x19e   :  { %v6002_v31 = vpop.f32.mrf.mxu2  ;;  %6470 = vmatpush.bf16.msra.mxu3 %v11024_v54  ;;  %6417 = vmatpush.bf16.msrb.mxu1 %v11003_v26  ;;  %v11040_v26 = vld [vmem:[%s15008_s1 + $0x870] sm:$0xff] }
 0x19f   :  { %v12849_v33 = vadd.f32 %v6002_v31, %v5974_v17  ;;  %v12854_v36 = vadd.f32 %v6050_v56, %v6022_v32  ;;  %v6072_v38 = vpop.f32.mrf.mxu1  ;;  %v11011_v17 = vld [vmem:[%s15008_s1 + $0x788] sm:$0xff] }
 0x1a0   :  { %v6073_v29 = vadd.f32 %v6072_v38, %v12749_v35  ;;  %v11023_v56 = vld [vmem:[%s15008_s1 + $0x7e8] sm:$0xff] }
 0x1a1   :  { %v6053_v43 = vpop.f32.mrf.mxu0  ;;  %6255 = vmatmul.bf16.gmra.mxu3 %v8093_v15  ;;  %v10531_v31 = vld [vmem:[%s15007_s0 + $0x6c] sm:$0xf]  ;;  %v7602_v32 = vld [vmem:[%s15007_s0 + $0x164] sm:$0xf0]  ;;  %v8098_v15 = vld [vmem:[%s15007_s0 + $0x54c] sm:$0xf0] }
 0x1a2   :  { %6303 = vmatmul.bf16.vlgmr.msra.gmra.mxu1 %v7597_v34  ;;  %6471 = vmatpush.bf16.msra.mxu3 %v11023_v56  ;;  %v8104_v34 = vld [vmem:[%s15007_s0 + $0x458] sm:$0xf]  ;;  %v10563_v38 = vld [vmem:[%s15007_s0 + $0x168] sm:$0xf0]  ;;  %v8101_v44 = vor.u32 %v10656_v12, %v8098_v15 }
 0x1a3   :  { %6332 = vmatmul.bf16.vlgmr.msra.gmra.mxu2 %v7601_v20  ;;  %v10688_v20 = vld [vmem:[%s15007_s0 + $0x550] sm:$0xf0]  ;;  %v11027_v15 = vld [vmem:[%s15008_s1 + $0x808] sm:$0xff] }
 0x1a4   :  { %6284 = vmatmul.bf16.gmra.mxu0 %v8097_v40  ;;  %v6024_v22 = vpop.f32.mrf.mxu3  ;;  %v8105_v23 = vor.u32 %v10688_v20, %v8104_v34  ;;  %v11039_v34 = vld [vmem:[%s15008_s1 + $0x868] sm:$0xff] }
 0x1a5   :  { %v6025_v39 = vadd.f32 %v6024_v22, %v12747_v30  ;;  %v11012_v30 = vld [vmem:[%s15008_s1 + $0x790] sm:$0xff]  ;;  %v11002_v22 = vld [vmem:[%s15008_s1 + $0x740] sm:$0xff] }
 0x1a6   :  { %v6101_v47 = vpop.f32.mrf.mxu2  ;;  %6445 = vmatpush.bf16.msrb.mxu2 %v11012_v30  ;;  %6472 = vmatpush.bf16.msra.mxu3 %v11022_v21 }
 0x1a7   :  { %v12867_v35 = vadd.f32 %v6101_v47, %v6073_v29  ;;  %v12869_v50 = vadd.f32 %v6053_v43, %v6025_v39  ;;  %v6074_v37 = vpop.f32.mrf.mxu1  ;;  %v7605_v43 = vor.u32 %v10531_v31, %v7602_v32  ;;  %6418 = vmatpush.bf16.msrb.mxu1 %v11002_v22 }
 0x1a8   :  { %v6075_v28 = vadd.f32 %v6074_v37, %v12791_v48 }
 0x1a9   :  { %v6055_v53 = vpop.f32.mrf.mxu0 }
 0x1aa   :  { %6446 = vmatpush.bf16.msrb.mxu2 %v11011_v17 }
 0x1ab   :  { %6527 = vmatpush.bf16.msra.mxu1 %v11041_v62 }
 0x1ac   :  { %v6026_v48 = vpop.f32.mrf.mxu3 }
 0x1ad   :  { %v6027_v4 = vadd.f32 %v6026_v48, %v12789_v3  ;;  %v11032_v3 = vld [vmem:[%s15008_s1 + $0x830] sm:$0xff] }
 0x1ae   :  { %v6103_v6 = vpop.f32.mrf.mxu2  ;;  %6499 = vmatpush.bf16.msra.mxu0 %v11032_v3 }
 0x1af   :  { %v12909_v5 = vadd.f32 %v6103_v6, %v6075_v28  ;;  %v12911_v49 = vadd.f32 %v6055_v53, %v6027_v4  ;;  %v6077_v10 = vpop.f32.mrf.mxu1  ;;  %v11021_v53 = vld [vmem:[%s15008_s1 + $0x7d8] sm:$0xff]  ;;  %v10594_v4 = vld [vmem:[%s15007_s0 + $0x264] sm:$0xf]  ;;  %v7854_v6 = vld [vmem:[%s15007_s0 + $0x35c] sm:$0xf0]  ;;  %6528 = vmatpush.bf16.msra.mxu1 %v11040_v26 }
 0x1b0   :  { %v6078_v16 = vadd.f32 %v6077_v10, %v12809_v13  ;;  %v11049_v28 = vld [vmem:[%s15008_s1 + $0x8b8] sm:$0xff]  ;;  %6473 = vmatpush.bf16.msra.mxu3 %v11021_v53  ;;  %v7860_v10 = vld [vmem:[%s15007_s0 + $0x268] sm:$0xf] }
 0x1b1   :  { %v6058_v60 = vpop.f32.mrf.mxu0  ;;  %6260 = vmatmul.bf16.gmra.mxu3 %v8345_v8  ;;  %v8350_v8 = vld [vmem:[%s15007_s0 + $0x744] sm:$0xf0] }
 0x1b2   :  { %6308 = vmatmul.bf16.gmra.mxu1 %v7849_v9  ;;  %6500 = vmatpush.bf16.msra.mxu0 %v11031_v7  ;;  %v8356_v9 = vld [vmem:[%s15007_s0 + $0x650] sm:$0xf]  ;;  %v8353_v17 = vor.u32 %v10719_v63, %v8350_v8 }
 0x1b3   :  { %6337 = vmatmul.bf16.gmra.mxu2 %v7853_v46  ;;  %v10751_v46 = vld [vmem:[%s15007_s0 + $0x748] sm:$0xf0]  ;;  %6529 = vmatpush.bf16.msra.mxu1 %v11039_v34 }
 0x1b4   :  { %6289 = vmatmul.bf16.gmra.mxu0 %v8349_v11  ;;  %v6029_v0 = vpop.f32.mrf.mxu3  ;;  %v10626_v11 = vld [vmem:[%s15007_s0 + $0x360] sm:$0xf0]  ;;  %v8357_v56 = vor.u32 %v10751_v46, %v8356_v9 }
 0x1b5   :  { %v6030_v13 = vadd.f32 %v6029_v0, %v12807_v2  ;;  %v11010_v2 = vld [vmem:[%s15008_s1 + $0x780] sm:$0xff] }
 0x1b6   :  { %v6106_v18 = vpop.f32.mrf.mxu2  ;;  %6447 = vmatpush.bf16.msrb.mxu2 %v11010_v2  ;;  %6501 = vmatpush.bf16.msra.mxu0 %v11030_v51 }
 0x1b7   :  { %v12927_v19 = vadd.f32 %v6106_v18, %v6078_v16  ;;  %v12929_v24 = vadd.f32 %v6058_v60, %v6030_v13  ;;  %v6079_v25 = vpop.f32.mrf.mxu1  ;;  %v7857_v16 = vor.u32 %v10594_v4, %v7854_v6  ;;  %v7861_v18 = vor.u32 %v10626_v11, %v7860_v10  ;;  %v11037_v4 = vld [vmem:[%s15008_s1 + $0x858] sm:$0xff]  ;;  %v11056_v10 = vld [vmem:[%s15008_s1 + $0x8f0] sm:$0xff] }
 0x1b8   :  { %v6080_v1 = vadd.f32 %v6079_v25, %v12854_v36  ;;  %v7608_v36 = vld [vmem:[%s15007_s0 + $0x70] sm:$0xf]  ;;  %v11065_v6 = vld [vmem:[%s15008_s1 + $0x938] sm:$0xff]  ;;  %v10720_v11 = vld [vmem:[%s15007_s0 + $0x654] sm:$0xf] }
 0x1b9   :  { %v6060_v27 = vpop.f32.mrf.mxu0  ;;  %v7609_v37 = vor.u32 %v10563_v38, %v7608_v36  ;;  %v11028_v25 = vld [vmem:[%s15008_s1 + $0x810] sm:$0xff]  ;;  %v11046_v36 = vld [vmem:[%s15008_s1 + $0x8a0] sm:$0xff]  ;;  %v10657_v38 = vld [vmem:[%s15007_s0 + $0x45c] sm:$0xf] }
 0x1ba   :  { %6556 = vmatpush.bf16.msra.mxu2 %v11049_v28  ;;  %6502 = vmatpush.bf16.msra.mxu0 %v11029_v61  ;;  %v11038_v61 = vld [vmem:[%s15008_s1 + $0x860] sm:$0xff] }
 0x1bb   :  { %6530 = vmatpush.bf16.msra.mxu1 %v11038_v61 }
 0x1bc   :  { %v6031_v57 = vpop.f32.mrf.mxu3 }
 0x1bd   :  { %v6032_v40 = vadd.f32 %v6031_v57, %v12849_v33 }
 0x1be   :  { %v6108_v42 = vpop.f32.mrf.mxu2  ;;  %6557 = vmatpush.bf16.msra.mxu2 %v11048_v58  ;;  %6503 = vmatpush.bf16.msra.mxu0 %v11028_v25 }
 0x1bf   :  { %v12969_v29 = vadd.f32 %v6108_v42, %v6080_v1  ;;  %v12974_v39 = vadd.f32 %v6060_v27, %v6032_v40  ;;  %v6082_v47 = vpop.f32.mrf.mxu1  ;;  %v11019_v27 = vld [vmem:[%s15008_s1 + $0x7c8] sm:$0xff]  ;;  %v8106_v40 = vld [vmem:[%s15007_s0 + $0x554] sm:$0xf0]  ;;  %v10532_v42 = vld [vmem:[%s15007_s0 + $0x74] sm:$0xf]  ;;  %6531 = vmatpush.bf16.msra.mxu1 %v11037_v4 }
 0x1c0   :  { %v6083_v33 = vadd.f32 %v6082_v47, %v12869_v50  ;;  %v11047_v1 = vld [vmem:[%s15008_s1 + $0x8a8] sm:$0xff]  ;;  %v10689_v47 = vld [vmem:[%s15007_s0 + $0x558] sm:$0xf0] }
 0x1c1   :  { %v6159_v52 = vpop.f32.mrf.mxu0  ;;  %6361 = vmatmul.bf16.vlgmr.msrb.gmra.mxu3 %v7605_v43  ;;  %v7610_v43 = vld [vmem:[%s15007_s0 + $0x16c] sm:$0xf0] }
 0x1c2   :  { %6313 = vmatmul.bf16.gmra.mxu1 %v8101_v44  ;;  %6558 = vmatpush.bf16.msra.mxu2 %v11047_v1  ;;  %v7616_v44 = vld [vmem:[%s15007_s0 + $0x78] sm:$0xf]  ;;  %v7613_v53 = vor.u32 %v10532_v42, %v7610_v43  ;;  %v11063_v42 = vld [vmem:[%s15008_s1 + $0x928] sm:$0xff] }
 0x1c3   :  { %6342 = vmatmul.bf16.gmra.mxu2 %v8105_v23  ;;  %6504 = vmatpush.bf16.msra.mxu0 %v11027_v15  ;;  %v10564_v23 = vld [vmem:[%s15007_s0 + $0x170] sm:$0xf0] }
 0x1c4   :  { %6390 = vmatmul.bf16.vlgmr.msrb.gmra.mxu0 %v7609_v37  ;;  %v6130_v30 = vpop.f32.mrf.mxu3  ;;  %v7617_v28 = vor.u32 %v10564_v23, %v7616_v44 }
 0x1c5   :  { %v6131_v55 = vadd.f32 %v6130_v30, %v12867_v35  ;;  %v11020_v35 = vld [vmem:[%s15008_s1 + $0x7d0] sm:$0xff]  ;;  %v11026_v30 = vld [vmem:[%s15008_s1 + $0x800] sm:$0xff] }
 0x1c6   :  { %v6111_v54 = vpop.f32.mrf.mxu2  ;;  %6474 = vmatpush.bf16.msra.mxu3 %v11020_v35  ;;  %6559 = vmatpush.bf16.msra.mxu2 %v11046_v36 }
 0x1c7   :  { %v12987_v50 = vadd.f32 %v6111_v54, %v6083_v33  ;;  %v12989_v59 = vadd.f32 %v6159_v52, %v6131_v55  ;;  %v6084_v41 = vpop.f32.mrf.mxu1  ;;  %v8109_v33 = vor.u32 %v10657_v38, %v8106_v40  ;;  %6505 = vmatpush.bf16.msra.mxu0 %v11026_v30  ;;  %v11035_v40 = vld [vmem:[%s15008_s1 + $0x848] sm:$0xff] }
 0x1c8   :  { %v6085_v45 = vadd.f32 %v6084_v41, %v12911_v49 }
 0x1c9   :  { %v6161_v48 = vpop.f32.mrf.mxu0 }
 0x1ca   :  { %6475 = vmatpush.bf16.msra.mxu3 %v11019_v27 }
 0x1cb   :  { %6614 = vmatpush.bf16.msrb.mxu0 %v11065_v6 }
 0x1cc   :  { %v6132_v49 = vpop.f32.mrf.mxu3 }
 0x1cd   :  { %v6133_v60 = vadd.f32 %v6132_v49, %v12909_v5 }
 0x1ce   :  { %v6113_v14 = vpop.f32.mrf.mxu2 }
 0x1cf   :  { %v13029_v3 = vadd.f32 %v6113_v14, %v6085_v45  ;;  %v13031_v0 = vadd.f32 %v6161_v48, %v6133_v60  ;;  %v6087_v13 = vpop.f32.mrf.mxu1  ;;  %v11045_v45 = vld [vmem:[%s15008_s1 + $0x898] sm:$0xff]  ;;  %v8358_v14 = vld [vmem:[%s15007_s0 + $0x74c] sm:$0xf0]  ;;  %v10595_v60 = vld [vmem:[%s15007_s0 + $0x26c] sm:$0xf] }
 0x1d0   :  { %v6088_v7 = vadd.f32 %v6087_v13, %v12929_v24  ;;  %v11057_v48 = vld [vmem:[%s15008_s1 + $0x8f8] sm:$0xff]  ;;  %6560 = vmatpush.bf16.msra.mxu2 %v11045_v45 }
 0x1d1   :  { %v6164_v5 = vpop.f32.mrf.mxu0  ;;  %6366 = vmatmul.bf16.gmra.mxu3 %v7857_v16  ;;  %v7862_v16 = vld [vmem:[%s15007_s0 + $0x364] sm:$0xf0]  ;;  %v8364_v13 = vld [vmem:[%s15007_s0 + $0x658] sm:$0xf] }
 0x1d2   :  { %6318 = vmatmul.bf16.gmra.mxu1 %v8353_v17  ;;  %v7868_v17 = vld [vmem:[%s15007_s0 + $0x270] sm:$0xf]  ;;  %v7865_v27 = vor.u32 %v10595_v60, %v7862_v16  ;;  %v11073_v60 = vld [vmem:[%s15008_s1 + $0x978] sm:$0xff] }
 0x1d3   :  { %6347 = vmatmul.bf16.gmra.mxu2 %v8357_v56  ;;  %v10627_v56 = vld [vmem:[%s15007_s0 + $0x368] sm:$0xf0] }
 0x1d4   :  { %6395 = vmatmul.bf16.gmra.mxu0 %v7861_v18  ;;  %v6135_v2 = vpop.f32.mrf.mxu3  ;;  %v10752_v18 = vld [vmem:[%s15007_s0 + $0x750] sm:$0xf0]  ;;  %v7869_v1 = vor.u32 %v10627_v56, %v7868_v17 }
 0x1d5   :  { %v6136_v12 = vadd.f32 %v6135_v2, %v12927_v19  ;;  %v11018_v19 = vld [vmem:[%s15008_s1 + $0x7c0] sm:$0xff]  ;;  %v11036_v2 = vld [vmem:[%s15008_s1 + $0x850] sm:$0xff]  ;;  %v8365_v15 = vor.u32 %v10752_v18, %v8364_v13  ;;  %v10721_v18 = vld [vmem:[%s15007_s0 + $0x65c] sm:$0xf] }
 0x1d6   :  { %v6116_v21 = vpop.f32.mrf.mxu2  ;;  %6476 = vmatpush.bf16.msra.mxu3 %v11018_v19  ;;  %6532 = vmatpush.bf16.msra.mxu1 %v11036_v2  ;;  %v11080_v13 = vld [vmem:[%s15008_s1 + $0x9b0] sm:$0xff] }
 0x1d7   :  { %v13047_v24 = vadd.f32 %v6116_v21, %v6088_v7  ;;  %v13049_v31 = vadd.f32 %v6164_v5, %v6136_v12  ;;  %v6089_v32 = vpop.f32.mrf.mxu1  ;;  %v8361_v7 = vor.u32 %v10720_v11, %v8358_v14  ;;  %v11064_v21 = vld [vmem:[%s15008_s1 + $0x930] sm:$0xff]  ;;  %v11061_v14 = vld [vmem:[%s15008_s1 + $0x918] sm:$0xff] }
 0x1d8   :  { %v6090_v20 = vadd.f32 %v6089_v32, %v12974_v39  ;;  %v8112_v39 = vld [vmem:[%s15007_s0 + $0x460] sm:$0xf]  ;;  %6615 = vmatpush.bf16.msrb.mxu0 %v11064_v21  ;;  %v7876_v21 = vld [vmem:[%s15007_s0 + $0x278] sm:$0xf] }
 0x1d9   :  { %v6166_v57 = vpop.f32.mrf.mxu0  ;;  %v8113_v41 = vor.u32 %v10689_v47, %v8112_v39  ;;  %v11054_v39 = vld [vmem:[%s15008_s1 + $0x8e0] sm:$0xff] }
 0x1da   :  { %6585 = vmatpush.bf16.msrb.mxu3 %v11057_v48  ;;  %6533 = vmatpush.bf16.msra.mxu1 %v11035_v40  ;;  %v10658_v47 = vld [vmem:[%s15007_s0 + $0x464] sm:$0xf] }
 0x1dc   :  { %v6137_v22 = vpop.f32.mrf.mxu3  ;;  %6616 = vmatpush.bf16.msrb.mxu0 %v11063_v42 }
 0x1dd   :  { %v6138_v51 = vadd.f32 %v6137_v22, %v12969_v29 }
 0x1de   :  { %v6118_v37 = vpop.f32.mrf.mxu2  ;;  %6586 = vmatpush.bf16.msrb.mxu3 %v11056_v10 }
 0x1df   :  { %v13089_v52 = vadd.f32 %v6118_v37, %v6090_v20  ;;  %v13094_v54 = vadd.f32 %v6166_v57, %v6138_v51  ;;  %v6188_v55 = vpop.f32.mrf.mxu1  ;;  %v11043_v20 = vld [vmem:[%s15008_s1 + $0x888] sm:$0xff]  ;;  %v10533_v37 = vld [vmem:[%s15007_s0 + $0x7c] sm:$0xf]  ;;  %v7618_v51 = vld [vmem:[%s15007_s0 + $0x174] sm:$0xf0] }
 0x1e0   :  { %v6189_v29 = vadd.f32 %v6188_v55, %v12989_v59  ;;  %v11055_v57 = vld [vmem:[%s15008_s1 + $0x8e8] sm:$0xff]  ;;  %v10565_v55 = vld [vmem:[%s15007_s0 + $0x178] sm:$0xf0] }
 0x1e1   :  { %v6169_v62 = vpop.f32.mrf.mxu0  ;;  %6371 = vmatmul.bf16.gmra.mxu3 %v8109_v33  ;;  %v8114_v33 = vld [vmem:[%s15007_s0 + $0x55c] sm:$0xf0] }
 0x1e2   :  { %6419 = vmatmul.bf16.vlgmr.msrb.gmra.mxu1 %v7613_v53  ;;  %6587 = vmatpush.bf16.msrb.mxu3 %v11055_v57  ;;  %v8120_v53 = vld [vmem:[%s15007_s0 + $0x468] sm:$0xf]  ;;  %v8117_v45 = vor.u32 %v10658_v47, %v8114_v33 }
 0x1e3   :  { %6448 = vmatmul.bf16.vlgmr.msrb.gmra.mxu2 %v7617_v28  ;;  %v10690_v28 = vld [vmem:[%s15007_s0 + $0x560] sm:$0xf0] }
 0x1e4   :  { %6400 = vmatmul.bf16.gmra.mxu0 %v8113_v41  ;;  %v6140_v35 = vpop.f32.mrf.mxu3  ;;  %v8121_v48 = vor.u32 %v10690_v28, %v8120_v53 }
 0x1e5   :  { %v6141_v58 = vadd.f32 %v6140_v35, %v12987_v50  ;;  %v11044_v50 = vld [vmem:[%s15008_s1 + $0x890] sm:$0xff]  ;;  %v11034_v35 = vld [vmem:[%s15008_s1 + $0x840] sm:$0xff] }
 0x1e6   :  { %v6217_v63 = vpop.f32.mrf.mxu2  ;;  %6561 = vmatpush.bf16.msra.mxu2 %v11044_v50  ;;  %6588 = vmatpush.bf16.msrb.mxu3 %v11054_v39 }
 0x1e7   :  { %v13107_v59 = vadd.f32 %v6217_v63, %v6189_v29  ;;  %v13115_v8 = vadd.f32 %v6169_v62, %v6141_v58  ;;  %v6190_v9 = vpop.f32.mrf.mxu1  ;;  %v7621_v62 = vor.u32 %v10533_v37, %v7618_v51  ;;  %v11062_v58 = vld [vmem:[%s15008_s1 + $0x920] sm:$0xff]  ;;  %6534 = vmatpush.bf16.msra.mxu1 %v11034_v35  ;;  %v11059_v37 = vld [vmem:[%s15008_s1 + $0x908] sm:$0xff] }
 0x1e8   :  { %v6191_v49 = vadd.f32 %v6190_v9, %v13031_v0  ;;  %6617 = vmatpush.bf16.msrb.mxu0 %v11062_v58  ;;  %v11071_v51 = vld [vmem:[%s15008_s1 + $0x968] sm:$0xff]  ;;  %v8128_v58 = vld [vmem:[%s15007_s0 + $0x470] sm:$0xf] }
 0x1e9   :  { %v6171_v46 = vpop.f32.mrf.mxu0 }
 0x1ea   :  { %6562 = vmatpush.bf16.msra.mxu2 %v11043_v20 }
 0x1eb   :  { %6643 = vmatpush.bf16.msrb.mxu1 %v11073_v60 }
 0x1ec   :  { %v6142_v0 = vpop.f32.mrf.mxu3  ;;  %6618 = vmatpush.bf16.msrb.mxu0 %v11061_v14 }
 0x1ed   :  { %v6143_v25 = vadd.f32 %v6142_v0, %v13029_v3 }
 0x1ee   :  { %v6219_v26 = vpop.f32.mrf.mxu2 }
 0x1ef   :  { %v13149_v5 = vadd.f32 %v6219_v26, %v6191_v49  ;;  %v13157_v12 = vadd.f32 %v6171_v46, %v6143_v25  ;;  %v6193_v32 = vpop.f32.mrf.mxu1  ;;  %v11053_v46 = vld [vmem:[%s15008_s1 + $0x8d8] sm:$0xff]  ;;  %v10596_v25 = vld [vmem:[%s15007_s0 + $0x274] sm:$0xf]  ;;  %v7870_v26 = vld [vmem:[%s15007_s0 + $0x36c] sm:$0xf0] }
 0x1f0   :  { %v6194_v3 = vadd.f32 %v6193_v32, %v13049_v31  ;;  %v11081_v49 = vld [vmem:[%s15008_s1 + $0x9b8] sm:$0xff]  ;;  %6589 = vmatpush.bf16.msrb.mxu3 %v11053_v46 }
 0x1f1   :  { %v6174_v34 = vpop.f32.mrf.mxu0  ;;  %6376 = vmatmul.bf16.gmra.mxu3 %v8361_v7  ;;  %v8366_v7 = vld [vmem:[%s15007_s0 + $0x754] sm:$0xf0] }
 0x1f2   :  { %6424 = vmatmul.bf16.gmra.mxu1 %v7865_v27  ;;  %v8372_v27 = vld [vmem:[%s15007_s0 + $0x660] sm:$0xf]  ;;  %v8369_v20 = vor.u32 %v10721_v18, %v8366_v7 }
 0x1f3   :  { %6453 = vmatmul.bf16.gmra.mxu2 %v7869_v1  ;;  %v10753_v1 = vld [vmem:[%s15007_s0 + $0x758] sm:$0xf0] }
 0x1f4   :  { %6405 = vmatmul.bf16.gmra.mxu0 %v8365_v15  ;;  %v6145_v19 = vpop.f32.mrf.mxu3  ;;  %v8373_v57 = vor.u32 %v10753_v1, %v8372_v27 }
 0x1f5   :  { %v6146_v36 = vadd.f32 %v6145_v19, %v13047_v24  ;;  %v11042_v24 = vld [vmem:[%s15008_s1 + $0x880] sm:$0xff]  ;;  %v11060_v19 = vld [vmem:[%s15008_s1 + $0x910] sm:$0xff] }
 0x1f6   :  { %v6222_v38 = vpop.f32.mrf.mxu2  ;;  %6563 = vmatpush.bf16.msra.mxu2 %v11042_v24  ;;  %6619 = vmatpush.bf16.msrb.mxu0 %v11060_v19 }
 0x1f7   :  { %v13167_v31 = vadd.f32 %v6222_v38, %v6194_v3  ;;  %v13175_v43 = vadd.f32 %v6174_v34, %v6146_v36  ;;  %v6195_v44 = vpop.f32.mrf.mxu1  ;;  %v7873_v34 = vor.u32 %v10596_v25, %v7870_v26  ;;  %v11072_v36 = vld [vmem:[%s15008_s1 + $0x970] sm:$0xff]  ;;  %v11069_v25 = vld [vmem:[%s15008_s1 + $0x958] sm:$0xff] }
 0x1f8   :  { %v6196_v22 = vadd.f32 %v6195_v44, %v13094_v54  ;;  %v7624_v54 = vld [vmem:[%s15007_s0 + $0x80] sm:$0xf]  ;;  %6644 = vmatpush.bf16.msrb.mxu1 %v11072_v36  ;;  %v11097_v26 = vld [vmem:[%s15008_s1 + $0xa38] sm:$0xff]  ;;  %v8380_v36 = vld [vmem:[%s15007_s0 + $0x668] sm:$0xf] }
 0x1f9   :  { %v6176_v23 = vpop.f32.mrf.mxu0  ;;  %v7625_v6 = vor.u32 %v10565_v55, %v7624_v54  ;;  %v11078_v54 = vld [vmem:[%s15008_s1 + $0x9a0] sm:$0xff]  ;;  %v10659_v55 = vld [vmem:[%s15007_s0 + $0x46c] sm:$0xf] }
 0x1fa   :  { %6672 = vmatpush.bf16.msrb.mxu2 %v11081_v49  ;;  %6620 = vmatpush.bf16.msrb.mxu0 %v11059_v37 }
 0x1fc   :  { %v6147_v30 = vpop.f32.mrf.mxu3  ;;  %6645 = vmatpush.bf16.msrb.mxu1 %v11071_v51 }
 0x1fd   :  { %v6148_v41 = vadd.f32 %v6147_v30, %v13089_v52 }
 0x1fe   :  { %v6224_v61 = vpop.f32.mrf.mxu2  ;;  %6673 = vmatpush.bf16.msrb.mxu2 %v11080_v13 }
 0x1ff   :  { %v13209_v29 = vadd.f32 %v6224_v61, %v6196_v22  ;;  %v13217_v63 = vadd.f32 %v6176_v23, %v6148_v41  ;;  %v6198_v4 = vpop.f32.mrf.mxu1  ;;  %v11051_v23 = vld [vmem:[%s15008_s1 + $0x8c8] sm:$0xff]  ;;  %v10534_v61 = vld [vmem:[%s15007_s0 + $0x84] sm:$0xf] }
 0x200   :  { %v6199_v52 = vadd.f32 %v6198_v4, %v13115_v8  ;;  %v11079_v22 = vld [vmem:[%s15008_s1 + $0x9a8] sm:$0xff] }
 0x201   :  { %v6275_v9 = vpop.f32.mrf.mxu0  ;;  %6477 = vmatmul.bf16.vlgmr.msra.gmra.mxu3 %v7621_v62  ;;  %v8122_v41 = vld [vmem:[%s15007_s0 + $0x564] sm:$0xf0]  ;;  %v7626_v62 = vld [vmem:[%s15007_s0 + $0x17c] sm:$0xf0] }
 0x202   :  { %6429 = vmatmul.bf16.gmra.mxu1 %v8117_v45  ;;  %6674 = vmatpush.bf16.msrb.mxu2 %v11079_v22  ;;  %v7632_v45 = vld [vmem:[%s15007_s0 + $0x88] sm:$0xf]  ;;  %v7629_v46 = vor.u32 %v10534_v61, %v7626_v62 }
 0x203   :  { %6458 = vmatmul.bf16.gmra.mxu2 %v8121_v48  ;;  %v10566_v48 = vld [vmem:[%s15007_s0 + $0x180] sm:$0xf0]  ;;  %v11095_v61 = vld [vmem:[%s15008_s1 + $0xa28] sm:$0xff] }
 0x204   :  { %6506 = vmatmul.bf16.vlgmr.msra.gmra.mxu0 %v7625_v6  ;;  %v6246_v50 = vpop.f32.mrf.mxu3  ;;  %v7633_v49 = vor.u32 %v10566_v48, %v7632_v45 }
 0x205   :  { %v6247_v11 = vadd.f32 %v6246_v50, %v13107_v59  ;;  %v11052_v59 = vld [vmem:[%s15008_s1 + $0x8d0] sm:$0xff]  ;;  %v11058_v50 = vld [vmem:[%s15008_s1 + $0x900] sm:$0xff] }
 0x206   :  { %v6227_v10 = vpop.f32.mrf.mxu2  ;;  %6590 = vmatpush.bf16.msrb.mxu3 %v11052_v59  ;;  %6675 = vmatpush.bf16.msrb.mxu2 %v11078_v54 }
 0x207   :  { %v13227_v8 = vadd.f32 %v6227_v10, %v6199_v52  ;;  %v6200_v16 = vpop.f32.mrf.mxu1  ;;  %v13235_v17 = vadd.f32 %v6275_v9, %v6247_v11  ;;  %v8125_v52 = vor.u32 %v10659_v55, %v8122_v41  ;;  %v11070_v10 = vld [vmem:[%s15008_s1 + $0x960] sm:$0xff]  ;;  %6621 = vmatpush.bf16.msrb.mxu0 %v11058_v50  ;;  %v11067_v41 = vld [vmem:[%s15008_s1 + $0x948] sm:$0xff] }
 0x208   :  { %v6201_v56 = vadd.f32 %v6200_v16, %v13157_v12  ;;  %v10628_v12 = vld [vmem:[%s15007_s0 + $0x370] sm:$0xf0]  ;;  %6646 = vmatpush.bf16.msrb.mxu1 %v11070_v10  ;;  %v7640_v10 = vld [vmem:[%s15007_s0 + $0x90] sm:$0xf] }
 0x209   :  { %v6277_v0 = vpop.f32.mrf.mxu0  ;;  %v7877_v40 = vor.u32 %v10628_v12, %v7876_v21  ;;  %v11088_v21 = vld [vmem:[%s15008_s1 + $0x9f0] sm:$0xff]  ;;  %v10722_v12 = vld [vmem:[%s15007_s0 + $0x664] sm:$0xf] }
 0x20a   :  { %6591 = vmatpush.bf16.msrb.mxu3 %v11051_v23 }
 0x20b   :  { %6730 = vmatpush.bf16.msra.mxu0 %v11097_v26 }
 0x20c   :  { %v6248_v2 = vpop.f32.mrf.mxu3  ;;  %6647 = vmatpush.bf16.msrb.mxu1 %v11069_v25 }
 0x20d   :  { %v6249_v15 = vadd.f32 %v6248_v2, %v13149_v5 }
 0x20e   :  { %v6229_v32 = vpop.f32.mrf.mxu2 }
 0x20f   :  { %v13269_v3 = vadd.f32 %v6229_v32, %v6201_v56  ;;  %v6203_v38 = vpop.f32.mrf.mxu1  ;;  %v13277_v42 = vadd.f32 %v6277_v0, %v6249_v15  ;;  %v11077_v56 = vld [vmem:[%s15008_s1 + $0x998] sm:$0xff]  ;;  %v8374_v32 = vld [vmem:[%s15007_s0 + $0x75c] sm:$0xf0] }
 0x210   :  { %v6204_v44 = vadd.f32 %v6203_v38, %v13175_v43  ;;  %v11089_v0 = vld [vmem:[%s15008_s1 + $0x9f8] sm:$0xff]  ;;  %6676 = vmatpush.bf16.msrb.mxu2 %v11077_v56  ;;  %v10754_v38 = vld [vmem:[%s15007_s0 + $0x760] sm:$0xf0] }
 0x211   :  { %v6280_v5 = vpop.f32.mrf.mxu0  ;;  %6482 = vmatmul.bf16.gmra.mxu3 %v7873_v34  ;;  %v10597_v15 = vld [vmem:[%s15007_s0 + $0x27c] sm:$0xf]  ;;  %v7878_v34 = vld [vmem:[%s15007_s0 + $0x374] sm:$0xf0]  ;;  %v8381_v37 = vor.u32 %v10754_v38, %v8380_v36  ;;  %v11112_v36 = vld [vmem:[%s15008_s1 + $0xab0] sm:$0xff] }
 0x212   :  { %6434 = vmatmul.bf16.gmra.mxu1 %v8369_v20  ;;  %v7884_v20 = vld [vmem:[%s15007_s0 + $0x280] sm:$0xf]  ;;  %v7881_v23 = vor.u32 %v10597_v15, %v7878_v34  ;;  %v11105_v15 = vld [vmem:[%s15008_s1 + $0xa78] sm:$0xff]  ;;  %v10723_v38 = vld [vmem:[%s15007_s0 + $0x66c] sm:$0xf] }
 0x213   :  { %6463 = vmatmul.bf16.gmra.mxu2 %v8373_v57  ;;  %v10629_v57 = vld [vmem:[%s15007_s0 + $0x378] sm:$0xf0] }
 0x214   :  { %6511 = vmatmul.bf16.gmra.mxu0 %v7877_v40  ;;  %v6251_v24 = vpop.f32.mrf.mxu3  ;;  %v7885_v22 = vor.u32 %v10629_v57, %v7884_v20 }
 0x215   :  { %v6252_v47 = vadd.f32 %v6251_v24, %v13167_v31  ;;  %v11050_v31 = vld [vmem:[%s15008_s1 + $0x8c0] sm:$0xff]  ;;  %v11068_v24 = vld [vmem:[%s15008_s1 + $0x950] sm:$0xff] }
 0x216   :  { %v6232_v39 = vpop.f32.mrf.mxu2  ;;  %6592 = vmatpush.bf16.msrb.mxu3 %v11050_v31  ;;  %6648 = vmatpush.bf16.msrb.mxu1 %v11068_v24 }
 0x217   :  { %v13287_v43 = vadd.f32 %v6232_v39, %v6204_v44  ;;  %v6205_v33 = vpop.f32.mrf.mxu1  ;;  %v13295_v53 = vadd.f32 %v6280_v5, %v6252_v47  ;;  %v8377_v44 = vor.u32 %v10722_v12, %v8374_v32  ;;  %v11096_v39 = vld [vmem:[%s15008_s1 + $0xa30] sm:$0xff]  ;;  %v11093_v32 = vld [vmem:[%s15008_s1 + $0xa18] sm:$0xff] }
 0x218   :  { %v6206_v28 = vadd.f32 %v6205_v33, %v13217_v63  ;;  %v10691_v63 = vld [vmem:[%s15007_s0 + $0x568] sm:$0xf0]  ;;  %6731 = vmatpush.bf16.msra.mxu0 %v11096_v39  ;;  %v7892_v39 = vld [vmem:[%s15007_s0 + $0x288] sm:$0xf] }
 0x219   :  { %v6282_v30 = vpop.f32.mrf.mxu0  ;;  %v8129_v14 = vor.u32 %v10691_v63, %v8128_v58  ;;  %v11086_v58 = vld [vmem:[%s15008_s1 + $0x9e0] sm:$0xff]  ;;  %v10660_v63 = vld [vmem:[%s15007_s0 + $0x474] sm:$0xf] }
 0x21a   :  { %6701 = vmatpush.bf16.msra.mxu3 %v11089_v0  ;;  %6649 = vmatpush.bf16.msrb.mxu1 %v11067_v41 }
 0x21c   :  { %v6253_v35 = vpop.f32.mrf.mxu3  ;;  %6732 = vmatpush.bf16.msra.mxu0 %v11095_v61 }
 0x21d   :  { %v6254_v6 = vadd.f32 %v6253_v35, %v13209_v29 }
 0x21e   :  { %v6234_v4 = vpop.f32.mrf.mxu2  ;;  %6702 = vmatpush.bf16.msra.mxu3 %v11088_v21 }
 0x21f   :  { %v13329_v9 = vadd.f32 %v6234_v4, %v6206_v28  ;;  %v6304_v11 = vpop.f32.mrf.mxu1  ;;  %v13337_v60 = vadd.f32 %v6282_v30, %v6254_v6  ;;  %v11075_v28 = vld [vmem:[%s15008_s1 + $0x988] sm:$0xff] }
 0x220   :  { %v6305_v29 = vadd.f32 %v6304_v11, %v13235_v17  ;;  %v11087_v30 = vld [vmem:[%s15008_s1 + $0x9e8] sm:$0xff] }
 0x221   :  { %v6285_v16 = vpop.f32.mrf.mxu0  ;;  %6487 = vmatmul.bf16.gmra.mxu3 %v8125_v52  ;;  %v10535_v4 = vld [vmem:[%s15007_s0 + $0x8c] sm:$0xf]  ;;  %v7634_v6 = vld [vmem:[%s15007_s0 + $0x184] sm:$0xf0]  ;;  %v8130_v52 = vld [vmem:[%s15007_s0 + $0x56c] sm:$0xf0] }
 0x222   :  { %6535 = vmatmul.bf16.vlgmr.msra.gmra.mxu1 %v7629_v46  ;;  %6703 = vmatpush.bf16.msra.mxu3 %v11087_v30  ;;  %v8136_v46 = vld [vmem:[%s15007_s0 + $0x478] sm:$0xf]  ;;  %v10567_v11 = vld [vmem:[%s15007_s0 + $0x188] sm:$0xf0]  ;;  %v8133_v56 = vor.u32 %v10660_v63, %v8130_v52 }
 0x223   :  { %6564 = vmatmul.bf16.vlgmr.msra.gmra.mxu2 %v7633_v49  ;;  %v10692_v49 = vld [vmem:[%s15007_s0 + $0x570] sm:$0xf0]  ;;  %v7641_v25 = vor.u32 %v10567_v11, %v7640_v10  ;;  %v11110_v10 = vld [vmem:[%s15008_s1 + $0xaa0] sm:$0xff]  ;;  %v10661_v11 = vld [vmem:[%s15007_s0 + $0x47c] sm:$0xf] }
 0x224   :  { %6516 = vmatmul.bf16.gmra.mxu0 %v8129_v14  ;;  %v6256_v59 = vpop.f32.mrf.mxu3  ;;  %v8137_v0 = vor.u32 %v10692_v49, %v8136_v46 }
 0x225   :  { %v6257_v13 = vadd.f32 %v6256_v59, %v13227_v8  ;;  %v11076_v8 = vld [vmem:[%s15008_s1 + $0x990] sm:$0xff]  ;;  %v11066_v59 = vld [vmem:[%s15008_s1 + $0x940] sm:$0xff] }
 0x226   :  { %v6333_v18 = vpop.f32.mrf.mxu2  ;;  %6677 = vmatpush.bf16.msrb.mxu2 %v11076_v8  ;;  %6704 = vmatpush.bf16.msra.mxu3 %v11086_v58 }
 0x227   :  { %v13347_v17 = vadd.f32 %v6333_v18, %v6305_v29  ;;  %v6306_v7 = vpop.f32.mrf.mxu1  ;;  %v13355_v27 = vadd.f32 %v6285_v16, %v6257_v13  ;;  %v7637_v16 = vor.u32 %v10535_v4, %v7634_v6  ;;  %v11094_v13 = vld [vmem:[%s15008_s1 + $0xa20] sm:$0xff]  ;;  %6650 = vmatpush.bf16.msrb.mxu1 %v11066_v59  ;;  %v11091_v4 = vld [vmem:[%s15008_s1 + $0xa08] sm:$0xff] }
 0x228   :  { %v6307_v2 = vadd.f32 %v6306_v7, %v13277_v42  ;;  %6733 = vmatpush.bf16.msra.mxu0 %v11094_v13  ;;  %v11103_v6 = vld [vmem:[%s15008_s1 + $0xa68] sm:$0xff]  ;;  %v8144_v13 = vld [vmem:[%s15007_s0 + $0x480] sm:$0xf] }
 0x229   :  { %v6287_v1 = vpop.f32.mrf.mxu0 }
 0x22a   :  { %6678 = vmatpush.bf16.msrb.mxu2 %v11075_v28 }
 0x22b   :  { %6759 = vmatpush.bf16.msra.mxu1 %v11105_v15 }
 0x22c   :  { %v6258_v19 = vpop.f32.mrf.mxu3  ;;  %6734 = vmatpush.bf16.msra.mxu0 %v11093_v32 }
 0x22d   :  { %v6259_v40 = vadd.f32 %v6258_v19, %v13269_v3 }
 0x22e   :  { %v6335_v42 = vpop.f32.mrf.mxu2 }
 0x22f   :  { %v13389_v5 = vadd.f32 %v6335_v42, %v6307_v2  ;;  %v6309_v47 = vpop.f32.mrf.mxu1  ;;  %v13397_v51 = vadd.f32 %v6287_v1, %v6259_v40  ;;  %v11085_v1 = vld [vmem:[%s15008_s1 + $0x9d8] sm:$0xff]  ;;  %v10598_v40 = vld [vmem:[%s15007_s0 + $0x284] sm:$0xf]  ;;  %v7886_v42 = vld [vmem:[%s15007_s0 + $0x37c] sm:$0xf0] }
 0x230   :  { %v6310_v3 = vadd.f32 %v6309_v47, %v13295_v53  ;;  %v11113_v2 = vld [vmem:[%s15008_s1 + $0xab8] sm:$0xff]  ;;  %6705 = vmatpush.bf16.msra.mxu3 %v11085_v1  ;;  %v10630_v47 = vld [vmem:[%s15007_s0 + $0x380] sm:$0xf0] }
 0x231   :  { %v6290_v33 = vpop.f32.mrf.mxu0  ;;  %6492 = vmatmul.bf16.gmra.mxu3 %v8377_v44  ;;  %v8382_v44 = vld [vmem:[%s15007_s0 + $0x764] sm:$0xf0]  ;;  %v7893_v41 = vor.u32 %v10630_v47, %v7892_v39  ;;  %v11120_v39 = vld [vmem:[%s15008_s1 + $0xaf0] sm:$0xff] }
 0x232   :  { %6540 = vmatmul.bf16.gmra.mxu1 %v7881_v23  ;;  %v8388_v23 = vld [vmem:[%s15007_s0 + $0x670] sm:$0xf]  ;;  %v8385_v28 = vor.u32 %v10723_v38, %v8382_v44  ;;  %v10724_v47 = vld [vmem:[%s15007_s0 + $0x674] sm:$0xf] }
 0x233   :  { %6569 = vmatmul.bf16.gmra.mxu2 %v7885_v22  ;;  %v10755_v22 = vld [vmem:[%s15007_s0 + $0x768] sm:$0xf0] }
 0x234   :  { %6521 = vmatmul.bf16.gmra.mxu0 %v8381_v37  ;;  %v6261_v31 = vpop.f32.mrf.mxu3  ;;  %v8389_v30 = vor.u32 %v10755_v22, %v8388_v23 }
 0x235   :  { %v6262_v54 = vadd.f32 %v6261_v31, %v13287_v43  ;;  %v11074_v43 = vld [vmem:[%s15008_s1 + $0x980] sm:$0xff]  ;;  %v11092_v31 = vld [vmem:[%s15008_s1 + $0xa10] sm:$0xff] }
 0x236   :  { %v6338_v55 = vpop.f32.mrf.mxu2  ;;  %6679 = vmatpush.bf16.msrb.mxu2 %v11074_v43  ;;  %6735 = vmatpush.bf16.msra.mxu0 %v11092_v31 }
 0x237   :  { %v13407_v53 = vadd.f32 %v6338_v55, %v6310_v3  ;;  %v6311_v62 = vpop.f32.mrf.mxu1  ;;  %v13415_v45 = vadd.f32 %v6290_v33, %v6262_v54  ;;  %v7889_v33 = vor.u32 %v10598_v40, %v7886_v42  ;;  %v11104_v54 = vld [vmem:[%s15008_s1 + $0xa70] sm:$0xff]  ;;  %v11101_v40 = vld [vmem:[%s15008_s1 + $0xa58] sm:$0xff] }
 0x238   :  { %v6312_v35 = vadd.f32 %v6311_v62, %v13337_v60  ;;  %6760 = vmatpush.bf16.msra.mxu1 %v11104_v54  ;;  %v11129_v42 = vld [vmem:[%s15008_s1 + $0xb38] sm:$0xff] }
 0x239   :  { %v6292_v48 = vpop.f32.mrf.mxu0  ;;  %v8396_v54 = vld [vmem:[%s15007_s0 + $0x678] sm:$0xf] }
 0x23a   :  { %6788 = vmatpush.bf16.msra.mxu2 %v11113_v2  ;;  %6736 = vmatpush.bf16.msra.mxu0 %v11091_v4 }
 0x23c   :  { %v6263_v50 = vpop.f32.mrf.mxu3  ;;  %6761 = vmatpush.bf16.msra.mxu1 %v11103_v6 }
 0x23d   :  { %v6264_v14 = vadd.f32 %v6263_v50, %v13329_v9 }
 0x23e   :  { %v6340_v60 = vpop.f32.mrf.mxu2  ;;  %6789 = vmatpush.bf16.msra.mxu2 %v11112_v36 }
 0x23f   :  { %v13449_v29 = vadd.f32 %v6340_v60, %v6312_v35  ;;  %v6314_v18 = vpop.f32.mrf.mxu1  ;;  %v13457_v26 = vadd.f32 %v6292_v48, %v6264_v14  ;;  %v11083_v48 = vld [vmem:[%s15008_s1 + $0x9c8] sm:$0xff]  ;;  %v8138_v14 = vld [vmem:[%s15007_s0 + $0x574] sm:$0xf0]  ;;  %v10536_v60 = vld [vmem:[%s15007_s0 + $0x94] sm:$0xf] }
 0x240   :  { %v6315_v9 = vadd.f32 %v6314_v18, %v13355_v27  ;;  %v11111_v35 = vld [vmem:[%s15008_s1 + $0xaa8] sm:$0xff]  ;;  %v10693_v18 = vld [vmem:[%s15007_s0 + $0x578] sm:$0xf0] }
 0x241   :  { %v6391_v7 = vpop.f32.mrf.mxu0  ;;  %6593 = vmatmul.bf16.vlgmr.msrb.gmra.mxu3 %v7637_v16  ;;  %v7642_v16 = vld [vmem:[%s15007_s0 + $0x18c] sm:$0xf0]  ;;  %v8145_v32 = vor.u32 %v10693_v18, %v8144_v13  ;;  %v11118_v13 = vld [vmem:[%s15008_s1 + $0xae0] sm:$0xff] }
 0x242   :  { %6545 = vmatmul.bf16.gmra.mxu1 %v8133_v56  ;;  %6790 = vmatpush.bf16.msra.mxu2 %v11111_v35  ;;  %v7648_v56 = vld [vmem:[%s15007_s0 + $0x98] sm:$0xf]  ;;  %v7645_v1 = vor.u32 %v10536_v60, %v7642_v16  ;;  %v11127_v60 = vld [vmem:[%s15008_s1 + $0xb28] sm:$0xff]  ;;  %v10662_v18 = vld [vmem:[%s15007_s0 + $0x484] sm:$0xf] }
 0x243   :  { %6574 = vmatmul.bf16.gmra.mxu2 %v8137_v0  ;;  %v10568_v0 = vld [vmem:[%s15007_s0 + $0x190] sm:$0xf0] }
 0x244   :  { %6622 = vmatmul.bf16.vlgmr.msrb.gmra.mxu0 %v7641_v25  ;;  %v6362_v8 = vpop.f32.mrf.mxu3  ;;  %v7649_v2 = vor.u32 %v10568_v0, %v7648_v56 }
 0x245   :  { %v6363_v12 = vadd.f32 %v6362_v8, %v13347_v17  ;;  %v11084_v17 = vld [vmem:[%s15008_s1 + $0x9d0] sm:$0xff]  ;;  %v11090_v8 = vld [vmem:[%s15008_s1 + $0xa00] sm:$0xff] }
 0x246   :  { %v6343_v21 = vpop.f32.mrf.mxu2  ;;  %6706 = vmatpush.bf16.msra.mxu3 %v11084_v17  ;;  %6791 = vmatpush.bf16.msra.mxu2 %v11110_v10 }
 0x247   :  { %v13467_v27 = vadd.f32 %v6343_v21, %v6315_v9  ;;  %v6316_v34 = vpop.f32.mrf.mxu1  ;;  %v13475_v20 = vadd.f32 %v6391_v7, %v6363_v12  ;;  %v8141_v9 = vor.u32 %v10661_v11, %v8138_v14  ;;  %v11102_v21 = vld [vmem:[%s15008_s1 + $0xa60] sm:$0xff]  ;;  %6737 = vmatpush.bf16.msra.mxu0 %v11090_v8  ;;  %v11099_v14 = vld [vmem:[%s15008_s1 + $0xa48] sm:$0xff] }
 0x248   :  { %v6317_v57 = vadd.f32 %v6316_v34, %v13397_v51  ;;  %6762 = vmatpush.bf16.msra.mxu1 %v11102_v21  ;;  %v7656_v21 = vld [vmem:[%s15007_s0 + $0xa0] sm:$0xf] }
 0x249   :  { %v6393_v19 = vpop.f32.mrf.mxu0 }
 0x24a   :  { %6707 = vmatpush.bf16.msra.mxu3 %v11083_v48 }
 0x24b   :  { %6846 = vmatpush.bf16.msrb.mxu0 %v11129_v42 }
 0x24c   :  { %v6364_v24 = vpop.f32.mrf.mxu3  ;;  %6763 = vmatpush.bf16.msra.mxu1 %v11101_v40 }
 0x24d   :  { %v6365_v51 = vadd.f32 %v6364_v24, %v13389_v5 }
 0x24e   :  { %v6345_v37 = vpop.f32.mrf.mxu2 }
 0x24f   :  { %v13509_v3 = vadd.f32 %v6345_v37, %v6317_v57  ;;  %v6319_v55 = vpop.f32.mrf.mxu1  ;;  %v13517_v61 = vadd.f32 %v6393_v19, %v6365_v51  ;;  %v11109_v57 = vld [vmem:[%s15008_s1 + $0xa98] sm:$0xff]  ;;  %v8390_v37 = vld [vmem:[%s15007_s0 + $0x76c] sm:$0xf0]  ;;  %v10599_v51 = vld [vmem:[%s15007_s0 + $0x28c] sm:$0xf] }
 0x250   :  { %v6320_v62 = vadd.f32 %v6319_v55, %v13415_v45  ;;  %v11121_v19 = vld [vmem:[%s15008_s1 + $0xaf8] sm:$0xff]  ;;  %6792 = vmatpush.bf16.msra.mxu2 %v11109_v57  ;;  %v10756_v55 = vld [vmem:[%s15007_s0 + $0x770] sm:$0xf0] }
 0x251   :  { %v6396_v5 = vpop.f32.mrf.mxu0  ;;  %6598 = vmatmul.bf16.gmra.mxu3 %v7889_v33  ;;  %v7894_v33 = vld [vmem:[%s15007_s0 + $0x384] sm:$0xf0]  ;;  %v8397_v4 = vor.u32 %v10756_v55, %v8396_v54  ;;  %v11144_v54 = vld [vmem:[%s15008_s1 + $0xbb0] sm:$0xff]  ;;  %v10725_v55 = vld [vmem:[%s15007_s0 + $0x67c] sm:$0xf] }
 0x252   :  { %6550 = vmatmul.bf16.gmra.mxu1 %v8385_v28  ;;  %v7900_v28 = vld [vmem:[%s15007_s0 + $0x290] sm:$0xf]  ;;  %v7897_v48 = vor.u32 %v10599_v51, %v7894_v33  ;;  %v11137_v51 = vld [vmem:[%s15008_s1 + $0xb78] sm:$0xff] }
 0x253   :  { %6579 = vmatmul.bf16.gmra.mxu2 %v8389_v30  ;;  %v10631_v30 = vld [vmem:[%s15007_s0 + $0x388] sm:$0xf0] }
 0x254   :  { %6627 = vmatmul.bf16.gmra.mxu0 %v7893_v41  ;;  %v6367_v43 = vpop.f32.mrf.mxu3  ;;  %v7901_v35 = vor.u32 %v10631_v30, %v7900_v28 }
 0x255   :  { %v6368_v63 = vadd.f32 %v6367_v43, %v13407_v53  ;;  %v11082_v53 = vld [vmem:[%s15008_s1 + $0x9c0] sm:$0xff]  ;;  %v11100_v43 = vld [vmem:[%s15008_s1 + $0xa50] sm:$0xff] }
 0x256   :  { %v6348_v58 = vpop.f32.mrf.mxu2  ;;  %6708 = vmatpush.bf16.msra.mxu3 %v11082_v53  ;;  %6764 = vmatpush.bf16.msra.mxu1 %v11100_v43 }
 0x257   :  { %v13527_v45 = vadd.f32 %v6348_v58, %v6320_v62  ;;  %v6321_v52 = vpop.f32.mrf.mxu1  ;;  %v13535_v46 = vadd.f32 %v6396_v5, %v6368_v63  ;;  %v8393_v62 = vor.u32 %v10724_v47, %v8390_v37  ;;  %v11128_v58 = vld [vmem:[%s15008_s1 + $0xb30] sm:$0xff]  ;;  %v11125_v37 = vld [vmem:[%s15008_s1 + $0xb18] sm:$0xff] }
 0x258   :  { %v6322_v49 = vadd.f32 %v6321_v52, %v13457_v26  ;;  %6847 = vmatpush.bf16.msrb.mxu0 %v11128_v58  ;;  %v7908_v58 = vld [vmem:[%s15007_s0 + $0x298] sm:$0xf] }
 0x259   :  { %v6398_v50 = vpop.f32.mrf.mxu0 }
 0x25a   :  { %6817 = vmatpush.bf16.msrb.mxu3 %v11121_v19  ;;  %6765 = vmatpush.bf16.msra.mxu1 %v11099_v14 }
 0x25c   :  { %v6369_v59 = vpop.f32.mrf.mxu3  ;;  %6848 = vmatpush.bf16.msrb.mxu0 %v11127_v60 }
 0x25d   :  { %v6370_v26 = vadd.f32 %v6369_v59, %v13449_v29 }
 0x25e   :  { %v6350_v25 = vpop.f32.mrf.mxu2  ;;  %6818 = vmatpush.bf16.msrb.mxu3 %v11120_v39 }
 0x25f   :  { %v13569_v7 = vadd.f32 %v6350_v25, %v6322_v49  ;;  %v6420_v12 = vpop.f32.mrf.mxu1  ;;  %v13577_v15 = vadd.f32 %v6398_v50, %v6370_v26  ;;  %v11107_v49 = vld [vmem:[%s15008_s1 + $0xa88] sm:$0xff]  ;;  %v10537_v25 = vld [vmem:[%s15007_s0 + $0x9c] sm:$0xf]  ;;  %v7650_v26 = vld [vmem:[%s15007_s0 + $0x194] sm:$0xf0] }
 0x260   :  { %v6421_v29 = vadd.f32 %v6420_v12, %v13475_v20  ;;  %v11119_v50 = vld [vmem:[%s15008_s1 + $0xae8] sm:$0xff]  ;;  %v10569_v12 = vld [vmem:[%s15007_s0 + $0x198] sm:$0xf0] }
 0x261   :  { %v6401_v34 = vpop.f32.mrf.mxu0  ;;  %6603 = vmatmul.bf16.gmra.mxu3 %v8141_v9  ;;  %v8146_v9 = vld [vmem:[%s15007_s0 + $0x57c] sm:$0xf0]  ;;  %v7657_v40 = vor.u32 %v10569_v12, %v7656_v21  ;;  %v10663_v12 = vld [vmem:[%s15007_s0 + $0x48c] sm:$0xf] }
 0x262   :  { %6651 = vmatmul.bf16.vlgmr.msrb.gmra.mxu1 %v7645_v1  ;;  %6819 = vmatpush.bf16.msrb.mxu3 %v11119_v50  ;;  %v8152_v1 = vld [vmem:[%s15007_s0 + $0x488] sm:$0xf]  ;;  %v8149_v57 = vor.u32 %v10662_v18, %v8146_v9  ;;  %v11142_v21 = vld [vmem:[%s15008_s1 + $0xba0] sm:$0xff] }
 0x263   :  { %6680 = vmatmul.bf16.vlgmr.msrb.gmra.mxu2 %v7649_v2  ;;  %v10694_v2 = vld [vmem:[%s15007_s0 + $0x580] sm:$0xf0] }
 0x264   :  { %6632 = vmatmul.bf16.gmra.mxu0 %v8145_v32  ;;  %v6372_v17 = vpop.f32.mrf.mxu3  ;;  %v8153_v19 = vor.u32 %v10694_v2, %v8152_v1 }
 0x265   :  { %v6373_v36 = vadd.f32 %v6372_v17, %v13467_v27  ;;  %v11108_v27 = vld [vmem:[%s15008_s1 + $0xa90] sm:$0xff]  ;;  %v11098_v17 = vld [vmem:[%s15008_s1 + $0xa40] sm:$0xff] }
 0x266   :  { %v6449_v38 = vpop.f32.mrf.mxu2  ;;  %6793 = vmatpush.bf16.msra.mxu2 %v11108_v27  ;;  %6820 = vmatpush.bf16.msrb.mxu3 %v11118_v13 }
 0x267   :  { %v13587_v20 = vadd.f32 %v6449_v38, %v6421_v29  ;;  %v6422_v44 = vpop.f32.mrf.mxu1  ;;  %v13595_v23 = vadd.f32 %v6401_v34, %v6373_v36  ;;  %v7653_v34 = vor.u32 %v10537_v25, %v7650_v26  ;;  %v11126_v36 = vld [vmem:[%s15008_s1 + $0xb20] sm:$0xff]  ;;  %6766 = vmatpush.bf16.msra.mxu1 %v11098_v17  ;;  %v11123_v25 = vld [vmem:[%s15008_s1 + $0xb08] sm:$0xff] }
 0x268   :  { %v6423_v24 = vadd.f32 %v6422_v44, %v13517_v61  ;;  %6849 = vmatpush.bf16.msrb.mxu0 %v11126_v36  ;;  %v11135_v26 = vld [vmem:[%s15008_s1 + $0xb68] sm:$0xff]  ;;  %v8160_v36 = vld [vmem:[%s15007_s0 + $0x490] sm:$0xf] }
 0x269   :  { %v6403_v22 = vpop.f32.mrf.mxu0 }
 0x26a   :  { %6794 = vmatpush.bf16.msra.mxu2 %v11107_v49 }
 0x26b   :  { %6875 = vmatpush.bf16.msrb.mxu1 %v11137_v51 }
 0x26c   :  { %v6374_v31 = vpop.f32.mrf.mxu3  ;;  %6850 = vmatpush.bf16.msrb.mxu0 %v11125_v37 }
 0x26d   :  { %v6375_v41 = vadd.f32 %v6374_v31, %v13509_v3 }
 0x26e   :  { %v6451_v61 = vpop.f32.mrf.mxu2 }
 0x26f   :  { %v13629_v5 = vadd.f32 %v6451_v61, %v6423_v24  ;;  %v6425_v63 = vpop.f32.mrf.mxu1  ;;  %v13637_v6 = vadd.f32 %v6403_v22, %v6375_v41  ;;  %v11117_v22 = vld [vmem:[%s15008_s1 + $0xad8] sm:$0xff]  ;;  %v10600_v41 = vld [vmem:[%s15007_s0 + $0x294] sm:$0xf]  ;;  %v7902_v61 = vld [vmem:[%s15007_s0 + $0x38c] sm:$0xf0] }
 0x270   :  { %v6426_v3 = vadd.f32 %v6425_v63, %v13535_v46  ;;  %v11145_v24 = vld [vmem:[%s15008_s1 + $0xbb8] sm:$0xff]  ;;  %6821 = vmatpush.bf16.msrb.mxu3 %v11117_v22  ;;  %v10632_v63 = vld [vmem:[%s15007_s0 + $0x390] sm:$0xf0] }
 0x271   :  { %v6406_v52 = vpop.f32.mrf.mxu0  ;;  %6608 = vmatmul.bf16.gmra.mxu3 %v8393_v62  ;;  %v8398_v62 = vld [vmem:[%s15007_s0 + $0x774] sm:$0xf0]  ;;  %v7909_v14 = vor.u32 %v10632_v63, %v7908_v58  ;;  %v11152_v58 = vld [vmem:[%s15008_s1 + $0xbf0] sm:$0xff]  ;;  %v10726_v63 = vld [vmem:[%s15007_s0 + $0x684] sm:$0xf] }
 0x272   :  { %6656 = vmatmul.bf16.gmra.mxu1 %v7897_v48  ;;  %v8404_v48 = vld [vmem:[%s15007_s0 + $0x680] sm:$0xf]  ;;  %v8401_v49 = vor.u32 %v10725_v55, %v8398_v62 }
 0x273   :  { %6685 = vmatmul.bf16.gmra.mxu2 %v7901_v35  ;;  %v10757_v35 = vld [vmem:[%s15007_s0 + $0x778] sm:$0xf0] }
 0x274   :  { %6637 = vmatmul.bf16.gmra.mxu0 %v8397_v4  ;;  %v6377_v53 = vpop.f32.mrf.mxu3  ;;  %v8405_v50 = vor.u32 %v10757_v35, %v8404_v48 }
 0x275   :  { %v6378_v10 = vadd.f32 %v6377_v53, %v13527_v45  ;;  %v11106_v45 = vld [vmem:[%s15008_s1 + $0xa80] sm:$0xff]  ;;  %v11124_v53 = vld [vmem:[%s15008_s1 + $0xb10] sm:$0xff] }
 0x276   :  { %v6454_v11 = vpop.f32.mrf.mxu2  ;;  %6795 = vmatpush.bf16.msra.mxu2 %v11106_v45  ;;  %6851 = vmatpush.bf16.msrb.mxu0 %v11124_v53 }
 0x277   :  { %v13647_v46 = vadd.f32 %v6454_v11, %v6426_v3  ;;  %v6427_v16 = vpop.f32.mrf.mxu1  ;;  %v13655_v56 = vadd.f32 %v6406_v52, %v6378_v10  ;;  %v7905_v52 = vor.u32 %v10600_v41, %v7902_v61  ;;  %v11136_v10 = vld [vmem:[%s15008_s1 + $0xb70] sm:$0xff]  ;;  %v11133_v41 = vld [vmem:[%s15008_s1 + $0xb58] sm:$0xff] }
 0x278   :  { %v6428_v59 = vadd.f32 %v6427_v16, %v13577_v15  ;;  %6876 = vmatpush.bf16.msrb.mxu1 %v11136_v10  ;;  %v11161_v61 = vld [vmem:[%s15008_s1 + $0xc38] sm:$0xff]  ;;  %v8412_v10 = vld [vmem:[%s15007_s0 + $0x688] sm:$0xf] }
 0x279   :  { %v6408_v0 = vpop.f32.mrf.mxu0 }
 0x27a   :  { %6904 = vmatpush.bf16.msrb.mxu2 %v11145_v24  ;;  %6852 = vmatpush.bf16.msrb.mxu0 %v11123_v25 }
 0x27c   :  { %v6379_v8 = vpop.f32.mrf.mxu3  ;;  %6877 = vmatpush.bf16.msrb.mxu1 %v11135_v26 }
 0x27d   :  { %v6380_v32 = vadd.f32 %v6379_v8, %v13569_v7 }
 0x27e   :  { %v6456_v15 = vpop.f32.mrf.mxu2  ;;  %6905 = vmatpush.bf16.msrb.mxu2 %v11144_v54 }
 0x27f   :  { %v13689_v29 = vadd.f32 %v6456_v15, %v6428_v59  ;;  %v6430_v38 = vpop.f32.mrf.mxu1  ;;  %v13697_v42 = vadd.f32 %v6408_v0, %v6380_v32  ;;  %v11115_v0 = vld [vmem:[%s15008_s1 + $0xac8] sm:$0xff]  ;;  %v10538_v15 = vld [vmem:[%s15007_s0 + $0xa4] sm:$0xf] }
 0x280   :  { %v6431_v7 = vadd.f32 %v6430_v38, %v13595_v23  ;;  %v11143_v59 = vld [vmem:[%s15008_s1 + $0xba8] sm:$0xff] }
 0x281   :  { %v6507_v44 = vpop.f32.mrf.mxu0  ;;  %6709 = vmatmul.bf16.vlgmr.msra.gmra.mxu3 %v7653_v34  ;;  %v8154_v32 = vld [vmem:[%s15007_s0 + $0x584] sm:$0xf0]  ;;  %v7658_v34 = vld [vmem:[%s15007_s0 + $0x19c] sm:$0xf0]  ;;  %v10695_v38 = vld [vmem:[%s15007_s0 + $0x588] sm:$0xf0] }
 0x282   :  { %6661 = vmatmul.bf16.gmra.mxu1 %v8149_v57  ;;  %6906 = vmatpush.bf16.msrb.mxu2 %v11143_v59  ;;  %v7664_v57 = vld [vmem:[%s15007_s0 + $0xa8] sm:$0xf]  ;;  %v7661_v22 = vor.u32 %v10538_v15, %v7658_v34  ;;  %v8161_v37 = vor.u32 %v10695_v38, %v8160_v36  ;;  %v11150_v36 = vld [vmem:[%s15008_s1 + $0xbe0] sm:$0xff]  ;;  %v10664_v38 = vld [vmem:[%s15007_s0 + $0x494] sm:$0xf] }
 0x283   :  { %6690 = vmatmul.bf16.gmra.mxu2 %v8153_v19  ;;  %v10570_v19 = vld [vmem:[%s15007_s0 + $0x1a0] sm:$0xf0]  ;;  %v11159_v15 = vld [vmem:[%s15008_s1 + $0xc28] sm:$0xff] }
 0x284   :  { %6738 = vmatmul.bf16.vlgmr.msra.gmra.mxu0 %v7657_v40  ;;  %v6478_v27 = vpop.f32.mrf.mxu3  ;;  %v7665_v24 = vor.u32 %v10570_v19, %v7664_v57 }
 0x285   :  { %v6479_v47 = vadd.f32 %v6478_v27, %v13587_v20  ;;  %v11116_v20 = vld [vmem:[%s15008_s1 + $0xad0] sm:$0xff]  ;;  %v11122_v27 = vld [vmem:[%s15008_s1 + $0xb00] sm:$0xff] }
 0x286   :  { %v6459_v39 = vpop.f32.mrf.mxu2  ;;  %6822 = vmatpush.bf16.msrb.mxu3 %v11116_v20  ;;  %6907 = vmatpush.bf16.msrb.mxu2 %v11142_v21 }
 0x287   :  { %v13707_v23 = vadd.f32 %v6459_v39, %v6431_v7  ;;  %v6432_v33 = vpop.f32.mrf.mxu1  ;;  %v13715_v28 = vadd.f32 %v6507_v44, %v6479_v47  ;;  %v8157_v7 = vor.u32 %v10663_v12, %v8154_v32  ;;  %v11134_v39 = vld [vmem:[%s15008_s1 + $0xb60] sm:$0xff]  ;;  %6853 = vmatpush.bf16.msrb.mxu0 %v11122_v27  ;;  %v11131_v32 = vld [vmem:[%s15008_s1 + $0xb48] sm:$0xff] }
 0x288   :  { %v6433_v30 = vadd.f32 %v6432_v33, %v13637_v6  ;;  %6878 = vmatpush.bf16.msrb.mxu1 %v11134_v39  ;;  %v7672_v39 = vld [vmem:[%s15007_s0 + $0xb0] sm:$0xf] }
 0x289   :  { %v6509_v31 = vpop.f32.mrf.mxu0 }
 0x28a   :  { %6823 = vmatpush.bf16.msrb.mxu3 %v11115_v0 }
 0x28b   :  { %6962 = vmatpush.bf16.msra.mxu0 %v11161_v61 }
 0x28c   :  { %v6480_v43 = vpop.f32.mrf.mxu3  ;;  %6879 = vmatpush.bf16.msrb.mxu1 %v11133_v41 }
 0x28d   :  { %v6481_v6 = vadd.f32 %v6480_v43, %v13629_v5 }
 0x28e   :  { %v6461_v4 = vpop.f32.mrf.mxu2 }
 0x28f   :  { %v13749_v3 = vadd.f32 %v6461_v4, %v6433_v30  ;;  %v6435_v11 = vpop.f32.mrf.mxu1  ;;  %v13757_v60 = vadd.f32 %v6509_v31, %v6481_v6  ;;  %v11141_v30 = vld [vmem:[%s15008_s1 + $0xb98] sm:$0xff]  ;;  %v8406_v4 = vld [vmem:[%s15007_s0 + $0x77c] sm:$0xf0] }
 0x290   :  { %v6436_v16 = vadd.f32 %v6435_v11, %v13655_v56  ;;  %v11153_v31 = vld [vmem:[%s15008_s1 + $0xbf8] sm:$0xff]  ;;  %6908 = vmatpush.bf16.msrb.mxu2 %v11141_v30  ;;  %v10758_v11 = vld [vmem:[%s15007_s0 + $0x780] sm:$0xf0] }
 0x291   :  { %v6512_v5 = vpop.f32.mrf.mxu0  ;;  %6714 = vmatmul.bf16.gmra.mxu3 %v7905_v52  ;;  %v10601_v6 = vld [vmem:[%s15007_s0 + $0x29c] sm:$0xf]  ;;  %v7910_v52 = vld [vmem:[%s15007_s0 + $0x394] sm:$0xf0]  ;;  %v8413_v25 = vor.u32 %v10758_v11, %v8412_v10  ;;  %v11176_v10 = vld [vmem:[%s15008_s1 + $0xcb0] sm:$0xff] }
 0x292   :  { %6666 = vmatmul.bf16.gmra.mxu1 %v8401_v49  ;;  %v7916_v49 = vld [vmem:[%s15007_s0 + $0x2a0] sm:$0xf]  ;;  %v7913_v0 = vor.u32 %v10601_v6, %v7910_v52  ;;  %v11169_v6 = vld [vmem:[%s15008_s1 + $0xc78] sm:$0xff]  ;;  %v10727_v11 = vld [vmem:[%s15007_s0 + $0x68c] sm:$0xf] }
 0x293   :  { %6695 = vmatmul.bf16.gmra.mxu2 %v8405_v50  ;;  %v10633_v50 = vld [vmem:[%s15007_s0 + $0x398] sm:$0xf0] }
 0x294   :  { %6743 = vmatmul.bf16.gmra.mxu0 %v7909_v14  ;;  %v6483_v45 = vpop.f32.mrf.mxu3  ;;  %v7917_v59 = vor.u32 %v10633_v50, %v7916_v49 }
 0x295   :  { %v6484_v18 = vadd.f32 %v6483_v45, %v13647_v46  ;;  %v11114_v46 = vld [vmem:[%s15008_s1 + $0xac0] sm:$0xff]  ;;  %v11132_v45 = vld [vmem:[%s15008_s1 + $0xb50] sm:$0xff] }
 0x296   :  { %v6464_v13 = vpop.f32.mrf.mxu2  ;;  %6824 = vmatpush.bf16.msrb.mxu3 %v11114_v46  ;;  %6880 = vmatpush.bf16.msrb.mxu1 %v11132_v45 }
 0x297   :  { %v13767_v56 = vadd.f32 %v6464_v13, %v6436_v16  ;;  %v6437_v9 = vpop.f32.mrf.mxu1  ;;  %v13775_v1 = vadd.f32 %v6512_v5, %v6484_v18  ;;  %v8409_v16 = vor.u32 %v10726_v63, %v8406_v4  ;;  %v11160_v13 = vld [vmem:[%s15008_s1 + $0xc30] sm:$0xff]  ;;  %v11157_v4 = vld [vmem:[%s15008_s1 + $0xc18] sm:$0xff] }
 0x298   :  { %v6438_v2 = vadd.f32 %v6437_v9, %v13697_v42  ;;  %6963 = vmatpush.bf16.msra.mxu0 %v11160_v13  ;;  %v7924_v13 = vld [vmem:[%s15007_s0 + $0x2a8] sm:$0xf] }
 0x299   :  { %v6514_v8 = vpop.f32.mrf.mxu0 }
 0x29a   :  { %6933 = vmatpush.bf16.msra.mxu3 %v11153_v31  ;;  %6881 = vmatpush.bf16.msrb.mxu1 %v11131_v32 }
 0x29c   :  { %v6485_v17 = vpop.f32.mrf.mxu3  ;;  %6964 = vmatpush.bf16.msra.mxu0 %v11159_v15 }
 0x29d   :  { %v6486_v42 = vadd.f32 %v6485_v17, %v13689_v29 }
 0x29e   :  { %v6466_v40 = vpop.f32.mrf.mxu2  ;;  %6934 = vmatpush.bf16.msra.mxu3 %v11152_v58 }
 0x29f   :  { %v13809_v44 = vadd.f32 %v6466_v40, %v6438_v2  ;;  %v6536_v47 = vpop.f32.mrf.mxu1  ;;  %v13817_v51 = vadd.f32 %v6514_v8, %v6486_v42  ;;  %v11139_v2 = vld [vmem:[%s15008_s1 + $0xb88] sm:$0xff] }
 0x2a0   :  { %v6537_v29 = vadd.f32 %v6536_v47, %v13715_v28  ;;  %v11151_v8 = vld [vmem:[%s15008_s1 + $0xbe8] sm:$0xff] }
 0x2a1   :  { %v6517_v33 = vpop.f32.mrf.mxu0  ;;  %6719 = vmatmul.bf16.gmra.mxu3 %v8157_v7  ;;  %v10539_v40 = vld [vmem:[%s15007_s0 + $0xac] sm:$0xf]  ;;  %v7666_v42 = vld [vmem:[%s15007_s0 + $0x1a4] sm:$0xf0]  ;;  %v8162_v7 = vld [vmem:[%s15007_s0 + $0x58c] sm:$0xf0] }
 0x2a2   :  { %6767 = vmatmul.bf16.vlgmr.msra.gmra.mxu1 %v7661_v22  ;;  %6935 = vmatpush.bf16.msra.mxu3 %v11151_v8  ;;  %v8168_v22 = vld [vmem:[%s15007_s0 + $0x498] sm:$0xf]  ;;  %v10571_v47 = vld [vmem:[%s15007_s0 + $0x1a8] sm:$0xf0]  ;;  %v8165_v30 = vor.u32 %v10664_v38, %v8162_v7 }
 0x2a3   :  { %6796 = vmatmul.bf16.vlgmr.msra.gmra.mxu2 %v7665_v24  ;;  %v10696_v24 = vld [vmem:[%s15007_s0 + $0x590] sm:$0xf0]  ;;  %v7673_v41 = vor.u32 %v10571_v47, %v7672_v39  ;;  %v11174_v39 = vld [vmem:[%s15008_s1 + $0xca0] sm:$0xff]  ;;  %v10665_v47 = vld [vmem:[%s15007_s0 + $0x49c] sm:$0xf] }
 0x2a4   :  { %6748 = vmatmul.bf16.gmra.mxu0 %v8161_v37  ;;  %v6488_v20 = vpop.f32.mrf.mxu3  ;;  %v8169_v31 = vor.u32 %v10696_v24, %v8168_v22 }
 0x2a5   :  { %v6489_v54 = vadd.f32 %v6488_v20, %v13707_v23  ;;  %v11140_v23 = vld [vmem:[%s15008_s1 + $0xb90] sm:$0xff]  ;;  %v11130_v20 = vld [vmem:[%s15008_s1 + $0xb40] sm:$0xff] }
 0x2a6   :  { %v6565_v55 = vpop.f32.mrf.mxu2  ;;  %6909 = vmatpush.bf16.msrb.mxu2 %v11140_v23  ;;  %6936 = vmatpush.bf16.msra.mxu3 %v11150_v36 }
 0x2a7   :  { %v13827_v28 = vadd.f32 %v6565_v55, %v6537_v29  ;;  %v6538_v62 = vpop.f32.mrf.mxu1  ;;  %v13835_v48 = vadd.f32 %v6517_v33, %v6489_v54  ;;  %v7669_v33 = vor.u32 %v10539_v40, %v7666_v42  ;;  %v11158_v54 = vld [vmem:[%s15008_s1 + $0xc20] sm:$0xff]  ;;  %6882 = vmatpush.bf16.msrb.mxu1 %v11130_v20  ;;  %v11155_v40 = vld [vmem:[%s15008_s1 + $0xc08] sm:$0xff] }
 0x2a8   :  { %v6539_v43 = vadd.f32 %v6538_v62, %v13757_v60  ;;  %6965 = vmatpush.bf16.msra.mxu0 %v11158_v54  ;;  %v11167_v42 = vld [vmem:[%s15008_s1 + $0xc68] sm:$0xff]  ;;  %v8176_v54 = vld [vmem:[%s15007_s0 + $0x4a0] sm:$0xf] }
 0x2a9   :  { %v6519_v35 = vpop.f32.mrf.mxu0 }
 0x2aa   :  { %6910 = vmatpush.bf16.msrb.mxu2 %v11139_v2 }
 0x2ab   :  { %6991 = vmatpush.bf16.msra.mxu1 %v11169_v6 }
 0x2ac   :  { %v6490_v53 = vpop.f32.mrf.mxu3  ;;  %6966 = vmatpush.bf16.msra.mxu0 %v11157_v4 }
 0x2ad   :  { %v6491_v14 = vadd.f32 %v6490_v53, %v13749_v3 }
 0x2ae   :  { %v6567_v60 = vpop.f32.mrf.mxu2 }
 0x2af   :  { %v13869_v5 = vadd.f32 %v6567_v60, %v6539_v43  ;;  %v6541_v18 = vpop.f32.mrf.mxu1  ;;  %v13877_v26 = vadd.f32 %v6519_v35, %v6491_v14  ;;  %v11149_v35 = vld [vmem:[%s15008_s1 + $0xbd8] sm:$0xff]  ;;  %v10602_v14 = vld [vmem:[%s15007_s0 + $0x2a4] sm:$0xf]  ;;  %v7918_v60 = vld [vmem:[%s15007_s0 + $0x39c] sm:$0xf0] }
 0x2b0   :  { %v6542_v3 = vadd.f32 %v6541_v18, %v13775_v1  ;;  %v11177_v43 = vld [vmem:[%s15008_s1 + $0xcb8] sm:$0xff]  ;;  %6937 = vmatpush.bf16.msra.mxu3 %v11149_v35  ;;  %v10634_v18 = vld [vmem:[%s15007_s0 + $0x3a0] sm:$0xf0] }
 0x2b1   :  { %v6522_v9 = vpop.f32.mrf.mxu0  ;;  %6724 = vmatmul.bf16.gmra.mxu3 %v8409_v16  ;;  %v8414_v16 = vld [vmem:[%s15007_s0 + $0x784] sm:$0xf0]  ;;  %v7925_v32 = vor.u32 %v10634_v18, %v7924_v13  ;;  %v11184_v13 = vld [vmem:[%s15008_s1 + $0xcf0] sm:$0xff] }
 0x2b2   :  { %6772 = vmatmul.bf16.gmra.mxu1 %v7913_v0  ;;  %v8420_v0 = vld [vmem:[%s15007_s0 + $0x690] sm:$0xf]  ;;  %v8417_v2 = vor.u32 %v10727_v11, %v8414_v16  ;;  %v10728_v18 = vld [vmem:[%s15007_s0 + $0x694] sm:$0xf] }
 0x2b3   :  { %6801 = vmatmul.bf16.gmra.mxu2 %v7917_v59  ;;  %v10759_v59 = vld [vmem:[%s15007_s0 + $0x788] sm:$0xf0] }
 0x2b4   :  { %6753 = vmatmul.bf16.gmra.mxu0 %v8413_v25  ;;  %v6493_v46 = vpop.f32.mrf.mxu3  ;;  %v8421_v8 = vor.u32 %v10759_v59, %v8420_v0 }
 0x2b5   :  { %v6494_v21 = vadd.f32 %v6493_v46, %v13767_v56  ;;  %v11138_v56 = vld [vmem:[%s15008_s1 + $0xb80] sm:$0xff]  ;;  %v11156_v46 = vld [vmem:[%s15008_s1 + $0xc10] sm:$0xff] }
 0x2b6   :  { %v6570_v12 = vpop.f32.mrf.mxu2  ;;  %6911 = vmatpush.bf16.msrb.mxu2 %v11138_v56  ;;  %6967 = vmatpush.bf16.msra.mxu0 %v11156_v46 }
 0x2b7   :  { %v13887_v1 = vadd.f32 %v6570_v12, %v6542_v3  ;;  %v6543_v34 = vpop.f32.mrf.mxu1  ;;  %v13895_v57 = vadd.f32 %v6522_v9, %v6494_v21  ;;  %v7921_v9 = vor.u32 %v10602_v14, %v7918_v60  ;;  %v11168_v21 = vld [vmem:[%s15008_s1 + $0xc70] sm:$0xff]  ;;  %v11165_v14 = vld [vmem:[%s15008_s1 + $0xc58] sm:$0xff] }
 0x2b8   :  { %v6544_v17 = vadd.f32 %v6543_v34, %v13817_v51  ;;  %6992 = vmatpush.bf16.msra.mxu1 %v11168_v21  ;;  %v11193_v60 = vld [vmem:[%s15008_s1 + $0xd38] sm:$0xff] }
 0x2b9   :  { %v6524_v19 = vpop.f32.mrf.mxu0  ;;  %v8428_v21 = vld [vmem:[%s15007_s0 + $0x698] sm:$0xf] }
 0x2ba   :  { %7020 = vmatpush.bf16.msra.mxu2 %v11177_v43  ;;  %6968 = vmatpush.bf16.msra.mxu0 %v11155_v40 }
 0x2bc   :  { %v6495_v27 = vpop.f32.mrf.mxu3  ;;  %6993 = vmatpush.bf16.msra.mxu1 %v11167_v42 }
 0x2bd   :  { %v6496_v37 = vadd.f32 %v6495_v27, %v13809_v44 }
 0x2be   :  { %v6572_v51 = vpop.f32.mrf.mxu2  ;;  %7021 = vmatpush.bf16.msra.mxu2 %v11176_v10 }
 0x2bf   :  { %v13929_v29 = vadd.f32 %v6572_v51, %v6544_v17  ;;  %v6546_v55 = vpop.f32.mrf.mxu1  ;;  %v13937_v61 = vadd.f32 %v6524_v19, %v6496_v37  ;;  %v11147_v19 = vld [vmem:[%s15008_s1 + $0xbc8] sm:$0xff]  ;;  %v8170_v37 = vld [vmem:[%s15007_s0 + $0x594] sm:$0xf0]  ;;  %v10540_v51 = vld [vmem:[%s15007_s0 + $0xb4] sm:$0xf] }
 0x2c0   :  { %v6547_v44 = vadd.f32 %v6546_v55, %v13835_v48  ;;  %v11175_v17 = vld [vmem:[%s15008_s1 + $0xca8] sm:$0xff]  ;;  %v10697_v55 = vld [vmem:[%s15007_s0 + $0x598] sm:$0xf0] }
 0x2c1   :  { %v6623_v62 = vpop.f32.mrf.mxu0  ;;  %6825 = vmatmul.bf16.vlgmr.msrb.gmra.mxu3 %v7669_v33  ;;  %v7674_v33 = vld [vmem:[%s15007_s0 + $0x1ac] sm:$0xf0]  ;;  %v8177_v4 = vor.u32 %v10697_v55, %v8176_v54  ;;  %v11182_v54 = vld [vmem:[%s15008_s1 + $0xce0] sm:$0xff] }
 0x2c2   :  { %6777 = vmatmul.bf16.gmra.mxu1 %v8165_v30  ;;  %7022 = vmatpush.bf16.msra.mxu2 %v11175_v17  ;;  %v7680_v30 = vld [vmem:[%s15007_s0 + $0xb8] sm:$0xf]  ;;  %v7677_v35 = vor.u32 %v10540_v51, %v7674_v33  ;;  %v11191_v51 = vld [vmem:[%s15008_s1 + $0xd28] sm:$0xff]  ;;  %v10666_v55 = vld [vmem:[%s15007_s0 + $0x4a4] sm:$0xf] }
 0x2c3   :  { %6806 = vmatmul.bf16.gmra.mxu2 %v8169_v31  ;;  %v10572_v31 = vld [vmem:[%s15007_s0 + $0x1b0] sm:$0xf0] }
 0x2c4   :  { %6854 = vmatmul.bf16.vlgmr.msrb.gmra.mxu0 %v7673_v41  ;;  %v6594_v23 = vpop.f32.mrf.mxu3  ;;  %v7681_v43 = vor.u32 %v10572_v31, %v7680_v30 }
 0x2c5   :  { %v6595_v63 = vadd.f32 %v6594_v23, %v13827_v28  ;;  %v11148_v28 = vld [vmem:[%s15008_s1 + $0xbd0] sm:$0xff]  ;;  %v11154_v23 = vld [vmem:[%s15008_s1 + $0xc00] sm:$0xff] }
 0x2c6   :  { %v6575_v58 = vpop.f32.mrf.mxu2  ;;  %6938 = vmatpush.bf16.msra.mxu3 %v11148_v28  ;;  %7023 = vmatpush.bf16.msra.mxu2 %v11174_v39 }
 0x2c7   :  { %v13947_v48 = vadd.f32 %v6575_v58, %v6547_v44  ;;  %v6548_v52 = vpop.f32.mrf.mxu1  ;;  %v13955_v49 = vadd.f32 %v6623_v62, %v6595_v63  ;;  %v8173_v44 = vor.u32 %v10665_v47, %v8170_v37  ;;  %v11166_v58 = vld [vmem:[%s15008_s1 + $0xc60] sm:$0xff]  ;;  %6969 = vmatpush.bf16.msra.mxu0 %v11154_v23  ;;  %v11163_v37 = vld [vmem:[%s15008_s1 + $0xc48] sm:$0xff] }
 0x2c8   :  { %v6549_v50 = vadd.f32 %v6548_v52, %v13877_v26  ;;  %6994 = vmatpush.bf16.msra.mxu1 %v11166_v58  ;;  %v7688_v58 = vld [vmem:[%s15007_s0 + $0xc0] sm:$0xf] }
 0x2c9   :  { %v6625_v53 = vpop.f32.mrf.mxu0 }
 0x2ca   :  { %6939 = vmatpush.bf16.msra.mxu3 %v11147_v19 }
 0x2cb   :  { %7078 = vmatpush.bf16.msrb.mxu0 %v11193_v60 }
 0x2cc   :  { %v6596_v45 = vpop.f32.mrf.mxu3  ;;  %6995 = vmatpush.bf16.msra.mxu1 %v11165_v14 }
 0x2cd   :  { %v6597_v26 = vadd.f32 %v6596_v45, %v13869_v5 }
 0x2ce   :  { %v6577_v25 = vpop.f32.mrf.mxu2 }
 0x2cf   :  { %v13989_v3 = vadd.f32 %v6577_v25, %v6549_v50  ;;  %v6551_v12 = vpop.f32.mrf.mxu1  ;;  %v13997_v15 = vadd.f32 %v6625_v53, %v6597_v26  ;;  %v11173_v50 = vld [vmem:[%s15008_s1 + $0xc98] sm:$0xff]  ;;  %v8422_v25 = vld [vmem:[%s15007_s0 + $0x78c] sm:$0xf0]  ;;  %v10603_v26 = vld [vmem:[%s15007_s0 + $0x2ac] sm:$0xf] }
 0x2d0   :  { %v6552_v34 = vadd.f32 %v6551_v12, %v13895_v57  ;;  %v11185_v53 = vld [vmem:[%s15008_s1 + $0xcf8] sm:$0xff]  ;;  %7024 = vmatpush.bf16.msra.mxu2 %v11173_v50  ;;  %v10760_v12 = vld [vmem:[%s15007_s0 + $0x790] sm:$0xf0] }
 0x2d1   :  { %v6628_v5 = vpop.f32.mrf.mxu0  ;;  %6830 = vmatmul.bf16.gmra.mxu3 %v7921_v9  ;;  %v7926_v9 = vld [vmem:[%s15007_s0 + $0x3a4] sm:$0xf0]  ;;  %v8429_v40 = vor.u32 %v10760_v12, %v8428_v21  ;;  %v11208_v21 = vld [vmem:[%s15008_s1 + $0xdb0] sm:$0xff]  ;;  %v10729_v12 = vld [vmem:[%s15007_s0 + $0x69c] sm:$0xf] }
 0x2d2   :  { %6782 = vmatmul.bf16.gmra.mxu1 %v8417_v2  ;;  %v7932_v2 = vld [vmem:[%s15007_s0 + $0x2b0] sm:$0xf]  ;;  %v7929_v19 = vor.u32 %v10603_v26, %v7926_v9  ;;  %v11201_v26 = vld [vmem:[%s15008_s1 + $0xd78] sm:$0xff] }
 0x2d3   :  { %6811 = vmatmul.bf16.gmra.mxu2 %v8421_v8  ;;  %v10635_v8 = vld [vmem:[%s15007_s0 + $0x3a8] sm:$0xf0] }
 0x2d4   :  { %6859 = vmatmul.bf16.gmra.mxu0 %v7925_v32  ;;  %v6599_v56 = vpop.f32.mrf.mxu3  ;;  %v7933_v17 = vor.u32 %v10635_v8, %v7932_v2 }
 0x2d5   :  { %v6600_v38 = vadd.f32 %v6599_v56, %v13887_v1  ;;  %v11146_v1 = vld [vmem:[%s15008_s1 + $0xbc0] sm:$0xff]  ;;  %v11164_v56 = vld [vmem:[%s15008_s1 + $0xc50] sm:$0xff] }
 0x2d6   :  { %v6580_v36 = vpop.f32.mrf.mxu2  ;;  %6940 = vmatpush.bf16.msra.mxu3 %v11146_v1  ;;  %6996 = vmatpush.bf16.msra.mxu1 %v11164_v56 }
 0x2d7   :  { %v14007_v57 = vadd.f32 %v6580_v36, %v6552_v34  ;;  %v6553_v7 = vpop.f32.mrf.mxu1  ;;  %v14015_v22 = vadd.f32 %v6628_v5, %v6600_v38  ;;  %v8425_v34 = vor.u32 %v10728_v18, %v8422_v25  ;;  %v11192_v36 = vld [vmem:[%s15008_s1 + $0xd30] sm:$0xff]  ;;  %v11189_v25 = vld [vmem:[%s15008_s1 + $0xd18] sm:$0xff] }
 0x2d8   :  { %v6554_v24 = vadd.f32 %v6553_v7, %v13937_v61  ;;  %7079 = vmatpush.bf16.msrb.mxu0 %v11192_v36  ;;  %v7940_v36 = vld [vmem:[%s15007_s0 + $0x2b8] sm:$0xf] }
 0x2d9   :  { %v6630_v27 = vpop.f32.mrf.mxu0 }
 0x2da   :  { %7049 = vmatpush.bf16.msrb.mxu3 %v11185_v53  ;;  %6997 = vmatpush.bf16.msra.mxu1 %v11163_v37 }
 0x2dc   :  { %v6601_v20 = vpop.f32.mrf.mxu3  ;;  %7080 = vmatpush.bf16.msrb.mxu0 %v11191_v51 }
 0x2dd   :  { %v6602_v61 = vadd.f32 %v6601_v20, %v13929_v29 }
 0x2de   :  { %v6582_v41 = vpop.f32.mrf.mxu2  ;;  %7050 = vmatpush.bf16.msrb.mxu3 %v11184_v13 }
 0x2df   :  { %v14049_v62 = vadd.f32 %v6582_v41, %v6554_v24  ;;  %v6652_v63 = vpop.f32.mrf.mxu1  ;;  %v14057_v6 = vadd.f32 %v6630_v27, %v6602_v61  ;;  %v11171_v24 = vld [vmem:[%s15008_s1 + $0xc88] sm:$0xff]  ;;  %v10541_v41 = vld [vmem:[%s15007_s0 + $0xbc] sm:$0xf]  ;;  %v7682_v61 = vld [vmem:[%s15007_s0 + $0x1b4] sm:$0xf0] }
 0x2e0   :  { %v6653_v29 = vadd.f32 %v6652_v63, %v13955_v49  ;;  %v11183_v27 = vld [vmem:[%s15008_s1 + $0xce8] sm:$0xff]  ;;  %v10573_v63 = vld [vmem:[%s15007_s0 + $0x1b8] sm:$0xf0] }
 0x2e1   :  { %v6633_v52 = vpop.f32.mrf.mxu0  ;;  %6835 = vmatmul.bf16.gmra.mxu3 %v8173_v44  ;;  %v8178_v44 = vld [vmem:[%s15007_s0 + $0x59c] sm:$0xf0]  ;;  %v7689_v14 = vor.u32 %v10573_v63, %v7688_v58  ;;  %v10667_v63 = vld [vmem:[%s15007_s0 + $0x4ac] sm:$0xf] }
 0x2e2   :  { %6883 = vmatmul.bf16.vlgmr.msrb.gmra.mxu1 %v7677_v35  ;;  %7051 = vmatpush.bf16.msrb.mxu3 %v11183_v27  ;;  %v8184_v35 = vld [vmem:[%s15007_s0 + $0x4a8] sm:$0xf]  ;;  %v8181_v50 = vor.u32 %v10666_v55, %v8178_v44  ;;  %v11206_v58 = vld [vmem:[%s15008_s1 + $0xda0] sm:$0xff] }
 0x2e3   :  { %6912 = vmatmul.bf16.vlgmr.msrb.gmra.mxu2 %v7681_v43  ;;  %v10698_v43 = vld [vmem:[%s15007_s0 + $0x5a0] sm:$0xf0] }
 0x2e4   :  { %6864 = vmatmul.bf16.gmra.mxu0 %v8177_v4  ;;  %v6604_v28 = vpop.f32.mrf.mxu3  ;;  %v8185_v53 = vor.u32 %v10698_v43, %v8184_v35 }
 0x2e5   :  { %v6605_v10 = vadd.f32 %v6604_v28, %v13947_v48  ;;  %v11172_v48 = vld [vmem:[%s15008_s1 + $0xc90] sm:$0xff]  ;;  %v11162_v28 = vld [vmem:[%s15008_s1 + $0xc40] sm:$0xff] }
 0x2e6   :  { %v6681_v11 = vpop.f32.mrf.mxu2  ;;  %7025 = vmatpush.bf16.msra.mxu2 %v11172_v48  ;;  %7052 = vmatpush.bf16.msrb.mxu3 %v11182_v54 }
 0x2e7   :  { %v14067_v49 = vadd.f32 %v6681_v11, %v6653_v29  ;;  %v6654_v16 = vpop.f32.mrf.mxu1  ;;  %v14075_v0 = vadd.f32 %v6633_v52, %v6605_v10  ;;  %v7685_v52 = vor.u32 %v10541_v41, %v7682_v61  ;;  %v11190_v10 = vld [vmem:[%s15008_s1 + $0xd20] sm:$0xff]  ;;  %6998 = vmatpush.bf16.msra.mxu1 %v11162_v28  ;;  %v11187_v41 = vld [vmem:[%s15008_s1 + $0xd08] sm:$0xff] }
 0x2e8   :  { %v6655_v45 = vadd.f32 %v6654_v16, %v13997_v15  ;;  %7081 = vmatpush.bf16.msrb.mxu0 %v11190_v10  ;;  %v11199_v61 = vld [vmem:[%s15008_s1 + $0xd68] sm:$0xff]  ;;  %v8192_v10 = vld [vmem:[%s15007_s0 + $0x4b0] sm:$0xf] }
 0x2e9   :  { %v6635_v59 = vpop.f32.mrf.mxu0 }
 0x2ea   :  { %7026 = vmatpush.bf16.msra.mxu2 %v11171_v24 }
 0x2eb   :  { %7107 = vmatpush.bf16.msrb.mxu1 %v11201_v26 }
 0x2ec   :  { %v6606_v46 = vpop.f32.mrf.mxu3  ;;  %7082 = vmatpush.bf16.msrb.mxu0 %v11189_v25 }
 0x2ed   :  { %v6607_v32 = vadd.f32 %v6606_v46, %v13989_v3 }
 0x2ee   :  { %v6683_v15 = vpop.f32.mrf.mxu2 }
 0x2ef   :  { %v14109_v5 = vadd.f32 %v6683_v15, %v6655_v45  ;;  %v6657_v38 = vpop.f32.mrf.mxu1  ;;  %v14117_v42 = vadd.f32 %v6635_v59, %v6607_v32  ;;  %v11181_v59 = vld [vmem:[%s15008_s1 + $0xcd8] sm:$0xff]  ;;  %v10604_v32 = vld [vmem:[%s15007_s0 + $0x2b4] sm:$0xf]  ;;  %v7934_v15 = vld [vmem:[%s15007_s0 + $0x3ac] sm:$0xf0] }
 0x2f0   :  { %v6658_v3 = vadd.f32 %v6657_v38, %v14015_v22  ;;  %v11209_v45 = vld [vmem:[%s15008_s1 + $0xdb8] sm:$0xff]  ;;  %7053 = vmatpush.bf16.msrb.mxu3 %v11181_v59  ;;  %v10636_v38 = vld [vmem:[%s15007_s0 + $0x3b0] sm:$0xf0] }
 0x2f1   :  { %v6638_v7 = vpop.f32.mrf.mxu0  ;;  %6840 = vmatmul.bf16.gmra.mxu3 %v8425_v34  ;;  %v8430_v34 = vld [vmem:[%s15007_s0 + $0x794] sm:$0xf0]  ;;  %v7941_v37 = vor.u32 %v10636_v38, %v7940_v36  ;;  %v11216_v36 = vld [vmem:[%s15008_s1 + $0xdf0] sm:$0xff]  ;;  %v10730_v38 = vld [vmem:[%s15007_s0 + $0x6a4] sm:$0xf] }
 0x2f2   :  { %6888 = vmatmul.bf16.gmra.mxu1 %v7929_v19  ;;  %v8436_v19 = vld [vmem:[%s15007_s0 + $0x6a0] sm:$0xf]  ;;  %v8433_v24 = vor.u32 %v10729_v12, %v8430_v34 }
 0x2f3   :  { %6917 = vmatmul.bf16.gmra.mxu2 %v7933_v17  ;;  %v10761_v17 = vld [vmem:[%s15007_s0 + $0x798] sm:$0xf0] }
 0x2f4   :  { %6869 = vmatmul.bf16.gmra.mxu0 %v8429_v40  ;;  %v6609_v1 = vpop.f32.mrf.mxu3  ;;  %v8437_v27 = vor.u32 %v10761_v17, %v8436_v19 }
 0x2f5   :  { %v6610_v39 = vadd.f32 %v6609_v1, %v14007_v57  ;;  %v11170_v57 = vld [vmem:[%s15008_s1 + $0xc80] sm:$0xff]  ;;  %v11188_v1 = vld [vmem:[%s15008_s1 + $0xd10] sm:$0xff] }
 0x2f6   :  { %v6686_v47 = vpop.f32.mrf.mxu2  ;;  %7027 = vmatpush.bf16.msra.mxu2 %v11170_v57  ;;  %7083 = vmatpush.bf16.msrb.mxu0 %v11188_v1 }
 0x2f7   :  { %v14127_v22 = vadd.f32 %v6686_v47, %v6658_v3  ;;  %v6659_v33 = vpop.f32.mrf.mxu1  ;;  %v14135_v30 = vadd.f32 %v6638_v7, %v6610_v39  ;;  %v7937_v7 = vor.u32 %v10604_v32, %v7934_v15  ;;  %v11200_v39 = vld [vmem:[%s15008_s1 + $0xd70] sm:$0xff]  ;;  %v11197_v32 = vld [vmem:[%s15008_s1 + $0xd58] sm:$0xff] }
 0x2f8   :  { %v6660_v20 = vadd.f32 %v6659_v33, %v14057_v6  ;;  %7108 = vmatpush.bf16.msrb.mxu1 %v11200_v39  ;;  %v11225_v15 = vld [vmem:[%s15008_s1 + $0xe38] sm:$0xff]  ;;  %v8444_v39 = vld [vmem:[%s15007_s0 + $0x6a8] sm:$0xf] }
 0x2f9   :  { %v6640_v31 = vpop.f32.mrf.mxu0 }
 0x2fa   :  { %7136 = vmatpush.bf16.msrb.mxu2 %v11209_v45  ;;  %7084 = vmatpush.bf16.msrb.mxu0 %v11187_v41 }
 0x2fc   :  { %v6611_v23 = vpop.f32.mrf.mxu3  ;;  %7109 = vmatpush.bf16.msrb.mxu1 %v11199_v61 }
 0x2fd   :  { %v6612_v4 = vadd.f32 %v6611_v23, %v14049_v62 }
 0x2fe   :  { %v6688_v6 = vpop.f32.mrf.mxu2  ;;  %7137 = vmatpush.bf16.msrb.mxu2 %v11208_v21 }
 0x2ff   :  { %v14169_v29 = vadd.f32 %v6688_v6, %v6660_v20  ;;  %v6662_v11 = vpop.f32.mrf.mxu1  ;;  %v14177_v60 = vadd.f32 %v6640_v31, %v6612_v4  ;;  %v11179_v31 = vld [vmem:[%s15008_s1 + $0xcc8] sm:$0xff]  ;;  %v10542_v6 = vld [vmem:[%s15007_s0 + $0xc4] sm:$0xf] }
 0x300   :  { %v6663_v62 = vadd.f32 %v6662_v11, %v14075_v0  ;;  %v11207_v20 = vld [vmem:[%s15008_s1 + $0xda8] sm:$0xff] }
 0x301   :  { %v6739_v16 = vpop.f32.mrf.mxu0  ;;  %6941 = vmatmul.bf16.vlgmr.msra.gmra.mxu3 %v7685_v52  ;;  %v8186_v4 = vld [vmem:[%s15007_s0 + $0x5a4] sm:$0xf0]  ;;  %v7690_v52 = vld [vmem:[%s15007_s0 + $0x1bc] sm:$0xf0]  ;;  %v10699_v11 = vld [vmem:[%s15007_s0 + $0x5a8] sm:$0xf0] }
 0x302   :  { %6893 = vmatmul.bf16.gmra.mxu1 %v8181_v50  ;;  %7138 = vmatpush.bf16.msrb.mxu2 %v11207_v20  ;;  %v7696_v50 = vld [vmem:[%s15007_s0 + $0xc8] sm:$0xf]  ;;  %v7693_v59 = vor.u32 %v10542_v6, %v7690_v52  ;;  %v8193_v25 = vor.u32 %v10699_v11, %v8192_v10  ;;  %v11214_v10 = vld [vmem:[%s15008_s1 + $0xde0] sm:$0xff]  ;;  %v10668_v11 = vld [vmem:[%s15007_s0 + $0x4b4] sm:$0xf] }
 0x303   :  { %6922 = vmatmul.bf16.gmra.mxu2 %v8185_v53  ;;  %v10574_v53 = vld [vmem:[%s15007_s0 + $0x1c0] sm:$0xf0]  ;;  %v11223_v6 = vld [vmem:[%s15008_s1 + $0xe28] sm:$0xff] }
 0x304   :  { %6970 = vmatmul.bf16.vlgmr.msra.gmra.mxu0 %v7689_v14  ;;  %v6710_v48 = vpop.f32.mrf.mxu3  ;;  %v7697_v45 = vor.u32 %v10574_v53, %v7696_v50 }
 0x305   :  { %v6711_v18 = vadd.f32 %v6710_v48, %v14067_v49  ;;  %v11180_v49 = vld [vmem:[%s15008_s1 + $0xcd0] sm:$0xff]  ;;  %v11186_v48 = vld [vmem:[%s15008_s1 + $0xd00] sm:$0xff] }
 0x306   :  { %v6691_v13 = vpop.f32.mrf.mxu2  ;;  %7054 = vmatpush.bf16.msrb.mxu3 %v11180_v49  ;;  %7139 = vmatpush.bf16.msrb.mxu2 %v11206_v58 }
 0x307   :  { %v14187_v0 = vadd.f32 %v6691_v13, %v6663_v62  ;;  %v6664_v9 = vpop.f32.mrf.mxu1  ;;  %v14195_v2 = vadd.f32 %v6739_v16, %v6711_v18  ;;  %v8189_v62 = vor.u32 %v10667_v63, %v8186_v4  ;;  %v11198_v13 = vld [vmem:[%s15008_s1 + $0xd60] sm:$0xff]  ;;  %7085 = vmatpush.bf16.msrb.mxu0 %v11186_v48  ;;  %v11195_v4 = vld [vmem:[%s15008_s1 + $0xd48] sm:$0xff] }
 0x308   :  { %v6665_v8 = vadd.f32 %v6664_v9, %v14117_v42  ;;  %7110 = vmatpush.bf16.msrb.mxu1 %v11198_v13  ;;  %v7704_v13 = vld [vmem:[%s15007_s0 + $0xd0] sm:$0xf] }
 0x309   :  { %v6741_v46 = vpop.f32.mrf.mxu0 }
 0x30a   :  { %7055 = vmatpush.bf16.msrb.mxu3 %v11179_v31 }
 0x30b   :  { %7194 = vmatpush.bf16.msra.mxu0 %v11225_v15 }
 0x30c   :  { %v6712_v56 = vpop.f32.mrf.mxu3  ;;  %7111 = vmatpush.bf16.msrb.mxu1 %v11197_v32 }
 0x30d   :  { %v6713_v42 = vadd.f32 %v6712_v56, %v14109_v5 }
 0x30e   :  { %v6693_v40 = vpop.f32.mrf.mxu2 }
 0x30f   :  { %v14229_v3 = vadd.f32 %v6693_v40, %v6665_v8  ;;  %v6667_v47 = vpop.f32.mrf.mxu1  ;;  %v14237_v51 = vadd.f32 %v6741_v46, %v6713_v42  ;;  %v11205_v8 = vld [vmem:[%s15008_s1 + $0xd98] sm:$0xff]  ;;  %v8438_v40 = vld [vmem:[%s15007_s0 + $0x79c] sm:$0xf0] }
 0x310   :  { %v6668_v33 = vadd.f32 %v6667_v47, %v14135_v30  ;;  %v11217_v46 = vld [vmem:[%s15008_s1 + $0xdf8] sm:$0xff]  ;;  %7140 = vmatpush.bf16.msrb.mxu2 %v11205_v8  ;;  %v10762_v47 = vld [vmem:[%s15007_s0 + $0x7a0] sm:$0xf0] }
 0x311   :  { %v6744_v5 = vpop.f32.mrf.mxu0  ;;  %6946 = vmatmul.bf16.gmra.mxu3 %v7937_v7  ;;  %v10605_v42 = vld [vmem:[%s15007_s0 + $0x2bc] sm:$0xf]  ;;  %v7942_v7 = vld [vmem:[%s15007_s0 + $0x3b4] sm:$0xf0]  ;;  %v8445_v41 = vor.u32 %v10762_v47, %v8444_v39  ;;  %v11240_v39 = vld [vmem:[%s15008_s1 + $0xeb0] sm:$0xff] }
 0x312   :  { %6898 = vmatmul.bf16.gmra.mxu1 %v8433_v24  ;;  %v7948_v24 = vld [vmem:[%s15007_s0 + $0x2c0] sm:$0xf]  ;;  %v7945_v31 = vor.u32 %v10605_v42, %v7942_v7  ;;  %v11233_v42 = vld [vmem:[%s15008_s1 + $0xe78] sm:$0xff]  ;;  %v10731_v47 = vld [vmem:[%s15007_s0 + $0x6ac] sm:$0xf] }
 0x313   :  { %6927 = vmatmul.bf16.gmra.mxu2 %v8437_v27  ;;  %v10637_v27 = vld [vmem:[%s15007_s0 + $0x3b8] sm:$0xf0] }
 0x314   :  { %6975 = vmatmul.bf16.gmra.mxu0 %v7941_v37  ;;  %v6715_v57 = vpop.f32.mrf.mxu3  ;;  %v7949_v20 = vor.u32 %v10637_v27, %v7948_v24 }
 0x315   :  { %v6716_v55 = vadd.f32 %v6715_v57, %v14127_v22  ;;  %v11178_v22 = vld [vmem:[%s15008_s1 + $0xcc0] sm:$0xff]  ;;  %v11196_v57 = vld [vmem:[%s15008_s1 + $0xd50] sm:$0xff] }
 0x316   :  { %v6696_v54 = vpop.f32.mrf.mxu2  ;;  %7056 = vmatpush.bf16.msrb.mxu3 %v11178_v22  ;;  %7112 = vmatpush.bf16.msrb.mxu1 %v11196_v57 }
 0x317   :  { %v14247_v30 = vadd.f32 %v6696_v54, %v6668_v33  ;;  %v6669_v44 = vpop.f32.mrf.mxu1  ;;  %v14255_v35 = vadd.f32 %v6744_v5, %v6716_v55  ;;  %v8441_v33 = vor.u32 %v10730_v38, %v8438_v40  ;;  %v11224_v54 = vld [vmem:[%s15008_s1 + $0xe30] sm:$0xff]  ;;  %v11221_v40 = vld [vmem:[%s15008_s1 + $0xe18] sm:$0xff] }
 0x318   :  { %v6670_v43 = vadd.f32 %v6669_v44, %v14177_v60  ;;  %7195 = vmatpush.bf16.msra.mxu0 %v11224_v54  ;;  %v7956_v54 = vld [vmem:[%s15007_s0 + $0x2c8] sm:$0xf] }
 0x319   :  { %v6746_v23 = vpop.f32.mrf.mxu0 }
 0x31a   :  { %7165 = vmatpush.bf16.msra.mxu3 %v11217_v46  ;;  %7113 = vmatpush.bf16.msrb.mxu1 %v11195_v4 }
 0x31c   :  { %v6717_v28 = vpop.f32.mrf.mxu3  ;;  %7196 = vmatpush.bf16.msra.mxu0 %v11223_v6 }
 0x31d   :  { %v6718_v60 = vadd.f32 %v6717_v28, %v14169_v29 }
 0x31e   :  { %v6698_v14 = vpop.f32.mrf.mxu2  ;;  %7166 = vmatpush.bf16.msra.mxu3 %v11216_v36 }
 0x31f   :  { %v14289_v16 = vadd.f32 %v6698_v14, %v6670_v43  ;;  %v6768_v18 = vpop.f32.mrf.mxu1  ;;  %v14297_v26 = vadd.f32 %v6746_v23, %v6718_v60  ;;  %v11203_v43 = vld [vmem:[%s15008_s1 + $0xd88] sm:$0xff] }
 0x320   :  { %v6769_v29 = vadd.f32 %v6768_v18, %v14195_v2  ;;  %v11215_v23 = vld [vmem:[%s15008_s1 + $0xde8] sm:$0xff] }
 0x321   :  { %v6749_v9 = vpop.f32.mrf.mxu0  ;;  %6951 = vmatmul.bf16.gmra.mxu3 %v8189_v62  ;;  %v10543_v14 = vld [vmem:[%s15007_s0 + $0xcc] sm:$0xf]  ;;  %v7698_v60 = vld [vmem:[%s15007_s0 + $0x1c4] sm:$0xf0]  ;;  %v8194_v62 = vld [vmem:[%s15007_s0 + $0x5ac] sm:$0xf0] }
 0x322   :  { %6999 = vmatmul.bf16.vlgmr.msra.gmra.mxu1 %v7693_v59  ;;  %7167 = vmatpush.bf16.msra.mxu3 %v11215_v23  ;;  %v8200_v59 = vld [vmem:[%s15007_s0 + $0x4b8] sm:$0xf]  ;;  %v10575_v18 = vld [vmem:[%s15007_s0 + $0x1c8] sm:$0xf0]  ;;  %v8197_v8 = vor.u32 %v10668_v11, %v8194_v62 }
 0x323   :  { %7028 = vmatmul.bf16.vlgmr.msra.gmra.mxu2 %v7697_v45  ;;  %v10700_v45 = vld [vmem:[%s15007_s0 + $0x5b0] sm:$0xf0]  ;;  %v7705_v32 = vor.u32 %v10575_v18, %v7704_v13  ;;  %v11238_v13 = vld [vmem:[%s15008_s1 + $0xea0] sm:$0xff]  ;;  %v10669_v18 = vld [vmem:[%s15007_s0 + $0x4bc] sm:$0xf] }
 0x324   :  { %6980 = vmatmul.bf16.gmra.mxu0 %v8193_v25  ;;  %v6720_v49 = vpop.f32.mrf.mxu3  ;;  %v8201_v46 = vor.u32 %v10700_v45, %v8200_v59 }
 0x325   :  { %v6721_v21 = vadd.f32 %v6720_v49, %v14187_v0  ;;  %v11204_v0 = vld [vmem:[%s15008_s1 + $0xd90] sm:$0xff]  ;;  %v11194_v49 = vld [vmem:[%s15008_s1 + $0xd40] sm:$0xff] }
 0x326   :  { %v6797_v12 = vpop.f32.mrf.mxu2  ;;  %7141 = vmatpush.bf16.msrb.mxu2 %v11204_v0  ;;  %7168 = vmatpush.bf16.msra.mxu3 %v11214_v10 }
 0x327   :  { %v14307_v2 = vadd.f32 %v6797_v12, %v6769_v29  ;;  %v6770_v34 = vpop.f32.mrf.mxu1  ;;  %v14315_v19 = vadd.f32 %v6749_v9, %v6721_v21  ;;  %v7701_v9 = vor.u32 %v10543_v14, %v7698_v60  ;;  %v11222_v21 = vld [vmem:[%s15008_s1 + $0xe20] sm:$0xff]  ;;  %7114 = vmatpush.bf16.msrb.mxu1 %v11194_v49  ;;  %v11219_v14 = vld [vmem:[%s15008_s1 + $0xe08] sm:$0xff] }
 0x328   :  { %v6771_v56 = vadd.f32 %v6770_v34, %v14237_v51  ;;  %7197 = vmatpush.bf16.msra.mxu0 %v11222_v21  ;;  %v11231_v60 = vld [vmem:[%s15008_s1 + $0xe68] sm:$0xff]  ;;  %v8208_v21 = vld [vmem:[%s15007_s0 + $0x4c0] sm:$0xf] }
 0x329   :  { %v6751_v17 = vpop.f32.mrf.mxu0 }
 0x32a   :  { %7142 = vmatpush.bf16.msrb.mxu2 %v11203_v43 }
 0x32b   :  { %7223 = vmatpush.bf16.msra.mxu1 %v11233_v42 }
 0x32c   :  { %v6722_v1 = vpop.f32.mrf.mxu3  ;;  %7198 = vmatpush.bf16.msra.mxu0 %v11221_v40 }
 0x32d   :  { %v6723_v37 = vadd.f32 %v6722_v1, %v14229_v3 }
 0x32e   :  { %v6799_v51 = vpop.f32.mrf.mxu2 }
 0x32f   :  { %v14349_v5 = vadd.f32 %v6799_v51, %v6771_v56  ;;  %v6773_v55 = vpop.f32.mrf.mxu1  ;;  %v14357_v61 = vadd.f32 %v6751_v17, %v6723_v37  ;;  %v11213_v17 = vld [vmem:[%s15008_s1 + $0xdd8] sm:$0xff]  ;;  %v10606_v37 = vld [vmem:[%s15007_s0 + $0x2c4] sm:$0xf]  ;;  %v7950_v51 = vld [vmem:[%s15007_s0 + $0x3bc] sm:$0xf0] }
 0x330   :  { %v6774_v3 = vadd.f32 %v6773_v55, %v14255_v35  ;;  %v11241_v56 = vld [vmem:[%s15008_s1 + $0xeb8] sm:$0xff]  ;;  %7169 = vmatpush.bf16.msra.mxu3 %v11213_v17  ;;  %v10638_v55 = vld [vmem:[%s15007_s0 + $0x3c0] sm:$0xf0] }
 0x331   :  { %v6754_v44 = vpop.f32.mrf.mxu0  ;;  %6956 = vmatmul.bf16.gmra.mxu3 %v8441_v33  ;;  %v8446_v33 = vld [vmem:[%s15007_s0 + $0x7a4] sm:$0xf0]  ;;  %v7957_v4 = vor.u32 %v10638_v55, %v7956_v54  ;;  %v11248_v54 = vld [vmem:[%s15008_s1 + $0xef0] sm:$0xff] }
 0x332   :  { %7004 = vmatmul.bf16.gmra.mxu1 %v7945_v31  ;;  %v8452_v31 = vld [vmem:[%s15007_s0 + $0x6b0] sm:$0xf]  ;;  %v8449_v43 = vor.u32 %v10731_v47, %v8446_v33  ;;  %v10732_v55 = vld [vmem:[%s15007_s0 + $0x6b4] sm:$0xf] }
 0x333   :  { %7033 = vmatmul.bf16.gmra.mxu2 %v7949_v20  ;;  %v10763_v20 = vld [vmem:[%s15007_s0 + $0x7a8] sm:$0xf0] }
 0x334   :  { %6985 = vmatmul.bf16.gmra.mxu0 %v8445_v41  ;;  %v6725_v22 = vpop.f32.mrf.mxu3  ;;  %v8453_v23 = vor.u32 %v10763_v20, %v8452_v31 }
 0x335   :  { %v6726_v58 = vadd.f32 %v6725_v22, %v14247_v30  ;;  %v11202_v30 = vld [vmem:[%s15008_s1 + $0xd80] sm:$0xff]  ;;  %v11220_v22 = vld [vmem:[%s15008_s1 + $0xe10] sm:$0xff] }
 0x336   :  { %v6802_v63 = vpop.f32.mrf.mxu2  ;;  %7143 = vmatpush.bf16.msrb.mxu2 %v11202_v30  ;;  %7199 = vmatpush.bf16.msra.mxu0 %v11220_v22 }
 0x337   :  { %v14367_v35 = vadd.f32 %v6802_v63, %v6774_v3  ;;  %v6775_v52 = vpop.f32.mrf.mxu1  ;;  %v14375_v50 = vadd.f32 %v6754_v44, %v6726_v58  ;;  %v7953_v44 = vor.u32 %v10606_v37, %v7950_v51  ;;  %v11232_v58 = vld [vmem:[%s15008_s1 + $0xe70] sm:$0xff]  ;;  %v11229_v37 = vld [vmem:[%s15008_s1 + $0xe58] sm:$0xff] }
 0x338   :  { %v6776_v28 = vadd.f32 %v6775_v52, %v14297_v26  ;;  %7224 = vmatpush.bf16.msra.mxu1 %v11232_v58  ;;  %v11257_v51 = vld [vmem:[%s15008_s1 + $0xf38] sm:$0xff] }
 0x339   :  { %v6756_v53 = vpop.f32.mrf.mxu0  ;;  %v8460_v58 = vld [vmem:[%s15007_s0 + $0x6b8] sm:$0xf] }
 0x33a   :  { %7252 = vmatpush.bf16.msra.mxu2 %v11241_v56  ;;  %7200 = vmatpush.bf16.msra.mxu0 %v11219_v14 }
 0x33c   :  { %v6727_v48 = vpop.f32.mrf.mxu3  ;;  %7225 = vmatpush.bf16.msra.mxu1 %v11231_v60 }
 0x33d   :  { %v6728_v25 = vadd.f32 %v6727_v48, %v14289_v16 }
 0x33e   :  { %v6804_v26 = vpop.f32.mrf.mxu2  ;;  %7253 = vmatpush.bf16.msra.mxu2 %v11240_v39 }
 0x33f   :  { %v14409_v29 = vadd.f32 %v6804_v26, %v6776_v28  ;;  %v6778_v12 = vpop.f32.mrf.mxu1  ;;  %v14417_v15 = vadd.f32 %v6756_v53, %v6728_v25  ;;  %v11211_v53 = vld [vmem:[%s15008_s1 + $0xdc8] sm:$0xff]  ;;  %v8202_v25 = vld [vmem:[%s15007_s0 + $0x5b4] sm:$0xf0]  ;;  %v10544_v26 = vld [vmem:[%s15007_s0 + $0xd4] sm:$0xf] }
 0x340   :  { %v6779_v16 = vadd.f32 %v6778_v12, %v14315_v19  ;;  %v11239_v28 = vld [vmem:[%s15008_s1 + $0xea8] sm:$0xff]  ;;  %v10701_v12 = vld [vmem:[%s15007_s0 + $0x5b8] sm:$0xf0] }
 0x341   :  { %v6855_v34 = vpop.f32.mrf.mxu0  ;;  %7057 = vmatmul.bf16.vlgmr.msrb.gmra.mxu3 %v7701_v9  ;;  %v7706_v9 = vld [vmem:[%s15007_s0 + $0x1cc] sm:$0xf0]  ;;  %v8209_v40 = vor.u32 %v10701_v12, %v8208_v21  ;;  %v11246_v21 = vld [vmem:[%s15008_s1 + $0xee0] sm:$0xff] }
 0x342   :  { %7009 = vmatmul.bf16.gmra.mxu1 %v8197_v8  ;;  %7254 = vmatpush.bf16.msra.mxu2 %v11239_v28  ;;  %v7712_v8 = vld [vmem:[%s15007_s0 + $0xd8] sm:$0xf]  ;;  %v7709_v17 = vor.u32 %v10544_v26, %v7706_v9  ;;  %v11255_v26 = vld [vmem:[%s15008_s1 + $0xf28] sm:$0xff]  ;;  %v10670_v12 = vld [vmem:[%s15007_s0 + $0x4c4] sm:$0xf] }
 0x343   :  { %7038 = vmatmul.bf16.gmra.mxu2 %v8201_v46  ;;  %v10576_v46 = vld [vmem:[%s15007_s0 + $0x1d0] sm:$0xf0] }
 0x344   :  { %7086 = vmatmul.bf16.vlgmr.msrb.gmra.mxu0 %v7705_v32  ;;  %v6826_v0 = vpop.f32.mrf.mxu3  ;;  %v7713_v56 = vor.u32 %v10576_v46, %v7712_v8 }
 0x345   :  { %v6827_v38 = vadd.f32 %v6826_v0, %v14307_v2  ;;  %v11212_v2 = vld [vmem:[%s15008_s1 + $0xdd0] sm:$0xff]  ;;  %v11218_v0 = vld [vmem:[%s15008_s1 + $0xe00] sm:$0xff] }
 0x346   :  { %v6807_v36 = vpop.f32.mrf.mxu2  ;;  %7170 = vmatpush.bf16.msra.mxu3 %v11212_v2  ;;  %7255 = vmatpush.bf16.msra.mxu2 %v11238_v13 }
 0x347   :  { %v14427_v19 = vadd.f32 %v6807_v36, %v6779_v16  ;;  %v6780_v7 = vpop.f32.mrf.mxu1  ;;  %v14435_v24 = vadd.f32 %v6855_v34, %v6827_v38  ;;  %v8205_v16 = vor.u32 %v10669_v18, %v8202_v25  ;;  %v11230_v36 = vld [vmem:[%s15008_s1 + $0xe60] sm:$0xff]  ;;  %7201 = vmatpush.bf16.msra.mxu0 %v11218_v0  ;;  %v11227_v25 = vld [vmem:[%s15008_s1 + $0xe48] sm:$0xff] }
 0x348   :  { %v6781_v27 = vadd.f32 %v6780_v7, %v14357_v61  ;;  %7226 = vmatpush.bf16.msra.mxu1 %v11230_v36  ;;  %v7720_v36 = vld [vmem:[%s15007_s0 + $0xe0] sm:$0xf] }
 0x349   :  { %v6857_v1 = vpop.f32.mrf.mxu0 }
 0x34a   :  { %7171 = vmatpush.bf16.msra.mxu3 %v11211_v53 }
 0x34b   :  { %7310 = vmatpush.bf16.msrb.mxu0 %v11257_v51 }
 0x34c   :  { %v6828_v57 = vpop.f32.mrf.mxu3  ;;  %7227 = vmatpush.bf16.msra.mxu1 %v11229_v37 }
 0x34d   :  { %v6829_v61 = vadd.f32 %v6828_v57, %v14349_v5 }
 0x34e   :  { %v6809_v41 = vpop.f32.mrf.mxu2 }
 0x34f   :  { %v14469_v3 = vadd.f32 %v6809_v41, %v6781_v27  ;;  %v6783_v63 = vpop.f32.mrf.mxu1  ;;  %v14477_v6 = vadd.f32 %v6857_v1, %v6829_v61  ;;  %v11237_v27 = vld [vmem:[%s15008_s1 + $0xe98] sm:$0xff]  ;;  %v8454_v41 = vld [vmem:[%s15007_s0 + $0x7ac] sm:$0xf0]  ;;  %v10607_v61 = vld [vmem:[%s15007_s0 + $0x2cc] sm:$0xf] }
 0x350   :  { %v6784_v52 = vadd.f32 %v6783_v63, %v14375_v50  ;;  %v11249_v1 = vld [vmem:[%s15008_s1 + $0xef8] sm:$0xff]  ;;  %7256 = vmatpush.bf16.msra.mxu2 %v11237_v27  ;;  %v10764_v63 = vld [vmem:[%s15007_s0 + $0x7b0] sm:$0xf0] }
 0x351   :  { %v6860_v5 = vpop.f32.mrf.mxu0  ;;  %7062 = vmatmul.bf16.gmra.mxu3 %v7953_v44  ;;  %v7958_v44 = vld [vmem:[%s15007_s0 + $0x3c4] sm:$0xf0]  ;;  %v8461_v14 = vor.u32 %v10764_v63, %v8460_v58  ;;  %v14690_v58 = vld [vmem:[%s15008_s1 + $0xfb0] sm:$0xff]  ;;  %v10733_v63 = vld [vmem:[%s15007_s0 + $0x6bc] sm:$0xf] }
 0x352   :  { %7014 = vmatmul.bf16.gmra.mxu1 %v8449_v43  ;;  %v7964_v43 = vld [vmem:[%s15007_s0 + $0x2d0] sm:$0xf]  ;;  %v7961_v53 = vor.u32 %v10607_v61, %v7958_v44  ;;  %v14678_v61 = vld [vmem:[%s15008_s1 + $0xf78] sm:$0xff] }
 0x353   :  { %7043 = vmatmul.bf16.gmra.mxu2 %v8453_v23  ;;  %v10639_v23 = vld [vmem:[%s15007_s0 + $0x3c8] sm:$0xf0] }
 0x354   :  { %7091 = vmatmul.bf16.gmra.mxu0 %v7957_v4  ;;  %v6831_v30 = vpop.f32.mrf.mxu3  ;;  %v7965_v28 = vor.u32 %v10639_v23, %v7964_v43 }
 0x355   :  { %v6832_v11 = vadd.f32 %v6831_v30, %v14367_v35  ;;  %v11210_v35 = vld [vmem:[%s15008_s1 + $0xdc0] sm:$0xff]  ;;  %v11228_v30 = vld [vmem:[%s15008_s1 + $0xe50] sm:$0xff] }
 0x356   :  { %v6812_v10 = vpop.f32.mrf.mxu2  ;;  %7172 = vmatpush.bf16.msra.mxu3 %v11210_v35  ;;  %7228 = vmatpush.bf16.msra.mxu1 %v11228_v30 }
 0x357   :  { %v14487_v50 = vadd.f32 %v6812_v10, %v6784_v52  ;;  %v6785_v62 = vpop.f32.mrf.mxu1  ;;  %v14495_v59 = vadd.f32 %v6860_v5, %v6832_v11  ;;  %v8457_v52 = vor.u32 %v10732_v55, %v8454_v41  ;;  %v11256_v10 = vld [vmem:[%s15008_s1 + $0xf30] sm:$0xff]  ;;  %v11253_v41 = vld [vmem:[%s15008_s1 + $0xf18] sm:$0xff] }
 0x358   :  { %v6786_v45 = vadd.f32 %v6785_v62, %v14417_v15  ;;  %7311 = vmatpush.bf16.msrb.mxu0 %v11256_v10  ;;  %v7972_v10 = vld [vmem:[%s15007_s0 + $0x2d8] sm:$0xf] }
 0x359   :  { %v6862_v48 = vpop.f32.mrf.mxu0 }
 0x35a   :  { %7281 = vmatpush.bf16.msrb.mxu3 %v11249_v1  ;;  %7229 = vmatpush.bf16.msra.mxu1 %v11227_v25 }
 0x35c   :  { %v6833_v49 = vpop.f32.mrf.mxu3  ;;  %7312 = vmatpush.bf16.msrb.mxu0 %v11255_v26 }
 0x35d   :  { %v6834_v15 = vadd.f32 %v6833_v49, %v14409_v29 }
 0x35e   :  { %v6814_v32 = vpop.f32.mrf.mxu2  ;;  %7282 = vmatpush.bf16.msrb.mxu3 %v11248_v54 }
 0x35f   :  { %v14529_v34 = vadd.f32 %v6814_v32, %v6786_v45  ;;  %v6884_v38 = vpop.f32.mrf.mxu1  ;;  %v14537_v42 = vadd.f32 %v6862_v48, %v6834_v15  ;;  %v11235_v45 = vld [vmem:[%s15008_s1 + $0xe88] sm:$0xff]  ;;  %v10545_v32 = vld [vmem:[%s15007_s0 + $0xdc] sm:$0xf]  ;;  %v7714_v15 = vld [vmem:[%s15007_s0 + $0x1d4] sm:$0xf0] }
 0x360   :  { %v6885_v29 = vadd.f32 %v6884_v38, %v14435_v24  ;;  %v11247_v48 = vld [vmem:[%s15008_s1 + $0xee8] sm:$0xff]  ;;  %v10577_v38 = vld [vmem:[%s15007_s0 + $0x1d8] sm:$0xf0] }
 0x361   :  { %v6865_v7 = vpop.f32.mrf.mxu0  ;;  %7067 = vmatmul.bf16.gmra.mxu3 %v8205_v16  ;;  %v8210_v16 = vld [vmem:[%s15007_s0 + $0x5bc] sm:$0xf0]  ;;  %v7721_v37 = vor.u32 %v10577_v38, %v7720_v36  ;;  %v10671_v38 = vld [vmem:[%s15007_s0 + $0x4cc] sm:$0xf] }
 0x362   :  { %7115 = vmatmul.bf16.vlgmr.msrb.gmra.mxu1 %v7709_v17  ;;  %7283 = vmatpush.bf16.msrb.mxu3 %v11247_v48  ;;  %v8216_v17 = vld [vmem:[%s15007_s0 + $0x4c8] sm:$0xf]  ;;  %v8213_v27 = vor.u32 %v10670_v12, %v8210_v16  ;;  %v11270_v36 = vld [vmem:[%s15008_s1 + $0xfa0] sm:$0xff] }
 0x363   :  { %7144 = vmatmul.bf16.vlgmr.msrb.gmra.mxu2 %v7713_v56  ;;  %v10702_v56 = vld [vmem:[%s15007_s0 + $0x5c0] sm:$0xf0] }
 0x364   :  { %7096 = vmatmul.bf16.gmra.mxu0 %v8209_v40  ;;  %v6836_v2 = vpop.f32.mrf.mxu3  ;;  %v8217_v1 = vor.u32 %v10702_v56, %v8216_v17 }
 0x365   :  { %v6837_v39 = vadd.f32 %v6836_v2, %v14427_v19  ;;  %v11236_v19 = vld [vmem:[%s15008_s1 + $0xe90] sm:$0xff]  ;;  %v11226_v2 = vld [vmem:[%s15008_s1 + $0xe40] sm:$0xff] }
 0x366   :  { %v6913_v47 = vpop.f32.mrf.mxu2  ;;  %7257 = vmatpush.bf16.msra.mxu2 %v11236_v19  ;;  %7284 = vmatpush.bf16.msrb.mxu3 %v11246_v21 }
 0x367   :  { %v14547_v24 = vadd.f32 %v6913_v47, %v6885_v29  ;;  %v6886_v33 = vpop.f32.mrf.mxu1  ;;  %v14555_v31 = vadd.f32 %v6865_v7, %v6837_v39  ;;  %v7717_v7 = vor.u32 %v10545_v32, %v7714_v15  ;;  %v11254_v39 = vld [vmem:[%s15008_s1 + $0xf20] sm:$0xff]  ;;  %7230 = vmatpush.bf16.msra.mxu1 %v11226_v2  ;;  %v11251_v32 = vld [vmem:[%s15008_s1 + $0xf08] sm:$0xff] }
 0x368   :  { %v6887_v57 = vadd.f32 %v6886_v33, %v14477_v6  ;;  %7313 = vmatpush.bf16.msrb.mxu0 %v11254_v39  ;;  %v11263_v15 = vld [vmem:[%s15008_s1 + $0xf68] sm:$0xff]  ;;  %v8224_v39 = vld [vmem:[%s15007_s0 + $0x4d0] sm:$0xf] }
 0x369   :  { %v6867_v20 = vpop.f32.mrf.mxu0 }
 0x36a   :  { %7258 = vmatpush.bf16.msra.mxu2 %v11235_v45 }
 0x36b   :  { %11305 = vmatpush.bf16.msrb.mxu1 %v14678_v61 }
 0x36c   :  { %v6838_v22 = vpop.f32.mrf.mxu3  ;;  %7314 = vmatpush.bf16.msrb.mxu0 %v11253_v41 }
 0x36d   :  { %v6839_v4 = vadd.f32 %v6838_v22, %v14469_v3  ;;  %v11244_v22 = vld [vmem:[%s15008_s1 + $0xed0] sm:$0xff] }
 0x36e   :  { %v6915_v6 = vpop.f32.mrf.mxu2 }
 0x36f   :  { %v14589_v5 = vadd.f32 %v6915_v6, %v6887_v57  ;;  %v6889_v11 = vpop.f32.mrf.mxu1  ;;  %v14597_v60 = vadd.f32 %v6867_v20, %v6839_v4  ;;  %v11245_v20 = vld [vmem:[%s15008_s1 + $0xed8] sm:$0xff]  ;;  %v10608_v4 = vld [vmem:[%s15007_s0 + $0x2d4] sm:$0xf]  ;;  %v7966_v6 = vld [vmem:[%s15007_s0 + $0x3cc] sm:$0xf0] }
 0x370   :  { %v6890_v3 = vadd.f32 %v6889_v11, %v14495_v59  ;;  %v14666_v57 = vld [vmem:[%s15008_s1 + $0xfb8] sm:$0xff]  ;;  %7285 = vmatpush.bf16.msrb.mxu3 %v11245_v20  ;;  %v10640_v11 = vld [vmem:[%s15007_s0 + $0x3d0] sm:$0xf0] }
 0x371   :  { %v6870_v62 = vpop.f32.mrf.mxu0  ;;  %7072 = vmatmul.bf16.gmra.mxu3 %v8457_v52  ;;  %v8462_v52 = vld [vmem:[%s15007_s0 + $0x7b4] sm:$0xf0]  ;;  %v7973_v25 = vor.u32 %v10640_v11, %v7972_v10  ;;  %v10609_v10 = vld [vmem:[%s15007_s0 + $0x2dc] sm:$0xf] }
 0x372   :  { %7120 = vmatmul.bf16.gmra.mxu1 %v7961_v53  ;;  %v8468_v53 = vld [vmem:[%s15007_s0 + $0x6c0] sm:$0xf]  ;;  %v8465_v45 = vor.u32 %v10733_v63, %v8462_v52  ;;  %v7974_v11 = vld [vmem:[%s15007_s0 + $0x3d4] sm:$0xf0] }
 0x373   :  { %7149 = vmatmul.bf16.gmra.mxu2 %v7965_v28  ;;  %v10765_v28 = vld [vmem:[%s15007_s0 + $0x7b8] sm:$0xf0] }
 0x374   :  { %7101 = vmatmul.bf16.gmra.mxu0 %v8461_v14  ;;  %v6841_v35 = vpop.f32.mrf.mxu3  ;;  %7286 = vmatpush.bf16.msrb.mxu3 %v11244_v22  ;;  %v8469_v48 = vor.u32 %v10765_v28, %v8468_v53  ;;  %v10734_v28 = vld [vmem:[%s15007_s0 + $0x6c4] sm:$0xf] }
 0x375   :  { %v6842_v13 = vadd.f32 %v6841_v35, %v14487_v50  ;;  %v11234_v50 = vld [vmem:[%s15008_s1 + $0xe80] sm:$0xff]  ;;  %v11252_v35 = vld [vmem:[%s15008_s1 + $0xf10] sm:$0xff] }
 0x376   :  { %v6918_v18 = vpop.f32.mrf.mxu2  ;;  %7259 = vmatpush.bf16.msra.mxu2 %v11234_v50  ;;  %7315 = vmatpush.bf16.msrb.mxu0 %v11252_v35 }
 0x377   :  { %v14607_v59 = vadd.f32 %v6918_v18, %v6890_v3  ;;  %v6891_v9 = vpop.f32.mrf.mxu1  ;;  %v14615_v8 = vadd.f32 %v6870_v62, %v6842_v13  ;;  %v7969_v62 = vor.u32 %v10608_v4, %v7966_v6  ;;  %v14726_v13 = vld [vmem:[%s15008_s1 + $0xf70] sm:$0xff] }
 0x378   :  { %v6892_v49 = vadd.f32 %v6891_v9, %v14537_v42  ;;  %11306 = vmatpush.bf16.msrb.mxu1 %v14726_v13 }
 0x379   :  { %v6872_v46 = vpop.f32.mrf.mxu0 }
 0x37a   :  { %7368 = vmatpush.bf16.msrb.mxu2 %v14666_v57  ;;  %7316 = vmatpush.bf16.msrb.mxu0 %v11251_v32 }
 0x37c   :  { %v6843_v0 = vpop.f32.mrf.mxu3  ;;  %11307 = vmatpush.bf16.msrb.mxu1 %v11263_v15 }
 0x37d   :  { %v6844_v40 = vadd.f32 %v6843_v0, %v14529_v34 }
 0x37e   :  { %v6920_v42 = vpop.f32.mrf.mxu2  ;;  %7369 = vmatpush.bf16.msrb.mxu2 %v14690_v58 }
 0x37f   :  { %v14649_v29 = vadd.f32 %v6920_v42, %v6892_v49  ;;  %v6894_v47 = vpop.f32.mrf.mxu1  ;;  %v14657_v51 = vadd.f32 %v6872_v46, %v6844_v40  ;;  %v11243_v46 = vld [vmem:[%s15008_s1 + $0xec8] sm:$0xff]  ;;  %v10546_v42 = vld [vmem:[%s15007_s0 + $0xe4] sm:$0xf] }
 0x380   :  { %v6895_v34 = vadd.f32 %v6894_v47, %v14555_v31  ;;  %v11271_v49 = vld [vmem:[%s15008_s1 + $0xfa8] sm:$0xff]  ;;  %7287 = vmatpush.bf16.msrb.mxu3 %v11243_v46 }
 0x381   :  { %v6971_v33 = vpop.f32.mrf.mxu0  ;;  %7173 = vmatmul.bf16.vlgmr.msra.gmra.mxu3 %v7717_v7  ;;  %v8218_v40 = vld [vmem:[%s15007_s0 + $0x5c4] sm:$0xf0]  ;;  %v7722_v7 = vld [vmem:[%s15007_s0 + $0x1dc] sm:$0xf0]  ;;  %v10703_v47 = vld [vmem:[%s15007_s0 + $0x5c8] sm:$0xf0] }
 0x382   :  { %7125 = vmatmul.bf16.gmra.mxu1 %v8213_v27  ;;  %7370 = vmatpush.bf16.msrb.mxu2 %v11271_v49  ;;  %v7728_v27 = vld [vmem:[%s15007_s0 + $0xe8] sm:$0xf]  ;;  %v7725_v20 = vor.u32 %v10546_v42, %v7722_v7  ;;  %v8225_v41 = vor.u32 %v10703_v47, %v8224_v39  ;;  %v10547_v42 = vld [vmem:[%s15007_s0 + $0xec] sm:$0xf]  ;;  %v7736_v47 = vld [vmem:[%s15007_s0 + $0xf0] sm:$0xf] }
 0x383   :  { %7154 = vmatmul.bf16.gmra.mxu2 %v8217_v1  ;;  %v10578_v1 = vld [vmem:[%s15007_s0 + $0x1e0] sm:$0xf0]  ;;  %v7730_v7 = vld [vmem:[%s15007_s0 + $0x1e4] sm:$0xf0] }
 0x384   :  { %7202 = vmatmul.bf16.vlgmr.msra.gmra.mxu0 %v7721_v37  ;;  %v6942_v19 = vpop.f32.mrf.mxu3 }
 0x385   :  { %v6943_v31 = vadd.f32 %v6942_v19, %v14547_v24  ;;  %v7729_v19 = vor.u32 %v10578_v1, %v7728_v27  ;;  %v8226_v27 = vld [vmem:[%s15007_s0 + $0x5cc] sm:$0xf0]  ;;  %v8232_v1 = vld [vmem:[%s15007_s0 + $0x4d8] sm:$0xf] }
 0x386   :  { %v6923_v54 = vpop.f32.mrf.mxu2  ;;  %7371 = vmatpush.bf16.msrb.mxu2 %v11270_v36 }
 0x387   :  { %v14670_v55 = vadd.f32 %v6923_v54, %v6895_v34  ;;  %v6896_v44 = vpop.f32.mrf.mxu1  ;;  %v14680_v43 = vadd.f32 %v6971_v33, %v6943_v31  ;;  %v8221_v34 = vor.u32 %v10671_v38, %v8218_v40  ;;  %v11262_v54 = vld [vmem:[%s15008_s1 + $0xf60] sm:$0xff]  ;;  %v10672_v40 = vld [vmem:[%s15007_s0 + $0x4d4] sm:$0xf] }
 0x388   :  { %v6897_v23 = vadd.f32 %v6896_v44, %v14597_v60  ;;  %11308 = vmatpush.bf16.msrb.mxu1 %v11262_v54 }
 0x389   :  { %v6973_v24 = vpop.f32.mrf.mxu0 }
 0x38c   :  { %v6944_v30 = vpop.f32.mrf.mxu3 }
 0x38d   :  { %v6945_v60 = vadd.f32 %v6944_v30, %v14589_v5  ;;  %v8470_v30 = vld [vmem:[%s15007_s0 + $0x7bc] sm:$0xf0] }
 0x38e   :  { %v6925_v14 = vpop.f32.mrf.mxu2 }
 0x38f   :  { %v14718_v3 = vadd.f32 %v6925_v14, %v6897_v23  ;;  %v6899_v18 = vpop.f32.mrf.mxu1  ;;  %v14728_v26 = vadd.f32 %v6973_v24, %v6945_v60  ;;  %v11269_v24 = vld [vmem:[%s15008_s1 + $0xf98] sm:$0xff]  ;;  %v7980_v14 = vld [vmem:[%s15007_s0 + $0x2e0] sm:$0xf] }
 0x390   :  { %v6900_v5 = vadd.f32 %v6899_v18, %v14615_v8  ;;  %7372 = vmatpush.bf16.msrb.mxu2 %v11269_v24  ;;  %v10641_v60 = vld [vmem:[%s15007_s0 + $0x3d8] sm:$0xf0]  ;;  %v8473_v18 = vor.u32 %v10734_v28, %v8470_v30  ;;  %v7982_v28 = vld [vmem:[%s15007_s0 + $0x3dc] sm:$0xf0]  ;;  %v8484_v30 = vld [vmem:[%s15007_s0 + $0x6d0] sm:$0xf] }
 0x391   :  { %v6976_v9 = vpop.f32.mrf.mxu0  ;;  %7178 = vmatmul.bf16.gmra.mxu3 %v7969_v62 }
 0x392   :  { %7130 = vmatmul.bf16.gmra.mxu1 %v8465_v45  ;;  %v8476_v45 = vld [vmem:[%s15007_s0 + $0x6c8] sm:$0xf] }
 0x393   :  { %7159 = vmatmul.bf16.gmra.mxu2 %v8469_v48  ;;  %v10766_v48 = vld [vmem:[%s15007_s0 + $0x7c0] sm:$0xf0] }
 0x394   :  { %7207 = vmatmul.bf16.gmra.mxu0 %v7973_v25  ;;  %v6947_v50 = vpop.f32.mrf.mxu3 }
 0x395   :  { %v6948_v8 = vadd.f32 %v6947_v50, %v14607_v59  ;;  %v11242_v59 = vld [vmem:[%s15008_s1 + $0xec0] sm:$0xff] }
 0x396   :  { %v6928_v21 = vpop.f32.mrf.mxu2  ;;  %7288 = vmatpush.bf16.msrb.mxu3 %v11242_v59 }
 0x397   :  { %v14739_v12 = vadd.f32 %v6928_v21, %v6900_v5  ;;  %v6901_v16 = vpop.f32.mrf.mxu1  ;;  %v14747_v17 = vadd.f32 %v6976_v9, %v6948_v8  ;;  %v7981_v5 = vor.u32 %v10641_v60, %v7980_v14  ;;  %v11260_v9 = vld [vmem:[%s15008_s1 + $0xf50] sm:$0xff]  ;;  %v7988_v14 = vld [vmem:[%s15007_s0 + $0x2e8] sm:$0xf]  ;;  %v10642_v60 = vld [vmem:[%s15007_s0 + $0x3e0] sm:$0xf0] }
 0x398   :  { %v6902_v56 = vadd.f32 %v6901_v16, %v14657_v51 }
 0x399   :  { %v6978_v0 = vpop.f32.mrf.mxu0 }
 0x39a   :  { %11313 = vmatpush.bf16.msra.mxu3 %v14666_v57  ;;  %v11250_v57 = vld [vmem:[%s15008_s1 + $0xf00] sm:$0xff] }
 0x39b   :  { %7317 = vmatpush.bf16.msrb.mxu0 %v11250_v57  ;;  %v8229_v57 = vor.u32 %v10672_v40, %v8226_v27  ;;  %v8240_v40 = vld [vmem:[%s15007_s0 + $0x4e0] sm:$0xf] }
 0x39c   :  { %v6949_v2 = vpop.f32.mrf.mxu3 }
 0x39d   :  { %v6950_v51 = vadd.f32 %v6949_v2, %v14649_v29  ;;  %v10704_v2 = vld [vmem:[%s15007_s0 + $0x5d0] sm:$0xf0] }
 0x39e   :  { %v6930_v37 = vpop.f32.mrf.mxu2  ;;  %11314 = vmatpush.bf16.msra.mxu3 %v14690_v58 }
 0x39f   :  { %v14782_v33 = vadd.f32 %v6930_v37, %v6902_v56  ;;  %v7000_v31 = vpop.f32.mrf.mxu1  ;;  %v14790_v44 = vadd.f32 %v6978_v0, %v6950_v51  ;;  %7339 = vmatpush.bf16.msra.mxu0 %v14678_v61  ;;  %v11261_v61 = vld [vmem:[%s15008_s1 + $0xf58] sm:$0xff]  ;;  %v10579_v37 = vld [vmem:[%s15007_s0 + $0x1e8] sm:$0xf0] }
 0x3a0   :  { %v7001_v23 = vadd.f32 %v7000_v31, %v14680_v43  ;;  %11309 = vmatpush.bf16.msrb.mxu1 %v11261_v61  ;;  %v11258_v31 = vld [vmem:[%s15008_s1 + $0xf40] sm:$0xff] }
 0x3a1   :  { %v6981_v29 = vpop.f32.mrf.mxu0  ;;  %7183 = vmatmul.bf16.gmra.mxu3 %v8221_v34 }
 0x3a2   :  { %7231 = vmatmul.bf16.vlgmr.msra.gmra.mxu1 %v7725_v20  ;;  %11315 = vmatpush.bf16.msra.mxu3 %v11271_v49  ;;  %v8477_v49 = vor.u32 %v10766_v48, %v8476_v45  ;;  %v7733_v20 = vor.u32 %v10547_v42, %v7730_v7  ;;  %v10705_v42 = vld [vmem:[%s15007_s0 + $0x5d8] sm:$0xf0] }
 0x3a3   :  { %7260 = vmatmul.bf16.vlgmr.msra.gmra.mxu2 %v7729_v19  ;;  %7340 = vmatpush.bf16.msra.mxu0 %v14726_v13 }
 0x3a4   :  { %7212 = vmatmul.bf16.gmra.mxu0 %v8225_v41  ;;  %v6952_v22 = vpop.f32.mrf.mxu3  ;;  %11310 = vmatpush.bf16.msrb.mxu1 %v11260_v9 }
 0x3a5   :  { %v6953_v63 = vadd.f32 %v6952_v22, %v14670_v55  ;;  %v11268_v55 = vld [vmem:[%s15008_s1 + $0xf90] sm:$0xff] }
 0x3a6   :  { %v7029_v58 = vpop.f32.mrf.mxu2  ;;  %11316 = vmatpush.bf16.msra.mxu3 %v11270_v36  ;;  %7373 = vmatpush.bf16.msrb.mxu2 %v11268_v55 }
 0x3a7   :  { %v14800_v43 = vadd.f32 %v7029_v58, %v7001_v23  ;;  %v7002_v4 = vpop.f32.mrf.mxu1  ;;  %v14805_v6 = vadd.f32 %v6981_v29, %v6953_v63  ;;  %7341 = vmatpush.bf16.msra.mxu0 %v11263_v15 }
 0x3a8   :  { %v7003_v53 = vadd.f32 %v7002_v4, %v14728_v26  ;;  %v7977_v26 = vor.u32 %v10609_v10, %v7974_v11  ;;  %v10767_v10 = vld [vmem:[%s15007_s0 + $0x7c8] sm:$0xf0] }
 0x3a9   :  { %v6983_v52 = vpop.f32.mrf.mxu0 }
 0x3aa   :  { %11317 = vmatpush.bf16.msra.mxu3 %v11269_v24 }
 0x3ab   :  { %7342 = vmatpush.bf16.msra.mxu0 %v11262_v54  ;;  %v8233_v54 = vor.u32 %v10704_v2, %v8232_v1 }
 0x3ac   :  { %v6954_v62 = vpop.f32.mrf.mxu3 }
 0x3ad   :  { %v6955_v35 = vadd.f32 %v6954_v62, %v14718_v3  ;;  %v11267_v3 = vld [vmem:[%s15008_s1 + $0xf88] sm:$0xff] }
 0x3ae   :  { %v7031_v13 = vpop.f32.mrf.mxu2  ;;  %11318 = vmatpush.bf16.msra.mxu3 %v11268_v55  ;;  %7374 = vmatpush.bf16.msrb.mxu2 %v11267_v3  ;;  %v10610_v55 = vld [vmem:[%s15007_s0 + $0x2e4] sm:$0xf] }
 0x3af   :  { %v14836_v25 = vadd.f32 %v7031_v13, %v7003_v53  ;;  %v7005_v46 = vpop.f32.mrf.mxu1  ;;  %v6984_v50 = vadd.f32 %v6983_v52, %v6955_v35  ;;  %7343 = vmatpush.bf16.msra.mxu0 %v11261_v61  ;;  %v7985_v48 = vor.u32 %v10610_v55, %v7982_v28 }
 0x3b0   :  { %v7006_v8 = vadd.f32 %v7005_v46, %v14747_v17  ;;  %v11259_v17 = vld [vmem:[%s15008_s1 + $0xf48] sm:$0xff] }
 0x3b1   :  { %v6986_v21 = vpop.f32.mrf.mxu0  ;;  %7188 = vmatmul.bf16.gmra.mxu3 %v8473_v18  ;;  %11311 = vmatpush.bf16.msrb.mxu1 %v11259_v17  ;;  %v8485_v18 = vor.u32 %v10767_v10, %v8484_v30 }
 0x3b2   :  { %7236 = vmatmul.bf16.gmra.mxu1 %v7977_v26  ;;  %11319 = vmatpush.bf16.msra.mxu3 %v11267_v3 }
 0x3b3   :  { %7265 = vmatmul.bf16.gmra.mxu2 %v7981_v5  ;;  %7344 = vmatpush.bf16.msra.mxu0 %v11260_v9  ;;  %v7989_v5 = vor.u32 %v10642_v60, %v7988_v14 }
 0x3b4   :  { %7217 = vmatmul.bf16.gmra.mxu0 %v8477_v49  ;;  %v6957_v32 = vpop.f32.mrf.mxu3 }
 0x3b5   :  { %v6958_v15 = vadd.f32 %v6957_v32, %v14739_v12  ;;  %v11266_v12 = vld [vmem:[%s15008_s1 + $0xf80] sm:$0xff]  ;;  %11312 = vmatpush.bf16.msrb.mxu1 %v11258_v31 }
 0x3b6   :  { %v7034_v16 = vpop.f32.mrf.mxu2  ;;  %7375 = vmatpush.bf16.msrb.mxu2 %v11266_v12  ;;  %11320 = vmatpush.bf16.msra.mxu3 %v11266_v12 }
 0x3b7   :  { %v14846_v56 = vadd.f32 %v7034_v16, %v7006_v8  ;;  %v7007_v0 = vpop.f32.mrf.mxu1  ;;  %v6987_v59 = vadd.f32 %v6986_v21, %v6958_v15  ;;  %7345 = vmatpush.bf16.msra.mxu0 %v11259_v17  ;;  %v10673_v17 = vld [vmem:[%s15007_s0 + $0x4dc] sm:$0xf] }
 0x3b8   :  { %v7008_v38 = vadd.f32 %v7007_v0, %v14790_v44  ;;  %v7737_v44 = vor.u32 %v10579_v37, %v7736_v47  ;;  %v8234_v0 = vld [vmem:[%s15007_s0 + $0x5d4] sm:$0xf0] }
 0x3b9   :  { %v6988_v36 = vpop.f32.mrf.mxu0  ;;  %v8237_v1 = vor.u32 %v10673_v17, %v8234_v0  ;;  %v7738_v17 = vld [vmem:[%s15007_s0 + $0x1ec] sm:$0xf0] }
 0x3bb   :  { %7346 = vmatpush.bf16.msra.mxu0 %v11258_v31 }
 0x3bc   :  { %v6959_v39 = vpop.f32.mrf.mxu3 }
 0x3bd   :  { %v6960_v51 = vadd.f32 %v6959_v39, %v14782_v33 }
 0x3be   :  { %v7036_v34 = vpop.f32.mrf.mxu2 }
 0x3bf   :  { %v14880_v19 = vadd.f32 %v7036_v34, %v7008_v38  ;;  %v7010_v41 = vpop.f32.mrf.mxu1  ;;  %v6989_v29 = vadd.f32 %v6988_v36, %v6960_v51  ;;  %v7744_v36 = vld [vmem:[%s15007_s0 + $0xf8] sm:$0xf]  ;;  %v10580_v38 = vld [vmem:[%s15007_s0 + $0x1f0] sm:$0xf0]  ;;  %v8241_v51 = vor.u32 %v10705_v42, %v8240_v40 }
 0x3c0   :  { %v7011_v23 = vadd.f32 %v7010_v41, %v14805_v6  ;;  %v10735_v6 = vld [vmem:[%s15007_s0 + $0x6cc] sm:$0xf]  ;;  %v7745_v47 = vor.u32 %v10580_v38, %v7744_v36 }
 0x3c1   :  { %v7087_v24 = vpop.f32.mrf.mxu0  ;;  %7289 = vmatmul.bf16.vlgmr.msrb.gmra.mxu3 %v7733_v20 }
 0x3c2   :  { %7241 = vmatmul.bf16.gmra.mxu1 %v8229_v57 }
 0x3c3   :  { %7270 = vmatmul.bf16.gmra.mxu2 %v8233_v54 }
 0x3c4   :  { %7318 = vmatmul.bf16.vlgmr.msrb.gmra.mxu0 %v7737_v44  ;;  %v7058_v33 = vpop.f32.mrf.mxu3 }
 0x3c5   :  { %v7059_v63 = vadd.f32 %v7058_v33, %v14800_v43  ;;  %v8478_v43 = vld [vmem:[%s15007_s0 + $0x7c4] sm:$0xf0]  ;;  %v10736_v33 = vld [vmem:[%s15007_s0 + $0x6d4] sm:$0xf] }
 0x3c6   :  { %v7039_v22 = vpop.f32.mrf.mxu2  ;;  %v8481_v13 = vor.u32 %v10735_v6, %v8478_v43  ;;  %v10768_v6 = vld [vmem:[%s15007_s0 + $0x7d0] sm:$0xf0] }
 0x3c7   :  { %v7040_v58 = vadd.f32 %v7039_v22, %v7011_v23  ;;  %v7012_v61 = vpop.f32.mrf.mxu1  ;;  %v7088_v4 = vadd.f32 %v7087_v24, %v7059_v63  ;;  %v8486_v22 = vld [vmem:[%s15007_s0 + $0x7cc] sm:$0xf0]  ;;  %v10674_v63 = vld [vmem:[%s15007_s0 + $0x4e4] sm:$0xf] }
 0x3c8   :  { %v7013_v52 = vadd.f32 %v7012_v61, %v6984_v50  ;;  %v7996_v61 = vld [vmem:[%s15007_s0 + $0x2f0] sm:$0xf]  ;;  %v8489_v43 = vor.u32 %v10736_v33, %v8486_v22 }
 0x3c9   :  { %v7089_v53 = vpop.f32.mrf.mxu0 }
 0x3cc   :  { %v7060_v11 = vpop.f32.mrf.mxu3 }
 0x3cd   :  { %v7061_v45 = vadd.f32 %v7060_v11, %v14836_v25 }
 0x3ce   :  { %v7041_v62 = vpop.f32.mrf.mxu2 }
 0x3cf   :  { %v7042_v35 = vadd.f32 %v7041_v62, %v7013_v52  ;;  %v7015_v26 = vpop.f32.mrf.mxu1  ;;  %v7090_v9 = vadd.f32 %v7089_v53, %v7061_v45  ;;  %v8492_v53 = vld [vmem:[%s15007_s0 + $0x6d8] sm:$0xf] }
 0x3d0   :  { %v7016_v46 = vadd.f32 %v7015_v26, %v6987_v59  ;;  %v10611_v59 = vld [vmem:[%s15007_s0 + $0x2ec] sm:$0xf]  ;;  %v8493_v60 = vor.u32 %v10768_v6, %v8492_v53 }
 0x3d1   :  { %v7092_v49 = vpop.f32.mrf.mxu0  ;;  %7294 = vmatmul.bf16.gmra.mxu3 %v7985_v48 }
 0x3d2   :  { %7246 = vmatmul.bf16.gmra.mxu1 %v8481_v13 }
 0x3d3   :  { %7275 = vmatmul.bf16.gmra.mxu2 %v8485_v18 }
 0x3d4   :  { %7323 = vmatmul.bf16.gmra.mxu0 %v7989_v5  ;;  %v7063_v50 = vpop.f32.mrf.mxu3 }
 0x3d5   :  { %v7064_v8 = vadd.f32 %v7063_v50, %v14846_v56  ;;  %v7990_v56 = vld [vmem:[%s15007_s0 + $0x3e4] sm:$0xf0]  ;;  %v10737_v50 = vld [vmem:[%s15007_s0 + $0x6dc] sm:$0xf] }
 0x3d6   :  { %v7044_v21 = vpop.f32.mrf.mxu2  ;;  %v7993_v39 = vor.u32 %v10611_v59, %v7990_v56 }
 0x3d7   :  { %v7045_v3 = vadd.f32 %v7044_v21, %v7016_v46  ;;  %v7017_v32 = vpop.f32.mrf.mxu1  ;;  %v7093_v25 = vadd.f32 %v7092_v49, %v7064_v8  ;;  %v8500_v21 = vld [vmem:[%s15007_s0 + $0x6e0] sm:$0xf]  ;;  %v10769_v8 = vld [vmem:[%s15007_s0 + $0x7d8] sm:$0xf0] }
 0x3d8   :  { %v7018_v15 = vadd.f32 %v7017_v32, %v6989_v29  ;;  %v8248_v32 = vld [vmem:[%s15007_s0 + $0x4e8] sm:$0xf]  ;;  %v8501_v56 = vor.u32 %v10769_v8, %v8500_v21 }
 0x3d9   :  { %v7094_v16 = vpop.f32.mrf.mxu0 }
 0x3dc   :  { %v7065_v12 = vpop.f32.mrf.mxu3 }
 0x3dd   :  { %v7066_v27 = vadd.f32 %v7065_v12, %v14880_v19 }
 0x3de   :  { %v7046_v7 = vpop.f32.mrf.mxu2 }
 0x3df   :  { %v7047_v2 = vadd.f32 %v7046_v7, %v7018_v15  ;;  %v7116_v37 = vpop.f32.mrf.mxu1  ;;  %v7095_v34 = vadd.f32 %v7094_v16, %v7066_v27  ;;  %v10548_v16 = vld [vmem:[%s15007_s0 + $0xf4] sm:$0xf] }
 0x3e0   :  { %v7117_v57 = vadd.f32 %v7116_v37, %v7088_v4  ;;  %v10643_v4 = vld [vmem:[%s15007_s0 + $0x3e8] sm:$0xf0]  ;;  %v7741_v42 = vor.u32 %v10548_v16, %v7738_v17 }
 0x3e1   :  { %v7097_v20 = vpop.f32.mrf.mxu0  ;;  %7299 = vmatmul.bf16.gmra.mxu3 %v8237_v1  ;;  %v7997_v11 = vor.u32 %v10643_v4, %v7996_v61 }
 0x3e2   :  { %7352 = vmatmul.bf16.vlgmr.msrb.gmra.mxu1 %v7993_v39 }
 0x3e3   :  { %7376 = vmatmul.bf16.vlgmr.msrb.gmra.mxu2 %v7745_v47 }
 0x3e4   :  { %7328 = vmatmul.bf16.gmra.mxu0 %v8241_v51  ;;  %v7068_v54 = vpop.f32.mrf.mxu3 }
 0x3e5   :  { %v7069_v31 = vadd.f32 %v7068_v54, %v7040_v58  ;;  %v8242_v58 = vld [vmem:[%s15007_s0 + $0x5dc] sm:$0xf0] }
 0x3e6   :  { %v7145_v41 = vpop.f32.mrf.mxu2  ;;  %v8245_v10 = vor.u32 %v10674_v63, %v8242_v58 }
 0x3e7   :  { %v14938_v44 = vadd.f32 %v7145_v41, %v7117_v57  ;;  %v7118_v29 = vpop.f32.mrf.mxu1  ;;  %v7098_v19 = vadd.f32 %v7097_v20, %v7069_v31 }
 0x3e8   :  { %v7119_v24 = vadd.f32 %v7118_v29, %v7090_v9 }
 0x3e9   :  { %v7099_v23 = vpop.f32.mrf.mxu0 }
 0x3ec   :  { %v7070_v52 = vpop.f32.mrf.mxu3 }
 0x3ed   :  { %v7071_v55 = vadd.f32 %v7070_v52, %v7042_v35 }
 0x3ee   :  { %v7147_v28 = vpop.f32.mrf.mxu2 }
 0x3ef   :  { %v7148_v30 = vadd.f32 %v7147_v28, %v7119_v24  ;;  %v7121_v14 = vpop.f32.mrf.mxu1  ;;  %v7100_v62 = vadd.f32 %v7099_v23, %v7071_v55 }
 0x3f0   :  { %v7122_v48 = vadd.f32 %v7121_v14, %v7093_v25  ;;  %v10706_v25 = vld [vmem:[%s15007_s0 + $0x5e0] sm:$0xf0] }
 0x3f1   :  { %v7102_v45 = vpop.f32.mrf.mxu0  ;;  %7304 = vmatmul.bf16.gmra.mxu3 %v8489_v43  ;;  %v8249_v12 = vor.u32 %v10706_v25, %v8248_v32 }
 0x3f2   :  { %7357 = vmatmul.bf16.gmra.mxu1 %v8245_v10 }
 0x3f3   :  { %7381 = vmatmul.bf16.gmra.mxu2 %v7997_v11 }
 0x3f4   :  { %7333 = vmatmul.bf16.gmra.mxu0 %v8493_v60  ;;  %v7073_v13 = vpop.f32.mrf.mxu3 }
 0x3f5   :  { %v7074_v18 = vadd.f32 %v7073_v13, %v7045_v3  ;;  %v8494_v3 = vld [vmem:[%s15007_s0 + $0x7d4] sm:$0xf0] }
 0x3f6   :  { %v7150_v26 = vpop.f32.mrf.mxu2  ;;  %v8497_v38 = vor.u32 %v10737_v50, %v8494_v3 }
 0x3f7   :  { %v7151_v5 = vadd.f32 %v7150_v26, %v7122_v48  ;;  %v7123_v9 = vpop.f32.mrf.mxu1  ;;  %v7103_v35 = vadd.f32 %v7102_v45, %v7074_v18 }
 0x3f8   :  { %v7124_v49 = vadd.f32 %v7123_v9, %v7095_v34 }
 0x3f9   :  { %v7104_v46 = vpop.f32.mrf.mxu0 }
 0x3fc   :  { %v7075_v15 = vpop.f32.mrf.mxu3 }
 0x3fd   :  { %v7076_v0 = vadd.f32 %v7075_v15, %v7047_v2 }
 0x3fe   :  { %v7152_v59 = vpop.f32.mrf.mxu2 }
 0x3ff   :  { %v7153_v36 = vadd.f32 %v7152_v59, %v7124_v49  ;;  %v7126_v40 = vpop.f32.mrf.mxu1  ;;  %v7105_v7 = vadd.f32 %v7104_v46, %v7076_v0 }
 0x400   :  { %v7127_v27 = vadd.f32 %v7126_v40, %v7098_v19 }
 0x401   :  { %v7203_v1 = vpop.f32.mrf.mxu0  ;;  %7391 = vmatmul.bf16.vlgmr.msra.gmra.mxu3 %v8501_v56 }
 0x402   :  { %7362 = vmatmul.bf16.gmra.mxu1 %v8497_v38 }
 0x403   :  { %7386 = vmatmul.bf16.gmra.mxu2 %v8249_v12 }
 0x404   :  { %7347 = vmatmul.bf16.vlgmr.msra.gmra.mxu0 %v7741_v42  ;;  %v7174_v39 = vpop.f32.mrf.mxu3 }
 0x405   :  { %v7175_v37 = vadd.f32 %v7174_v39, %v14938_v44 }
 0x406   :  { %v7155_v47 = vpop.f32.mrf.mxu2 }
 0x407   :  { %v7156_v51 = vadd.f32 %v7155_v47, %v7127_v27  ;;  %v7128_v2 = vpop.f32.mrf.mxu1  ;;  %v7204_v34 = vadd.f32 %v7203_v1, %v7175_v37 }
 0x408   :  { %v7129_v20 = vadd.f32 %v7128_v2, %v7100_v62 }
 0x409   :  { %v7205_v57 = vpop.f32.mrf.mxu0 }
 0x40c   :  { %v7176_v54 = vpop.f32.mrf.mxu3 }
 0x40d   :  { %v7177_v41 = vadd.f32 %v7176_v54, %v7148_v30 }
 0x40e   :  { %v7157_v31 = vpop.f32.mrf.mxu2 }
 0x40f   :  { %v7158_v29 = vadd.f32 %v7157_v31, %v7129_v20  ;;  %v7131_v23 = vpop.f32.mrf.mxu1  ;;  %v7206_v19 = vadd.f32 %v7205_v57, %v7177_v41 }
 0x410   :  { %v7132_v24 = vadd.f32 %v7131_v23, %v7103_v35 }
 0x411   :  { %v7208_v33 = vpop.f32.mrf.mxu0 }
 0x414   :  { %v7179_v22 = vpop.f32.mrf.mxu3 }
 0x415   :  { %v7180_v58 = vadd.f32 %v7179_v22, %v7151_v5 }
 0x416   :  { %v7160_v63 = vpop.f32.mrf.mxu2 }
 0x417   :  { %v7161_v61 = vadd.f32 %v7160_v63, %v7132_v24  ;;  %v7133_v4 = vpop.f32.mrf.mxu1  ;;  %v7209_v52 = vadd.f32 %v7208_v33, %v7180_v58 }
 0x418   :  { %v7134_v44 = vadd.f32 %v7133_v4, %v7105_v7 }
 0x419   :  { %v7210_v53 = vpop.f32.mrf.mxu0 }
 0x41c   :  { %v7181_v6 = vpop.f32.mrf.mxu3 }
 0x41d   :  { %v7182_v28 = vadd.f32 %v7181_v6, %v7153_v36 }
 0x41e   :  { %v7162_v55 = vpop.f32.mrf.mxu2 }
 0x41f   :  { %v7163_v43 = vadd.f32 %v7162_v55, %v7134_v44  ;;  %v7232_v10 = vpop.f32.mrf.mxu1  ;;  %v7211_v11 = vadd.f32 %v7210_v53, %v7182_v28 }
 0x420   :  { %v7233_v14 = vadd.f32 %v7232_v10, %v7204_v34 }
 0x421   :  { %v7213_v30 = vpop.f32.mrf.mxu0 }
 0x424   :  { %v7184_v60 = vpop.f32.mrf.mxu3 }
 0x425   :  { %v7185_v62 = vadd.f32 %v7184_v60, %v7156_v51 }
 0x426   :  { %v7261_v45 = vpop.f32.mrf.mxu2 }
 0x427   :  { %v7262_v48 = vadd.f32 %v7261_v45, %v7233_v14  ;;  %v7234_v13 = vpop.f32.mrf.mxu1  ;;  %v7214_v18 = vadd.f32 %v7213_v30, %v7185_v62 }
 0x428   :  { %v7235_v5 = vadd.f32 %v7234_v13, %v7206_v19 }
 0x429   :  { %v7215_v26 = vpop.f32.mrf.mxu0 }
 0x42c   :  { %v7186_v9 = vpop.f32.mrf.mxu3 }
 0x42d   :  { %v7187_v35 = vadd.f32 %v7186_v9, %v7158_v29 }
 0x42e   :  { %v7263_v46 = vpop.f32.mrf.mxu2 }
 0x42f   :  { %v14989_v49 = vadd.f32 %v7263_v46, %v7235_v5  ;;  %v7237_v50 = vpop.f32.mrf.mxu1  ;;  %v14991_v21 = vadd.f32 %v7215_v26, %v7187_v35 }
 0x430   :  { %v7238_v3 = vadd.f32 %v7237_v50, %v7209_v52 }
 0x431   :  { %v7218_v8 = vpop.f32.mrf.mxu0 }
 0x434   :  { %v7189_v32 = vpop.f32.mrf.mxu3 }
 0x435   :  { %v7190_v25 = vadd.f32 %v7189_v32, %v7161_v61 }
 0x436   :  { %v7266_v15 = vpop.f32.mrf.mxu2 }
 0x437   :  { %v7267_v16 = vadd.f32 %v7266_v15, %v7238_v3  ;;  %v7239_v17 = vpop.f32.mrf.mxu1  ;;  %v7219_v0 = vadd.f32 %v7218_v8, %v7190_v25 }
 0x438   :  { %v7240_v55 = vadd.f32 %v7239_v17, %v7211_v11 }
 0x439   :  { %v7220_v59 = vpop.f32.mrf.mxu0 }
 0x43c   :  { %v7191_v56 = vpop.f32.mrf.mxu3 }
 0x43d   :  { %v7192_v36 = vadd.f32 %v7191_v56, %v7163_v43 }
 0x43e   :  { %v7268_v38 = vpop.f32.mrf.mxu2 }
 0x43f   :  { %v7242_v12 = vpop.f32.mrf.mxu1  ;;  %v7221_v40 = vadd.f32 %v7220_v59, %v7192_v36  ;;  %v7269_v28 = vadd.f32 %v7268_v38, %v7240_v55 }
 0x440   :  { %v7243_v42 = vadd.f32 %v7242_v12, %v7214_v18 }
 0x441   :  { %v7319_v7 = vpop.f32.mrf.mxu0 }
 0x444   :  { %v7290_v27 = vpop.f32.mrf.mxu3 }
 0x445   :  { %v7291_v39 = vadd.f32 %v7290_v27, %v7262_v48 }
 0x446   :  { %v7271_v1 = vpop.f32.mrf.mxu2 }
 0x447   :  { %v7272_v47 = vadd.f32 %v7271_v1, %v7243_v42  ;;  %v7244_v37 = vpop.f32.mrf.mxu1  ;;  %v7320_v51 = vadd.f32 %v7319_v7, %v7291_v39 }
 0x448   :  { %v7245_v15 = vadd.f32 %v7244_v37, %v14991_v21 }
 0x449   :  { %v7321_v2 = vpop.f32.mrf.mxu0 }
 0x44c   :  { %v7292_v34 = vpop.f32.mrf.mxu3 }
 0x44d   :  { %v7293_v17 = vadd.f32 %v7292_v34, %v14989_v49 }
 0x44e   :  { %v7273_v20 = vpop.f32.mrf.mxu2 }
 0x44f   :  { %v7247_v57 = vpop.f32.mrf.mxu1  ;;  %v7274_v36 = vadd.f32 %v7273_v20, %v7245_v15  ;;  %v7322_v39 = vadd.f32 %v7321_v2, %v7293_v17 }
 0x450   :  { %v7248_v46 = vadd.f32 %v7247_v57, %v7219_v0 }
 0x451   :  { %v7324_v54 = vpop.f32.mrf.mxu0 }
 0x454   :  { %v7295_v31 = vpop.f32.mrf.mxu3 }
 0x455   :  { %v7296_v43 = vadd.f32 %v7295_v31, %v7267_v16 }
 0x456   :  { %v7276_v41 = vpop.f32.mrf.mxu2 }
 0x457   :  { %v7249_v29 = vpop.f32.mrf.mxu1  ;;  %v7325_v62 = vadd.f32 %v7324_v54, %v7296_v43  ;;  %v7277_v32 = vadd.f32 %v7276_v41, %v7248_v46 }
 0x458   :  { %v7250_v25 = vadd.f32 %v7249_v29, %v7221_v40 }
 0x459   :  { %v7326_v23 = vpop.f32.mrf.mxu0 }
 0x45c   :  { %v7297_v19 = vpop.f32.mrf.mxu3 }
 0x45d   :  { %v7298_v14 = vadd.f32 %v7297_v19, %v7269_v28 }
 0x45e   :  { %v7278_v24 = vpop.f32.mrf.mxu2 }
 0x45f   :  { %v7353_v33 = vpop.f32.mrf.mxu1  ;;  %v7327_v13 = vadd.f32 %v7326_v23, %v7298_v14  ;;  %v7279_v59 = vadd.f32 %v7278_v24, %v7250_v25 }
 0x460   :  { %v7354_v48 = vadd.f32 %v7353_v33, %v7325_v62 }
 0x461   :  { %v7329_v22 = vpop.f32.mrf.mxu0 }
 0x464   :  { %v7300_v63 = vpop.f32.mrf.mxu3 }
 0x465   :  { %v7301_v38 = vadd.f32 %v7300_v63, %v7272_v47 }
 0x466   :  { %v7377_v58 = vpop.f32.mrf.mxu2 }
 0x467   :  { %v7355_v61 = vpop.f32.mrf.mxu1  ;;  %v7330_v57 = vadd.f32 %v7329_v22, %v7301_v38 }
 0x468   :  { %v7356_v18 = vadd.f32 %v7355_v61, %v7327_v13 }
 0x469   :  { %v7331_v4 = vpop.f32.mrf.mxu0 }
 0x46c   :  { %v7302_v52 = vpop.f32.mrf.mxu3 }
 0x46d   :  { %v7303_v27 = vadd.f32 %v7302_v52, %v7274_v36 }
 0x46e   :  { %v7379_v44 = vpop.f32.mrf.mxu2 }
 0x46f   :  { %v7358_v53 = vpop.f32.mrf.mxu1  ;;  %v7332_v34 = vadd.f32 %v7331_v4, %v7303_v27 }
 0x470   :  { %v7359_v49 = vadd.f32 %v7358_v53, %v7330_v57 }
 0x471   :  { %v7334_v6 = vpop.f32.mrf.mxu0 }
 0x474   :  { %v7305_v10 = vpop.f32.mrf.mxu3 }
 0x475   :  { %v7306_v56 = vadd.f32 %v7305_v10, %v7277_v32 }
 0x476   :  { %v7382_v30 = vpop.f32.mrf.mxu2 }
 0x477   :  { %v7360_v60 = vpop.f32.mrf.mxu1  ;;  %v7383_v26 = vadd.f32 %v7382_v30, %v7354_v48  ;;  %v7335_v1 = vadd.f32 %v7334_v6, %v7306_v56 }
 0x478   :  { %v7361_v19 = vadd.f32 %v7360_v60, %v7332_v34 }
 0x479   :  { %v7336_v45 = vpop.f32.mrf.mxu0  ;;  %v7399_v8 = vmax.f32 %v7383_v26, 0.0 }
 0x47c   :  { %v7307_v5 = vpop.f32.mrf.mxu3 }
 0x47d   :  { %v7308_v42 = vadd.f32 %v7307_v5, %v7279_v59 }
 0x47e   :  { %v7384_v9 = vpop.f32.mrf.mxu2 }
 0x47f   :  { %v7385_v35 = vadd.f32 %v7384_v9, %v7356_v18  ;;  %v7363_v50 = vpop.f32.mrf.mxu1  ;;  %v7337_v41 = vadd.f32 %v7336_v45, %v7308_v42 }
 0x480   :  { %v7364_v21 = vadd.f32 %v7363_v50, %v7335_v1 }
 0x481   :  { %v7400_v3 = vmax.f32 %v7385_v35, 0.0  ;;  %v7348_v11 = vpop.f32.mrf.mxu0 }
 0x482   :  { %v7349_v7 = vadd.f32 %v7348_v11, %v7320_v51 }
 0x483   :  { %v11282_v16 = vpack.c.bf16 %v7400_v3, %v7399_v8 }
 0x484   :  { %v7392_v12 = vpop.f32.mrf.mxu3  ;;  %v7378_v31 = vadd.f32 %v7377_v58, %v7349_v7 }
 0x485   :  { %11294 = vst [vmem:[#allocation2 + $0x8] sm:$0xff] %v11282_v16   ;;  %v7393_v20 = vadd.f32 %v7392_v12, %v7364_v21 }
 0x486   :  { %v7387_v0 = vpop.f32.mrf.mxu2  ;;  %v7397_v24 = vmax.f32 %v7378_v31, 0.0 }
 0x487   :  { %v7365_v40 = vpop.f32.mrf.mxu1  ;;  %v7388_v51 = vadd.f32 %v7387_v0, %v7359_v49  ;;  %v7403_v61 = vmax.f32 %v7393_v20, 0.0 }
 0x488   :  { %v7366_v23 = vadd.f32 %v7365_v40, %v7337_v41 }
 0x489   :  { %v7350_v54 = vpop.f32.mrf.mxu0  ;;  %v7401_v4 = vmax.f32 %v7388_v51, 0.0 }
 0x48a   :  { %v7351_v37 = vadd.f32 %v7350_v54, %v7322_v39 }
 0x48c   :  { %v7443_v29 = vld [vmem:[#allocation2 + $0x8] sm:$0xff]   ;;  %v7380_v47 = vadd.f32 %v7379_v44, %v7351_v37  ;;  %v7394_v2 = vpop.f32.mrf.mxu3 }
 0x48d   :  { %7444 = vst [vmem:[%s15010_s3 + $0x8] sm:$0xff] %v7443_v29   ;;  %v7395_v63 = vadd.f32 %v7394_v2, %v7366_v23 }
 0x48e   :  { %v7398_v33 = vmax.f32 %v7380_v47, 0.0  ;;  %v7389_v22 = vpop.f32.mrf.mxu2 }
 0x48f   :  { %v7390_v58 = vadd.f32 %v7389_v22, %v7361_v19  ;;  %v7404_v53 = vmax.f32 %v7395_v63, 0.0 }
 0x490   :  { %v11277_v52 = vpack.c.bf16 %v7398_v33, %v7397_v24 }
 0x491   :  { %v7402_v6 = vmax.f32 %v7390_v58, 0.0  ;;  %v11292_v44 = vpack.c.bf16 %v7404_v53, %v7403_v61 }
 0x492   :  { %11278 = vst [vmem:[#allocation2] sm:$0xff] %v11277_v52  }
 0x493   :  { %v11287_v55 = vpack.c.bf16 %v7402_v6, %v7401_v4  ;;  %11296 = vst [vmem:[#allocation2 + $0x18] sm:$0xff] %v11292_v44  }
 0x495   :  { %11295 = vst [vmem:[#allocation2 + $0x10] sm:$0xff] %v11287_v55  }
 0x499   :  { %v7439_v28 = vld [vmem:[#allocation2] sm:$0xff]  }
 0x49a   :  { %7440 = vst [vmem:[%s15010_s3] sm:$0xff] %v7439_v28   ;;  %v7451_v43 = vld [vmem:[#allocation2 + $0x18] sm:$0xf] }
 0x49b   :  { %7452 = vst [vmem:[%s15010_s3 + $0x18] sm:$0xf] %v7451_v43 }
 0x49c   :  { %v7447_v10 = vld [vmem:[#allocation2 + $0x10] sm:$0xff]  }
 0x49d   :  { %7448 = vst [vmem:[%s15010_s3 + $0x10] sm:$0xff] %v7447_v10  }

</bundles_post_ra>
